<compile_context>
chip_gen: v7x
topology: tpu7x:2x2x1
jax: 0.10.0
libtpu: 0.0.40
codegen_flags: <defaults>
</compile_context>

<pallas_src>
import functools
import numpy as np
import jax
import jax.numpy as jnp
from jax import lax
from jax.experimental import pallas as pl
from jax.experimental.pallas import tpu as pltpu

_NEG = -1e30          # large finite negative (avoids NaN on fully-masked rows)
_LN_EPS = 1e-5
_NT = (((1,), (1,)), ((), ()))   # contract last dims of both operands: q @ k^T


# ----------------------------- in-kernel helpers ------------------------------

def _layer_norm(x, g, b):
    mu = jnp.mean(x, axis=-1, keepdims=True)
    var = jnp.mean(jnp.square(x - mu), axis=-1, keepdims=True)
    return (x - mu) * lax.rsqrt(var + _LN_EPS) * g + b


def _mha(q_slab, k_slab, v_slab, mask_add, out_wt, out_b, H, Dh):
    """Multi-head attention on fused slabs.

    q_slab: (Lq, E), k_slab/v_slab: (S, E), mask_add broadcastable to (Lq, S).
    out_wt: (E, E) out-projection, out_b: (1, E).
    Merge-heads is fused into the out-projection accumulation.
    Softmax scale is already folded into the Q weights.
    """
    y = out_b
    for h in range(H):
        lo = h * Dh
        qh = q_slab[:, lo:lo + Dh]
        kh = k_slab[:, lo:lo + Dh]
        vh = v_slab[:, lo:lo + Dh]
        s = lax.dot_general(qh, kh, _NT, preferred_element_type=jnp.float32)
        s = s + mask_add
        m = jnp.max(s, axis=-1, keepdims=True)
        p = jnp.exp(s - m)
        den = jnp.sum(p, axis=-1, keepdims=True)
        ctx = jnp.dot(p, vh, preferred_element_type=jnp.float32) / den
        y = y + jnp.dot(ctx, out_wt[lo:lo + Dh, :], preferred_element_type=jnp.float32)
    return y


# ----------------------------- fused stack kernels ------------------------------

def _encoder_kernel(x_ref, kpad_ref,
                    sa_wt_ref, sa_b_ref, sa_ow_ref, sa_ob_ref, ln1g_ref, ln1b_ref,
                    w1t_ref, b1_ref, w2t_ref, b2_ref, ln2g_ref, ln2b_ref,
                    fng_ref, fnb_ref, o_ref, *, H, Dh, E, nL):
    # One encoder chunk-batch row per grid step; full layer stack fused.
    x = x_ref[0]          # (L, E)
    kpad = kpad_ref[0]    # (1, L) additive key-pad mask
    for l in range(nL):
        qkv = jnp.dot(x, sa_wt_ref[l], preferred_element_type=jnp.float32) + sa_b_ref[l]
        attn = _mha(qkv[:, :E], qkv[:, E:2 * E], qkv[:, 2 * E:],
                    kpad, sa_ow_ref[l], sa_ob_ref[l], H, Dh)
        x = _layer_norm(x + attn, ln1g_ref[l], ln1b_ref[l])
        hmid = jnp.maximum(
            jnp.dot(x, w1t_ref[l], preferred_element_type=jnp.float32) + b1_ref[l], 0.0)
        ff = jnp.dot(hmid, w2t_ref[l], preferred_element_type=jnp.float32) + b2_ref[l]
        x = _layer_norm(x + ff, ln2g_ref[l], ln2b_ref[l])
    o_ref[0] = _layer_norm(x, fng_ref[...], fnb_ref[...])


def _decoder_kernel(tgt_ref, mem_ref, smask_ref, ckpad_ref,
                    sa_wt_ref, sa_b_ref, sa_ow_ref, sa_ob_ref, ln1g_ref, ln1b_ref,
                    caq_wt_ref, caq_b_ref, cakv_wt_ref, cakv_b_ref,
                    ca_ow_ref, ca_ob_ref, ln2g_ref, ln2b_ref,
                    w1t_ref, b1_ref, w2t_ref, b2_ref, ln3g_ref, ln3b_ref,
                    fng_ref, fnb_ref, out_wt_ref, out_b_ref, o_ref,
                    *, H, Dh, E, nL):
    # One batch row per grid step; decoder stack + final norm + vocab proj fused.
    x = tgt_ref[0]          # (T, E)
    mem = mem_ref[0]        # (S_pad, E)
    smask = smask_ref[0]    # (T, T) additive: causal + tgt key-pad
    ckpad = ckpad_ref[0]    # (1, S_pad) additive memory key-pad
    for l in range(nL):
        # masked (causal) self-attention
        qkv = jnp.dot(x, sa_wt_ref[l], preferred_element_type=jnp.float32) + sa_b_ref[l]
        attn = _mha(qkv[:, :E], qkv[:, E:2 * E], qkv[:, 2 * E:],
                    smask, sa_ow_ref[l], sa_ob_ref[l], H, Dh)
        x = _layer_norm(x + attn, ln1g_ref[l], ln1b_ref[l])
        # cross-attention over (padded, masked) memory
        q = jnp.dot(x, caq_wt_ref[l], preferred_element_type=jnp.float32) + caq_b_ref[l]
        kv = jnp.dot(mem, cakv_wt_ref[l], preferred_element_type=jnp.float32) + cakv_b_ref[l]
        attn = _mha(q, kv[:, :E], kv[:, E:],
                    ckpad, ca_ow_ref[l], ca_ob_ref[l], H, Dh)
        x = _layer_norm(x + attn, ln2g_ref[l], ln2b_ref[l])
        # FFN
        hmid = jnp.maximum(
            jnp.dot(x, w1t_ref[l], preferred_element_type=jnp.float32) + b1_ref[l], 0.0)
        ff = jnp.dot(hmid, w2t_ref[l], preferred_element_type=jnp.float32) + b2_ref[l]
        x = _layer_norm(x + ff, ln3g_ref[l], ln3b_ref[l])
    x = _layer_norm(x, fng_ref[...], fnb_ref[...])
    # vocab projection padded to 128 lanes -> lane-dense stores; sliced back in JAX
    o_ref[0] = jnp.dot(x, out_wt_ref[...], preferred_element_type=jnp.float32) + out_b_ref[...]


# ----------------------------- pallas_call wrappers ------------------------------

def _const_spec(a):
    nd = a.ndim
    return pl.BlockSpec(a.shape, lambda i, _n=nd: (0,) * _n)


def run_encoder_stack(src, kpad_add, ep, cfg):
    """src: (N, L, E) embedded chunk-batch, kpad_add: (N, 1, L) additive mask."""
    N, L, E = src.shape
    H = cfg["numHeads"]
    Dh = E // H
    nL = cfg["numLayers"]
    consts = [ep["sa_wt"], ep["sa_b"], ep["sa_out_wt"], ep["sa_out_b"],
              ep["ln1_g"], ep["ln1_b"],
              ep["w1t"], ep["b1"], ep["w2t"], ep["b2"],
              ep["ln2_g"], ep["ln2_b"],
              ep["norm_g"], ep["norm_b"]]
    return pl.pallas_call(
        functools.partial(_encoder_kernel, H=H, Dh=Dh, E=E, nL=nL),
        grid=(N,),
        in_specs=[pl.BlockSpec((1, L, E), lambda n: (n, 0, 0)),
                  pl.BlockSpec((1, 1, L), lambda n: (n, 0, 0))]
                 + [_const_spec(a) for a in consts],
        out_specs=pl.BlockSpec((1, L, E), lambda n: (n, 0, 0)),
        out_shape=jax.ShapeDtypeStruct((N, L, E), jnp.float32),
        compiler_params=pltpu.CompilerParams(dimension_semantics=("parallel",)),
    )(src, kpad_add, *consts)


def run_decoder_stack(tgt, memory, self_mask, cross_mask, dp, cfg):
    """tgt: (B, T, E), memory: (B, S_pad, E), self_mask: (B, T, T), cross_mask: (B, 1, S_pad)."""
    B, T, E = tgt.shape
    S = memory.shape[1]
    H = cfg["numHeads"]
    Dh = E // H
    nL = cfg["decNumLayers"]
    Vpad = dp["out_wt"].shape[-1]
    consts = [dp["sa_wt"], dp["sa_b"], dp["sa_out_wt"], dp["sa_out_b"],
              dp["ln1_g"], dp["ln1_b"],
              dp["ca_q_wt"], dp["ca_q_b"], dp["ca_kv_wt"], dp["ca_kv_b"],
              dp["ca_out_wt"], dp["ca_out_b"], dp["ln2_g"], dp["ln2_b"],
              dp["w1t"], dp["b1"], dp["w2t"], dp["b2"], dp["ln3_g"], dp["ln3_b"],
              dp["norm_g"], dp["norm_b"], dp["out_wt"], dp["out_b"]]
    return pl.pallas_call(
        functools.partial(_decoder_kernel, H=H, Dh=Dh, E=E, nL=nL),
        grid=(B,),
        in_specs=[pl.BlockSpec((1, T, E), lambda b: (b, 0, 0)),
                  pl.BlockSpec((1, S, E), lambda b: (b, 0, 0)),
                  pl.BlockSpec((1, T, T), lambda b: (b, 0, 0)),
                  pl.BlockSpec((1, 1, S), lambda b: (b, 0, 0))]
                 + [_const_spec(a) for a in consts],
        out_specs=pl.BlockSpec((1, T, Vpad), lambda b: (b, 0, 0)),
        out_shape=jax.ShapeDtypeStruct((B, T, Vpad), jnp.float32),
        compiler_params=pltpu.CompilerParams(dimension_semantics=("parallel",)),
    )(tgt, memory, self_mask, cross_mask, *consts)


# ----------------------------- model (plain-JAX glue) ------------------------------

def make_pos_encoding(max_len, d_model):
    pe = np.zeros((max_len, d_model), np.float32)
    position = np.arange(max_len, dtype=np.float32)[:, None]
    div_term = (10000.0 ** (2 * np.arange(0, d_model, 2) / d_model))[None, :]
    pe[:, 0::2] = np.sin(position / div_term)
    pe[:, 1::2] = np.cos(position / div_term)
    return jnp.asarray(pe)


def _kpad_additive(key_pad_bool):
    return jnp.where(key_pad_bool, _NEG, 0.0).astype(jnp.float32)


def run_encoder(x, params, pe_enc, cfg):
    """Split into 4 overlapping chunks, pad to one length, run ONE fused encoder call."""
    num_splits, overlap = 4, 100
    pad = cfg["pad_token"]
    B, Lenc = x.shape
    split = Lenc // num_splits
    lens = [min((i + 1) * split + overlap, Lenc) - i * split for i in range(num_splits)]
    Ls = max(lens)
    chunks = []
    for i in range(num_splits):
        c = x[:, i * split:i * split + lens[i]]
        if lens[i] < Ls:
            c = jnp.pad(c, ((0, 0), (0, Ls - lens[i])), constant_values=pad)
        chunks.append(c)
    xs = jnp.stack(chunks, axis=0).reshape(num_splits * B, Ls)      # (N, Ls), split-major

    x_mask = (xs != pad)[..., None]                                  # (N, Ls, 1)
    emb = jnp.take(params["enc_emb"], xs, axis=0) * np.sqrt(cfg["embMult"]) + pe_enc[:Ls][None]
    src = (emb * x_mask).astype(jnp.float32)                         # (N, Ls, E)
    key_pad = (~x_mask[..., 0]).at[:, 0].set(False)                  # reference: srcKeyPadMask[:,0]=False
    kpad_add = _kpad_additive(key_pad)[:, None, :]                   # (N, 1, Ls)

    mem = run_encoder_stack(src, kpad_add, params["enc"], cfg)       # (N, Ls, E)

    E = mem.shape[-1]
    mem = mem.reshape(num_splits, B, Ls, E)
    key_pad = key_pad.reshape(num_splits, B, Ls)
    memory = jnp.concatenate([mem[i, :, :lens[i]] for i in range(num_splits)], axis=1)
    mem_key_pad = jnp.concatenate([key_pad[i, :, :lens[i]] for i in range(num_splits)], axis=1)
    return memory, mem_key_pad                                       # (B, S, E), (B, S)


def forward(params, x, y, pe_enc, pe_dec, *, cfg):
    pad = cfg["pad_token"]
    memory, mem_key_pad = run_encoder(x, params, pe_enc, cfg)
    B, S = mem_key_pad.shape

    # pad the concatenated memory to a lane-dense multiple of 128 keys (masked)
    S_pad = max(128, ((S + 127) // 128) * 128)
    memory = jnp.pad(memory, ((0, 0), (0, S_pad - S), (0, 0)))
    mem_key_pad = jnp.pad(mem_key_pad, ((0, 0), (0, S_pad - S)), constant_values=True)
    cross_mask = _kpad_additive(mem_key_pad)[:, None, :]             # (B, 1, S_pad)

    T = y.shape[1]
    y_mask = (y != pad)[..., None]
    emb = jnp.take(params["dec_emb"], y, axis=0) * np.sqrt(cfg["embMult"]) + pe_dec[:T][None]
    tgt = (emb * y_mask).astype(jnp.float32)                         # (B, T, E)
    tgt_key_pad = ~y_mask[..., 0]

    # combined causal + target key-pad additive mask (precomputed once, tiny)
    causal = jnp.where(jnp.arange(T)[:, None] >= jnp.arange(T)[None, :], 0.0, _NEG)
    self_mask = causal.astype(jnp.float32)[None] + _kpad_additive(tgt_key_pad)[:, None, :]

    logits_p = run_decoder_stack(tgt, memory, self_mask, cross_mask, params["dec"], cfg)
    V = cfg["absVocabSize"]
    return jnp.transpose(logits_p[:, :, :V], (0, 2, 1))              # (B, V, T)


# ----------------------------- parameter init ------------------------------

def init_params(key, cfg):
    E = cfg["hiddenDim"]
    F = cfg["hiddenDim"]                   # reference: dim_feedforward == hiddenDim
    H = cfg["numHeads"]
    Dh = E // H
    Vd, Va = cfg["descVocabSize"], cfg["absVocabSize"]
    Vpad = max(128, ((Va + 127) // 128) * 128)
    qscale = 1.0 / float(np.sqrt(Dh))      # softmax scale folded into Q weights
    keys = iter(jax.random.split(key, 1024))
    nxt = lambda: next(keys)

    def xavier_t(out_dim, in_dim):         # torch (out,in) xavier-uniform, stored transposed
        a = float(np.sqrt(6.0 / (in_dim + out_dim)))
        return jax.random.uniform(nxt(), (out_dim, in_dim), jnp.float32, -a, a).T

    def bias_row(n, fan_in):
        a = 1.0 / float(np.sqrt(fan_in))
        return jax.random.uniform(nxt(), (1, n), jnp.float32, -a, a)

    zeros = lambda n: jnp.zeros((1, n), jnp.float32)
    ones = lambda n: jnp.ones((1, n), jnp.float32)

    def enc_layer():
        wqkv = xavier_t(3 * E, E)
        wqkv = wqkv.at[:, :E].multiply(qscale)
        return dict(sa_wt=wqkv, sa_b=zeros(3 * E),
                    sa_out_wt=xavier_t(E, E), sa_out_b=zeros(E),
                    ln1_g=ones(E), ln1_b=zeros(E),
                    w1t=xavier_t(F, E), b1=bias_row(F, E),
                    w2t=xavier_t(E, F), b2=bias_row(E, F),
                    ln2_g=ones(E), ln2_b=zeros(E))

    def dec_layer():
        wqkv = xavier_t(3 * E, E)
        wqkv = wqkv.at[:, :E].multiply(qscale)
        ca_full = xavier_t(3 * E, E)
        return dict(sa_wt=wqkv, sa_b=zeros(3 * E),
                    sa_out_wt=xavier_t(E, E), sa_out_b=zeros(E),
                    ln1_g=ones(E), ln1_b=zeros(E),
                    ca_q_wt=ca_full[:, :E] * qscale, ca_q_b=zeros(E),
                    ca_kv_wt=ca_full[:, E:], ca_kv_b=zeros(2 * E),
                    ca_out_wt=xavier_t(E, E), ca_out_b=zeros(E),
                    ln2_g=ones(E), ln2_b=zeros(E),
                    w1t=xavier_t(F, E), b1=bias_row(F, E),
                    w2t=xavier_t(E, F), b2=bias_row(E, F),
                    ln3_g=ones(E), ln3_b=zeros(E))

    enc_layers = [enc_layer() for _ in range(cfg["numLayers"])]
    enc = {k: jnp.stack([ly[k] for ly in enc_layers]) for k in enc_layers[0]}
    enc["norm_g"], enc["norm_b"] = ones(E), zeros(E)

    dec_layers = [dec_layer() for _ in range(cfg["decNumLayers"])]
    dec = {k: jnp.stack([ly[k] for ly in dec_layers]) for k in dec_layers[0]}
    dec["norm_g"], dec["norm_b"] = ones(E), zeros(E)
    out_w = xavier_t(Va, E)                                          # (E, Va)
    out_b = bias_row(Va, E)
    dec["out_wt"] = jnp.zeros((E, Vpad), jnp.float32).at[:, :Va].set(out_w)
    dec["out_b"] = jnp.zeros((1, Vpad), jnp.float32).at[:, :Va].set(out_b)

    return dict(
        enc_emb=jax.random.uniform(nxt(), (Vd, E), jnp.float32, -1.0, 1.0),
        dec_emb=jax.random.uniform(nxt(), (Va, E), jnp.float32, -1.0, 1.0),
        enc=enc, dec=dec)


# ----------------------------- main ------------------------------

if __name__ == "__main__":
    cfg = dict(
        descVocabSize=50, absVocabSize=48, hiddenDim=32, beamSize=0,
        embMult=32, numHeads=4, dropout=0.0, numLayers=2, decNumLayers=2,
        predMaxLen=64, encMaxLen=512, pad_token=0,
    )
    B, Lenc, Labs = 2, 32, 16

    root = jax.random.PRNGKey(0)
    kp, kx, ky = jax.random.split(root, 3)
    params = init_params(kp, cfg)
    pe_enc = make_pos_encoding(cfg["encMaxLen"], cfg["hiddenDim"])
    pe_dec = make_pos_encoding(cfg["predMaxLen"], cfg["hiddenDim"])

    x = jax.random.randint(kx, (B, Lenc), 1, cfg["descVocabSize"], dtype=jnp.int32)
    y = jax.random.randint(ky, (B, Labs), 1, cfg["absVocabSize"], dtype=jnp.int32)
    # pad the tails to exercise masking (first tokens stay non-pad -> no fully-masked rows)
    x = x.at[:, -4:].set(cfg["pad_token"])
    y = y.at[:, -3:].set(cfg["pad_token"])

    # TODO(synk): evaluate() (autoregressive beam-search decode) is host-side control flow, not kernelized.
    fwd = jax.jit(functools.partial(forward, cfg=cfg))
    logits = jax.block_until_ready(fwd(params, x, y, pe_enc, pe_dec))

    assert logits.shape == (B, cfg["absVocabSize"], Labs), logits.shape
    assert bool(jnp.all(jnp.isfinite(logits)))
    print("KERNEL_OK")
</pallas_src>

<mosaic_0001>
module attributes {stable_mosaic.version = 11 : i64} {
  func.func @_encoder_kernel(%arg0: i32, %arg1: memref<1x32x32xf32, #tpu.memory_space<vmem>>, %arg2: memref<1x1x32xf32, #tpu.memory_space<vmem>>, %arg3: memref<2x32x96xf32, #tpu.memory_space<vmem>>, %arg4: memref<2x1x96xf32, #tpu.memory_space<vmem>>, %arg5: memref<2x32x32xf32, #tpu.memory_space<vmem>>, %arg6: memref<2x1x32xf32, #tpu.memory_space<vmem>>, %arg7: memref<2x1x32xf32, #tpu.memory_space<vmem>>, %arg8: memref<2x1x32xf32, #tpu.memory_space<vmem>>, %arg9: memref<2x32x32xf32, #tpu.memory_space<vmem>>, %arg10: memref<2x1x32xf32, #tpu.memory_space<vmem>>, %arg11: memref<2x32x32xf32, #tpu.memory_space<vmem>>, %arg12: memref<2x1x32xf32, #tpu.memory_space<vmem>>, %arg13: memref<2x1x32xf32, #tpu.memory_space<vmem>>, %arg14: memref<2x1x32xf32, #tpu.memory_space<vmem>>, %arg15: memref<1x32xf32, #tpu.memory_space<vmem>>, %arg16: memref<1x32xf32, #tpu.memory_space<vmem>>, %arg17: memref<1x32x32xf32, #tpu.memory_space<vmem>>) attributes {dimension_semantics = [#tpu.dimension_semantics<parallel>], iteration_bounds = array<i64: 8>, scalar_prefetch = 0 : i64, scratch_operands = 0 : i64, tpu.core_type = #tpu.core_type<tc>, window_params = [{transform_indices = @transform_0, window_bounds = array<i64: 1, 32, 32>}, {transform_indices = @transform_1, window_bounds = array<i64: 1, 1, 32>}, {pipeline_mode = #tpu.pipeline_mode<synchronous>, transform_indices = @transform_2, window_bounds = array<i64: 2, 32, 96>}, {pipeline_mode = #tpu.pipeline_mode<synchronous>, transform_indices = @transform_3, window_bounds = array<i64: 2, 1, 96>}, {pipeline_mode = #tpu.pipeline_mode<synchronous>, transform_indices = @transform_4, window_bounds = array<i64: 2, 32, 32>}, {pipeline_mode = #tpu.pipeline_mode<synchronous>, transform_indices = @transform_5, window_bounds = array<i64: 2, 1, 32>}, {pipeline_mode = #tpu.pipeline_mode<synchronous>, transform_indices = @transform_6, window_bounds = array<i64: 2, 1, 32>}, {pipeline_mode = #tpu.pipeline_mode<synchronous>, transform_indices = @transform_7, window_bounds = array<i64: 2, 1, 32>}, {pipeline_mode = #tpu.pipeline_mode<synchronous>, transform_indices = @transform_8, window_bounds = array<i64: 2, 32, 32>}, {pipeline_mode = #tpu.pipeline_mode<synchronous>, transform_indices = @transform_9, window_bounds = array<i64: 2, 1, 32>}, {pipeline_mode = #tpu.pipeline_mode<synchronous>, transform_indices = @transform_10, window_bounds = array<i64: 2, 32, 32>}, {pipeline_mode = #tpu.pipeline_mode<synchronous>, transform_indices = @transform_11, window_bounds = array<i64: 2, 1, 32>}, {pipeline_mode = #tpu.pipeline_mode<synchronous>, transform_indices = @transform_12, window_bounds = array<i64: 2, 1, 32>}, {pipeline_mode = #tpu.pipeline_mode<synchronous>, transform_indices = @transform_13, window_bounds = array<i64: 2, 1, 32>}, {pipeline_mode = #tpu.pipeline_mode<synchronous>, transform_indices = @transform_14, window_bounds = array<i64: 1, 32>}, {pipeline_mode = #tpu.pipeline_mode<synchronous>, transform_indices = @transform_15, window_bounds = array<i64: 1, 32>}, {transform_indices = @transform_16, window_bounds = array<i64: 1, 32, 32>}]} {
    %c0 = arith.constant 0 : index
    %c0_0 = arith.constant 0 : index
    %c0_1 = arith.constant 0 : index
    %0 = vector.load %arg1[%c0, %c0_0, %c0_1] : memref<1x32x32xf32, #tpu.memory_space<vmem>>, vector<1x32x32xf32>
    %1 = vector.shape_cast %0 : vector<1x32x32xf32> to vector<32x32xf32>
    %c0_2 = arith.constant 0 : index
    %c0_3 = arith.constant 0 : index
    %c0_4 = arith.constant 0 : index
    %2 = vector.load %arg2[%c0_2, %c0_3, %c0_4] : memref<1x1x32xf32, #tpu.memory_space<vmem>>, vector<1x1x32xf32>
    %3 = vector.shape_cast %2 : vector<1x1x32xf32> to vector<1x32xf32>
    %c0_5 = arith.constant 0 : index
    %c0_6 = arith.constant 0 : index
    %c0_7 = arith.constant 0 : index
    %4 = vector.load %arg3[%c0_5, %c0_6, %c0_7] : memref<2x32x96xf32, #tpu.memory_space<vmem>>, vector<1x32x96xf32>
    %5 = vector.shape_cast %4 : vector<1x32x96xf32> to vector<32x96xf32>
    %cst = arith.constant dense<0.000000e+00> : vector<32x96xf32>
    %6 = tpu.matmul %1, %5, %cst {dimension_numbers = #tpu.dot_dimension_numbers<[1], [0], [0], [1], [0, 0, 1, 1], [], []>} : vector<32x32xf32>, vector<32x96xf32>, vector<32x96xf32> -> vector<32x96xf32>
    %c0_8 = arith.constant 0 : index
    %c0_9 = arith.constant 0 : index
    %c0_10 = arith.constant 0 : index
    %7 = vector.load %arg4[%c0_8, %c0_9, %c0_10] : memref<2x1x96xf32, #tpu.memory_space<vmem>>, vector<1x1x96xf32>
    %8 = vector.shape_cast %7 : vector<1x1x96xf32> to vector<1x96xf32>
    %9 = vector.broadcast %8 : vector<1x96xf32> to vector<32x96xf32>
    %10 = arith.addf %6, %9 : vector<32x96xf32>
    %11 = vector.extract_strided_slice %10 {offsets = [0, 0], sizes = [32, 32], strides = [1, 1]} : vector<32x96xf32> to vector<32x32xf32>
    %12 = vector.extract_strided_slice %10 {offsets = [0, 32], sizes = [32, 32], strides = [1, 1]} : vector<32x96xf32> to vector<32x32xf32>
    %13 = vector.extract_strided_slice %10 {offsets = [0, 64], sizes = [32, 32], strides = [1, 1]} : vector<32x96xf32> to vector<32x32xf32>
    %c0_11 = arith.constant 0 : index
    %c0_12 = arith.constant 0 : index
    %c0_13 = arith.constant 0 : index
    %14 = vector.load %arg5[%c0_11, %c0_12, %c0_13] : memref<2x32x32xf32, #tpu.memory_space<vmem>>, vector<1x32x32xf32>
    %15 = vector.shape_cast %14 : vector<1x32x32xf32> to vector<32x32xf32>
    %c0_14 = arith.constant 0 : index
    %c0_15 = arith.constant 0 : index
    %c0_16 = arith.constant 0 : index
    %16 = vector.load %arg6[%c0_14, %c0_15, %c0_16] : memref<2x1x32xf32, #tpu.memory_space<vmem>>, vector<1x1x32xf32>
    %17 = vector.shape_cast %16 : vector<1x1x32xf32> to vector<1x32xf32>
    %18 = vector.extract_strided_slice %11 {offsets = [0, 0], sizes = [32, 8], strides = [1, 1]} : vector<32x32xf32> to vector<32x8xf32>
    %19 = vector.extract_strided_slice %12 {offsets = [0, 0], sizes = [32, 8], strides = [1, 1]} : vector<32x32xf32> to vector<32x8xf32>
    %20 = vector.extract_strided_slice %13 {offsets = [0, 0], sizes = [32, 8], strides = [1, 1]} : vector<32x32xf32> to vector<32x8xf32>
    %cst_17 = arith.constant dense<0.000000e+00> : vector<32x32xf32>
    %21 = tpu.matmul %18, %19, %cst_17 {dimension_numbers = #tpu.dot_dimension_numbers<[1], [1], [0], [0], [0, 0, 1, 0], [], []>} : vector<32x8xf32>, vector<32x8xf32>, vector<32x32xf32> -> vector<32x32xf32>
    %22 = vector.broadcast %3 : vector<1x32xf32> to vector<32x32xf32>
    %23 = arith.addf %21, %22 : vector<32x32xf32>
    %cst_18 = arith.constant dense<0xFF800000> : vector<32xf32>
    %24 = vector.multi_reduction <maximumf>, %23, %cst_18 [1] : vector<32x32xf32> to vector<32xf32>
    %25 = vector.shape_cast %24 : vector<32xf32> to vector<32x1xf32>
    %26 = vector.broadcast %25 : vector<32x1xf32> to vector<32x32xf32>
    %27 = arith.subf %23, %26 : vector<32x32xf32>
    %28 = math.exp %27 : vector<32x32xf32>
    %cst_19 = arith.constant dense<0.000000e+00> : vector<32xf32>
    %29 = vector.multi_reduction <add>, %28, %cst_19 [1] : vector<32x32xf32> to vector<32xf32>
    %30 = vector.shape_cast %29 : vector<32xf32> to vector<32x1xf32>
    %cst_20 = arith.constant dense<0.000000e+00> : vector<32x8xf32>
    %31 = tpu.matmul %28, %20, %cst_20 {dimension_numbers = #tpu.dot_dimension_numbers<[1], [0], [0], [1], [0, 0, 1, 1], [], []>} : vector<32x32xf32>, vector<32x8xf32>, vector<32x8xf32> -> vector<32x8xf32>
    %32 = vector.broadcast %30 : vector<32x1xf32> to vector<32x8xf32>
    %33 = arith.divf %31, %32 : vector<32x8xf32>
    %34 = vector.extract_strided_slice %15 {offsets = [0, 0], sizes = [8, 32], strides = [1, 1]} : vector<32x32xf32> to vector<8x32xf32>
    %cst_21 = arith.constant dense<0.000000e+00> : vector<32x32xf32>
    %35 = tpu.matmul %33, %34, %cst_21 {dimension_numbers = #tpu.dot_dimension_numbers<[1], [0], [0], [1], [0, 0, 1, 1], [], []>} : vector<32x8xf32>, vector<8x32xf32>, vector<32x32xf32> -> vector<32x32xf32>
    %36 = vector.broadcast %17 : vector<1x32xf32> to vector<32x32xf32>
    %37 = arith.addf %36, %35 : vector<32x32xf32>
    %38 = vector.extract_strided_slice %11 {offsets = [0, 8], sizes = [32, 8], strides = [1, 1]} : vector<32x32xf32> to vector<32x8xf32>
    %39 = vector.extract_strided_slice %12 {offsets = [0, 8], sizes = [32, 8], strides = [1, 1]} : vector<32x32xf32> to vector<32x8xf32>
    %40 = vector.extract_strided_slice %13 {offsets = [0, 8], sizes = [32, 8], strides = [1, 1]} : vector<32x32xf32> to vector<32x8xf32>
    %cst_22 = arith.constant dense<0.000000e+00> : vector<32x32xf32>
    %41 = tpu.matmul %38, %39, %cst_22 {dimension_numbers = #tpu.dot_dimension_numbers<[1], [1], [0], [0], [0, 0, 1, 0], [], []>} : vector<32x8xf32>, vector<32x8xf32>, vector<32x32xf32> -> vector<32x32xf32>
    %42 = vector.broadcast %3 : vector<1x32xf32> to vector<32x32xf32>
    %43 = arith.addf %41, %42 : vector<32x32xf32>
    %cst_23 = arith.constant dense<0xFF800000> : vector<32xf32>
    %44 = vector.multi_reduction <maximumf>, %43, %cst_23 [1] : vector<32x32xf32> to vector<32xf32>
    %45 = vector.shape_cast %44 : vector<32xf32> to vector<32x1xf32>
    %46 = vector.broadcast %45 : vector<32x1xf32> to vector<32x32xf32>
    %47 = arith.subf %43, %46 : vector<32x32xf32>
    %48 = math.exp %47 : vector<32x32xf32>
    %cst_24 = arith.constant dense<0.000000e+00> : vector<32xf32>
    %49 = vector.multi_reduction <add>, %48, %cst_24 [1] : vector<32x32xf32> to vector<32xf32>
    %50 = vector.shape_cast %49 : vector<32xf32> to vector<32x1xf32>
    %cst_25 = arith.constant dense<0.000000e+00> : vector<32x8xf32>
    %51 = tpu.matmul %48, %40, %cst_25 {dimension_numbers = #tpu.dot_dimension_numbers<[1], [0], [0], [1], [0, 0, 1, 1], [], []>} : vector<32x32xf32>, vector<32x8xf32>, vector<32x8xf32> -> vector<32x8xf32>
    %52 = vector.broadcast %50 : vector<32x1xf32> to vector<32x8xf32>
    %53 = arith.divf %51, %52 : vector<32x8xf32>
    %54 = vector.extract_strided_slice %15 {offsets = [8, 0], sizes = [8, 32], strides = [1, 1]} : vector<32x32xf32> to vector<8x32xf32>
    %cst_26 = arith.constant dense<0.000000e+00> : vector<32x32xf32>
    %55 = tpu.matmul %53, %54, %cst_26 {dimension_numbers = #tpu.dot_dimension_numbers<[1], [0], [0], [1], [0, 0, 1, 1], [], []>} : vector<32x8xf32>, vector<8x32xf32>, vector<32x32xf32> -> vector<32x32xf32>
    %56 = arith.addf %37, %55 : vector<32x32xf32>
    %57 = vector.extract_strided_slice %11 {offsets = [0, 16], sizes = [32, 8], strides = [1, 1]} : vector<32x32xf32> to vector<32x8xf32>
    %58 = vector.extract_strided_slice %12 {offsets = [0, 16], sizes = [32, 8], strides = [1, 1]} : vector<32x32xf32> to vector<32x8xf32>
    %59 = vector.extract_strided_slice %13 {offsets = [0, 16], sizes = [32, 8], strides = [1, 1]} : vector<32x32xf32> to vector<32x8xf32>
    %cst_27 = arith.constant dense<0.000000e+00> : vector<32x32xf32>
    %60 = tpu.matmul %57, %58, %cst_27 {dimension_numbers = #tpu.dot_dimension_numbers<[1], [1], [0], [0], [0, 0, 1, 0], [], []>} : vector<32x8xf32>, vector<32x8xf32>, vector<32x32xf32> -> vector<32x32xf32>
    %61 = vector.broadcast %3 : vector<1x32xf32> to vector<32x32xf32>
    %62 = arith.addf %60, %61 : vector<32x32xf32>
    %cst_28 = arith.constant dense<0xFF800000> : vector<32xf32>
    %63 = vector.multi_reduction <maximumf>, %62, %cst_28 [1] : vector<32x32xf32> to vector<32xf32>
    %64 = vector.shape_cast %63 : vector<32xf32> to vector<32x1xf32>
    %65 = vector.broadcast %64 : vector<32x1xf32> to vector<32x32xf32>
    %66 = arith.subf %62, %65 : vector<32x32xf32>
    %67 = math.exp %66 : vector<32x32xf32>
    %cst_29 = arith.constant dense<0.000000e+00> : vector<32xf32>
    %68 = vector.multi_reduction <add>, %67, %cst_29 [1] : vector<32x32xf32> to vector<32xf32>
    %69 = vector.shape_cast %68 : vector<32xf32> to vector<32x1xf32>
    %cst_30 = arith.constant dense<0.000000e+00> : vector<32x8xf32>
    %70 = tpu.matmul %67, %59, %cst_30 {dimension_numbers = #tpu.dot_dimension_numbers<[1], [0], [0], [1], [0, 0, 1, 1], [], []>} : vector<32x32xf32>, vector<32x8xf32>, vector<32x8xf32> -> vector<32x8xf32>
    %71 = vector.broadcast %69 : vector<32x1xf32> to vector<32x8xf32>
    %72 = arith.divf %70, %71 : vector<32x8xf32>
    %73 = vector.extract_strided_slice %15 {offsets = [16, 0], sizes = [8, 32], strides = [1, 1]} : vector<32x32xf32> to vector<8x32xf32>
    %cst_31 = arith.constant dense<0.000000e+00> : vector<32x32xf32>
    %74 = tpu.matmul %72, %73, %cst_31 {dimension_numbers = #tpu.dot_dimension_numbers<[1], [0], [0], [1], [0, 0, 1, 1], [], []>} : vector<32x8xf32>, vector<8x32xf32>, vector<32x32xf32> -> vector<32x32xf32>
    %75 = arith.addf %56, %74 : vector<32x32xf32>
    %76 = vector.extract_strided_slice %11 {offsets = [0, 24], sizes = [32, 8], strides = [1, 1]} : vector<32x32xf32> to vector<32x8xf32>
    %77 = vector.extract_strided_slice %12 {offsets = [0, 24], sizes = [32, 8], strides = [1, 1]} : vector<32x32xf32> to vector<32x8xf32>
    %78 = vector.extract_strided_slice %13 {offsets = [0, 24], sizes = [32, 8], strides = [1, 1]} : vector<32x32xf32> to vector<32x8xf32>
    %cst_32 = arith.constant dense<0.000000e+00> : vector<32x32xf32>
    %79 = tpu.matmul %76, %77, %cst_32 {dimension_numbers = #tpu.dot_dimension_numbers<[1], [1], [0], [0], [0, 0, 1, 0], [], []>} : vector<32x8xf32>, vector<32x8xf32>, vector<32x32xf32> -> vector<32x32xf32>
    %80 = vector.broadcast %3 : vector<1x32xf32> to vector<32x32xf32>
    %81 = arith.addf %79, %80 : vector<32x32xf32>
    %cst_33 = arith.constant dense<0xFF800000> : vector<32xf32>
    %82 = vector.multi_reduction <maximumf>, %81, %cst_33 [1] : vector<32x32xf32> to vector<32xf32>
    %83 = vector.shape_cast %82 : vector<32xf32> to vector<32x1xf32>
    %84 = vector.broadcast %83 : vector<32x1xf32> to vector<32x32xf32>
    %85 = arith.subf %81, %84 : vector<32x32xf32>
    %86 = math.exp %85 : vector<32x32xf32>
    %cst_34 = arith.constant dense<0.000000e+00> : vector<32xf32>
    %87 = vector.multi_reduction <add>, %86, %cst_34 [1] : vector<32x32xf32> to vector<32xf32>
    %88 = vector.shape_cast %87 : vector<32xf32> to vector<32x1xf32>
    %cst_35 = arith.constant dense<0.000000e+00> : vector<32x8xf32>
    %89 = tpu.matmul %86, %78, %cst_35 {dimension_numbers = #tpu.dot_dimension_numbers<[1], [0], [0], [1], [0, 0, 1, 1], [], []>} : vector<32x32xf32>, vector<32x8xf32>, vector<32x8xf32> -> vector<32x8xf32>
    %90 = vector.broadcast %88 : vector<32x1xf32> to vector<32x8xf32>
    %91 = arith.divf %89, %90 : vector<32x8xf32>
    %92 = vector.extract_strided_slice %15 {offsets = [24, 0], sizes = [8, 32], strides = [1, 1]} : vector<32x32xf32> to vector<8x32xf32>
    %cst_36 = arith.constant dense<0.000000e+00> : vector<32x32xf32>
    %93 = tpu.matmul %91, %92, %cst_36 {dimension_numbers = #tpu.dot_dimension_numbers<[1], [0], [0], [1], [0, 0, 1, 1], [], []>} : vector<32x8xf32>, vector<8x32xf32>, vector<32x32xf32> -> vector<32x32xf32>
    %94 = arith.addf %75, %93 : vector<32x32xf32>
    %95 = arith.addf %1, %94 : vector<32x32xf32>
    %c0_37 = arith.constant 0 : index
    %c0_38 = arith.constant 0 : index
    %c0_39 = arith.constant 0 : index
    %96 = vector.load %arg7[%c0_37, %c0_38, %c0_39] : memref<2x1x32xf32, #tpu.memory_space<vmem>>, vector<1x1x32xf32>
    %97 = vector.shape_cast %96 : vector<1x1x32xf32> to vector<1x32xf32>
    %c0_40 = arith.constant 0 : index
    %c0_41 = arith.constant 0 : index
    %c0_42 = arith.constant 0 : index
    %98 = vector.load %arg8[%c0_40, %c0_41, %c0_42] : memref<2x1x32xf32, #tpu.memory_space<vmem>>, vector<1x1x32xf32>
    %99 = vector.shape_cast %98 : vector<1x1x32xf32> to vector<1x32xf32>
    %cst_43 = arith.constant dense<0.000000e+00> : vector<32xf32>
    %100 = vector.multi_reduction <add>, %95, %cst_43 [1] : vector<32x32xf32> to vector<32xf32>
    %101 = vector.shape_cast %100 : vector<32xf32> to vector<32x1xf32>
    %cst_44 = arith.constant 3.200000e+01 : f32
    %102 = vector.broadcast %cst_44 : f32 to vector<32x1xf32>
    %103 = arith.divf %101, %102 : vector<32x1xf32>
    %104 = vector.broadcast %103 : vector<32x1xf32> to vector<32x32xf32>
    %105 = arith.subf %95, %104 : vector<32x32xf32>
    %106 = arith.mulf %105, %105 : vector<32x32xf32>
    %cst_45 = arith.constant dense<0.000000e+00> : vector<32xf32>
    %107 = vector.multi_reduction <add>, %106, %cst_45 [1] : vector<32x32xf32> to vector<32xf32>
    %108 = vector.shape_cast %107 : vector<32xf32> to vector<32x1xf32>
    %cst_46 = arith.constant 3.200000e+01 : f32
    %109 = vector.broadcast %cst_46 : f32 to vector<32x1xf32>
    %110 = arith.divf %108, %109 : vector<32x1xf32>
    %111 = vector.broadcast %103 : vector<32x1xf32> to vector<32x32xf32>
    %112 = arith.subf %95, %111 : vector<32x32xf32>
    %cst_47 = arith.constant 9.99999974E-6 : f32
    %113 = vector.broadcast %cst_47 : f32 to vector<32x1xf32>
    %114 = arith.addf %110, %113 : vector<32x1xf32>
    %115 = math.rsqrt %114 : vector<32x1xf32>
    %116 = vector.broadcast %115 : vector<32x1xf32> to vector<32x32xf32>
    %117 = arith.mulf %112, %116 : vector<32x32xf32>
    %118 = vector.broadcast %97 : vector<1x32xf32> to vector<32x32xf32>
    %119 = arith.mulf %117, %118 : vector<32x32xf32>
    %120 = vector.broadcast %99 : vector<1x32xf32> to vector<32x32xf32>
    %121 = arith.addf %119, %120 : vector<32x32xf32>
    %c0_48 = arith.constant 0 : index
    %c0_49 = arith.constant 0 : index
    %c0_50 = arith.constant 0 : index
    %122 = vector.load %arg9[%c0_48, %c0_49, %c0_50] : memref<2x32x32xf32, #tpu.memory_space<vmem>>, vector<1x32x32xf32>
    %123 = vector.shape_cast %122 : vector<1x32x32xf32> to vector<32x32xf32>
    %cst_51 = arith.constant dense<0.000000e+00> : vector<32x32xf32>
    %124 = tpu.matmul %121, %123, %cst_51 {dimension_numbers = #tpu.dot_dimension_numbers<[1], [0], [0], [1], [0, 0, 1, 1], [], []>} : vector<32x32xf32>, vector<32x32xf32>, vector<32x32xf32> -> vector<32x32xf32>
    %c0_52 = arith.constant 0 : index
    %c0_53 = arith.constant 0 : index
    %c0_54 = arith.constant 0 : index
    %125 = vector.load %arg10[%c0_52, %c0_53, %c0_54] : memref<2x1x32xf32, #tpu.memory_space<vmem>>, vector<1x1x32xf32>
    %126 = vector.shape_cast %125 : vector<1x1x32xf32> to vector<1x32xf32>
    %127 = vector.broadcast %126 : vector<1x32xf32> to vector<32x32xf32>
    %128 = arith.addf %124, %127 : vector<32x32xf32>
    %cst_55 = arith.constant 0.000000e+00 : f32
    %129 = vector.broadcast %cst_55 : f32 to vector<32x32xf32>
    %130 = arith.maximumf %128, %129 : vector<32x32xf32>
    %c0_56 = arith.constant 0 : index
    %c0_57 = arith.constant 0 : index
    %c0_58 = arith.constant 0 : index
    %131 = vector.load %arg11[%c0_56, %c0_57, %c0_58] : memref<2x32x32xf32, #tpu.memory_space<vmem>>, vector<1x32x32xf32>
    %132 = vector.shape_cast %131 : vector<1x32x32xf32> to vector<32x32xf32>
    %cst_59 = arith.constant dense<0.000000e+00> : vector<32x32xf32>
    %133 = tpu.matmul %130, %132, %cst_59 {dimension_numbers = #tpu.dot_dimension_numbers<[1], [0], [0], [1], [0, 0, 1, 1], [], []>} : vector<32x32xf32>, vector<32x32xf32>, vector<32x32xf32> -> vector<32x32xf32>
    %c0_60 = arith.constant 0 : index
    %c0_61 = arith.constant 0 : index
    %c0_62 = arith.constant 0 : index
    %134 = vector.load %arg12[%c0_60, %c0_61, %c0_62] : memref<2x1x32xf32, #tpu.memory_space<vmem>>, vector<1x1x32xf32>
    %135 = vector.shape_cast %134 : vector<1x1x32xf32> to vector<1x32xf32>
    %136 = vector.broadcast %135 : vector<1x32xf32> to vector<32x32xf32>
    %137 = arith.addf %133, %136 : vector<32x32xf32>
    %138 = arith.addf %121, %137 : vector<32x32xf32>
    %c0_63 = arith.constant 0 : index
    %c0_64 = arith.constant 0 : index
    %c0_65 = arith.constant 0 : index
    %139 = vector.load %arg13[%c0_63, %c0_64, %c0_65] : memref<2x1x32xf32, #tpu.memory_space<vmem>>, vector<1x1x32xf32>
    %140 = vector.shape_cast %139 : vector<1x1x32xf32> to vector<1x32xf32>
    %c0_66 = arith.constant 0 : index
    %c0_67 = arith.constant 0 : index
    %c0_68 = arith.constant 0 : index
    %141 = vector.load %arg14[%c0_66, %c0_67, %c0_68] : memref<2x1x32xf32, #tpu.memory_space<vmem>>, vector<1x1x32xf32>
    %142 = vector.shape_cast %141 : vector<1x1x32xf32> to vector<1x32xf32>
    %cst_69 = arith.constant dense<0.000000e+00> : vector<32xf32>
    %143 = vector.multi_reduction <add>, %138, %cst_69 [1] : vector<32x32xf32> to vector<32xf32>
    %144 = vector.shape_cast %143 : vector<32xf32> to vector<32x1xf32>
    %cst_70 = arith.constant 3.200000e+01 : f32
    %145 = vector.broadcast %cst_70 : f32 to vector<32x1xf32>
    %146 = arith.divf %144, %145 : vector<32x1xf32>
    %147 = vector.broadcast %146 : vector<32x1xf32> to vector<32x32xf32>
    %148 = arith.subf %138, %147 : vector<32x32xf32>
    %149 = arith.mulf %148, %148 : vector<32x32xf32>
    %cst_71 = arith.constant dense<0.000000e+00> : vector<32xf32>
    %150 = vector.multi_reduction <add>, %149, %cst_71 [1] : vector<32x32xf32> to vector<32xf32>
    %151 = vector.shape_cast %150 : vector<32xf32> to vector<32x1xf32>
    %cst_72 = arith.constant 3.200000e+01 : f32
    %152 = vector.broadcast %cst_72 : f32 to vector<32x1xf32>
    %153 = arith.divf %151, %152 : vector<32x1xf32>
    %154 = vector.broadcast %146 : vector<32x1xf32> to vector<32x32xf32>
    %155 = arith.subf %138, %154 : vector<32x32xf32>
    %cst_73 = arith.constant 9.99999974E-6 : f32
    %156 = vector.broadcast %cst_73 : f32 to vector<32x1xf32>
    %157 = arith.addf %153, %156 : vector<32x1xf32>
    %158 = math.rsqrt %157 : vector<32x1xf32>
    %159 = vector.broadcast %158 : vector<32x1xf32> to vector<32x32xf32>
    %160 = arith.mulf %155, %159 : vector<32x32xf32>
    %161 = vector.broadcast %140 : vector<1x32xf32> to vector<32x32xf32>
    %162 = arith.mulf %160, %161 : vector<32x32xf32>
    %163 = vector.broadcast %142 : vector<1x32xf32> to vector<32x32xf32>
    %164 = arith.addf %162, %163 : vector<32x32xf32>
    %c1 = arith.constant 1 : index
    %c0_74 = arith.constant 0 : index
    %c0_75 = arith.constant 0 : index
    %165 = vector.load %arg3[%c1, %c0_74, %c0_75] : memref<2x32x96xf32, #tpu.memory_space<vmem>>, vector<1x32x96xf32>
    %166 = vector.shape_cast %165 : vector<1x32x96xf32> to vector<32x96xf32>
    %cst_76 = arith.constant dense<0.000000e+00> : vector<32x96xf32>
    %167 = tpu.matmul %164, %166, %cst_76 {dimension_numbers = #tpu.dot_dimension_numbers<[1], [0], [0], [1], [0, 0, 1, 1], [], []>} : vector<32x32xf32>, vector<32x96xf32>, vector<32x96xf32> -> vector<32x96xf32>
    %c1_77 = arith.constant 1 : index
    %c0_78 = arith.constant 0 : index
    %c0_79 = arith.constant 0 : index
    %168 = vector.load %arg4[%c1_77, %c0_78, %c0_79] : memref<2x1x96xf32, #tpu.memory_space<vmem>>, vector<1x1x96xf32>
    %169 = vector.shape_cast %168 : vector<1x1x96xf32> to vector<1x96xf32>
    %170 = vector.broadcast %169 : vector<1x96xf32> to vector<32x96xf32>
    %171 = arith.addf %167, %170 : vector<32x96xf32>
    %172 = vector.extract_strided_slice %171 {offsets = [0, 0], sizes = [32, 32], strides = [1, 1]} : vector<32x96xf32> to vector<32x32xf32>
    %173 = vector.extract_strided_slice %171 {offsets = [0, 32], sizes = [32, 32], strides = [1, 1]} : vector<32x96xf32> to vector<32x32xf32>
    %174 = vector.extract_strided_slice %171 {offsets = [0, 64], sizes = [32, 32], strides = [1, 1]} : vector<32x96xf32> to vector<32x32xf32>
    %c1_80 = arith.constant 1 : index
    %c0_81 = arith.constant 0 : index
    %c0_82 = arith.constant 0 : index
    %175 = vector.load %arg5[%c1_80, %c0_81, %c0_82] : memref<2x32x32xf32, #tpu.memory_space<vmem>>, vector<1x32x32xf32>
    %176 = vector.shape_cast %175 : vector<1x32x32xf32> to vector<32x32xf32>
    %c1_83 = arith.constant 1 : index
    %c0_84 = arith.constant 0 : index
    %c0_85 = arith.constant 0 : index
    %177 = vector.load %arg6[%c1_83, %c0_84, %c0_85] : memref<2x1x32xf32, #tpu.memory_space<vmem>>, vector<1x1x32xf32>
    %178 = vector.shape_cast %177 : vector<1x1x32xf32> to vector<1x32xf32>
    %179 = vector.extract_strided_slice %172 {offsets = [0, 0], sizes = [32, 8], strides = [1, 1]} : vector<32x32xf32> to vector<32x8xf32>
    %180 = vector.extract_strided_slice %173 {offsets = [0, 0], sizes = [32, 8], strides = [1, 1]} : vector<32x32xf32> to vector<32x8xf32>
    %181 = vector.extract_strided_slice %174 {offsets = [0, 0], sizes = [32, 8], strides = [1, 1]} : vector<32x32xf32> to vector<32x8xf32>
    %cst_86 = arith.constant dense<0.000000e+00> : vector<32x32xf32>
    %182 = tpu.matmul %179, %180, %cst_86 {dimension_numbers = #tpu.dot_dimension_numbers<[1], [1], [0], [0], [0, 0, 1, 0], [], []>} : vector<32x8xf32>, vector<32x8xf32>, vector<32x32xf32> -> vector<32x32xf32>
    %183 = vector.broadcast %3 : vector<1x32xf32> to vector<32x32xf32>
    %184 = arith.addf %182, %183 : vector<32x32xf32>
    %cst_87 = arith.constant dense<0xFF800000> : vector<32xf32>
    %185 = vector.multi_reduction <maximumf>, %184, %cst_87 [1] : vector<32x32xf32> to vector<32xf32>
    %186 = vector.shape_cast %185 : vector<32xf32> to vector<32x1xf32>
    %187 = vector.broadcast %186 : vector<32x1xf32> to vector<32x32xf32>
    %188 = arith.subf %184, %187 : vector<32x32xf32>
    %189 = math.exp %188 : vector<32x32xf32>
    %cst_88 = arith.constant dense<0.000000e+00> : vector<32xf32>
    %190 = vector.multi_reduction <add>, %189, %cst_88 [1] : vector<32x32xf32> to vector<32xf32>
    %191 = vector.shape_cast %190 : vector<32xf32> to vector<32x1xf32>
    %cst_89 = arith.constant dense<0.000000e+00> : vector<32x8xf32>
    %192 = tpu.matmul %189, %181, %cst_89 {dimension_numbers = #tpu.dot_dimension_numbers<[1], [0], [0], [1], [0, 0, 1, 1], [], []>} : vector<32x32xf32>, vector<32x8xf32>, vector<32x8xf32> -> vector<32x8xf32>
    %193 = vector.broadcast %191 : vector<32x1xf32> to vector<32x8xf32>
    %194 = arith.divf %192, %193 : vector<32x8xf32>
    %195 = vector.extract_strided_slice %176 {offsets = [0, 0], sizes = [8, 32], strides = [1, 1]} : vector<32x32xf32> to vector<8x32xf32>
    %cst_90 = arith.constant dense<0.000000e+00> : vector<32x32xf32>
    %196 = tpu.matmul %194, %195, %cst_90 {dimension_numbers = #tpu.dot_dimension_numbers<[1], [0], [0], [1], [0, 0, 1, 1], [], []>} : vector<32x8xf32>, vector<8x32xf32>, vector<32x32xf32> -> vector<32x32xf32>
    %197 = vector.broadcast %178 : vector<1x32xf32> to vector<32x32xf32>
    %198 = arith.addf %197, %196 : vector<32x32xf32>
    %199 = vector.extract_strided_slice %172 {offsets = [0, 8], sizes = [32, 8], strides = [1, 1]} : vector<32x32xf32> to vector<32x8xf32>
    %200 = vector.extract_strided_slice %173 {offsets = [0, 8], sizes = [32, 8], strides = [1, 1]} : vector<32x32xf32> to vector<32x8xf32>
    %201 = vector.extract_strided_slice %174 {offsets = [0, 8], sizes = [32, 8], strides = [1, 1]} : vector<32x32xf32> to vector<32x8xf32>
    %cst_91 = arith.constant dense<0.000000e+00> : vector<32x32xf32>
    %202 = tpu.matmul %199, %200, %cst_91 {dimension_numbers = #tpu.dot_dimension_numbers<[1], [1], [0], [0], [0, 0, 1, 0], [], []>} : vector<32x8xf32>, vector<32x8xf32>, vector<32x32xf32> -> vector<32x32xf32>
    %203 = vector.broadcast %3 : vector<1x32xf32> to vector<32x32xf32>
    %204 = arith.addf %202, %203 : vector<32x32xf32>
    %cst_92 = arith.constant dense<0xFF800000> : vector<32xf32>
    %205 = vector.multi_reduction <maximumf>, %204, %cst_92 [1] : vector<32x32xf32> to vector<32xf32>
    %206 = vector.shape_cast %205 : vector<32xf32> to vector<32x1xf32>
    %207 = vector.broadcast %206 : vector<32x1xf32> to vector<32x32xf32>
    %208 = arith.subf %204, %207 : vector<32x32xf32>
    %209 = math.exp %208 : vector<32x32xf32>
    %cst_93 = arith.constant dense<0.000000e+00> : vector<32xf32>
    %210 = vector.multi_reduction <add>, %209, %cst_93 [1] : vector<32x32xf32> to vector<32xf32>
    %211 = vector.shape_cast %210 : vector<32xf32> to vector<32x1xf32>
    %cst_94 = arith.constant dense<0.000000e+00> : vector<32x8xf32>
    %212 = tpu.matmul %209, %201, %cst_94 {dimension_numbers = #tpu.dot_dimension_numbers<[1], [0], [0], [1], [0, 0, 1, 1], [], []>} : vector<32x32xf32>, vector<32x8xf32>, vector<32x8xf32> -> vector<32x8xf32>
    %213 = vector.broadcast %211 : vector<32x1xf32> to vector<32x8xf32>
    %214 = arith.divf %212, %213 : vector<32x8xf32>
    %215 = vector.extract_strided_slice %176 {offsets = [8, 0], sizes = [8, 32], strides = [1, 1]} : vector<32x32xf32> to vector<8x32xf32>
    %cst_95 = arith.constant dense<0.000000e+00> : vector<32x32xf32>
    %216 = tpu.matmul %214, %215, %cst_95 {dimension_numbers = #tpu.dot_dimension_numbers<[1], [0], [0], [1], [0, 0, 1, 1], [], []>} : vector<32x8xf32>, vector<8x32xf32>, vector<32x32xf32> -> vector<32x32xf32>
    %217 = arith.addf %198, %216 : vector<32x32xf32>
    %218 = vector.extract_strided_slice %172 {offsets = [0, 16], sizes = [32, 8], strides = [1, 1]} : vector<32x32xf32> to vector<32x8xf32>
    %219 = vector.extract_strided_slice %173 {offsets = [0, 16], sizes = [32, 8], strides = [1, 1]} : vector<32x32xf32> to vector<32x8xf32>
    %220 = vector.extract_strided_slice %174 {offsets = [0, 16], sizes = [32, 8], strides = [1, 1]} : vector<32x32xf32> to vector<32x8xf32>
    %cst_96 = arith.constant dense<0.000000e+00> : vector<32x32xf32>
    %221 = tpu.matmul %218, %219, %cst_96 {dimension_numbers = #tpu.dot_dimension_numbers<[1], [1], [0], [0], [0, 0, 1, 0], [], []>} : vector<32x8xf32>, vector<32x8xf32>, vector<32x32xf32> -> vector<32x32xf32>
    %222 = vector.broadcast %3 : vector<1x32xf32> to vector<32x32xf32>
    %223 = arith.addf %221, %222 : vector<32x32xf32>
    %cst_97 = arith.constant dense<0xFF800000> : vector<32xf32>
    %224 = vector.multi_reduction <maximumf>, %223, %cst_97 [1] : vector<32x32xf32> to vector<32xf32>
    %225 = vector.shape_cast %224 : vector<32xf32> to vector<32x1xf32>
    %226 = vector.broadcast %225 : vector<32x1xf32> to vector<32x32xf32>
    %227 = arith.subf %223, %226 : vector<32x32xf32>
    %228 = math.exp %227 : vector<32x32xf32>
    %cst_98 = arith.constant dense<0.000000e+00> : vector<32xf32>
    %229 = vector.multi_reduction <add>, %228, %cst_98 [1] : vector<32x32xf32> to vector<32xf32>
    %230 = vector.shape_cast %229 : vector<32xf32> to vector<32x1xf32>
    %cst_99 = arith.constant dense<0.000000e+00> : vector<32x8xf32>
    %231 = tpu.matmul %228, %220, %cst_99 {dimension_numbers = #tpu.dot_dimension_numbers<[1], [0], [0], [1], [0, 0, 1, 1], [], []>} : vector<32x32xf32>, vector<32x8xf32>, vector<32x8xf32> -> vector<32x8xf32>
    %232 = vector.broadcast %230 : vector<32x1xf32> to vector<32x8xf32>
    %233 = arith.divf %231, %232 : vector<32x8xf32>
    %234 = vector.extract_strided_slice %176 {offsets = [16, 0], sizes = [8, 32], strides = [1, 1]} : vector<32x32xf32> to vector<8x32xf32>
    %cst_100 = arith.constant dense<0.000000e+00> : vector<32x32xf32>
    %235 = tpu.matmul %233, %234, %cst_100 {dimension_numbers = #tpu.dot_dimension_numbers<[1], [0], [0], [1], [0, 0, 1, 1], [], []>} : vector<32x8xf32>, vector<8x32xf32>, vector<32x32xf32> -> vector<32x32xf32>
    %236 = arith.addf %217, %235 : vector<32x32xf32>
    %237 = vector.extract_strided_slice %172 {offsets = [0, 24], sizes = [32, 8], strides = [1, 1]} : vector<32x32xf32> to vector<32x8xf32>
    %238 = vector.extract_strided_slice %173 {offsets = [0, 24], sizes = [32, 8], strides = [1, 1]} : vector<32x32xf32> to vector<32x8xf32>
    %239 = vector.extract_strided_slice %174 {offsets = [0, 24], sizes = [32, 8], strides = [1, 1]} : vector<32x32xf32> to vector<32x8xf32>
    %cst_101 = arith.constant dense<0.000000e+00> : vector<32x32xf32>
    %240 = tpu.matmul %237, %238, %cst_101 {dimension_numbers = #tpu.dot_dimension_numbers<[1], [1], [0], [0], [0, 0, 1, 0], [], []>} : vector<32x8xf32>, vector<32x8xf32>, vector<32x32xf32> -> vector<32x32xf32>
    %241 = vector.broadcast %3 : vector<1x32xf32> to vector<32x32xf32>
    %242 = arith.addf %240, %241 : vector<32x32xf32>
    %cst_102 = arith.constant dense<0xFF800000> : vector<32xf32>
    %243 = vector.multi_reduction <maximumf>, %242, %cst_102 [1] : vector<32x32xf32> to vector<32xf32>
    %244 = vector.shape_cast %243 : vector<32xf32> to vector<32x1xf32>
    %245 = vector.broadcast %244 : vector<32x1xf32> to vector<32x32xf32>
    %246 = arith.subf %242, %245 : vector<32x32xf32>
    %247 = math.exp %246 : vector<32x32xf32>
    %cst_103 = arith.constant dense<0.000000e+00> : vector<32xf32>
    %248 = vector.multi_reduction <add>, %247, %cst_103 [1] : vector<32x32xf32> to vector<32xf32>
    %249 = vector.shape_cast %248 : vector<32xf32> to vector<32x1xf32>
    %cst_104 = arith.constant dense<0.000000e+00> : vector<32x8xf32>
    %250 = tpu.matmul %247, %239, %cst_104 {dimension_numbers = #tpu.dot_dimension_numbers<[1], [0], [0], [1], [0, 0, 1, 1], [], []>} : vector<32x32xf32>, vector<32x8xf32>, vector<32x8xf32> -> vector<32x8xf32>
    %251 = vector.broadcast %249 : vector<32x1xf32> to vector<32x8xf32>
    %252 = arith.divf %250, %251 : vector<32x8xf32>
    %253 = vector.extract_strided_slice %176 {offsets = [24, 0], sizes = [8, 32], strides = [1, 1]} : vector<32x32xf32> to vector<8x32xf32>
    %cst_105 = arith.constant dense<0.000000e+00> : vector<32x32xf32>
    %254 = tpu.matmul %252, %253, %cst_105 {dimension_numbers = #tpu.dot_dimension_numbers<[1], [0], [0], [1], [0, 0, 1, 1], [], []>} : vector<32x8xf32>, vector<8x32xf32>, vector<32x32xf32> -> vector<32x32xf32>
    %255 = arith.addf %236, %254 : vector<32x32xf32>
    %256 = arith.addf %164, %255 : vector<32x32xf32>
    %c1_106 = arith.constant 1 : index
    %c0_107 = arith.constant 0 : index
    %c0_108 = arith.constant 0 : index
    %257 = vector.load %arg7[%c1_106, %c0_107, %c0_108] : memref<2x1x32xf32, #tpu.memory_space<vmem>>, vector<1x1x32xf32>
    %258 = vector.shape_cast %257 : vector<1x1x32xf32> to vector<1x32xf32>
    %c1_109 = arith.constant 1 : index
    %c0_110 = arith.constant 0 : index
    %c0_111 = arith.constant 0 : index
    %259 = vector.load %arg8[%c1_109, %c0_110, %c0_111] : memref<2x1x32xf32, #tpu.memory_space<vmem>>, vector<1x1x32xf32>
    %260 = vector.shape_cast %259 : vector<1x1x32xf32> to vector<1x32xf32>
    %cst_112 = arith.constant dense<0.000000e+00> : vector<32xf32>
    %261 = vector.multi_reduction <add>, %256, %cst_112 [1] : vector<32x32xf32> to vector<32xf32>
    %262 = vector.shape_cast %261 : vector<32xf32> to vector<32x1xf32>
    %cst_113 = arith.constant 3.200000e+01 : f32
    %263 = vector.broadcast %cst_113 : f32 to vector<32x1xf32>
    %264 = arith.divf %262, %263 : vector<32x1xf32>
    %265 = vector.broadcast %264 : vector<32x1xf32> to vector<32x32xf32>
    %266 = arith.subf %256, %265 : vector<32x32xf32>
    %267 = arith.mulf %266, %266 : vector<32x32xf32>
    %cst_114 = arith.constant dense<0.000000e+00> : vector<32xf32>
    %268 = vector.multi_reduction <add>, %267, %cst_114 [1] : vector<32x32xf32> to vector<32xf32>
    %269 = vector.shape_cast %268 : vector<32xf32> to vector<32x1xf32>
    %cst_115 = arith.constant 3.200000e+01 : f32
    %270 = vector.broadcast %cst_115 : f32 to vector<32x1xf32>
    %271 = arith.divf %269, %270 : vector<32x1xf32>
    %272 = vector.broadcast %264 : vector<32x1xf32> to vector<32x32xf32>
    %273 = arith.subf %256, %272 : vector<32x32xf32>
    %cst_116 = arith.constant 9.99999974E-6 : f32
    %274 = vector.broadcast %cst_116 : f32 to vector<32x1xf32>
    %275 = arith.addf %271, %274 : vector<32x1xf32>
    %276 = math.rsqrt %275 : vector<32x1xf32>
    %277 = vector.broadcast %276 : vector<32x1xf32> to vector<32x32xf32>
    %278 = arith.mulf %273, %277 : vector<32x32xf32>
    %279 = vector.broadcast %258 : vector<1x32xf32> to vector<32x32xf32>
    %280 = arith.mulf %278, %279 : vector<32x32xf32>
    %281 = vector.broadcast %260 : vector<1x32xf32> to vector<32x32xf32>
    %282 = arith.addf %280, %281 : vector<32x32xf32>
    %c1_117 = arith.constant 1 : index
    %c0_118 = arith.constant 0 : index
    %c0_119 = arith.constant 0 : index
    %283 = vector.load %arg9[%c1_117, %c0_118, %c0_119] : memref<2x32x32xf32, #tpu.memory_space<vmem>>, vector<1x32x32xf32>
    %284 = vector.shape_cast %283 : vector<1x32x32xf32> to vector<32x32xf32>
    %cst_120 = arith.constant dense<0.000000e+00> : vector<32x32xf32>
    %285 = tpu.matmul %282, %284, %cst_120 {dimension_numbers = #tpu.dot_dimension_numbers<[1], [0], [0], [1], [0, 0, 1, 1], [], []>} : vector<32x32xf32>, vector<32x32xf32>, vector<32x32xf32> -> vector<32x32xf32>
    %c1_121 = arith.constant 1 : index
    %c0_122 = arith.constant 0 : index
    %c0_123 = arith.constant 0 : index
    %286 = vector.load %arg10[%c1_121, %c0_122, %c0_123] : memref<2x1x32xf32, #tpu.memory_space<vmem>>, vector<1x1x32xf32>
    %287 = vector.shape_cast %286 : vector<1x1x32xf32> to vector<1x32xf32>
    %288 = vector.broadcast %287 : vector<1x32xf32> to vector<32x32xf32>
    %289 = arith.addf %285, %288 : vector<32x32xf32>
    %cst_124 = arith.constant 0.000000e+00 : f32
    %290 = vector.broadcast %cst_124 : f32 to vector<32x32xf32>
    %291 = arith.maximumf %289, %290 : vector<32x32xf32>
    %c1_125 = arith.constant 1 : index
    %c0_126 = arith.constant 0 : index
    %c0_127 = arith.constant 0 : index
    %292 = vector.load %arg11[%c1_125, %c0_126, %c0_127] : memref<2x32x32xf32, #tpu.memory_space<vmem>>, vector<1x32x32xf32>
    %293 = vector.shape_cast %292 : vector<1x32x32xf32> to vector<32x32xf32>
    %cst_128 = arith.constant dense<0.000000e+00> : vector<32x32xf32>
    %294 = tpu.matmul %291, %293, %cst_128 {dimension_numbers = #tpu.dot_dimension_numbers<[1], [0], [0], [1], [0, 0, 1, 1], [], []>} : vector<32x32xf32>, vector<32x32xf32>, vector<32x32xf32> -> vector<32x32xf32>
    %c1_129 = arith.constant 1 : index
    %c0_130 = arith.constant 0 : index
    %c0_131 = arith.constant 0 : index
    %295 = vector.load %arg12[%c1_129, %c0_130, %c0_131] : memref<2x1x32xf32, #tpu.memory_space<vmem>>, vector<1x1x32xf32>
    %296 = vector.shape_cast %295 : vector<1x1x32xf32> to vector<1x32xf32>
    %297 = vector.broadcast %296 : vector<1x32xf32> to vector<32x32xf32>
    %298 = arith.addf %294, %297 : vector<32x32xf32>
    %299 = arith.addf %282, %298 : vector<32x32xf32>
    %c1_132 = arith.constant 1 : index
    %c0_133 = arith.constant 0 : index
    %c0_134 = arith.constant 0 : index
    %300 = vector.load %arg13[%c1_132, %c0_133, %c0_134] : memref<2x1x32xf32, #tpu.memory_space<vmem>>, vector<1x1x32xf32>
    %301 = vector.shape_cast %300 : vector<1x1x32xf32> to vector<1x32xf32>
    %c1_135 = arith.constant 1 : index
    %c0_136 = arith.constant 0 : index
    %c0_137 = arith.constant 0 : index
    %302 = vector.load %arg14[%c1_135, %c0_136, %c0_137] : memref<2x1x32xf32, #tpu.memory_space<vmem>>, vector<1x1x32xf32>
    %303 = vector.shape_cast %302 : vector<1x1x32xf32> to vector<1x32xf32>
    %cst_138 = arith.constant dense<0.000000e+00> : vector<32xf32>
    %304 = vector.multi_reduction <add>, %299, %cst_138 [1] : vector<32x32xf32> to vector<32xf32>
    %305 = vector.shape_cast %304 : vector<32xf32> to vector<32x1xf32>
    %cst_139 = arith.constant 3.200000e+01 : f32
    %306 = vector.broadcast %cst_139 : f32 to vector<32x1xf32>
    %307 = arith.divf %305, %306 : vector<32x1xf32>
    %308 = vector.broadcast %307 : vector<32x1xf32> to vector<32x32xf32>
    %309 = arith.subf %299, %308 : vector<32x32xf32>
    %310 = arith.mulf %309, %309 : vector<32x32xf32>
    %cst_140 = arith.constant dense<0.000000e+00> : vector<32xf32>
    %311 = vector.multi_reduction <add>, %310, %cst_140 [1] : vector<32x32xf32> to vector<32xf32>
    %312 = vector.shape_cast %311 : vector<32xf32> to vector<32x1xf32>
    %cst_141 = arith.constant 3.200000e+01 : f32
    %313 = vector.broadcast %cst_141 : f32 to vector<32x1xf32>
    %314 = arith.divf %312, %313 : vector<32x1xf32>
    %315 = vector.broadcast %307 : vector<32x1xf32> to vector<32x32xf32>
    %316 = arith.subf %299, %315 : vector<32x32xf32>
    %cst_142 = arith.constant 9.99999974E-6 : f32
    %317 = vector.broadcast %cst_142 : f32 to vector<32x1xf32>
    %318 = arith.addf %314, %317 : vector<32x1xf32>
    %319 = math.rsqrt %318 : vector<32x1xf32>
    %320 = vector.broadcast %319 : vector<32x1xf32> to vector<32x32xf32>
    %321 = arith.mulf %316, %320 : vector<32x32xf32>
    %322 = vector.broadcast %301 : vector<1x32xf32> to vector<32x32xf32>
    %323 = arith.mulf %321, %322 : vector<32x32xf32>
    %324 = vector.broadcast %303 : vector<1x32xf32> to vector<32x32xf32>
    %325 = arith.addf %323, %324 : vector<32x32xf32>
    %c0_143 = arith.constant 0 : index
    %c0_144 = arith.constant 0 : index
    %326 = vector.load %arg15[%c0_143, %c0_144] : memref<1x32xf32, #tpu.memory_space<vmem>>, vector<1x32xf32>
    %c0_145 = arith.constant 0 : index
    %c0_146 = arith.constant 0 : index
    %327 = vector.load %arg16[%c0_145, %c0_146] : memref<1x32xf32, #tpu.memory_space<vmem>>, vector<1x32xf32>
    %cst_147 = arith.constant dense<0.000000e+00> : vector<32xf32>
    %328 = vector.multi_reduction <add>, %325, %cst_147 [1] : vector<32x32xf32> to vector<32xf32>
    %329 = vector.shape_cast %328 : vector<32xf32> to vector<32x1xf32>
    %cst_148 = arith.constant 3.200000e+01 : f32
    %330 = vector.broadcast %cst_148 : f32 to vector<32x1xf32>
    %331 = arith.divf %329, %330 : vector<32x1xf32>
    %332 = vector.broadcast %331 : vector<32x1xf32> to vector<32x32xf32>
    %333 = arith.subf %325, %332 : vector<32x32xf32>
    %334 = arith.mulf %333, %333 : vector<32x32xf32>
    %cst_149 = arith.constant dense<0.000000e+00> : vector<32xf32>
    %335 = vector.multi_reduction <add>, %334, %cst_149 [1] : vector<32x32xf32> to vector<32xf32>
    %336 = vector.shape_cast %335 : vector<32xf32> to vector<32x1xf32>
    %cst_150 = arith.constant 3.200000e+01 : f32
    %337 = vector.broadcast %cst_150 : f32 to vector<32x1xf32>
    %338 = arith.divf %336, %337 : vector<32x1xf32>
    %339 = vector.broadcast %331 : vector<32x1xf32> to vector<32x32xf32>
    %340 = arith.subf %325, %339 : vector<32x32xf32>
    %cst_151 = arith.constant 9.99999974E-6 : f32
    %341 = vector.broadcast %cst_151 : f32 to vector<32x1xf32>
    %342 = arith.addf %338, %341 : vector<32x1xf32>
    %343 = math.rsqrt %342 : vector<32x1xf32>
    %344 = vector.broadcast %343 : vector<32x1xf32> to vector<32x32xf32>
    %345 = arith.mulf %340, %344 : vector<32x32xf32>
    %346 = vector.broadcast %326 : vector<1x32xf32> to vector<32x32xf32>
    %347 = arith.mulf %345, %346 : vector<32x32xf32>
    %348 = vector.broadcast %327 : vector<1x32xf32> to vector<32x32xf32>
    %349 = arith.addf %347, %348 : vector<32x32xf32>
    %c0_152 = arith.constant 0 : index
    %c0_153 = arith.constant 0 : index
    %c0_154 = arith.constant 0 : index
    %350 = vector.load %arg17[%c0_152, %c0_153, %c0_154] : memref<1x32x32xf32, #tpu.memory_space<vmem>>, vector<1x32x32xf32>
    %351 = vector.shape_cast %350 : vector<1x32x32xf32> to vector<32x32xf32>
    %352 = vector.shape_cast %349 : vector<32x32xf32> to vector<1x32x32xf32>
    tpu.vector_store %arg17[%c0_152, %c0_153, %c0_154], %352 {strides = array<i32>} : memref<1x32x32xf32, #tpu.memory_space<vmem>>, vector<1x32x32xf32>,
    return
  }
  func.func @transform_0(%arg0: i32) -> (i32, i32, i32) {
    %c0_i32 = arith.constant 0 : i32
    %c0_i32_0 = arith.constant 0 : i32
    %c0_i32_1 = arith.constant 0 : i32
    return %arg0, %c0_i32, %c0_i32_0 : i32, i32, i32
  }
  func.func @transform_1(%arg0: i32) -> (i32, i32, i32) {
    %c0_i32 = arith.constant 0 : i32
    %c0_i32_0 = arith.constant 0 : i32
    %c0_i32_1 = arith.constant 0 : i32
    return %arg0, %c0_i32, %c0_i32_0 : i32, i32, i32
  }
  func.func @transform_2(%arg0: i32) -> (i32, i32, i32) {
    %c0_i32 = arith.constant 0 : i32
    %c0_i32_0 = arith.constant 0 : i32
    %c0_i32_1 = arith.constant 0 : i32
    %c0_i32_2 = arith.constant 0 : i32
    return %c0_i32, %c0_i32_0, %c0_i32_1 : i32, i32, i32
  }
  func.func @transform_3(%arg0: i32) -> (i32, i32, i32) {
    %c0_i32 = arith.constant 0 : i32
    %c0_i32_0 = arith.constant 0 : i32
    %c0_i32_1 = arith.constant 0 : i32
    %c0_i32_2 = arith.constant 0 : i32
    return %c0_i32, %c0_i32_0, %c0_i32_1 : i32, i32, i32
  }
  func.func @transform_4(%arg0: i32) -> (i32, i32, i32) {
    %c0_i32 = arith.constant 0 : i32
    %c0_i32_0 = arith.constant 0 : i32
    %c0_i32_1 = arith.constant 0 : i32
    %c0_i32_2 = arith.constant 0 : i32
    return %c0_i32, %c0_i32_0, %c0_i32_1 : i32, i32, i32
  }
  func.func @transform_5(%arg0: i32) -> (i32, i32, i32) {
    %c0_i32 = arith.constant 0 : i32
    %c0_i32_0 = arith.constant 0 : i32
    %c0_i32_1 = arith.constant 0 : i32
    %c0_i32_2 = arith.constant 0 : i32
    return %c0_i32, %c0_i32_0, %c0_i32_1 : i32, i32, i32
  }
  func.func @transform_6(%arg0: i32) -> (i32, i32, i32) {
    %c0_i32 = arith.constant 0 : i32
    %c0_i32_0 = arith.constant 0 : i32
    %c0_i32_1 = arith.constant 0 : i32
    %c0_i32_2 = arith.constant 0 : i32
    return %c0_i32, %c0_i32_0, %c0_i32_1 : i32, i32, i32
  }
  func.func @transform_7(%arg0: i32) -> (i32, i32, i32) {
    %c0_i32 = arith.constant 0 : i32
    %c0_i32_0 = arith.constant 0 : i32
    %c0_i32_1 = arith.constant 0 : i32
    %c0_i32_2 = arith.constant 0 : i32
    return %c0_i32, %c0_i32_0, %c0_i32_1 : i32, i32, i32
  }
  func.func @transform_8(%arg0: i32) -> (i32, i32, i32) {
    %c0_i32 = arith.constant 0 : i32
    %c0_i32_0 = arith.constant 0 : i32
    %c0_i32_1 = arith.constant 0 : i32
    %c0_i32_2 = arith.constant 0 : i32
    return %c0_i32, %c0_i32_0, %c0_i32_1 : i32, i32, i32
  }
  func.func @transform_9(%arg0: i32) -> (i32, i32, i32) {
    %c0_i32 = arith.constant 0 : i32
    %c0_i32_0 = arith.constant 0 : i32
    %c0_i32_1 = arith.constant 0 : i32
    %c0_i32_2 = arith.constant 0 : i32
    return %c0_i32, %c0_i32_0, %c0_i32_1 : i32, i32, i32
  }
  func.func @transform_10(%arg0: i32) -> (i32, i32, i32) {
    %c0_i32 = arith.constant 0 : i32
    %c0_i32_0 = arith.constant 0 : i32
    %c0_i32_1 = arith.constant 0 : i32
    %c0_i32_2 = arith.constant 0 : i32
    return %c0_i32, %c0_i32_0, %c0_i32_1 : i32, i32, i32
  }
  func.func @transform_11(%arg0: i32) -> (i32, i32, i32) {
    %c0_i32 = arith.constant 0 : i32
    %c0_i32_0 = arith.constant 0 : i32
    %c0_i32_1 = arith.constant 0 : i32
    %c0_i32_2 = arith.constant 0 : i32
    return %c0_i32, %c0_i32_0, %c0_i32_1 : i32, i32, i32
  }
  func.func @transform_12(%arg0: i32) -> (i32, i32, i32) {
    %c0_i32 = arith.constant 0 : i32
    %c0_i32_0 = arith.constant 0 : i32
    %c0_i32_1 = arith.constant 0 : i32
    %c0_i32_2 = arith.constant 0 : i32
    return %c0_i32, %c0_i32_0, %c0_i32_1 : i32, i32, i32
  }
  func.func @transform_13(%arg0: i32) -> (i32, i32, i32) {
    %c0_i32 = arith.constant 0 : i32
    %c0_i32_0 = arith.constant 0 : i32
    %c0_i32_1 = arith.constant 0 : i32
    %c0_i32_2 = arith.constant 0 : i32
    return %c0_i32, %c0_i32_0, %c0_i32_1 : i32, i32, i32
  }
  func.func @transform_14(%arg0: i32) -> (i32, i32) {
    %c0_i32 = arith.constant 0 : i32
    %c0_i32_0 = arith.constant 0 : i32
    %c0_i32_1 = arith.constant 0 : i32
    return %c0_i32, %c0_i32_0 : i32, i32
  }
  func.func @transform_15(%arg0: i32) -> (i32, i32) {
    %c0_i32 = arith.constant 0 : i32
    %c0_i32_0 = arith.constant 0 : i32
    %c0_i32_1 = arith.constant 0 : i32
    return %c0_i32, %c0_i32_0 : i32, i32
  }
  func.func @transform_16(%arg0: i32) -> (i32, i32, i32) {
    %c0_i32 = arith.constant 0 : i32
    %c0_i32_0 = arith.constant 0 : i32
    %c0_i32_1 = arith.constant 0 : i32
    return %arg0, %c0_i32, %c0_i32_0 : i32, i32, i32
  }
}

module attributes {stable_mosaic.version = 11 : i64} {
  func.func @_decoder_kernel(%arg0: i32, %arg1: memref<1x16x32xf32, #tpu.memory_space<vmem>>, %arg2: memref<1x128x32xf32, #tpu.memory_space<vmem>>, %arg3: memref<1x16x16xf32, #tpu.memory_space<vmem>>, %arg4: memref<1x1x128xf32, #tpu.memory_space<vmem>>, %arg5: memref<2x32x96xf32, #tpu.memory_space<vmem>>, %arg6: memref<2x1x96xf32, #tpu.memory_space<vmem>>, %arg7: memref<2x32x32xf32, #tpu.memory_space<vmem>>, %arg8: memref<2x1x32xf32, #tpu.memory_space<vmem>>, %arg9: memref<2x1x32xf32, #tpu.memory_space<vmem>>, %arg10: memref<2x1x32xf32, #tpu.memory_space<vmem>>, %arg11: memref<2x32x32xf32, #tpu.memory_space<vmem>>, %arg12: memref<2x1x32xf32, #tpu.memory_space<vmem>>, %arg13: memref<2x32x64xf32, #tpu.memory_space<vmem>>, %arg14: memref<2x1x64xf32, #tpu.memory_space<vmem>>, %arg15: memref<2x32x32xf32, #tpu.memory_space<vmem>>, %arg16: memref<2x1x32xf32, #tpu.memory_space<vmem>>, %arg17: memref<2x1x32xf32, #tpu.memory_space<vmem>>, %arg18: memref<2x1x32xf32, #tpu.memory_space<vmem>>, %arg19: memref<2x32x32xf32, #tpu.memory_space<vmem>>, %arg20: memref<2x1x32xf32, #tpu.memory_space<vmem>>, %arg21: memref<2x32x32xf32, #tpu.memory_space<vmem>>, %arg22: memref<2x1x32xf32, #tpu.memory_space<vmem>>, %arg23: memref<2x1x32xf32, #tpu.memory_space<vmem>>, %arg24: memref<2x1x32xf32, #tpu.memory_space<vmem>>, %arg25: memref<1x32xf32, #tpu.memory_space<vmem>>, %arg26: memref<1x32xf32, #tpu.memory_space<vmem>>, %arg27: memref<32x128xf32, #tpu.memory_space<vmem>>, %arg28: memref<1x128xf32, #tpu.memory_space<vmem>>, %arg29: memref<1x16x128xf32, #tpu.memory_space<vmem>>) attributes {dimension_semantics = [#tpu.dimension_semantics<parallel>], iteration_bounds = array<i64: 2>, scalar_prefetch = 0 : i64, scratch_operands = 0 : i64, tpu.core_type = #tpu.core_type<tc>, window_params = [{transform_indices = @transform_0, window_bounds = array<i64: 1, 16, 32>}, {transform_indices = @transform_1, window_bounds = array<i64: 1, 128, 32>}, {transform_indices = @transform_2, window_bounds = array<i64: 1, 16, 16>}, {transform_indices = @transform_3, window_bounds = array<i64: 1, 1, 128>}, {pipeline_mode = #tpu.pipeline_mode<synchronous>, transform_indices = @transform_4, window_bounds = array<i64: 2, 32, 96>}, {pipeline_mode = #tpu.pipeline_mode<synchronous>, transform_indices = @transform_5, window_bounds = array<i64: 2, 1, 96>}, {pipeline_mode = #tpu.pipeline_mode<synchronous>, transform_indices = @transform_6, window_bounds = array<i64: 2, 32, 32>}, {pipeline_mode = #tpu.pipeline_mode<synchronous>, transform_indices = @transform_7, window_bounds = array<i64: 2, 1, 32>}, {pipeline_mode = #tpu.pipeline_mode<synchronous>, transform_indices = @transform_8, window_bounds = array<i64: 2, 1, 32>}, {pipeline_mode = #tpu.pipeline_mode<synchronous>, transform_indices = @transform_9, window_bounds = array<i64: 2, 1, 32>}, {pipeline_mode = #tpu.pipeline_mode<synchronous>, transform_indices = @transform_10, window_bounds = array<i64: 2, 32, 32>}, {pipeline_mode = #tpu.pipeline_mode<synchronous>, transform_indices = @transform_11, window_bounds = array<i64: 2, 1, 32>}, {pipeline_mode = #tpu.pipeline_mode<synchronous>, transform_indices = @transform_12, window_bounds = array<i64: 2, 32, 64>}, {pipeline_mode = #tpu.pipeline_mode<synchronous>, transform_indices = @transform_13, window_bounds = array<i64: 2, 1, 64>}, {pipeline_mode = #tpu.pipeline_mode<synchronous>, transform_indices = @transform_14, window_bounds = array<i64: 2, 32, 32>}, {pipeline_mode = #tpu.pipeline_mode<synchronous>, transform_indices = @transform_15, window_bounds = array<i64: 2, 1, 32>}, {pipeline_mode = #tpu.pipeline_mode<synchronous>, transform_indices = @transform_16, window_bounds = array<i64: 2, 1, 32>}, {pipeline_mode = #tpu.pipeline_mode<synchronous>, transform_indices = @transform_17, window_bounds = array<i64: 2, 1, 32>}, {pipeline_mode = #tpu.pipeline_mode<synchronous>, transform_indices = @transform_18, window_bounds = array<i64: 2, 32, 32>}, {pipeline_mode = #tpu.pipeline_mode<synchronous>, transform_indices = @transform_19, window_bounds = array<i64: 2, 1, 32>}, {pipeline_mode = #tpu.pipeline_mode<synchronous>, transform_indices = @transform_20, window_bounds = array<i64: 2, 32, 32>}, {pipeline_mode = #tpu.pipeline_mode<synchronous>, transform_indices = @transform_21, window_bounds = array<i64: 2, 1, 32>}, {pipeline_mode = #tpu.pipeline_mode<synchronous>, transform_indices = @transform_22, window_bounds = array<i64: 2, 1, 32>}, {pipeline_mode = #tpu.pipeline_mode<synchronous>, transform_indices = @transform_23, window_bounds = array<i64: 2, 1, 32>}, {pipeline_mode = #tpu.pipeline_mode<synchronous>, transform_indices = @transform_24, window_bounds = array<i64: 1, 32>}, {pipeline_mode = #tpu.pipeline_mode<synchronous>, transform_indices = @transform_25, window_bounds = array<i64: 1, 32>}, {pipeline_mode = #tpu.pipeline_mode<synchronous>, transform_indices = @transform_26, window_bounds = array<i64: 32, 128>}, {pipeline_mode = #tpu.pipeline_mode<synchronous>, transform_indices = @transform_27, window_bounds = array<i64: 1, 128>}, {transform_indices = @transform_28, window_bounds = array<i64: 1, 16, 128>}]} {
    %c0 = arith.constant 0 : index
    %c0_0 = arith.constant 0 : index
    %c0_1 = arith.constant 0 : index
    %0 = vector.load %arg1[%c0, %c0_0, %c0_1] : memref<1x16x32xf32, #tpu.memory_space<vmem>>, vector<1x16x32xf32>
    %1 = vector.shape_cast %0 : vector<1x16x32xf32> to vector<16x32xf32>
    %c0_2 = arith.constant 0 : index
    %c0_3 = arith.constant 0 : index
    %c0_4 = arith.constant 0 : index
    %2 = vector.load %arg2[%c0_2, %c0_3, %c0_4] : memref<1x128x32xf32, #tpu.memory_space<vmem>>, vector<1x128x32xf32>
    %3 = vector.shape_cast %2 : vector<1x128x32xf32> to vector<128x32xf32>
    %c0_5 = arith.constant 0 : index
    %c0_6 = arith.constant 0 : index
    %c0_7 = arith.constant 0 : index
    %4 = vector.load %arg3[%c0_5, %c0_6, %c0_7] : memref<1x16x16xf32, #tpu.memory_space<vmem>>, vector<1x16x16xf32>
    %5 = vector.shape_cast %4 : vector<1x16x16xf32> to vector<16x16xf32>
    %c0_8 = arith.constant 0 : index
    %c0_9 = arith.constant 0 : index
    %c0_10 = arith.constant 0 : index
    %6 = vector.load %arg4[%c0_8, %c0_9, %c0_10] : memref<1x1x128xf32, #tpu.memory_space<vmem>>, vector<1x1x128xf32>
    %7 = vector.shape_cast %6 : vector<1x1x128xf32> to vector<1x128xf32>
    %c0_11 = arith.constant 0 : index
    %c0_12 = arith.constant 0 : index
    %c0_13 = arith.constant 0 : index
    %8 = vector.load %arg5[%c0_11, %c0_12, %c0_13] : memref<2x32x96xf32, #tpu.memory_space<vmem>>, vector<1x32x96xf32>
    %9 = vector.shape_cast %8 : vector<1x32x96xf32> to vector<32x96xf32>
    %cst = arith.constant dense<0.000000e+00> : vector<16x96xf32>
    %10 = tpu.matmul %1, %9, %cst {dimension_numbers = #tpu.dot_dimension_numbers<[1], [0], [0], [1], [0, 0, 1, 1], [], []>} : vector<16x32xf32>, vector<32x96xf32>, vector<16x96xf32> -> vector<16x96xf32>
    %c0_14 = arith.constant 0 : index
    %c0_15 = arith.constant 0 : index
    %c0_16 = arith.constant 0 : index
    %11 = vector.load %arg6[%c0_14, %c0_15, %c0_16] : memref<2x1x96xf32, #tpu.memory_space<vmem>>, vector<1x1x96xf32>
    %12 = vector.shape_cast %11 : vector<1x1x96xf32> to vector<1x96xf32>
    %13 = vector.broadcast %12 : vector<1x96xf32> to vector<16x96xf32>
    %14 = arith.addf %10, %13 : vector<16x96xf32>
    %15 = vector.extract_strided_slice %14 {offsets = [0, 0], sizes = [16, 32], strides = [1, 1]} : vector<16x96xf32> to vector<16x32xf32>
    %16 = vector.extract_strided_slice %14 {offsets = [0, 32], sizes = [16, 32], strides = [1, 1]} : vector<16x96xf32> to vector<16x32xf32>
    %17 = vector.extract_strided_slice %14 {offsets = [0, 64], sizes = [16, 32], strides = [1, 1]} : vector<16x96xf32> to vector<16x32xf32>
    %c0_17 = arith.constant 0 : index
    %c0_18 = arith.constant 0 : index
    %c0_19 = arith.constant 0 : index
    %18 = vector.load %arg7[%c0_17, %c0_18, %c0_19] : memref<2x32x32xf32, #tpu.memory_space<vmem>>, vector<1x32x32xf32>
    %19 = vector.shape_cast %18 : vector<1x32x32xf32> to vector<32x32xf32>
    %c0_20 = arith.constant 0 : index
    %c0_21 = arith.constant 0 : index
    %c0_22 = arith.constant 0 : index
    %20 = vector.load %arg8[%c0_20, %c0_21, %c0_22] : memref<2x1x32xf32, #tpu.memory_space<vmem>>, vector<1x1x32xf32>
    %21 = vector.shape_cast %20 : vector<1x1x32xf32> to vector<1x32xf32>
    %22 = vector.extract_strided_slice %15 {offsets = [0, 0], sizes = [16, 8], strides = [1, 1]} : vector<16x32xf32> to vector<16x8xf32>
    %23 = vector.extract_strided_slice %16 {offsets = [0, 0], sizes = [16, 8], strides = [1, 1]} : vector<16x32xf32> to vector<16x8xf32>
    %24 = vector.extract_strided_slice %17 {offsets = [0, 0], sizes = [16, 8], strides = [1, 1]} : vector<16x32xf32> to vector<16x8xf32>
    %cst_23 = arith.constant dense<0.000000e+00> : vector<16x16xf32>
    %25 = tpu.matmul %22, %23, %cst_23 {dimension_numbers = #tpu.dot_dimension_numbers<[1], [1], [0], [0], [0, 0, 1, 0], [], []>} : vector<16x8xf32>, vector<16x8xf32>, vector<16x16xf32> -> vector<16x16xf32>
    %26 = arith.addf %25, %5 : vector<16x16xf32>
    %cst_24 = arith.constant dense<0xFF800000> : vector<16xf32>
    %27 = vector.multi_reduction <maximumf>, %26, %cst_24 [1] : vector<16x16xf32> to vector<16xf32>
    %28 = vector.shape_cast %27 : vector<16xf32> to vector<16x1xf32>
    %29 = vector.broadcast %28 : vector<16x1xf32> to vector<16x16xf32>
    %30 = arith.subf %26, %29 : vector<16x16xf32>
    %31 = math.exp %30 : vector<16x16xf32>
    %cst_25 = arith.constant dense<0.000000e+00> : vector<16xf32>
    %32 = vector.multi_reduction <add>, %31, %cst_25 [1] : vector<16x16xf32> to vector<16xf32>
    %33 = vector.shape_cast %32 : vector<16xf32> to vector<16x1xf32>
    %cst_26 = arith.constant dense<0.000000e+00> : vector<16x8xf32>
    %34 = tpu.matmul %31, %24, %cst_26 {dimension_numbers = #tpu.dot_dimension_numbers<[1], [0], [0], [1], [0, 0, 1, 1], [], []>} : vector<16x16xf32>, vector<16x8xf32>, vector<16x8xf32> -> vector<16x8xf32>
    %35 = vector.broadcast %33 : vector<16x1xf32> to vector<16x8xf32>
    %36 = arith.divf %34, %35 : vector<16x8xf32>
    %37 = vector.extract_strided_slice %19 {offsets = [0, 0], sizes = [8, 32], strides = [1, 1]} : vector<32x32xf32> to vector<8x32xf32>
    %cst_27 = arith.constant dense<0.000000e+00> : vector<16x32xf32>
    %38 = tpu.matmul %36, %37, %cst_27 {dimension_numbers = #tpu.dot_dimension_numbers<[1], [0], [0], [1], [0, 0, 1, 1], [], []>} : vector<16x8xf32>, vector<8x32xf32>, vector<16x32xf32> -> vector<16x32xf32>
    %39 = vector.broadcast %21 : vector<1x32xf32> to vector<16x32xf32>
    %40 = arith.addf %39, %38 : vector<16x32xf32>
    %41 = vector.extract_strided_slice %15 {offsets = [0, 8], sizes = [16, 8], strides = [1, 1]} : vector<16x32xf32> to vector<16x8xf32>
    %42 = vector.extract_strided_slice %16 {offsets = [0, 8], sizes = [16, 8], strides = [1, 1]} : vector<16x32xf32> to vector<16x8xf32>
    %43 = vector.extract_strided_slice %17 {offsets = [0, 8], sizes = [16, 8], strides = [1, 1]} : vector<16x32xf32> to vector<16x8xf32>
    %cst_28 = arith.constant dense<0.000000e+00> : vector<16x16xf32>
    %44 = tpu.matmul %41, %42, %cst_28 {dimension_numbers = #tpu.dot_dimension_numbers<[1], [1], [0], [0], [0, 0, 1, 0], [], []>} : vector<16x8xf32>, vector<16x8xf32>, vector<16x16xf32> -> vector<16x16xf32>
    %45 = arith.addf %44, %5 : vector<16x16xf32>
    %cst_29 = arith.constant dense<0xFF800000> : vector<16xf32>
    %46 = vector.multi_reduction <maximumf>, %45, %cst_29 [1] : vector<16x16xf32> to vector<16xf32>
    %47 = vector.shape_cast %46 : vector<16xf32> to vector<16x1xf32>
    %48 = vector.broadcast %47 : vector<16x1xf32> to vector<16x16xf32>
    %49 = arith.subf %45, %48 : vector<16x16xf32>
    %50 = math.exp %49 : vector<16x16xf32>
    %cst_30 = arith.constant dense<0.000000e+00> : vector<16xf32>
    %51 = vector.multi_reduction <add>, %50, %cst_30 [1] : vector<16x16xf32> to vector<16xf32>
    %52 = vector.shape_cast %51 : vector<16xf32> to vector<16x1xf32>
    %cst_31 = arith.constant dense<0.000000e+00> : vector<16x8xf32>
    %53 = tpu.matmul %50, %43, %cst_31 {dimension_numbers = #tpu.dot_dimension_numbers<[1], [0], [0], [1], [0, 0, 1, 1], [], []>} : vector<16x16xf32>, vector<16x8xf32>, vector<16x8xf32> -> vector<16x8xf32>
    %54 = vector.broadcast %52 : vector<16x1xf32> to vector<16x8xf32>
    %55 = arith.divf %53, %54 : vector<16x8xf32>
    %56 = vector.extract_strided_slice %19 {offsets = [8, 0], sizes = [8, 32], strides = [1, 1]} : vector<32x32xf32> to vector<8x32xf32>
    %cst_32 = arith.constant dense<0.000000e+00> : vector<16x32xf32>
    %57 = tpu.matmul %55, %56, %cst_32 {dimension_numbers = #tpu.dot_dimension_numbers<[1], [0], [0], [1], [0, 0, 1, 1], [], []>} : vector<16x8xf32>, vector<8x32xf32>, vector<16x32xf32> -> vector<16x32xf32>
    %58 = arith.addf %40, %57 : vector<16x32xf32>
    %59 = vector.extract_strided_slice %15 {offsets = [0, 16], sizes = [16, 8], strides = [1, 1]} : vector<16x32xf32> to vector<16x8xf32>
    %60 = vector.extract_strided_slice %16 {offsets = [0, 16], sizes = [16, 8], strides = [1, 1]} : vector<16x32xf32> to vector<16x8xf32>
    %61 = vector.extract_strided_slice %17 {offsets = [0, 16], sizes = [16, 8], strides = [1, 1]} : vector<16x32xf32> to vector<16x8xf32>
    %cst_33 = arith.constant dense<0.000000e+00> : vector<16x16xf32>
    %62 = tpu.matmul %59, %60, %cst_33 {dimension_numbers = #tpu.dot_dimension_numbers<[1], [1], [0], [0], [0, 0, 1, 0], [], []>} : vector<16x8xf32>, vector<16x8xf32>, vector<16x16xf32> -> vector<16x16xf32>
    %63 = arith.addf %62, %5 : vector<16x16xf32>
    %cst_34 = arith.constant dense<0xFF800000> : vector<16xf32>
    %64 = vector.multi_reduction <maximumf>, %63, %cst_34 [1] : vector<16x16xf32> to vector<16xf32>
    %65 = vector.shape_cast %64 : vector<16xf32> to vector<16x1xf32>
    %66 = vector.broadcast %65 : vector<16x1xf32> to vector<16x16xf32>
    %67 = arith.subf %63, %66 : vector<16x16xf32>
    %68 = math.exp %67 : vector<16x16xf32>
    %cst_35 = arith.constant dense<0.000000e+00> : vector<16xf32>
    %69 = vector.multi_reduction <add>, %68, %cst_35 [1] : vector<16x16xf32> to vector<16xf32>
    %70 = vector.shape_cast %69 : vector<16xf32> to vector<16x1xf32>
    %cst_36 = arith.constant dense<0.000000e+00> : vector<16x8xf32>
    %71 = tpu.matmul %68, %61, %cst_36 {dimension_numbers = #tpu.dot_dimension_numbers<[1], [0], [0], [1], [0, 0, 1, 1], [], []>} : vector<16x16xf32>, vector<16x8xf32>, vector<16x8xf32> -> vector<16x8xf32>
    %72 = vector.broadcast %70 : vector<16x1xf32> to vector<16x8xf32>
    %73 = arith.divf %71, %72 : vector<16x8xf32>
    %74 = vector.extract_strided_slice %19 {offsets = [16, 0], sizes = [8, 32], strides = [1, 1]} : vector<32x32xf32> to vector<8x32xf32>
    %cst_37 = arith.constant dense<0.000000e+00> : vector<16x32xf32>
    %75 = tpu.matmul %73, %74, %cst_37 {dimension_numbers = #tpu.dot_dimension_numbers<[1], [0], [0], [1], [0, 0, 1, 1], [], []>} : vector<16x8xf32>, vector<8x32xf32>, vector<16x32xf32> -> vector<16x32xf32>
    %76 = arith.addf %58, %75 : vector<16x32xf32>
    %77 = vector.extract_strided_slice %15 {offsets = [0, 24], sizes = [16, 8], strides = [1, 1]} : vector<16x32xf32> to vector<16x8xf32>
    %78 = vector.extract_strided_slice %16 {offsets = [0, 24], sizes = [16, 8], strides = [1, 1]} : vector<16x32xf32> to vector<16x8xf32>
    %79 = vector.extract_strided_slice %17 {offsets = [0, 24], sizes = [16, 8], strides = [1, 1]} : vector<16x32xf32> to vector<16x8xf32>
    %cst_38 = arith.constant dense<0.000000e+00> : vector<16x16xf32>
    %80 = tpu.matmul %77, %78, %cst_38 {dimension_numbers = #tpu.dot_dimension_numbers<[1], [1], [0], [0], [0, 0, 1, 0], [], []>} : vector<16x8xf32>, vector<16x8xf32>, vector<16x16xf32> -> vector<16x16xf32>
    %81 = arith.addf %80, %5 : vector<16x16xf32>
    %cst_39 = arith.constant dense<0xFF800000> : vector<16xf32>
    %82 = vector.multi_reduction <maximumf>, %81, %cst_39 [1] : vector<16x16xf32> to vector<16xf32>
    %83 = vector.shape_cast %82 : vector<16xf32> to vector<16x1xf32>
    %84 = vector.broadcast %83 : vector<16x1xf32> to vector<16x16xf32>
    %85 = arith.subf %81, %84 : vector<16x16xf32>
    %86 = math.exp %85 : vector<16x16xf32>
    %cst_40 = arith.constant dense<0.000000e+00> : vector<16xf32>
    %87 = vector.multi_reduction <add>, %86, %cst_40 [1] : vector<16x16xf32> to vector<16xf32>
    %88 = vector.shape_cast %87 : vector<16xf32> to vector<16x1xf32>
    %cst_41 = arith.constant dense<0.000000e+00> : vector<16x8xf32>
    %89 = tpu.matmul %86, %79, %cst_41 {dimension_numbers = #tpu.dot_dimension_numbers<[1], [0], [0], [1], [0, 0, 1, 1], [], []>} : vector<16x16xf32>, vector<16x8xf32>, vector<16x8xf32> -> vector<16x8xf32>
    %90 = vector.broadcast %88 : vector<16x1xf32> to vector<16x8xf32>
    %91 = arith.divf %89, %90 : vector<16x8xf32>
    %92 = vector.extract_strided_slice %19 {offsets = [24, 0], sizes = [8, 32], strides = [1, 1]} : vector<32x32xf32> to vector<8x32xf32>
    %cst_42 = arith.constant dense<0.000000e+00> : vector<16x32xf32>
    %93 = tpu.matmul %91, %92, %cst_42 {dimension_numbers = #tpu.dot_dimension_numbers<[1], [0], [0], [1], [0, 0, 1, 1], [], []>} : vector<16x8xf32>, vector<8x32xf32>, vector<16x32xf32> -> vector<16x32xf32>
    %94 = arith.addf %76, %93 : vector<16x32xf32>
    %95 = arith.addf %1, %94 : vector<16x32xf32>
    %c0_43 = arith.constant 0 : index
    %c0_44 = arith.constant 0 : index
    %c0_45 = arith.constant 0 : index
    %96 = vector.load %arg9[%c0_43, %c0_44, %c0_45] : memref<2x1x32xf32, #tpu.memory_space<vmem>>, vector<1x1x32xf32>
    %97 = vector.shape_cast %96 : vector<1x1x32xf32> to vector<1x32xf32>
    %c0_46 = arith.constant 0 : index
    %c0_47 = arith.constant 0 : index
    %c0_48 = arith.constant 0 : index
    %98 = vector.load %arg10[%c0_46, %c0_47, %c0_48] : memref<2x1x32xf32, #tpu.memory_space<vmem>>, vector<1x1x32xf32>
    %99 = vector.shape_cast %98 : vector<1x1x32xf32> to vector<1x32xf32>
    %cst_49 = arith.constant dense<0.000000e+00> : vector<16xf32>
    %100 = vector.multi_reduction <add>, %95, %cst_49 [1] : vector<16x32xf32> to vector<16xf32>
    %101 = vector.shape_cast %100 : vector<16xf32> to vector<16x1xf32>
    %cst_50 = arith.constant 3.200000e+01 : f32
    %102 = vector.broadcast %cst_50 : f32 to vector<16x1xf32>
    %103 = arith.divf %101, %102 : vector<16x1xf32>
    %104 = vector.broadcast %103 : vector<16x1xf32> to vector<16x32xf32>
    %105 = arith.subf %95, %104 : vector<16x32xf32>
    %106 = arith.mulf %105, %105 : vector<16x32xf32>
    %cst_51 = arith.constant dense<0.000000e+00> : vector<16xf32>
    %107 = vector.multi_reduction <add>, %106, %cst_51 [1] : vector<16x32xf32> to vector<16xf32>
    %108 = vector.shape_cast %107 : vector<16xf32> to vector<16x1xf32>
    %cst_52 = arith.constant 3.200000e+01 : f32
    %109 = vector.broadcast %cst_52 : f32 to vector<16x1xf32>
    %110 = arith.divf %108, %109 : vector<16x1xf32>
    %111 = vector.broadcast %103 : vector<16x1xf32> to vector<16x32xf32>
    %112 = arith.subf %95, %111 : vector<16x32xf32>
    %cst_53 = arith.constant 9.99999974E-6 : f32
    %113 = vector.broadcast %cst_53 : f32 to vector<16x1xf32>
    %114 = arith.addf %110, %113 : vector<16x1xf32>
    %115 = math.rsqrt %114 : vector<16x1xf32>
    %116 = vector.broadcast %115 : vector<16x1xf32> to vector<16x32xf32>
    %117 = arith.mulf %112, %116 : vector<16x32xf32>
    %118 = vector.broadcast %97 : vector<1x32xf32> to vector<16x32xf32>
    %119 = arith.mulf %117, %118 : vector<16x32xf32>
    %120 = vector.broadcast %99 : vector<1x32xf32> to vector<16x32xf32>
    %121 = arith.addf %119, %120 : vector<16x32xf32>
    %c0_54 = arith.constant 0 : index
    %c0_55 = arith.constant 0 : index
    %c0_56 = arith.constant 0 : index
    %122 = vector.load %arg11[%c0_54, %c0_55, %c0_56] : memref<2x32x32xf32, #tpu.memory_space<vmem>>, vector<1x32x32xf32>
    %123 = vector.shape_cast %122 : vector<1x32x32xf32> to vector<32x32xf32>
    %cst_57 = arith.constant dense<0.000000e+00> : vector<16x32xf32>
    %124 = tpu.matmul %121, %123, %cst_57 {dimension_numbers = #tpu.dot_dimension_numbers<[1], [0], [0], [1], [0, 0, 1, 1], [], []>} : vector<16x32xf32>, vector<32x32xf32>, vector<16x32xf32> -> vector<16x32xf32>
    %c0_58 = arith.constant 0 : index
    %c0_59 = arith.constant 0 : index
    %c0_60 = arith.constant 0 : index
    %125 = vector.load %arg12[%c0_58, %c0_59, %c0_60] : memref<2x1x32xf32, #tpu.memory_space<vmem>>, vector<1x1x32xf32>
    %126 = vector.shape_cast %125 : vector<1x1x32xf32> to vector<1x32xf32>
    %127 = vector.broadcast %126 : vector<1x32xf32> to vector<16x32xf32>
    %128 = arith.addf %124, %127 : vector<16x32xf32>
    %c0_61 = arith.constant 0 : index
    %c0_62 = arith.constant 0 : index
    %c0_63 = arith.constant 0 : index
    %129 = vector.load %arg13[%c0_61, %c0_62, %c0_63] : memref<2x32x64xf32, #tpu.memory_space<vmem>>, vector<1x32x64xf32>
    %130 = vector.shape_cast %129 : vector<1x32x64xf32> to vector<32x64xf32>
    %cst_64 = arith.constant dense<0.000000e+00> : vector<128x64xf32>
    %131 = tpu.matmul %3, %130, %cst_64 {dimension_numbers = #tpu.dot_dimension_numbers<[1], [0], [0], [1], [0, 0, 1, 1], [], []>} : vector<128x32xf32>, vector<32x64xf32>, vector<128x64xf32> -> vector<128x64xf32>
    %c0_65 = arith.constant 0 : index
    %c0_66 = arith.constant 0 : index
    %c0_67 = arith.constant 0 : index
    %132 = vector.load %arg14[%c0_65, %c0_66, %c0_67] : memref<2x1x64xf32, #tpu.memory_space<vmem>>, vector<1x1x64xf32>
    %133 = vector.shape_cast %132 : vector<1x1x64xf32> to vector<1x64xf32>
    %134 = vector.broadcast %133 : vector<1x64xf32> to vector<128x64xf32>
    %135 = arith.addf %131, %134 : vector<128x64xf32>
    %136 = vector.extract_strided_slice %135 {offsets = [0, 0], sizes = [128, 32], strides = [1, 1]} : vector<128x64xf32> to vector<128x32xf32>
    %137 = vector.extract_strided_slice %135 {offsets = [0, 32], sizes = [128, 32], strides = [1, 1]} : vector<128x64xf32> to vector<128x32xf32>
    %c0_68 = arith.constant 0 : index
    %c0_69 = arith.constant 0 : index
    %c0_70 = arith.constant 0 : index
    %138 = vector.load %arg15[%c0_68, %c0_69, %c0_70] : memref<2x32x32xf32, #tpu.memory_space<vmem>>, vector<1x32x32xf32>
    %139 = vector.shape_cast %138 : vector<1x32x32xf32> to vector<32x32xf32>
    %c0_71 = arith.constant 0 : index
    %c0_72 = arith.constant 0 : index
    %c0_73 = arith.constant 0 : index
    %140 = vector.load %arg16[%c0_71, %c0_72, %c0_73] : memref<2x1x32xf32, #tpu.memory_space<vmem>>, vector<1x1x32xf32>
    %141 = vector.shape_cast %140 : vector<1x1x32xf32> to vector<1x32xf32>
    %142 = vector.extract_strided_slice %128 {offsets = [0, 0], sizes = [16, 8], strides = [1, 1]} : vector<16x32xf32> to vector<16x8xf32>
    %143 = vector.extract_strided_slice %136 {offsets = [0, 0], sizes = [128, 8], strides = [1, 1]} : vector<128x32xf32> to vector<128x8xf32>
    %144 = vector.extract_strided_slice %137 {offsets = [0, 0], sizes = [128, 8], strides = [1, 1]} : vector<128x32xf32> to vector<128x8xf32>
    %cst_74 = arith.constant dense<0.000000e+00> : vector<16x128xf32>
    %145 = tpu.matmul %142, %143, %cst_74 {dimension_numbers = #tpu.dot_dimension_numbers<[1], [1], [0], [0], [0, 0, 1, 0], [], []>} : vector<16x8xf32>, vector<128x8xf32>, vector<16x128xf32> -> vector<16x128xf32>
    %146 = vector.broadcast %7 : vector<1x128xf32> to vector<16x128xf32>
    %147 = arith.addf %145, %146 : vector<16x128xf32>
    %cst_75 = arith.constant dense<0xFF800000> : vector<16xf32>
    %148 = vector.multi_reduction <maximumf>, %147, %cst_75 [1] : vector<16x128xf32> to vector<16xf32>
    %149 = vector.shape_cast %148 : vector<16xf32> to vector<16x1xf32>
    %150 = vector.broadcast %149 : vector<16x1xf32> to vector<16x128xf32>
    %151 = arith.subf %147, %150 : vector<16x128xf32>
    %152 = math.exp %151 : vector<16x128xf32>
    %cst_76 = arith.constant dense<0.000000e+00> : vector<16xf32>
    %153 = vector.multi_reduction <add>, %152, %cst_76 [1] : vector<16x128xf32> to vector<16xf32>
    %154 = vector.shape_cast %153 : vector<16xf32> to vector<16x1xf32>
    %cst_77 = arith.constant dense<0.000000e+00> : vector<16x8xf32>
    %155 = tpu.matmul %152, %144, %cst_77 {dimension_numbers = #tpu.dot_dimension_numbers<[1], [0], [0], [1], [0, 0, 1, 1], [], []>} : vector<16x128xf32>, vector<128x8xf32>, vector<16x8xf32> -> vector<16x8xf32>
    %156 = vector.broadcast %154 : vector<16x1xf32> to vector<16x8xf32>
    %157 = arith.divf %155, %156 : vector<16x8xf32>
    %158 = vector.extract_strided_slice %139 {offsets = [0, 0], sizes = [8, 32], strides = [1, 1]} : vector<32x32xf32> to vector<8x32xf32>
    %cst_78 = arith.constant dense<0.000000e+00> : vector<16x32xf32>
    %159 = tpu.matmul %157, %158, %cst_78 {dimension_numbers = #tpu.dot_dimension_numbers<[1], [0], [0], [1], [0, 0, 1, 1], [], []>} : vector<16x8xf32>, vector<8x32xf32>, vector<16x32xf32> -> vector<16x32xf32>
    %160 = vector.broadcast %141 : vector<1x32xf32> to vector<16x32xf32>
    %161 = arith.addf %160, %159 : vector<16x32xf32>
    %162 = vector.extract_strided_slice %128 {offsets = [0, 8], sizes = [16, 8], strides = [1, 1]} : vector<16x32xf32> to vector<16x8xf32>
    %163 = vector.extract_strided_slice %136 {offsets = [0, 8], sizes = [128, 8], strides = [1, 1]} : vector<128x32xf32> to vector<128x8xf32>
    %164 = vector.extract_strided_slice %137 {offsets = [0, 8], sizes = [128, 8], strides = [1, 1]} : vector<128x32xf32> to vector<128x8xf32>
    %cst_79 = arith.constant dense<0.000000e+00> : vector<16x128xf32>
    %165 = tpu.matmul %162, %163, %cst_79 {dimension_numbers = #tpu.dot_dimension_numbers<[1], [1], [0], [0], [0, 0, 1, 0], [], []>} : vector<16x8xf32>, vector<128x8xf32>, vector<16x128xf32> -> vector<16x128xf32>
    %166 = vector.broadcast %7 : vector<1x128xf32> to vector<16x128xf32>
    %167 = arith.addf %165, %166 : vector<16x128xf32>
    %cst_80 = arith.constant dense<0xFF800000> : vector<16xf32>
    %168 = vector.multi_reduction <maximumf>, %167, %cst_80 [1] : vector<16x128xf32> to vector<16xf32>
    %169 = vector.shape_cast %168 : vector<16xf32> to vector<16x1xf32>
    %170 = vector.broadcast %169 : vector<16x1xf32> to vector<16x128xf32>
    %171 = arith.subf %167, %170 : vector<16x128xf32>
    %172 = math.exp %171 : vector<16x128xf32>
    %cst_81 = arith.constant dense<0.000000e+00> : vector<16xf32>
    %173 = vector.multi_reduction <add>, %172, %cst_81 [1] : vector<16x128xf32> to vector<16xf32>
    %174 = vector.shape_cast %173 : vector<16xf32> to vector<16x1xf32>
    %cst_82 = arith.constant dense<0.000000e+00> : vector<16x8xf32>
    %175 = tpu.matmul %172, %164, %cst_82 {dimension_numbers = #tpu.dot_dimension_numbers<[1], [0], [0], [1], [0, 0, 1, 1], [], []>} : vector<16x128xf32>, vector<128x8xf32>, vector<16x8xf32> -> vector<16x8xf32>
    %176 = vector.broadcast %174 : vector<16x1xf32> to vector<16x8xf32>
    %177 = arith.divf %175, %176 : vector<16x8xf32>
    %178 = vector.extract_strided_slice %139 {offsets = [8, 0], sizes = [8, 32], strides = [1, 1]} : vector<32x32xf32> to vector<8x32xf32>
    %cst_83 = arith.constant dense<0.000000e+00> : vector<16x32xf32>
    %179 = tpu.matmul %177, %178, %cst_83 {dimension_numbers = #tpu.dot_dimension_numbers<[1], [0], [0], [1], [0, 0, 1, 1], [], []>} : vector<16x8xf32>, vector<8x32xf32>, vector<16x32xf32> -> vector<16x32xf32>
    %180 = arith.addf %161, %179 : vector<16x32xf32>
    %181 = vector.extract_strided_slice %128 {offsets = [0, 16], sizes = [16, 8], strides = [1, 1]} : vector<16x32xf32> to vector<16x8xf32>
    %182 = vector.extract_strided_slice %136 {offsets = [0, 16], sizes = [128, 8], strides = [1, 1]} : vector<128x32xf32> to vector<128x8xf32>
    %183 = vector.extract_strided_slice %137 {offsets = [0, 16], sizes = [128, 8], strides = [1, 1]} : vector<128x32xf32> to vector<128x8xf32>
    %cst_84 = arith.constant dense<0.000000e+00> : vector<16x128xf32>
    %184 = tpu.matmul %181, %182, %cst_84 {dimension_numbers = #tpu.dot_dimension_numbers<[1], [1], [0], [0], [0, 0, 1, 0], [], []>} : vector<16x8xf32>, vector<128x8xf32>, vector<16x128xf32> -> vector<16x128xf32>
    %185 = vector.broadcast %7 : vector<1x128xf32> to vector<16x128xf32>
    %186 = arith.addf %184, %185 : vector<16x128xf32>
    %cst_85 = arith.constant dense<0xFF800000> : vector<16xf32>
    %187 = vector.multi_reduction <maximumf>, %186, %cst_85 [1] : vector<16x128xf32> to vector<16xf32>
    %188 = vector.shape_cast %187 : vector<16xf32> to vector<16x1xf32>
    %189 = vector.broadcast %188 : vector<16x1xf32> to vector<16x128xf32>
    %190 = arith.subf %186, %189 : vector<16x128xf32>
    %191 = math.exp %190 : vector<16x128xf32>
    %cst_86 = arith.constant dense<0.000000e+00> : vector<16xf32>
    %192 = vector.multi_reduction <add>, %191, %cst_86 [1] : vector<16x128xf32> to vector<16xf32>
    %193 = vector.shape_cast %192 : vector<16xf32> to vector<16x1xf32>
    %cst_87 = arith.constant dense<0.000000e+00> : vector<16x8xf32>
    %194 = tpu.matmul %191, %183, %cst_87 {dimension_numbers = #tpu.dot_dimension_numbers<[1], [0], [0], [1], [0, 0, 1, 1], [], []>} : vector<16x128xf32>, vector<128x8xf32>, vector<16x8xf32> -> vector<16x8xf32>
    %195 = vector.broadcast %193 : vector<16x1xf32> to vector<16x8xf32>
    %196 = arith.divf %194, %195 : vector<16x8xf32>
    %197 = vector.extract_strided_slice %139 {offsets = [16, 0], sizes = [8, 32], strides = [1, 1]} : vector<32x32xf32> to vector<8x32xf32>
    %cst_88 = arith.constant dense<0.000000e+00> : vector<16x32xf32>
    %198 = tpu.matmul %196, %197, %cst_88 {dimension_numbers = #tpu.dot_dimension_numbers<[1], [0], [0], [1], [0, 0, 1, 1], [], []>} : vector<16x8xf32>, vector<8x32xf32>, vector<16x32xf32> -> vector<16x32xf32>
    %199 = arith.addf %180, %198 : vector<16x32xf32>
    %200 = vector.extract_strided_slice %128 {offsets = [0, 24], sizes = [16, 8], strides = [1, 1]} : vector<16x32xf32> to vector<16x8xf32>
    %201 = vector.extract_strided_slice %136 {offsets = [0, 24], sizes = [128, 8], strides = [1, 1]} : vector<128x32xf32> to vector<128x8xf32>
    %202 = vector.extract_strided_slice %137 {offsets = [0, 24], sizes = [128, 8], strides = [1, 1]} : vector<128x32xf32> to vector<128x8xf32>
    %cst_89 = arith.constant dense<0.000000e+00> : vector<16x128xf32>
    %203 = tpu.matmul %200, %201, %cst_89 {dimension_numbers = #tpu.dot_dimension_numbers<[1], [1], [0], [0], [0, 0, 1, 0], [], []>} : vector<16x8xf32>, vector<128x8xf32>, vector<16x128xf32> -> vector<16x128xf32>
    %204 = vector.broadcast %7 : vector<1x128xf32> to vector<16x128xf32>
    %205 = arith.addf %203, %204 : vector<16x128xf32>
    %cst_90 = arith.constant dense<0xFF800000> : vector<16xf32>
    %206 = vector.multi_reduction <maximumf>, %205, %cst_90 [1] : vector<16x128xf32> to vector<16xf32>
    %207 = vector.shape_cast %206 : vector<16xf32> to vector<16x1xf32>
    %208 = vector.broadcast %207 : vector<16x1xf32> to vector<16x128xf32>
    %209 = arith.subf %205, %208 : vector<16x128xf32>
    %210 = math.exp %209 : vector<16x128xf32>
    %cst_91 = arith.constant dense<0.000000e+00> : vector<16xf32>
    %211 = vector.multi_reduction <add>, %210, %cst_91 [1] : vector<16x128xf32> to vector<16xf32>
    %212 = vector.shape_cast %211 : vector<16xf32> to vector<16x1xf32>
    %cst_92 = arith.constant dense<0.000000e+00> : vector<16x8xf32>
    %213 = tpu.matmul %210, %202, %cst_92 {dimension_numbers = #tpu.dot_dimension_numbers<[1], [0], [0], [1], [0, 0, 1, 1], [], []>} : vector<16x128xf32>, vector<128x8xf32>, vector<16x8xf32> -> vector<16x8xf32>
    %214 = vector.broadcast %212 : vector<16x1xf32> to vector<16x8xf32>
    %215 = arith.divf %213, %214 : vector<16x8xf32>
    %216 = vector.extract_strided_slice %139 {offsets = [24, 0], sizes = [8, 32], strides = [1, 1]} : vector<32x32xf32> to vector<8x32xf32>
    %cst_93 = arith.constant dense<0.000000e+00> : vector<16x32xf32>
    %217 = tpu.matmul %215, %216, %cst_93 {dimension_numbers = #tpu.dot_dimension_numbers<[1], [0], [0], [1], [0, 0, 1, 1], [], []>} : vector<16x8xf32>, vector<8x32xf32>, vector<16x32xf32> -> vector<16x32xf32>
    %218 = arith.addf %199, %217 : vector<16x32xf32>
    %219 = arith.addf %121, %218 : vector<16x32xf32>
    %c0_94 = arith.constant 0 : index
    %c0_95 = arith.constant 0 : index
    %c0_96 = arith.constant 0 : index
    %220 = vector.load %arg17[%c0_94, %c0_95, %c0_96] : memref<2x1x32xf32, #tpu.memory_space<vmem>>, vector<1x1x32xf32>
    %221 = vector.shape_cast %220 : vector<1x1x32xf32> to vector<1x32xf32>
    %c0_97 = arith.constant 0 : index
    %c0_98 = arith.constant 0 : index
    %c0_99 = arith.constant 0 : index
    %222 = vector.load %arg18[%c0_97, %c0_98, %c0_99] : memref<2x1x32xf32, #tpu.memory_space<vmem>>, vector<1x1x32xf32>
    %223 = vector.shape_cast %222 : vector<1x1x32xf32> to vector<1x32xf32>
    %cst_100 = arith.constant dense<0.000000e+00> : vector<16xf32>
    %224 = vector.multi_reduction <add>, %219, %cst_100 [1] : vector<16x32xf32> to vector<16xf32>
    %225 = vector.shape_cast %224 : vector<16xf32> to vector<16x1xf32>
    %cst_101 = arith.constant 3.200000e+01 : f32
    %226 = vector.broadcast %cst_101 : f32 to vector<16x1xf32>
    %227 = arith.divf %225, %226 : vector<16x1xf32>
    %228 = vector.broadcast %227 : vector<16x1xf32> to vector<16x32xf32>
    %229 = arith.subf %219, %228 : vector<16x32xf32>
    %230 = arith.mulf %229, %229 : vector<16x32xf32>
    %cst_102 = arith.constant dense<0.000000e+00> : vector<16xf32>
    %231 = vector.multi_reduction <add>, %230, %cst_102 [1] : vector<16x32xf32> to vector<16xf32>
    %232 = vector.shape_cast %231 : vector<16xf32> to vector<16x1xf32>
    %cst_103 = arith.constant 3.200000e+01 : f32
    %233 = vector.broadcast %cst_103 : f32 to vector<16x1xf32>
    %234 = arith.divf %232, %233 : vector<16x1xf32>
    %235 = vector.broadcast %227 : vector<16x1xf32> to vector<16x32xf32>
    %236 = arith.subf %219, %235 : vector<16x32xf32>
    %cst_104 = arith.constant 9.99999974E-6 : f32
    %237 = vector.broadcast %cst_104 : f32 to vector<16x1xf32>
    %238 = arith.addf %234, %237 : vector<16x1xf32>
    %239 = math.rsqrt %238 : vector<16x1xf32>
    %240 = vector.broadcast %239 : vector<16x1xf32> to vector<16x32xf32>
    %241 = arith.mulf %236, %240 : vector<16x32xf32>
    %242 = vector.broadcast %221 : vector<1x32xf32> to vector<16x32xf32>
    %243 = arith.mulf %241, %242 : vector<16x32xf32>
    %244 = vector.broadcast %223 : vector<1x32xf32> to vector<16x32xf32>
    %245 = arith.addf %243, %244 : vector<16x32xf32>
    %c0_105 = arith.constant 0 : index
    %c0_106 = arith.constant 0 : index
    %c0_107 = arith.constant 0 : index
    %246 = vector.load %arg19[%c0_105, %c0_106, %c0_107] : memref<2x32x32xf32, #tpu.memory_space<vmem>>, vector<1x32x32xf32>
    %247 = vector.shape_cast %246 : vector<1x32x32xf32> to vector<32x32xf32>
    %cst_108 = arith.constant dense<0.000000e+00> : vector<16x32xf32>
    %248 = tpu.matmul %245, %247, %cst_108 {dimension_numbers = #tpu.dot_dimension_numbers<[1], [0], [0], [1], [0, 0, 1, 1], [], []>} : vector<16x32xf32>, vector<32x32xf32>, vector<16x32xf32> -> vector<16x32xf32>
    %c0_109 = arith.constant 0 : index
    %c0_110 = arith.constant 0 : index
    %c0_111 = arith.constant 0 : index
    %249 = vector.load %arg20[%c0_109, %c0_110, %c0_111] : memref<2x1x32xf32, #tpu.memory_space<vmem>>, vector<1x1x32xf32>
    %250 = vector.shape_cast %249 : vector<1x1x32xf32> to vector<1x32xf32>
    %251 = vector.broadcast %250 : vector<1x32xf32> to vector<16x32xf32>
    %252 = arith.addf %248, %251 : vector<16x32xf32>
    %cst_112 = arith.constant 0.000000e+00 : f32
    %253 = vector.broadcast %cst_112 : f32 to vector<16x32xf32>
    %254 = arith.maximumf %252, %253 : vector<16x32xf32>
    %c0_113 = arith.constant 0 : index
    %c0_114 = arith.constant 0 : index
    %c0_115 = arith.constant 0 : index
    %255 = vector.load %arg21[%c0_113, %c0_114, %c0_115] : memref<2x32x32xf32, #tpu.memory_space<vmem>>, vector<1x32x32xf32>
    %256 = vector.shape_cast %255 : vector<1x32x32xf32> to vector<32x32xf32>
    %cst_116 = arith.constant dense<0.000000e+00> : vector<16x32xf32>
    %257 = tpu.matmul %254, %256, %cst_116 {dimension_numbers = #tpu.dot_dimension_numbers<[1], [0], [0], [1], [0, 0, 1, 1], [], []>} : vector<16x32xf32>, vector<32x32xf32>, vector<16x32xf32> -> vector<16x32xf32>
    %c0_117 = arith.constant 0 : index
    %c0_118 = arith.constant 0 : index
    %c0_119 = arith.constant 0 : index
    %258 = vector.load %arg22[%c0_117, %c0_118, %c0_119] : memref<2x1x32xf32, #tpu.memory_space<vmem>>, vector<1x1x32xf32>
    %259 = vector.shape_cast %258 : vector<1x1x32xf32> to vector<1x32xf32>
    %260 = vector.broadcast %259 : vector<1x32xf32> to vector<16x32xf32>
    %261 = arith.addf %257, %260 : vector<16x32xf32>
    %262 = arith.addf %245, %261 : vector<16x32xf32>
    %c0_120 = arith.constant 0 : index
    %c0_121 = arith.constant 0 : index
    %c0_122 = arith.constant 0 : index
    %263 = vector.load %arg23[%c0_120, %c0_121, %c0_122] : memref<2x1x32xf32, #tpu.memory_space<vmem>>, vector<1x1x32xf32>
    %264 = vector.shape_cast %263 : vector<1x1x32xf32> to vector<1x32xf32>
    %c0_123 = arith.constant 0 : index
    %c0_124 = arith.constant 0 : index
    %c0_125 = arith.constant 0 : index
    %265 = vector.load %arg24[%c0_123, %c0_124, %c0_125] : memref<2x1x32xf32, #tpu.memory_space<vmem>>, vector<1x1x32xf32>
    %266 = vector.shape_cast %265 : vector<1x1x32xf32> to vector<1x32xf32>
    %cst_126 = arith.constant dense<0.000000e+00> : vector<16xf32>
    %267 = vector.multi_reduction <add>, %262, %cst_126 [1] : vector<16x32xf32> to vector<16xf32>
    %268 = vector.shape_cast %267 : vector<16xf32> to vector<16x1xf32>
    %cst_127 = arith.constant 3.200000e+01 : f32
    %269 = vector.broadcast %cst_127 : f32 to vector<16x1xf32>
    %270 = arith.divf %268, %269 : vector<16x1xf32>
    %271 = vector.broadcast %270 : vector<16x1xf32> to vector<16x32xf32>
    %272 = arith.subf %262, %271 : vector<16x32xf32>
    %273 = arith.mulf %272, %272 : vector<16x32xf32>
    %cst_128 = arith.constant dense<0.000000e+00> : vector<16xf32>
    %274 = vector.multi_reduction <add>, %273, %cst_128 [1] : vector<16x32xf32> to vector<16xf32>
    %275 = vector.shape_cast %274 : vector<16xf32> to vector<16x1xf32>
    %cst_129 = arith.constant 3.200000e+01 : f32
    %276 = vector.broadcast %cst_129 : f32 to vector<16x1xf32>
    %277 = arith.divf %275, %276 : vector<16x1xf32>
    %278 = vector.broadcast %270 : vector<16x1xf32> to vector<16x32xf32>
    %279 = arith.subf %262, %278 : vector<16x32xf32>
    %cst_130 = arith.constant 9.99999974E-6 : f32
    %280 = vector.broadcast %cst_130 : f32 to vector<16x1xf32>
    %281 = arith.addf %277, %280 : vector<16x1xf32>
    %282 = math.rsqrt %281 : vector<16x1xf32>
    %283 = vector.broadcast %282 : vector<16x1xf32> to vector<16x32xf32>
    %284 = arith.mulf %279, %283 : vector<16x32xf32>
    %285 = vector.broadcast %264 : vector<1x32xf32> to vector<16x32xf32>
    %286 = arith.mulf %284, %285 : vector<16x32xf32>
    %287 = vector.broadcast %266 : vector<1x32xf32> to vector<16x32xf32>
    %288 = arith.addf %286, %287 : vector<16x32xf32>
    %c1 = arith.constant 1 : index
    %c0_131 = arith.constant 0 : index
    %c0_132 = arith.constant 0 : index
    %289 = vector.load %arg5[%c1, %c0_131, %c0_132] : memref<2x32x96xf32, #tpu.memory_space<vmem>>, vector<1x32x96xf32>
    %290 = vector.shape_cast %289 : vector<1x32x96xf32> to vector<32x96xf32>
    %cst_133 = arith.constant dense<0.000000e+00> : vector<16x96xf32>
    %291 = tpu.matmul %288, %290, %cst_133 {dimension_numbers = #tpu.dot_dimension_numbers<[1], [0], [0], [1], [0, 0, 1, 1], [], []>} : vector<16x32xf32>, vector<32x96xf32>, vector<16x96xf32> -> vector<16x96xf32>
    %c1_134 = arith.constant 1 : index
    %c0_135 = arith.constant 0 : index
    %c0_136 = arith.constant 0 : index
    %292 = vector.load %arg6[%c1_134, %c0_135, %c0_136] : memref<2x1x96xf32, #tpu.memory_space<vmem>>, vector<1x1x96xf32>
    %293 = vector.shape_cast %292 : vector<1x1x96xf32> to vector<1x96xf32>
    %294 = vector.broadcast %293 : vector<1x96xf32> to vector<16x96xf32>
    %295 = arith.addf %291, %294 : vector<16x96xf32>
    %296 = vector.extract_strided_slice %295 {offsets = [0, 0], sizes = [16, 32], strides = [1, 1]} : vector<16x96xf32> to vector<16x32xf32>
    %297 = vector.extract_strided_slice %295 {offsets = [0, 32], sizes = [16, 32], strides = [1, 1]} : vector<16x96xf32> to vector<16x32xf32>
    %298 = vector.extract_strided_slice %295 {offsets = [0, 64], sizes = [16, 32], strides = [1, 1]} : vector<16x96xf32> to vector<16x32xf32>
    %c1_137 = arith.constant 1 : index
    %c0_138 = arith.constant 0 : index
    %c0_139 = arith.constant 0 : index
    %299 = vector.load %arg7[%c1_137, %c0_138, %c0_139] : memref<2x32x32xf32, #tpu.memory_space<vmem>>, vector<1x32x32xf32>
    %300 = vector.shape_cast %299 : vector<1x32x32xf32> to vector<32x32xf32>
    %c1_140 = arith.constant 1 : index
    %c0_141 = arith.constant 0 : index
    %c0_142 = arith.constant 0 : index
    %301 = vector.load %arg8[%c1_140, %c0_141, %c0_142] : memref<2x1x32xf32, #tpu.memory_space<vmem>>, vector<1x1x32xf32>
    %302 = vector.shape_cast %301 : vector<1x1x32xf32> to vector<1x32xf32>
    %303 = vector.extract_strided_slice %296 {offsets = [0, 0], sizes = [16, 8], strides = [1, 1]} : vector<16x32xf32> to vector<16x8xf32>
    %304 = vector.extract_strided_slice %297 {offsets = [0, 0], sizes = [16, 8], strides = [1, 1]} : vector<16x32xf32> to vector<16x8xf32>
    %305 = vector.extract_strided_slice %298 {offsets = [0, 0], sizes = [16, 8], strides = [1, 1]} : vector<16x32xf32> to vector<16x8xf32>
    %cst_143 = arith.constant dense<0.000000e+00> : vector<16x16xf32>
    %306 = tpu.matmul %303, %304, %cst_143 {dimension_numbers = #tpu.dot_dimension_numbers<[1], [1], [0], [0], [0, 0, 1, 0], [], []>} : vector<16x8xf32>, vector<16x8xf32>, vector<16x16xf32> -> vector<16x16xf32>
    %307 = arith.addf %306, %5 : vector<16x16xf32>
    %cst_144 = arith.constant dense<0xFF800000> : vector<16xf32>
    %308 = vector.multi_reduction <maximumf>, %307, %cst_144 [1] : vector<16x16xf32> to vector<16xf32>
    %309 = vector.shape_cast %308 : vector<16xf32> to vector<16x1xf32>
    %310 = vector.broadcast %309 : vector<16x1xf32> to vector<16x16xf32>
    %311 = arith.subf %307, %310 : vector<16x16xf32>
    %312 = math.exp %311 : vector<16x16xf32>
    %cst_145 = arith.constant dense<0.000000e+00> : vector<16xf32>
    %313 = vector.multi_reduction <add>, %312, %cst_145 [1] : vector<16x16xf32> to vector<16xf32>
    %314 = vector.shape_cast %313 : vector<16xf32> to vector<16x1xf32>
    %cst_146 = arith.constant dense<0.000000e+00> : vector<16x8xf32>
    %315 = tpu.matmul %312, %305, %cst_146 {dimension_numbers = #tpu.dot_dimension_numbers<[1], [0], [0], [1], [0, 0, 1, 1], [], []>} : vector<16x16xf32>, vector<16x8xf32>, vector<16x8xf32> -> vector<16x8xf32>
    %316 = vector.broadcast %314 : vector<16x1xf32> to vector<16x8xf32>
    %317 = arith.divf %315, %316 : vector<16x8xf32>
    %318 = vector.extract_strided_slice %300 {offsets = [0, 0], sizes = [8, 32], strides = [1, 1]} : vector<32x32xf32> to vector<8x32xf32>
    %cst_147 = arith.constant dense<0.000000e+00> : vector<16x32xf32>
    %319 = tpu.matmul %317, %318, %cst_147 {dimension_numbers = #tpu.dot_dimension_numbers<[1], [0], [0], [1], [0, 0, 1, 1], [], []>} : vector<16x8xf32>, vector<8x32xf32>, vector<16x32xf32> -> vector<16x32xf32>
    %320 = vector.broadcast %302 : vector<1x32xf32> to vector<16x32xf32>
    %321 = arith.addf %320, %319 : vector<16x32xf32>
    %322 = vector.extract_strided_slice %296 {offsets = [0, 8], sizes = [16, 8], strides = [1, 1]} : vector<16x32xf32> to vector<16x8xf32>
    %323 = vector.extract_strided_slice %297 {offsets = [0, 8], sizes = [16, 8], strides = [1, 1]} : vector<16x32xf32> to vector<16x8xf32>
    %324 = vector.extract_strided_slice %298 {offsets = [0, 8], sizes = [16, 8], strides = [1, 1]} : vector<16x32xf32> to vector<16x8xf32>
    %cst_148 = arith.constant dense<0.000000e+00> : vector<16x16xf32>
    %325 = tpu.matmul %322, %323, %cst_148 {dimension_numbers = #tpu.dot_dimension_numbers<[1], [1], [0], [0], [0, 0, 1, 0], [], []>} : vector<16x8xf32>, vector<16x8xf32>, vector<16x16xf32> -> vector<16x16xf32>
    %326 = arith.addf %325, %5 : vector<16x16xf32>
    %cst_149 = arith.constant dense<0xFF800000> : vector<16xf32>
    %327 = vector.multi_reduction <maximumf>, %326, %cst_149 [1] : vector<16x16xf32> to vector<16xf32>
    %328 = vector.shape_cast %327 : vector<16xf32> to vector<16x1xf32>
    %329 = vector.broadcast %328 : vector<16x1xf32> to vector<16x16xf32>
    %330 = arith.subf %326, %329 : vector<16x16xf32>
    %331 = math.exp %330 : vector<16x16xf32>
    %cst_150 = arith.constant dense<0.000000e+00> : vector<16xf32>
    %332 = vector.multi_reduction <add>, %331, %cst_150 [1] : vector<16x16xf32> to vector<16xf32>
    %333 = vector.shape_cast %332 : vector<16xf32> to vector<16x1xf32>
    %cst_151 = arith.constant dense<0.000000e+00> : vector<16x8xf32>
    %334 = tpu.matmul %331, %324, %cst_151 {dimension_numbers = #tpu.dot_dimension_numbers<[1], [0], [0], [1], [0, 0, 1, 1], [], []>} : vector<16x16xf32>, vector<16x8xf32>, vector<16x8xf32> -> vector<16x8xf32>
    %335 = vector.broadcast %333 : vector<16x1xf32> to vector<16x8xf32>
    %336 = arith.divf %334, %335 : vector<16x8xf32>
    %337 = vector.extract_strided_slice %300 {offsets = [8, 0], sizes = [8, 32], strides = [1, 1]} : vector<32x32xf32> to vector<8x32xf32>
    %cst_152 = arith.constant dense<0.000000e+00> : vector<16x32xf32>
    %338 = tpu.matmul %336, %337, %cst_152 {dimension_numbers = #tpu.dot_dimension_numbers<[1], [0], [0], [1], [0, 0, 1, 1], [], []>} : vector<16x8xf32>, vector<8x32xf32>, vector<16x32xf32> -> vector<16x32xf32>
    %339 = arith.addf %321, %338 : vector<16x32xf32>
    %340 = vector.extract_strided_slice %296 {offsets = [0, 16], sizes = [16, 8], strides = [1, 1]} : vector<16x32xf32> to vector<16x8xf32>
    %341 = vector.extract_strided_slice %297 {offsets = [0, 16], sizes = [16, 8], strides = [1, 1]} : vector<16x32xf32> to vector<16x8xf32>
    %342 = vector.extract_strided_slice %298 {offsets = [0, 16], sizes = [16, 8], strides = [1, 1]} : vector<16x32xf32> to vector<16x8xf32>
    %cst_153 = arith.constant dense<0.000000e+00> : vector<16x16xf32>
    %343 = tpu.matmul %340, %341, %cst_153 {dimension_numbers = #tpu.dot_dimension_numbers<[1], [1], [0], [0], [0, 0, 1, 0], [], []>} : vector<16x8xf32>, vector<16x8xf32>, vector<16x16xf32> -> vector<16x16xf32>
    %344 = arith.addf %343, %5 : vector<16x16xf32>
    %cst_154 = arith.constant dense<0xFF800000> : vector<16xf32>
    %345 = vector.multi_reduction <maximumf>, %344, %cst_154 [1] : vector<16x16xf32> to vector<16xf32>
    %346 = vector.shape_cast %345 : vector<16xf32> to vector<16x1xf32>
    %347 = vector.broadcast %346 : vector<16x1xf32> to vector<16x16xf32>
    %348 = arith.subf %344, %347 : vector<16x16xf32>
    %349 = math.exp %348 : vector<16x16xf32>
    %cst_155 = arith.constant dense<0.000000e+00> : vector<16xf32>
    %350 = vector.multi_reduction <add>, %349, %cst_155 [1] : vector<16x16xf32> to vector<16xf32>
    %351 = vector.shape_cast %350 : vector<16xf32> to vector<16x1xf32>
    %cst_156 = arith.constant dense<0.000000e+00> : vector<16x8xf32>
    %352 = tpu.matmul %349, %342, %cst_156 {dimension_numbers = #tpu.dot_dimension_numbers<[1], [0], [0], [1], [0, 0, 1, 1], [], []>} : vector<16x16xf32>, vector<16x8xf32>, vector<16x8xf32> -> vector<16x8xf32>
    %353 = vector.broadcast %351 : vector<16x1xf32> to vector<16x8xf32>
    %354 = arith.divf %352, %353 : vector<16x8xf32>
    %355 = vector.extract_strided_slice %300 {offsets = [16, 0], sizes = [8, 32], strides = [1, 1]} : vector<32x32xf32> to vector<8x32xf32>
    %cst_157 = arith.constant dense<0.000000e+00> : vector<16x32xf32>
    %356 = tpu.matmul %354, %355, %cst_157 {dimension_numbers = #tpu.dot_dimension_numbers<[1], [0], [0], [1], [0, 0, 1, 1], [], []>} : vector<16x8xf32>, vector<8x32xf32>, vector<16x32xf32> -> vector<16x32xf32>
    %357 = arith.addf %339, %356 : vector<16x32xf32>
    %358 = vector.extract_strided_slice %296 {offsets = [0, 24], sizes = [16, 8], strides = [1, 1]} : vector<16x32xf32> to vector<16x8xf32>
    %359 = vector.extract_strided_slice %297 {offsets = [0, 24], sizes = [16, 8], strides = [1, 1]} : vector<16x32xf32> to vector<16x8xf32>
    %360 = vector.extract_strided_slice %298 {offsets = [0, 24], sizes = [16, 8], strides = [1, 1]} : vector<16x32xf32> to vector<16x8xf32>
    %cst_158 = arith.constant dense<0.000000e+00> : vector<16x16xf32>
    %361 = tpu.matmul %358, %359, %cst_158 {dimension_numbers = #tpu.dot_dimension_numbers<[1], [1], [0], [0], [0, 0, 1, 0], [], []>} : vector<16x8xf32>, vector<16x8xf32>, vector<16x16xf32> -> vector<16x16xf32>
    %362 = arith.addf %361, %5 : vector<16x16xf32>
    %cst_159 = arith.constant dense<0xFF800000> : vector<16xf32>
    %363 = vector.multi_reduction <maximumf>, %362, %cst_159 [1] : vector<16x16xf32> to vector<16xf32>
    %364 = vector.shape_cast %363 : vector<16xf32> to vector<16x1xf32>
    %365 = vector.broadcast %364 : vector<16x1xf32> to vector<16x16xf32>
    %366 = arith.subf %362, %365 : vector<16x16xf32>
    %367 = math.exp %366 : vector<16x16xf32>
    %cst_160 = arith.constant dense<0.000000e+00> : vector<16xf32>
    %368 = vector.multi_reduction <add>, %367, %cst_160 [1] : vector<16x16xf32> to vector<16xf32>
    %369 = vector.shape_cast %368 : vector<16xf32> to vector<16x1xf32>
    %cst_161 = arith.constant dense<0.000000e+00> : vector<16x8xf32>
    %370 = tpu.matmul %367, %360, %cst_161 {dimension_numbers = #tpu.dot_dimension_numbers<[1], [0], [0], [1], [0, 0, 1, 1], [], []>} : vector<16x16xf32>, vector<16x8xf32>, vector<16x8xf32> -> vector<16x8xf32>
    %371 = vector.broadcast %369 : vector<16x1xf32> to vector<16x8xf32>
    %372 = arith.divf %370, %371 : vector<16x8xf32>
    %373 = vector.extract_strided_slice %300 {offsets = [24, 0], sizes = [8, 32], strides = [1, 1]} : vector<32x32xf32> to vector<8x32xf32>
    %cst_162 = arith.constant dense<0.000000e+00> : vector<16x32xf32>
    %374 = tpu.matmul %372, %373, %cst_162 {dimension_numbers = #tpu.dot_dimension_numbers<[1], [0], [0], [1], [0, 0, 1, 1], [], []>} : vector<16x8xf32>, vector<8x32xf32>, vector<16x32xf32> -> vector<16x32xf32>
    %375 = arith.addf %357, %374 : vector<16x32xf32>
    %376 = arith.addf %288, %375 : vector<16x32xf32>
    %c1_163 = arith.constant 1 : index
    %c0_164 = arith.constant 0 : index
    %c0_165 = arith.constant 0 : index
    %377 = vector.load %arg9[%c1_163, %c0_164, %c0_165] : memref<2x1x32xf32, #tpu.memory_space<vmem>>, vector<1x1x32xf32>
    %378 = vector.shape_cast %377 : vector<1x1x32xf32> to vector<1x32xf32>
    %c1_166 = arith.constant 1 : index
    %c0_167 = arith.constant 0 : index
    %c0_168 = arith.constant 0 : index
    %379 = vector.load %arg10[%c1_166, %c0_167, %c0_168] : memref<2x1x32xf32, #tpu.memory_space<vmem>>, vector<1x1x32xf32>
    %380 = vector.shape_cast %379 : vector<1x1x32xf32> to vector<1x32xf32>
    %cst_169 = arith.constant dense<0.000000e+00> : vector<16xf32>
    %381 = vector.multi_reduction <add>, %376, %cst_169 [1] : vector<16x32xf32> to vector<16xf32>
    %382 = vector.shape_cast %381 : vector<16xf32> to vector<16x1xf32>
    %cst_170 = arith.constant 3.200000e+01 : f32
    %383 = vector.broadcast %cst_170 : f32 to vector<16x1xf32>
    %384 = arith.divf %382, %383 : vector<16x1xf32>
    %385 = vector.broadcast %384 : vector<16x1xf32> to vector<16x32xf32>
    %386 = arith.subf %376, %385 : vector<16x32xf32>
    %387 = arith.mulf %386, %386 : vector<16x32xf32>
    %cst_171 = arith.constant dense<0.000000e+00> : vector<16xf32>
    %388 = vector.multi_reduction <add>, %387, %cst_171 [1] : vector<16x32xf32> to vector<16xf32>
    %389 = vector.shape_cast %388 : vector<16xf32> to vector<16x1xf32>
    %cst_172 = arith.constant 3.200000e+01 : f32
    %390 = vector.broadcast %cst_172 : f32 to vector<16x1xf32>
    %391 = arith.divf %389, %390 : vector<16x1xf32>
    %392 = vector.broadcast %384 : vector<16x1xf32> to vector<16x32xf32>
    %393 = arith.subf %376, %392 : vector<16x32xf32>
    %cst_173 = arith.constant 9.99999974E-6 : f32
    %394 = vector.broadcast %cst_173 : f32 to vector<16x1xf32>
    %395 = arith.addf %391, %394 : vector<16x1xf32>
    %396 = math.rsqrt %395 : vector<16x1xf32>
    %397 = vector.broadcast %396 : vector<16x1xf32> to vector<16x32xf32>
    %398 = arith.mulf %393, %397 : vector<16x32xf32>
    %399 = vector.broadcast %378 : vector<1x32xf32> to vector<16x32xf32>
    %400 = arith.mulf %398, %399 : vector<16x32xf32>
    %401 = vector.broadcast %380 : vector<1x32xf32> to vector<16x32xf32>
    %402 = arith.addf %400, %401 : vector<16x32xf32>
    %c1_174 = arith.constant 1 : index
    %c0_175 = arith.constant 0 : index
    %c0_176 = arith.constant 0 : index
    %403 = vector.load %arg11[%c1_174, %c0_175, %c0_176] : memref<2x32x32xf32, #tpu.memory_space<vmem>>, vector<1x32x32xf32>
    %404 = vector.shape_cast %403 : vector<1x32x32xf32> to vector<32x32xf32>
    %cst_177 = arith.constant dense<0.000000e+00> : vector<16x32xf32>
    %405 = tpu.matmul %402, %404, %cst_177 {dimension_numbers = #tpu.dot_dimension_numbers<[1], [0], [0], [1], [0, 0, 1, 1], [], []>} : vector<16x32xf32>, vector<32x32xf32>, vector<16x32xf32> -> vector<16x32xf32>
    %c1_178 = arith.constant 1 : index
    %c0_179 = arith.constant 0 : index
    %c0_180 = arith.constant 0 : index
    %406 = vector.load %arg12[%c1_178, %c0_179, %c0_180] : memref<2x1x32xf32, #tpu.memory_space<vmem>>, vector<1x1x32xf32>
    %407 = vector.shape_cast %406 : vector<1x1x32xf32> to vector<1x32xf32>
    %408 = vector.broadcast %407 : vector<1x32xf32> to vector<16x32xf32>
    %409 = arith.addf %405, %408 : vector<16x32xf32>
    %c1_181 = arith.constant 1 : index
    %c0_182 = arith.constant 0 : index
    %c0_183 = arith.constant 0 : index
    %410 = vector.load %arg13[%c1_181, %c0_182, %c0_183] : memref<2x32x64xf32, #tpu.memory_space<vmem>>, vector<1x32x64xf32>
    %411 = vector.shape_cast %410 : vector<1x32x64xf32> to vector<32x64xf32>
    %cst_184 = arith.constant dense<0.000000e+00> : vector<128x64xf32>
    %412 = tpu.matmul %3, %411, %cst_184 {dimension_numbers = #tpu.dot_dimension_numbers<[1], [0], [0], [1], [0, 0, 1, 1], [], []>} : vector<128x32xf32>, vector<32x64xf32>, vector<128x64xf32> -> vector<128x64xf32>
    %c1_185 = arith.constant 1 : index
    %c0_186 = arith.constant 0 : index
    %c0_187 = arith.constant 0 : index
    %413 = vector.load %arg14[%c1_185, %c0_186, %c0_187] : memref<2x1x64xf32, #tpu.memory_space<vmem>>, vector<1x1x64xf32>
    %414 = vector.shape_cast %413 : vector<1x1x64xf32> to vector<1x64xf32>
    %415 = vector.broadcast %414 : vector<1x64xf32> to vector<128x64xf32>
    %416 = arith.addf %412, %415 : vector<128x64xf32>
    %417 = vector.extract_strided_slice %416 {offsets = [0, 0], sizes = [128, 32], strides = [1, 1]} : vector<128x64xf32> to vector<128x32xf32>
    %418 = vector.extract_strided_slice %416 {offsets = [0, 32], sizes = [128, 32], strides = [1, 1]} : vector<128x64xf32> to vector<128x32xf32>
    %c1_188 = arith.constant 1 : index
    %c0_189 = arith.constant 0 : index
    %c0_190 = arith.constant 0 : index
    %419 = vector.load %arg15[%c1_188, %c0_189, %c0_190] : memref<2x32x32xf32, #tpu.memory_space<vmem>>, vector<1x32x32xf32>
    %420 = vector.shape_cast %419 : vector<1x32x32xf32> to vector<32x32xf32>
    %c1_191 = arith.constant 1 : index
    %c0_192 = arith.constant 0 : index
    %c0_193 = arith.constant 0 : index
    %421 = vector.load %arg16[%c1_191, %c0_192, %c0_193] : memref<2x1x32xf32, #tpu.memory_space<vmem>>, vector<1x1x32xf32>
    %422 = vector.shape_cast %421 : vector<1x1x32xf32> to vector<1x32xf32>
    %423 = vector.extract_strided_slice %409 {offsets = [0, 0], sizes = [16, 8], strides = [1, 1]} : vector<16x32xf32> to vector<16x8xf32>
    %424 = vector.extract_strided_slice %417 {offsets = [0, 0], sizes = [128, 8], strides = [1, 1]} : vector<128x32xf32> to vector<128x8xf32>
    %425 = vector.extract_strided_slice %418 {offsets = [0, 0], sizes = [128, 8], strides = [1, 1]} : vector<128x32xf32> to vector<128x8xf32>
    %cst_194 = arith.constant dense<0.000000e+00> : vector<16x128xf32>
    %426 = tpu.matmul %423, %424, %cst_194 {dimension_numbers = #tpu.dot_dimension_numbers<[1], [1], [0], [0], [0, 0, 1, 0], [], []>} : vector<16x8xf32>, vector<128x8xf32>, vector<16x128xf32> -> vector<16x128xf32>
    %427 = vector.broadcast %7 : vector<1x128xf32> to vector<16x128xf32>
    %428 = arith.addf %426, %427 : vector<16x128xf32>
    %cst_195 = arith.constant dense<0xFF800000> : vector<16xf32>
    %429 = vector.multi_reduction <maximumf>, %428, %cst_195 [1] : vector<16x128xf32> to vector<16xf32>
    %430 = vector.shape_cast %429 : vector<16xf32> to vector<16x1xf32>
    %431 = vector.broadcast %430 : vector<16x1xf32> to vector<16x128xf32>
    %432 = arith.subf %428, %431 : vector<16x128xf32>
    %433 = math.exp %432 : vector<16x128xf32>
    %cst_196 = arith.constant dense<0.000000e+00> : vector<16xf32>
    %434 = vector.multi_reduction <add>, %433, %cst_196 [1] : vector<16x128xf32> to vector<16xf32>
    %435 = vector.shape_cast %434 : vector<16xf32> to vector<16x1xf32>
    %cst_197 = arith.constant dense<0.000000e+00> : vector<16x8xf32>
    %436 = tpu.matmul %433, %425, %cst_197 {dimension_numbers = #tpu.dot_dimension_numbers<[1], [0], [0], [1], [0, 0, 1, 1], [], []>} : vector<16x128xf32>, vector<128x8xf32>, vector<16x8xf32> -> vector<16x8xf32>
    %437 = vector.broadcast %435 : vector<16x1xf32> to vector<16x8xf32>
    %438 = arith.divf %436, %437 : vector<16x8xf32>
    %439 = vector.extract_strided_slice %420 {offsets = [0, 0], sizes = [8, 32], strides = [1, 1]} : vector<32x32xf32> to vector<8x32xf32>
    %cst_198 = arith.constant dense<0.000000e+00> : vector<16x32xf32>
    %440 = tpu.matmul %438, %439, %cst_198 {dimension_numbers = #tpu.dot_dimension_numbers<[1], [0], [0], [1], [0, 0, 1, 1], [], []>} : vector<16x8xf32>, vector<8x32xf32>, vector<16x32xf32> -> vector<16x32xf32>
    %441 = vector.broadcast %422 : vector<1x32xf32> to vector<16x32xf32>
    %442 = arith.addf %441, %440 : vector<16x32xf32>
    %443 = vector.extract_strided_slice %409 {offsets = [0, 8], sizes = [16, 8], strides = [1, 1]} : vector<16x32xf32> to vector<16x8xf32>
    %444 = vector.extract_strided_slice %417 {offsets = [0, 8], sizes = [128, 8], strides = [1, 1]} : vector<128x32xf32> to vector<128x8xf32>
    %445 = vector.extract_strided_slice %418 {offsets = [0, 8], sizes = [128, 8], strides = [1, 1]} : vector<128x32xf32> to vector<128x8xf32>
    %cst_199 = arith.constant dense<0.000000e+00> : vector<16x128xf32>
    %446 = tpu.matmul %443, %444, %cst_199 {dimension_numbers = #tpu.dot_dimension_numbers<[1], [1], [0], [0], [0, 0, 1, 0], [], []>} : vector<16x8xf32>, vector<128x8xf32>, vector<16x128xf32> -> vector<16x128xf32>
    %447 = vector.broadcast %7 : vector<1x128xf32> to vector<16x128xf32>
    %448 = arith.addf %446, %447 : vector<16x128xf32>
    %cst_200 = arith.constant dense<0xFF800000> : vector<16xf32>
    %449 = vector.multi_reduction <maximumf>, %448, %cst_200 [1] : vector<16x128xf32> to vector<16xf32>
    %450 = vector.shape_cast %449 : vector<16xf32> to vector<16x1xf32>
    %451 = vector.broadcast %450 : vector<16x1xf32> to vector<16x128xf32>
    %452 = arith.subf %448, %451 : vector<16x128xf32>
    %453 = math.exp %452 : vector<16x128xf32>
    %cst_201 = arith.constant dense<0.000000e+00> : vector<16xf32>
    %454 = vector.multi_reduction <add>, %453, %cst_201 [1] : vector<16x128xf32> to vector<16xf32>
    %455 = vector.shape_cast %454 : vector<16xf32> to vector<16x1xf32>
    %cst_202 = arith.constant dense<0.000000e+00> : vector<16x8xf32>
    %456 = tpu.matmul %453, %445, %cst_202 {dimension_numbers = #tpu.dot_dimension_numbers<[1], [0], [0], [1], [0, 0, 1, 1], [], []>} : vector<16x128xf32>, vector<128x8xf32>, vector<16x8xf32> -> vector<16x8xf32>
    %457 = vector.broadcast %455 : vector<16x1xf32> to vector<16x8xf32>
    %458 = arith.divf %456, %457 : vector<16x8xf32>
    %459 = vector.extract_strided_slice %420 {offsets = [8, 0], sizes = [8, 32], strides = [1, 1]} : vector<32x32xf32> to vector<8x32xf32>
    %cst_203 = arith.constant dense<0.000000e+00> : vector<16x32xf32>
    %460 = tpu.matmul %458, %459, %cst_203 {dimension_numbers = #tpu.dot_dimension_numbers<[1], [0], [0], [1], [0, 0, 1, 1], [], []>} : vector<16x8xf32>, vector<8x32xf32>, vector<16x32xf32> -> vector<16x32xf32>
    %461 = arith.addf %442, %460 : vector<16x32xf32>
    %462 = vector.extract_strided_slice %409 {offsets = [0, 16], sizes = [16, 8], strides = [1, 1]} : vector<16x32xf32> to vector<16x8xf32>
    %463 = vector.extract_strided_slice %417 {offsets = [0, 16], sizes = [128, 8], strides = [1, 1]} : vector<128x32xf32> to vector<128x8xf32>
    %464 = vector.extract_strided_slice %418 {offsets = [0, 16], sizes = [128, 8], strides = [1, 1]} : vector<128x32xf32> to vector<128x8xf32>
    %cst_204 = arith.constant dense<0.000000e+00> : vector<16x128xf32>
    %465 = tpu.matmul %462, %463, %cst_204 {dimension_numbers = #tpu.dot_dimension_numbers<[1], [1], [0], [0], [0, 0, 1, 0], [], []>} : vector<16x8xf32>, vector<128x8xf32>, vector<16x128xf32> -> vector<16x128xf32>
    %466 = vector.broadcast %7 : vector<1x128xf32> to vector<16x128xf32>
    %467 = arith.addf %465, %466 : vector<16x128xf32>
    %cst_205 = arith.constant dense<0xFF800000> : vector<16xf32>
    %468 = vector.multi_reduction <maximumf>, %467, %cst_205 [1] : vector<16x128xf32> to vector<16xf32>
    %469 = vector.shape_cast %468 : vector<16xf32> to vector<16x1xf32>
    %470 = vector.broadcast %469 : vector<16x1xf32> to vector<16x128xf32>
    %471 = arith.subf %467, %470 : vector<16x128xf32>
    %472 = math.exp %471 : vector<16x128xf32>
    %cst_206 = arith.constant dense<0.000000e+00> : vector<16xf32>
    %473 = vector.multi_reduction <add>, %472, %cst_206 [1] : vector<16x128xf32> to vector<16xf32>
    %474 = vector.shape_cast %473 : vector<16xf32> to vector<16x1xf32>
    %cst_207 = arith.constant dense<0.000000e+00> : vector<16x8xf32>
    %475 = tpu.matmul %472, %464, %cst_207 {dimension_numbers = #tpu.dot_dimension_numbers<[1], [0], [0], [1], [0, 0, 1, 1], [], []>} : vector<16x128xf32>, vector<128x8xf32>, vector<16x8xf32> -> vector<16x8xf32>
    %476 = vector.broadcast %474 : vector<16x1xf32> to vector<16x8xf32>
    %477 = arith.divf %475, %476 : vector<16x8xf32>
    %478 = vector.extract_strided_slice %420 {offsets = [16, 0], sizes = [8, 32], strides = [1, 1]} : vector<32x32xf32> to vector<8x32xf32>
    %cst_208 = arith.constant dense<0.000000e+00> : vector<16x32xf32>
    %479 = tpu.matmul %477, %478, %cst_208 {dimension_numbers = #tpu.dot_dimension_numbers<[1], [0], [0], [1], [0, 0, 1, 1], [], []>} : vector<16x8xf32>, vector<8x32xf32>, vector<16x32xf32> -> vector<16x32xf32>
    %480 = arith.addf %461, %479 : vector<16x32xf32>
    %481 = vector.extract_strided_slice %409 {offsets = [0, 24], sizes = [16, 8], strides = [1, 1]} : vector<16x32xf32> to vector<16x8xf32>
    %482 = vector.extract_strided_slice %417 {offsets = [0, 24], sizes = [128, 8], strides = [1, 1]} : vector<128x32xf32> to vector<128x8xf32>
    %483 = vector.extract_strided_slice %418 {offsets = [0, 24], sizes = [128, 8], strides = [1, 1]} : vector<128x32xf32> to vector<128x8xf32>
    %cst_209 = arith.constant dense<0.000000e+00> : vector<16x128xf32>
    %484 = tpu.matmul %481, %482, %cst_209 {dimension_numbers = #tpu.dot_dimension_numbers<[1], [1], [0], [0], [0, 0, 1, 0], [], []>} : vector<16x8xf32>, vector<128x8xf32>, vector<16x128xf32> -> vector<16x128xf32>
    %485 = vector.broadcast %7 : vector<1x128xf32> to vector<16x128xf32>
    %486 = arith.addf %484, %485 : vector<16x128xf32>
    %cst_210 = arith.constant dense<0xFF800000> : vector<16xf32>
    %487 = vector.multi_reduction <maximumf>, %486, %cst_210 [1] : vector<16x128xf32> to vector<16xf32>
    %488 = vector.shape_cast %487 : vector<16xf32> to vector<16x1xf32>
    %489 = vector.broadcast %488 : vector<16x1xf32> to vector<16x128xf32>
    %490 = arith.subf %486, %489 : vector<16x128xf32>
    %491 = math.exp %490 : vector<16x128xf32>
    %cst_211 = arith.constant dense<0.000000e+00> : vector<16xf32>
    %492 = vector.multi_reduction <add>, %491, %cst_211 [1] : vector<16x128xf32> to vector<16xf32>
    %493 = vector.shape_cast %492 : vector<16xf32> to vector<16x1xf32>
    %cst_212 = arith.constant dense<0.000000e+00> : vector<16x8xf32>
    %494 = tpu.matmul %491, %483, %cst_212 {dimension_numbers = #tpu.dot_dimension_numbers<[1], [0], [0], [1], [0, 0, 1, 1], [], []>} : vector<16x128xf32>, vector<128x8xf32>, vector<16x8xf32> -> vector<16x8xf32>
    %495 = vector.broadcast %493 : vector<16x1xf32> to vector<16x8xf32>
    %496 = arith.divf %494, %495 : vector<16x8xf32>
    %497 = vector.extract_strided_slice %420 {offsets = [24, 0], sizes = [8, 32], strides = [1, 1]} : vector<32x32xf32> to vector<8x32xf32>
    %cst_213 = arith.constant dense<0.000000e+00> : vector<16x32xf32>
    %498 = tpu.matmul %496, %497, %cst_213 {dimension_numbers = #tpu.dot_dimension_numbers<[1], [0], [0], [1], [0, 0, 1, 1], [], []>} : vector<16x8xf32>, vector<8x32xf32>, vector<16x32xf32> -> vector<16x32xf32>
    %499 = arith.addf %480, %498 : vector<16x32xf32>
    %500 = arith.addf %402, %499 : vector<16x32xf32>
    %c1_214 = arith.constant 1 : index
    %c0_215 = arith.constant 0 : index
    %c0_216 = arith.constant 0 : index
    %501 = vector.load %arg17[%c1_214, %c0_215, %c0_216] : memref<2x1x32xf32, #tpu.memory_space<vmem>>, vector<1x1x32xf32>
    %502 = vector.shape_cast %501 : vector<1x1x32xf32> to vector<1x32xf32>
    %c1_217 = arith.constant 1 : index
    %c0_218 = arith.constant 0 : index
    %c0_219 = arith.constant 0 : index
    %503 = vector.load %arg18[%c1_217, %c0_218, %c0_219] : memref<2x1x32xf32, #tpu.memory_space<vmem>>, vector<1x1x32xf32>
    %504 = vector.shape_cast %503 : vector<1x1x32xf32> to vector<1x32xf32>
    %cst_220 = arith.constant dense<0.000000e+00> : vector<16xf32>
    %505 = vector.multi_reduction <add>, %500, %cst_220 [1] : vector<16x32xf32> to vector<16xf32>
    %506 = vector.shape_cast %505 : vector<16xf32> to vector<16x1xf32>
    %cst_221 = arith.constant 3.200000e+01 : f32
    %507 = vector.broadcast %cst_221 : f32 to vector<16x1xf32>
    %508 = arith.divf %506, %507 : vector<16x1xf32>
    %509 = vector.broadcast %508 : vector<16x1xf32> to vector<16x32xf32>
    %510 = arith.subf %500, %509 : vector<16x32xf32>
    %511 = arith.mulf %510, %510 : vector<16x32xf32>
    %cst_222 = arith.constant dense<0.000000e+00> : vector<16xf32>
    %512 = vector.multi_reduction <add>, %511, %cst_222 [1] : vector<16x32xf32> to vector<16xf32>
    %513 = vector.shape_cast %512 : vector<16xf32> to vector<16x1xf32>
    %cst_223 = arith.constant 3.200000e+01 : f32
    %514 = vector.broadcast %cst_223 : f32 to vector<16x1xf32>
    %515 = arith.divf %513, %514 : vector<16x1xf32>
    %516 = vector.broadcast %508 : vector<16x1xf32> to vector<16x32xf32>
    %517 = arith.subf %500, %516 : vector<16x32xf32>
    %cst_224 = arith.constant 9.99999974E-6 : f32
    %518 = vector.broadcast %cst_224 : f32 to vector<16x1xf32>
    %519 = arith.addf %515, %518 : vector<16x1xf32>
    %520 = math.rsqrt %519 : vector<16x1xf32>
    %521 = vector.broadcast %520 : vector<16x1xf32> to vector<16x32xf32>
    %522 = arith.mulf %517, %521 : vector<16x32xf32>
    %523 = vector.broadcast %502 : vector<1x32xf32> to vector<16x32xf32>
    %524 = arith.mulf %522, %523 : vector<16x32xf32>
    %525 = vector.broadcast %504 : vector<1x32xf32> to vector<16x32xf32>
    %526 = arith.addf %524, %525 : vector<16x32xf32>
    %c1_225 = arith.constant 1 : index
    %c0_226 = arith.constant 0 : index
    %c0_227 = arith.constant 0 : index
    %527 = vector.load %arg19[%c1_225, %c0_226, %c0_227] : memref<2x32x32xf32, #tpu.memory_space<vmem>>, vector<1x32x32xf32>
    %528 = vector.shape_cast %527 : vector<1x32x32xf32> to vector<32x32xf32>
    %cst_228 = arith.constant dense<0.000000e+00> : vector<16x32xf32>
    %529 = tpu.matmul %526, %528, %cst_228 {dimension_numbers = #tpu.dot_dimension_numbers<[1], [0], [0], [1], [0, 0, 1, 1], [], []>} : vector<16x32xf32>, vector<32x32xf32>, vector<16x32xf32> -> vector<16x32xf32>
    %c1_229 = arith.constant 1 : index
    %c0_230 = arith.constant 0 : index
    %c0_231 = arith.constant 0 : index
    %530 = vector.load %arg20[%c1_229, %c0_230, %c0_231] : memref<2x1x32xf32, #tpu.memory_space<vmem>>, vector<1x1x32xf32>
    %531 = vector.shape_cast %530 : vector<1x1x32xf32> to vector<1x32xf32>
    %532 = vector.broadcast %531 : vector<1x32xf32> to vector<16x32xf32>
    %533 = arith.addf %529, %532 : vector<16x32xf32>
    %cst_232 = arith.constant 0.000000e+00 : f32
    %534 = vector.broadcast %cst_232 : f32 to vector<16x32xf32>
    %535 = arith.maximumf %533, %534 : vector<16x32xf32>
    %c1_233 = arith.constant 1 : index
    %c0_234 = arith.constant 0 : index
    %c0_235 = arith.constant 0 : index
    %536 = vector.load %arg21[%c1_233, %c0_234, %c0_235] : memref<2x32x32xf32, #tpu.memory_space<vmem>>, vector<1x32x32xf32>
    %537 = vector.shape_cast %536 : vector<1x32x32xf32> to vector<32x32xf32>
    %cst_236 = arith.constant dense<0.000000e+00> : vector<16x32xf32>
    %538 = tpu.matmul %535, %537, %cst_236 {dimension_numbers = #tpu.dot_dimension_numbers<[1], [0], [0], [1], [0, 0, 1, 1], [], []>} : vector<16x32xf32>, vector<32x32xf32>, vector<16x32xf32> -> vector<16x32xf32>
    %c1_237 = arith.constant 1 : index
    %c0_238 = arith.constant 0 : index
    %c0_239 = arith.constant 0 : index
    %539 = vector.load %arg22[%c1_237, %c0_238, %c0_239] : memref<2x1x32xf32, #tpu.memory_space<vmem>>, vector<1x1x32xf32>
    %540 = vector.shape_cast %539 : vector<1x1x32xf32> to vector<1x32xf32>
    %541 = vector.broadcast %540 : vector<1x32xf32> to vector<16x32xf32>
    %542 = arith.addf %538, %541 : vector<16x32xf32>
    %543 = arith.addf %526, %542 : vector<16x32xf32>
    %c1_240 = arith.constant 1 : index
    %c0_241 = arith.constant 0 : index
    %c0_242 = arith.constant 0 : index
    %544 = vector.load %arg23[%c1_240, %c0_241, %c0_242] : memref<2x1x32xf32, #tpu.memory_space<vmem>>, vector<1x1x32xf32>
    %545 = vector.shape_cast %544 : vector<1x1x32xf32> to vector<1x32xf32>
    %c1_243 = arith.constant 1 : index
    %c0_244 = arith.constant 0 : index
    %c0_245 = arith.constant 0 : index
    %546 = vector.load %arg24[%c1_243, %c0_244, %c0_245] : memref<2x1x32xf32, #tpu.memory_space<vmem>>, vector<1x1x32xf32>
    %547 = vector.shape_cast %546 : vector<1x1x32xf32> to vector<1x32xf32>
    %cst_246 = arith.constant dense<0.000000e+00> : vector<16xf32>
    %548 = vector.multi_reduction <add>, %543, %cst_246 [1] : vector<16x32xf32> to vector<16xf32>
    %549 = vector.shape_cast %548 : vector<16xf32> to vector<16x1xf32>
    %cst_247 = arith.constant 3.200000e+01 : f32
    %550 = vector.broadcast %cst_247 : f32 to vector<16x1xf32>
    %551 = arith.divf %549, %550 : vector<16x1xf32>
    %552 = vector.broadcast %551 : vector<16x1xf32> to vector<16x32xf32>
    %553 = arith.subf %543, %552 : vector<16x32xf32>
    %554 = arith.mulf %553, %553 : vector<16x32xf32>
    %cst_248 = arith.constant dense<0.000000e+00> : vector<16xf32>
    %555 = vector.multi_reduction <add>, %554, %cst_248 [1] : vector<16x32xf32> to vector<16xf32>
    %556 = vector.shape_cast %555 : vector<16xf32> to vector<16x1xf32>
    %cst_249 = arith.constant 3.200000e+01 : f32
    %557 = vector.broadcast %cst_249 : f32 to vector<16x1xf32>
    %558 = arith.divf %556, %557 : vector<16x1xf32>
    %559 = vector.broadcast %551 : vector<16x1xf32> to vector<16x32xf32>
    %560 = arith.subf %543, %559 : vector<16x32xf32>
    %cst_250 = arith.constant 9.99999974E-6 : f32
    %561 = vector.broadcast %cst_250 : f32 to vector<16x1xf32>
    %562 = arith.addf %558, %561 : vector<16x1xf32>
    %563 = math.rsqrt %562 : vector<16x1xf32>
    %564 = vector.broadcast %563 : vector<16x1xf32> to vector<16x32xf32>
    %565 = arith.mulf %560, %564 : vector<16x32xf32>
    %566 = vector.broadcast %545 : vector<1x32xf32> to vector<16x32xf32>
    %567 = arith.mulf %565, %566 : vector<16x32xf32>
    %568 = vector.broadcast %547 : vector<1x32xf32> to vector<16x32xf32>
    %569 = arith.addf %567, %568 : vector<16x32xf32>
    %c0_251 = arith.constant 0 : index
    %c0_252 = arith.constant 0 : index
    %570 = vector.load %arg25[%c0_251, %c0_252] : memref<1x32xf32, #tpu.memory_space<vmem>>, vector<1x32xf32>
    %c0_253 = arith.constant 0 : index
    %c0_254 = arith.constant 0 : index
    %571 = vector.load %arg26[%c0_253, %c0_254] : memref<1x32xf32, #tpu.memory_space<vmem>>, vector<1x32xf32>
    %cst_255 = arith.constant dense<0.000000e+00> : vector<16xf32>
    %572 = vector.multi_reduction <add>, %569, %cst_255 [1] : vector<16x32xf32> to vector<16xf32>
    %573 = vector.shape_cast %572 : vector<16xf32> to vector<16x1xf32>
    %cst_256 = arith.constant 3.200000e+01 : f32
    %574 = vector.broadcast %cst_256 : f32 to vector<16x1xf32>
    %575 = arith.divf %573, %574 : vector<16x1xf32>
    %576 = vector.broadcast %575 : vector<16x1xf32> to vector<16x32xf32>
    %577 = arith.subf %569, %576 : vector<16x32xf32>
    %578 = arith.mulf %577, %577 : vector<16x32xf32>
    %cst_257 = arith.constant dense<0.000000e+00> : vector<16xf32>
    %579 = vector.multi_reduction <add>, %578, %cst_257 [1] : vector<16x32xf32> to vector<16xf32>
    %580 = vector.shape_cast %579 : vector<16xf32> to vector<16x1xf32>
    %cst_258 = arith.constant 3.200000e+01 : f32
    %581 = vector.broadcast %cst_258 : f32 to vector<16x1xf32>
    %582 = arith.divf %580, %581 : vector<16x1xf32>
    %583 = vector.broadcast %575 : vector<16x1xf32> to vector<16x32xf32>
    %584 = arith.subf %569, %583 : vector<16x32xf32>
    %cst_259 = arith.constant 9.99999974E-6 : f32
    %585 = vector.broadcast %cst_259 : f32 to vector<16x1xf32>
    %586 = arith.addf %582, %585 : vector<16x1xf32>
    %587 = math.rsqrt %586 : vector<16x1xf32>
    %588 = vector.broadcast %587 : vector<16x1xf32> to vector<16x32xf32>
    %589 = arith.mulf %584, %588 : vector<16x32xf32>
    %590 = vector.broadcast %570 : vector<1x32xf32> to vector<16x32xf32>
    %591 = arith.mulf %589, %590 : vector<16x32xf32>
    %592 = vector.broadcast %571 : vector<1x32xf32> to vector<16x32xf32>
    %593 = arith.addf %591, %592 : vector<16x32xf32>
    %c0_260 = arith.constant 0 : index
    %c0_261 = arith.constant 0 : index
    %594 = vector.load %arg27[%c0_260, %c0_261] : memref<32x128xf32, #tpu.memory_space<vmem>>, vector<32x128xf32>
    %cst_262 = arith.constant dense<0.000000e+00> : vector<16x128xf32>
    %595 = tpu.matmul %593, %594, %cst_262 {dimension_numbers = #tpu.dot_dimension_numbers<[1], [0], [0], [1], [0, 0, 1, 1], [], []>} : vector<16x32xf32>, vector<32x128xf32>, vector<16x128xf32> -> vector<16x128xf32>
    %c0_263 = arith.constant 0 : index
    %c0_264 = arith.constant 0 : index
    %596 = vector.load %arg28[%c0_263, %c0_264] : memref<1x128xf32, #tpu.memory_space<vmem>>, vector<1x128xf32>
    %597 = vector.broadcast %596 : vector<1x128xf32> to vector<16x128xf32>
    %598 = arith.addf %595, %597 : vector<16x128xf32>
    %c0_265 = arith.constant 0 : index
    %c0_266 = arith.constant 0 : index
    %c0_267 = arith.constant 0 : index
    %599 = vector.load %arg29[%c0_265, %c0_266, %c0_267] : memref<1x16x128xf32, #tpu.memory_space<vmem>>, vector<1x16x128xf32>
    %600 = vector.shape_cast %599 : vector<1x16x128xf32> to vector<16x128xf32>
    %601 = vector.shape_cast %598 : vector<16x128xf32> to vector<1x16x128xf32>
    tpu.vector_store %arg29[%c0_265, %c0_266, %c0_267], %601 {strides = array<i32>} : memref<1x16x128xf32, #tpu.memory_space<vmem>>, vector<1x16x128xf32>,
    return
  }
  func.func @transform_0(%arg0: i32) -> (i32, i32, i32) {
    %c0_i32 = arith.constant 0 : i32
    %c0_i32_0 = arith.constant 0 : i32
    %c0_i32_1 = arith.constant 0 : i32
    return %arg0, %c0_i32, %c0_i32_0 : i32, i32, i32
  }
  func.func @transform_1(%arg0: i32) -> (i32, i32, i32) {
    %c0_i32 = arith.constant 0 : i32
    %c0_i32_0 = arith.constant 0 : i32
    %c0_i32_1 = arith.constant 0 : i32
    return %arg0, %c0_i32, %c0_i32_0 : i32, i32, i32
  }
  func.func @transform_2(%arg0: i32) -> (i32, i32, i32) {
    %c0_i32 = arith.constant 0 : i32
    %c0_i32_0 = arith.constant 0 : i32
    %c0_i32_1 = arith.constant 0 : i32
    return %arg0, %c0_i32, %c0_i32_0 : i32, i32, i32
  }
  func.func @transform_3(%arg0: i32) -> (i32, i32, i32) {
    %c0_i32 = arith.constant 0 : i32
    %c0_i32_0 = arith.constant 0 : i32
    %c0_i32_1 = arith.constant 0 : i32
    return %arg0, %c0_i32, %c0_i32_0 : i32, i32, i32
  }
  func.func @transform_4(%arg0: i32) -> (i32, i32, i32) {
    %c0_i32 = arith.constant 0 : i32
    %c0_i32_0 = arith.constant 0 : i32
    %c0_i32_1 = arith.constant 0 : i32
    %c0_i32_2 = arith.constant 0 : i32
    return %c0_i32, %c0_i32_0, %c0_i32_1 : i32, i32, i32
  }
  func.func @transform_5(%arg0: i32) -> (i32, i32, i32) {
    %c0_i32 = arith.constant 0 : i32
    %c0_i32_0 = arith.constant 0 : i32
    %c0_i32_1 = arith.constant 0 : i32
    %c0_i32_2 = arith.constant 0 : i32
    return %c0_i32, %c0_i32_0, %c0_i32_1 : i32, i32, i32
  }
  func.func @transform_6(%arg0: i32) -> (i32, i32, i32) {
    %c0_i32 = arith.constant 0 : i32
    %c0_i32_0 = arith.constant 0 : i32
    %c0_i32_1 = arith.constant 0 : i32
    %c0_i32_2 = arith.constant 0 : i32
    return %c0_i32, %c0_i32_0, %c0_i32_1 : i32, i32, i32
  }
  func.func @transform_7(%arg0: i32) -> (i32, i32, i32) {
    %c0_i32 = arith.constant 0 : i32
    %c0_i32_0 = arith.constant 0 : i32
    %c0_i32_1 = arith.constant 0 : i32
    %c0_i32_2 = arith.constant 0 : i32
    return %c0_i32, %c0_i32_0, %c0_i32_1 : i32, i32, i32
  }
  func.func @transform_8(%arg0: i32) -> (i32, i32, i32) {
    %c0_i32 = arith.constant 0 : i32
    %c0_i32_0 = arith.constant 0 : i32
    %c0_i32_1 = arith.constant 0 : i32
    %c0_i32_2 = arith.constant 0 : i32
    return %c0_i32, %c0_i32_0, %c0_i32_1 : i32, i32, i32
  }
  func.func @transform_9(%arg0: i32) -> (i32, i32, i32) {
    %c0_i32 = arith.constant 0 : i32
    %c0_i32_0 = arith.constant 0 : i32
    %c0_i32_1 = arith.constant 0 : i32
    %c0_i32_2 = arith.constant 0 : i32
    return %c0_i32, %c0_i32_0, %c0_i32_1 : i32, i32, i32
  }
  func.func @transform_10(%arg0: i32) -> (i32, i32, i32) {
    %c0_i32 = arith.constant 0 : i32
    %c0_i32_0 = arith.constant 0 : i32
    %c0_i32_1 = arith.constant 0 : i32
    %c0_i32_2 = arith.constant 0 : i32
    return %c0_i32, %c0_i32_0, %c0_i32_1 : i32, i32, i32
  }
  func.func @transform_11(%arg0: i32) -> (i32, i32, i32) {
    %c0_i32 = arith.constant 0 : i32
    %c0_i32_0 = arith.constant 0 : i32
    %c0_i32_1 = arith.constant 0 : i32
    %c0_i32_2 = arith.constant 0 : i32
    return %c0_i32, %c0_i32_0, %c0_i32_1 : i32, i32, i32
  }
  func.func @transform_12(%arg0: i32) -> (i32, i32, i32) {
    %c0_i32 = arith.constant 0 : i32
    %c0_i32_0 = arith.constant 0 : i32
    %c0_i32_1 = arith.constant 0 : i32
    %c0_i32_2 = arith.constant 0 : i32
    return %c0_i32, %c0_i32_0, %c0_i32_1 : i32, i32, i32
  }
  func.func @transform_13(%arg0: i32) -> (i32, i32, i32) {
    %c0_i32 = arith.constant 0 : i32
    %c0_i32_0 = arith.constant 0 : i32
    %c0_i32_1 = arith.constant 0 : i32
    %c0_i32_2 = arith.constant 0 : i32
    return %c0_i32, %c0_i32_0, %c0_i32_1 : i32, i32, i32
  }
  func.func @transform_14(%arg0: i32) -> (i32, i32, i32) {
    %c0_i32 = arith.constant 0 : i32
    %c0_i32_0 = arith.constant 0 : i32
    %c0_i32_1 = arith.constant 0 : i32
    %c0_i32_2 = arith.constant 0 : i32
    return %c0_i32, %c0_i32_0, %c0_i32_1 : i32, i32, i32
  }
  func.func @transform_15(%arg0: i32) -> (i32, i32, i32) {
    %c0_i32 = arith.constant 0 : i32
    %c0_i32_0 = arith.constant 0 : i32
    %c0_i32_1 = arith.constant 0 : i32
    %c0_i32_2 = arith.constant 0 : i32
    return %c0_i32, %c0_i32_0, %c0_i32_1 : i32, i32, i32
  }
  func.func @transform_16(%arg0: i32) -> (i32, i32, i32) {
    %c0_i32 = arith.constant 0 : i32
    %c0_i32_0 = arith.constant 0 : i32
    %c0_i32_1 = arith.constant 0 : i32
    %c0_i32_2 = arith.constant 0 : i32
    return %c0_i32, %c0_i32_0, %c0_i32_1 : i32, i32, i32
  }
  func.func @transform_17(%arg0: i32) -> (i32, i32, i32) {
    %c0_i32 = arith.constant 0 : i32
    %c0_i32_0 = arith.constant 0 : i32
    %c0_i32_1 = arith.constant 0 : i32
    %c0_i32_2 = arith.constant 0 : i32
    return %c0_i32, %c0_i32_0, %c0_i32_1 : i32, i32, i32
  }
  func.func @transform_18(%arg0: i32) -> (i32, i32, i32) {
    %c0_i32 = arith.constant 0 : i32
    %c0_i32_0 = arith.constant 0 : i32
    %c0_i32_1 = arith.constant 0 : i32
    %c0_i32_2 = arith.constant 0 : i32
    return %c0_i32, %c0_i32_0, %c0_i32_1 : i32, i32, i32
  }
  func.func @transform_19(%arg0: i32) -> (i32, i32, i32) {
    %c0_i32 = arith.constant 0 : i32
    %c0_i32_0 = arith.constant 0 : i32
    %c0_i32_1 = arith.constant 0 : i32
    %c0_i32_2 = arith.constant 0 : i32
    return %c0_i32, %c0_i32_0, %c0_i32_1 : i32, i32, i32
  }
  func.func @transform_20(%arg0: i32) -> (i32, i32, i32) {
    %c0_i32 = arith.constant 0 : i32
    %c0_i32_0 = arith.constant 0 : i32
    %c0_i32_1 = arith.constant 0 : i32
    %c0_i32_2 = arith.constant 0 : i32
    return %c0_i32, %c0_i32_0, %c0_i32_1 : i32, i32, i32
  }
  func.func @transform_21(%arg0: i32) -> (i32, i32, i32) {
    %c0_i32 = arith.constant 0 : i32
    %c0_i32_0 = arith.constant 0 : i32
    %c0_i32_1 = arith.constant 0 : i32
    %c0_i32_2 = arith.constant 0 : i32
    return %c0_i32, %c0_i32_0, %c0_i32_1 : i32, i32, i32
  }
  func.func @transform_22(%arg0: i32) -> (i32, i32, i32) {
    %c0_i32 = arith.constant 0 : i32
    %c0_i32_0 = arith.constant 0 : i32
    %c0_i32_1 = arith.constant 0 : i32
    %c0_i32_2 = arith.constant 0 : i32
    return %c0_i32, %c0_i32_0, %c0_i32_1 : i32, i32, i32
  }
  func.func @transform_23(%arg0: i32) -> (i32, i32, i32) {
    %c0_i32 = arith.constant 0 : i32
    %c0_i32_0 = arith.constant 0 : i32
    %c0_i32_1 = arith.constant 0 : i32
    %c0_i32_2 = arith.constant 0 : i32
    return %c0_i32, %c0_i32_0, %c0_i32_1 : i32, i32, i32
  }
  func.func @transform_24(%arg0: i32) -> (i32, i32) {
    %c0_i32 = arith.constant 0 : i32
    %c0_i32_0 = arith.constant 0 : i32
    %c0_i32_1 = arith.constant 0 : i32
    return %c0_i32, %c0_i32_0 : i32, i32
  }
  func.func @transform_25(%arg0: i32) -> (i32, i32) {
    %c0_i32 = arith.constant 0 : i32
    %c0_i32_0 = arith.constant 0 : i32
    %c0_i32_1 = arith.constant 0 : i32
    return %c0_i32, %c0_i32_0 : i32, i32
  }
  func.func @transform_26(%arg0: i32) -> (i32, i32) {
    %c0_i32 = arith.constant 0 : i32
    %c0_i32_0 = arith.constant 0 : i32
    %c0_i32_1 = arith.constant 0 : i32
    return %c0_i32, %c0_i32_0 : i32, i32
  }
  func.func @transform_27(%arg0: i32) -> (i32, i32) {
    %c0_i32 = arith.constant 0 : i32
    %c0_i32_0 = arith.constant 0 : i32
    %c0_i32_1 = arith.constant 0 : i32
    return %c0_i32, %c0_i32_0 : i32, i32
  }
  func.func @transform_28(%arg0: i32) -> (i32, i32, i32) {
    %c0_i32 = arith.constant 0 : i32
    %c0_i32_0 = arith.constant 0 : i32
    %c0_i32_1 = arith.constant 0 : i32
    return %arg0, %c0_i32, %c0_i32_0 : i32, i32, i32
  }
}

</mosaic_0001>

<bundles_post_ra>
// kernel: forward.2
= control target key start
LH: loop header
LB: loop body
LE: loop exit
PB: predicated region body
PF: predicated region fallthrough
CT: control target
= control target key end

     0   :  { %s6143_s21 = smov 0   ;;  %s6910_s0 = inlined_call_operand.vmem [shape: f32[8,32,32], index: 0, kind: input, shape index: {}]   ;;  %s6911_s1 = inlined_call_operand.vmem [shape: f32[8,1,32], index: 1, kind: input, shape index: {}]   ;;  %s6912_s2 = inlined_call_operand.vmem [shape: f32[2,32,96], index: 2, kind: input, shape index: {}]   ;;  %s6913_s3 = inlined_call_operand.vmem [shape: f32[2,1,96], index: 3, kind: input, shape index: {}]   ;;  %s6914_s4 = inlined_call_operand.vmem [shape: f32[2,32,32], index: 4, kind: input, shape index: {}]   ;;  %s6915_s5 = inlined_call_operand.vmem [shape: f32[2,1,32], index: 5, kind: input, shape index: {}]   ;;  %s6916_s6 = inlined_call_operand.vmem [shape: f32[2,1,32], index: 6, kind: input, shape index: {}]   ;;  %s6917_s7 = inlined_call_operand.vmem [shape: f32[2,1,32], index: 7, kind: input, shape index: {}]   ;;  %s6918_s8 = inlined_call_operand.vmem [shape: f32[2,32,32], index: 8, kind: input, shape index: {}]   ;;  %s6919_s9 = inlined_call_operand.vmem [shape: f32[2,1,32], index: 9, kind: input, shape index: {}]   ;;  %s6920_s10 = inlined_call_operand.vmem [shape: f32[2,32,32], index: 10, kind: input, shape index: {}]   ;;  %s6921_s11 = inlined_call_operand.vmem [shape: f32[2,1,32], index: 11, kind: input, shape index: {}]   ;;  %s6922_s12 = inlined_call_operand.vmem [shape: f32[2,1,32], index: 12, kind: input, shape index: {}]   ;;  %s6923_s13 = inlined_call_operand.vmem [shape: f32[2,1,32], index: 13, kind: input, shape index: {}]   ;;  %s6924_s14 = inlined_call_operand.vmem [shape: f32[1,32], index: 14, kind: input, shape index: {}]   ;;  %s6925_s15 = inlined_call_operand.vmem [shape: f32[1,32], index: 15, kind: input, shape index: {}]   ;;  %s6926_s16 = inlined_call_operand.vmem [shape: f32[8,32,32], index: 16, kind: output, shape index: {}]  }
   0x1   :  { %6942 = sst [smem:[#allocation2_spill]] %s6910_s0 }
   0x2 LB: > { %s4654_s22 = sadd.s32 4294967295, %s6045_s21   ;;  %p4658_p0 = scmp.ge.s32.totalorder %s6045_s21, 1  ;;  %s6045_s21 = sphi %s6143_s21, %s26_s21  }
   0x3   : > { %p470_p1 = scmp.lt.s32.totalorder %s6045_s21, 9 }
   0x5   : > { %p471_p2 = pnand %p4658_p0, %p470_p1 }
   0x6   : > { %v541_v0 = vld [vmem:[%s6912_s2] sm:$0xff] (!%p471_p2)  ;;  %v542_v1 = vld [vmem:[%s6912_s2 + $0x8] sm:$0xff] (!%p471_p2)  ;;  %v543_v2 = vld [vmem:[%s6912_s2 + $0x10] sm:$0xff] (!%p471_p2)  ;;  %p523_p3 = scmp.lt.s32.totalorder (!%p471_p2), %s4654_s22, 7  ;;  %vm552_vm0 = vcmask (!%p471_p2), 261120   ;;  %s6943_s19 = sld [smem:[#allocation2_spill]] (!%p471_p2) }
   0x7   : > { %474 = sbr.rel (%p471_p2) target bundleno = 6134 (0x17f6), region = 84  ;;  %v5450_v3 = vpack.c.bf16 (!%p471_p2), %v542_v1, %v541_v0  ;;  %v544_v4 = vld [vmem:[%s6912_s2 + $0x18] sm:$0xff] (!%p471_p2)  ;;  %v4663_v10 = vld [vmem:[%s6913_s3] ss:$0 sm:$0xff] (!%p471_p2)  ;;  %vm673_vm1 = vcmask (!%p471_p2), 64512   ;;  %s6047_s25 = smov (!%p471_p2), 88  }
   0x8   : > { %v5454_v5 = vpack.c.bf16 (!%p471_p2), %v544_v4, %v543_v2  ;;  %s6048_s26 = smov (!%p471_p2), 96   ;;  %s6049_s27 = smov (!%p471_p2), 120   ;;  %vm6229_vm2 = vmpackc.low (!%p471_p2), %vm673_vm1, %vm673_vm1 }
   0x9   : > { %5451 = vmatprep.subr.bf16.mxu0 (!%p471_p2), %v5450_v3  ;;  %s6050_s17 = smov (!%p471_p2), 64   ;;  %s6940_s18 = smov (!%p471_p2), 80  }
   0xa   : > { %5453 = vmatpush3.bf16.msra.mxu0 (!%p471_p2), %v5450_v3  ;;  %s6936_s23 = smov (!%p471_p2), 56   ;;  %s6934_s29 = smov (!%p471_p2), 72  }
   0xb   : > { %5455 = vmatprep.subr.bf16.mxu0 (!%p471_p2), %v5454_v5  ;;  %s6932_s24 = smov (!%p471_p2), 48   ;;  %s6952_s28 = smov (!%p471_p2), 40  }
   0xe   : > { %s6955_s22 = smov (!%p523_p3, %s4654_s22), 7  ;;  %5457 = vmatpush3.bf16.msra.mxu0 %v5454_v5 }
   0xf   : > { %s6927_s0 = sshll.u32 %s6955_s22, 5  ;;  %s6263_s30 = scalar_lea.vmem %s6911_s1, %s6955_s22 }
  0x10   : > { %s6171_s20 = scalar_lea.vmem %s6943_s19, %s6927_s0  ;;  %v6266_v42 = vld [vmem:[%s6263_s30] ss:$0 sm:$0xff]  ;;  %s6938_s19 = smov 112  }
  0x11   : > { %v6174_v6 = vld [vmem:[%s6171_s20] sm:$0xff]  ;;  %v6179_v7 = vld [vmem:[%s6171_s20 + $0x8] sm:$0xff]  ;;  %v538_v8 = vld [vmem:[%s6171_s20 + $0x10] sm:$0xff]  ;;  %s6928_s0 = smov 104  }
  0x12   : > { %5086 = vmatprep.mubr.msk.f32.mxu0 %vm552_vm0, %v6174_v6  ;;  %v6186_v9 = vld [vmem:[%s6171_s20 + $0x18] sm:$0xff] }
  0x13   : > { %5087 = vmatmul.mubr.msk.f32.vlgmr.msra.gmra.mrb[0].mxu0 %vm552_vm0, %v6179_v7 }
  0x14   : > { %5089 = vmatprep.mubr.msk.f32.mxu0 %vm552_vm0, %v538_v8 }
  0x17   : > { %5090 = vmatmul.mubr.msk.f32.gmra.mrb[2].mxu0 %vm552_vm0, %v6186_v9 }
  0xe6   : > { %v5088_v11 = vpop.f32.mrb[0].mxu0 }
  0xe7   : > { %v6193_v12 = vadd.f32 %v5088_v11, %v4663_v10  ;;  %v631_v13 = vpop.f32.mrb[1].mxu0 }
  0xe8   : > { %v6195_v14 = vadd.f32 %v4663_v10, %v631_v13 }
  0xea   : > { %v5091_v15 = vpop.f32.mrb[2].mxu0  ;;  %5100 = vmatprep.mubr.msk.f32.mxu1 %vm673_vm1, %v6195_v14  ;;  %v6201_v16 = vpack.i.bf16 %v6193_v12, %v6195_v14 }
  0xeb   : > { %v6203_v17 = vadd.f32 %v5091_v15, %v4663_v10  ;;  %v641_v18 = vpop.f32.mrb[3].mxu0 }
  0xec   : > { %v6205_v19 = vadd.f32 %v4663_v10, %v641_v18  ;;  %5720 = vrot.lane.b32.xlu1 %v6201_v16, %s6047_s25  ;;  %5710 = vrot.lane.b32.xlu0 %v6201_v16, %s6048_s26 }
  0xee   : > { %v6213_v20 = vpack.i.bf16 %v6203_v17, %v6205_v19 }
  0xf0   : > { %5725 = vrot.lane.b32.xlu1 %v6213_v20, %s6047_s25  ;;  %5715 = vrot.lane.b32.xlu0 %v6213_v20, %s6048_s26 }
  0xf4   : > { %1037 = vrot.lane.b32.xlu1 %v6193_v12, %s6049_s27  ;;  %1035 = vrot.lane.b32.xlu0 %v6195_v14, %s6049_s27 }
  0xf8   : > { %1041 = vrot.lane.b32.xlu1 %v6203_v17, %s6049_s27  ;;  %1039 = vrot.lane.b32.xlu0 %v6205_v19, %s6049_s27 }
 0x15e   : > { %v5711_v21 = vpop.permute.xlu0 %5710  ;;  %v5721_v29 = vpop.permute.xlu1 %5720 }
 0x15f   : > { %v5713_v22 = vunpack.i.h.bf16 %v5711_v21  ;;  %v5712_v23 = vunpack.i.l.bf16 %v5711_v21  ;;  %v5723_v31 = vunpack.i.h.bf16 %v5721_v29  ;;  %v5722_v32 = vunpack.i.l.bf16 %v5721_v29 }
 0x161   : > { %v5458_v25 = vpack.c.bf16 %v5713_v22, %v5712_v23  ;;  %v5478_v33 = vpack.c.bf16 %v5723_v31, %v5722_v32 }
 0x162   : > { %v5716_v26 = vpop.permute.xlu0 %5715  ;;  %v5726_v34 = vpop.permute.xlu1 %5725 }
 0x163   : > { %v5718_v27 = vunpack.i.h.bf16 %v5716_v26  ;;  %v5717_v28 = vunpack.i.l.bf16 %v5716_v26  ;;  %5460 = vmatprep.subr.msk.bf16.mxu1 %vm6229_vm2, %v5458_v25  ;;  %v5728_v35 = vunpack.i.h.bf16 %v5726_v34  ;;  %v5727_v36 = vunpack.i.l.bf16 %v5726_v34 }
 0x164   : > { %5463 = vmatpush3.bf16.xpose.msk.msra.mxu1 %vm6229_vm2, %v5458_v25 }
 0x165   : > { %v5464_v30 = vpack.c.bf16 %v5718_v27, %v5717_v28  ;;  %v5484_v37 = vpack.c.bf16 %v5728_v35, %v5727_v36 }
 0x166   : > { %v1036_v38 = vpop.permute.xlu0 %1035  ;;  %v1038_v39 = vpop.permute.xlu1 %1037 }
 0x167   : > { %5466 = vmatprep.subr.msk.bf16.mxu1 %vm6229_vm2, %v5464_v30 }
 0x16a   : > { %v1040_v40 = vpop.permute.xlu0 %1039  ;;  %v1042_v41 = vpop.permute.xlu1 %1041 }
 0x16c   : > { %5469 = vmatpush3.bf16.xpose.msk.msra.mxu1 %vm6229_vm2, %v5464_v30 }
 0x16d   : > { %5480 = vmatprep.subr.msk.bf16.mxu1 %vm6229_vm2, %v5478_v33 }
 0x173   : > { %5101 = vmatmul.mubr.msk.f32.vlgmr.msra.gmra.mrb[0].mxu1 %vm673_vm1, %v6193_v12 }
 0x174   : > { %5103 = vmatprep.mubr.msk.f32.mxu1 %vm673_vm1, %v6205_v19  ;;  %5483 = vmatpush3.bf16.xpose.msk.msra.mxu1 %vm6229_vm2, %v5478_v33 }
 0x175   : > { %5486 = vmatprep.subr.msk.bf16.mxu1 %vm6229_vm2, %v5484_v37 }
 0x177   : > { %5104 = vmatmul.mubr.msk.f32.gmra.mrb[2].mxu1 %vm673_vm1, %v6203_v17 }
 0x178   : > { %5136 = vmatprep.mubr.msk.f32.mxu1 %vm673_vm1, %v1036_v38 }
 0x17c   : > { %5489 = vmatpush3.bf16.xpose.msk.msra.mxu1 %vm6229_vm2, %v5484_v37 }
 0x183   : > { %5137 = vmatmul.mubr.msk.f32.vlgmr.msra.gmra.mrb[4].mxu1 %vm673_vm1, %v1038_v39 }
 0x184   : > { %5139 = vmatprep.mubr.msk.f32.mxu1 %vm673_vm1, %v1040_v40 }
 0x187   : > { %5140 = vmatmul.mubr.msk.f32.gmra.mrb[6].mxu1 %vm673_vm1, %v1042_v41 }
 0x246   : > { %v5102_v43 = vpop.f32.mrb[0].mxu1 }
 0x247   : > { %v762_v44 = vadd.f32 %v5102_v43, %v6266_v42  ;;  %v756_v45 = vpop.f32.mrb[1].mxu1 }
 0x248   : > { %v757_v46 = vadd.f32 %v6266_v42, %v756_v45 }
 0x249   : > { %v778_v47 = vsel %vm552_vm0, %v762_v44, -inf }
 0x24a   : > { %779 = vmax.xlane.f32.xlu1 %v778_v47  ;;  %v5105_v48 = vpop.f32.mrb[2].mxu1  ;;  %v775_v49 = vsel %vm552_vm0, %v757_v46, -inf }
 0x24b   : > { %v772_v50 = vadd.f32 %v5105_v48, %v6266_v42  ;;  %v766_v51 = vpop.f32.mrb[3].mxu1  ;;  %776 = vmax.xlane.f32.xlu0 %v775_v49 }
 0x24c   : > { %v767_v53 = vadd.f32 %v6266_v42, %v766_v51 }
 0x24d   : > { %v784_v52 = vsel %vm552_vm0, %v772_v50, -inf }
 0x24e   : > { %v781_v54 = vsel %vm552_vm0, %v767_v53, -inf }
 0x24f   : > { %785 = vmax.xlane.f32.xlu0 %v784_v52 }
 0x253   : > { %782 = vmax.xlane.f32.xlu0 %v781_v54  ;;  %v650_v54 = vld [vmem:[%s6914_s4] sm:$0xff] }
 0x256   : > { %v5138_v55 = vpop.f32.mrb[4].mxu1 }
 0x257   : > { %v1133_v56 = vpop.f32.mrb[5].mxu1  ;;  %v6296_v60 = vadd.f32 %v5138_v55, %v6266_v42 }
 0x258   : > { %v6293_v59 = vadd.f32 %v6266_v42, %v1133_v56 }
 0x259   : > { %v1155_v0 = vsel %vm552_vm0, %v6296_v60, -inf }
 0x25a   : > { %v5141_v57 = vpop.f32.mrb[6].mxu1  ;;  %v1152_v62 = vsel %vm552_vm0, %v6293_v59, -inf }
 0x25b   : > { %5730 = vrot.lane.b32.xlu1 %v6201_v16, %s6050_s17  ;;  %v1143_v58 = vpop.f32.mrb[7].mxu1  ;;  %v6304_v63 = vadd.f32 %v5141_v57, %v6266_v42 }
 0x25c   : > { %v6299_v61 = vadd.f32 %v6266_v42, %v1143_v58 }
 0x25d   : > { %v1161_v2 = vsel %vm552_vm0, %v6304_v63, -inf }
 0x25e   : > { %v1158_v1 = vsel %vm552_vm0, %v6299_v61, -inf }
 0x25f   : > { %5740 = vrot.lane.b32.xlu1 %v6201_v16, %s6940_s18 }
 0x263   : > { %5745 = vrot.lane.b32.xlu1 %v6213_v20, %s6940_s18 }
 0x267   : > { %1408 = vrot.lane.b32.xlu1 %v6193_v12, %s6938_s19 }
 0x269   : > { %5735 = vrot.lane.b32.xlu0 %v6213_v20, %s6050_s17 }
 0x26b   : > { %1412 = vrot.lane.b32.xlu1 %v6203_v17, %s6938_s19 }
 0x26d   : > { %1406 = vrot.lane.b32.xlu0 %v6195_v14, %s6938_s19 }
 0x271   : > { %1410 = vrot.lane.b32.xlu0 %v6205_v19, %s6938_s19 }
 0x28f   : > { %1153 = vmax.xlane.f32.xlu1 %v1152_v62 }
 0x290   : > { %1156 = vmax.xlane.f32.xlu0 %v1155_v0 }
 0x293   : > { %1159 = vmax.xlane.f32.xlu1 %v1158_v1 }
 0x294   : > { %1162 = vmax.xlane.f32.xlu0 %v1161_v2 }
 0x2d7   : > { %v780_v3 = vpop.xlane.xlu1 %779 }
 0x2d8   : > { %v788_v4 = vsub.f32 %v762_v44, %v780_v3  ;;  %v777_v5 = vpop.xlane.xlu0 %776 }
 0x2d9   : > { %v787_v8 = vsub.f32 %v757_v46, %v777_v5 }
 0x2da   : > { %v793_v10 = vmul.f32 1.442695, %v788_v4 }
 0x2db   : > { %v791_v11 = vmul.f32 1.442695, %v787_v8  ;;  %v5731_v13 = vpop.permute.xlu1 %5730 }
 0x2dc   : > { %5869 = vpow2.f32 %v793_v10  ;;  %v5733_v15 = vunpack.i.h.bf16 %v5731_v13  ;;  %v5732_v18 = vunpack.i.l.bf16 %v5731_v13  ;;  %v786_v21 = vpop.xlane.xlu0 %785 }
 0x2dd   : > { %5871 = vpow2.f32 %v791_v11  ;;  %v790_v22 = vsub.f32 %v772_v50, %v786_v21 }
 0x2de   : > { %v5470_v23 = vpack.c.bf16 %v5733_v15, %v5732_v18 }
 0x2df   : > { %v797_v25 = vmul.f32 1.442695, %v790_v22  ;;  %v5741_v26 = vpop.permute.xlu1 %5740 }
 0x2e0   : > { %v5743_v27 = vunpack.i.h.bf16 %v5741_v26  ;;  %v5742_v28 = vunpack.i.l.bf16 %v5741_v26  ;;  %5471 = vmatprep.subr.bf16.mxu0 %v5470_v23  ;;  %v783_v29 = vpop.xlane.xlu0 %782 }
 0x2e1   : > { %5873 = vpow2.f32 %v797_v25  ;;  %v789_v30 = vsub.f32 %v767_v53, %v783_v29  ;;  %5473 = vmatpush3.bf16.msra.mxu0 %v5470_v23 }
 0x2e2   : > { %v5498_v31 = vpack.c.bf16 %v5743_v27, %v5742_v28 }
 0x2e3   : > { %v795_v32 = vmul.f32 1.442695, %v789_v30  ;;  %v5746_v33 = vpop.permute.xlu1 %5745 }
 0x2e4   : > { %v5748_v34 = vunpack.i.h.bf16 %v5746_v33  ;;  %v5747_v35 = vunpack.i.l.bf16 %v5746_v33  ;;  %5500 = vmatprep.subr.msk.bf16.mxu1 %vm6229_vm2, %v5498_v31  ;;  %v5736_v36 = vpop.permute.xlu0 %5735 }
 0x2e5   : > { %5875 = vpow2.f32 %v795_v32  ;;  %v5738_v37 = vunpack.i.h.bf16 %v5736_v36  ;;  %v5737_v38 = vunpack.i.l.bf16 %v5736_v36  ;;  %5503 = vmatpush3.bf16.xpose.msk.msra.mxu1 %vm6229_vm2, %v5498_v31 }
 0x2e6   : > { %v5870_v39 = vpop.eup %5869  ;;  %v5504_v40 = vpack.c.bf16 %v5748_v34, %v5747_v35 }
 0x2e7   : > { %v5872_v41 = vpop.eup %5871  ;;  %v802_v43 = vsel %vm552_vm0, %v5870_v39, 0.0  ;;  %v5474_v44 = vpack.c.bf16 %v5738_v37, %v5737_v38  ;;  %v1409_v51 = vpop.permute.xlu1 %1408 }
 0x2e8   : > { %5506 = vmatprep.subr.msk.bf16.mxu1 %vm6229_vm2, %v5504_v40  ;;  %803 = vadd.xlane.f32.xlu1 %v802_v43  ;;  %v1407_v45 = vpop.permute.xlu0 %1406  ;;  %v799_v46 = vsel %vm552_vm0, %v5872_v41, 0.0 }
 0x2e9   : > { %5114 = vmatprep.mubr.msk.f32.mxu0 %vm552_vm0, %v5872_v41  ;;  %800 = vadd.xlane.f32.xlu0 %v799_v46 }
 0x2ea   : > { %5475 = vmatprep.subr.bf16.mxu0 %v5474_v44  ;;  %5172 = vmatprep.mubr.msk.f32.mxu1 %vm673_vm1, %v1407_v45 }
 0x2eb   : > { %v5874_v47 = vpop.eup %5873  ;;  %5477 = vmatpush3.bf16.msra.mxu0 %v5474_v44  ;;  %v1413_v53 = vpop.permute.xlu1 %1412 }
 0x2ec   : > { %v808_v48 = vsel %vm552_vm0, %v5874_v47, 0.0  ;;  %v1411_v52 = vpop.permute.xlu0 %1410  ;;  %5120 = vmatprep.subr.mxu0 %v650_v54 }
 0x2ed   : > { %5509 = vmatpush3.bf16.xpose.msk.msra.mxu1 %vm6229_vm2, %v5504_v40  ;;  %809 = vadd.xlane.f32.xlu0 %v808_v48 }
 0x2ee   : > { %5115 = vmatmul.mubr.msk.f32.vlgmr.msra.gmra.mrb[4].mxu0 %vm552_vm0, %v5870_v39 }
 0x2ef   : > { %v5876_v49 = vpop.eup %5875  ;;  %5121 = vmatpush3.msra.mxu0 %v650_v54 }
 0x2f0   : > { %5117 = vmatprep.mubr.msk.f32.mxu0 %vm552_vm0, %v5876_v49  ;;  %v805_v50 = vsel %vm552_vm0, %v5876_v49, 0.0 }
 0x2f1   : > { %806 = vadd.xlane.f32.xlu0 %v805_v50 }
 0x2f2   : > { %5118 = vmatmul.mubr.msk.f32.gmra.mrb[6].mxu0 %vm552_vm0, %v5874_v47 }
 0x2f4   : > { %5173 = vmatmul.mubr.msk.f32.vlgmr.msra.gmra.mrb[8].mxu1 %vm673_vm1, %v1409_v51 }
 0x2f5   : > { %5175 = vmatprep.mubr.msk.f32.mxu1 %vm673_vm1, %v1411_v52 }
 0x2f8   : > { %5176 = vmatmul.mubr.msk.f32.gmra.mrb[10].mxu1 %vm673_vm1, %v1413_v53 }
 0x2f9   : > { %5750 = vrot.lane.b32.xlu1 %v6201_v16, %s6936_s23 }
 0x2fd   : > { %5760 = vrot.lane.b32.xlu1 %v6201_v16, %s6934_s29 }
 0x301   : > { %5765 = vrot.lane.b32.xlu1 %v6213_v20, %s6934_s29  ;;  %s6950_s29 = smov 104  }
 0x305   : > { %1779 = vrot.lane.b32.xlu1 %v6193_v12, %s6928_s0 }
 0x307   : > { %5755 = vrot.lane.b32.xlu0 %v6213_v20, %s6936_s23  ;;  %s6949_s23 = smov 72  }
 0x309   : > { %1783 = vrot.lane.b32.xlu1 %v6203_v17, %s6928_s0 }
 0x30b   : > { %1777 = vrot.lane.b32.xlu0 %v6195_v14, %s6928_s0 }
 0x30f   : > { %1781 = vrot.lane.b32.xlu0 %v6205_v19, %s6928_s0  ;;  %s6930_s0 = smov 40  }
 0x31c   : > { %v1154_v55 = vpop.xlane.xlu1 %1153 }
 0x31d   : > { %v1157_v56 = vpop.xlane.xlu0 %1156  ;;  %v1164_v26 = vsub.f32 %v6293_v59, %v1154_v55 }
 0x31e   : > { %v1165_v27 = vsub.f32 %v6296_v60, %v1157_v56 }
 0x31f   : > { %v1168_v28 = vmul.f32 1.442695, %v1164_v26 }
 0x320   : > { %v1160_v57 = vpop.xlane.xlu1 %1159  ;;  %v1170_v30 = vmul.f32 1.442695, %v1165_v27 }
 0x321   : > { %v1163_v58 = vpop.xlane.xlu0 %1162  ;;  %v1166_v29 = vsub.f32 %v6299_v61, %v1160_v57 }
 0x322   : > { %v1167_v31 = vsub.f32 %v6304_v63, %v1163_v58 }
 0x323   : > { %v1172_v32 = vmul.f32 1.442695, %v1166_v29 }
 0x324   : > { %v1174_v38 = vmul.f32 1.442695, %v1167_v31 }
 0x375   : > { %v804_v62 = vpop.xlane.xlu1 %803 }
 0x376   : > { %v801_v0 = vpop.xlane.xlu0 %800 }
 0x377   : > { %5877 = vrcp.f32 %v801_v0 }
 0x378   : > { %5879 = vrcp.f32 %v804_v62 }
 0x379   : > { %v5751_v1 = vpop.permute.xlu1 %5750 }
 0x37a   : > { %v5753_v12 = vunpack.i.h.bf16 %v5751_v1  ;;  %v5752_v2 = vunpack.i.l.bf16 %v5751_v1  ;;  %v810_v3 = vpop.xlane.xlu0 %809 }
 0x37c   : > { %v5490_v4 = vpack.c.bf16 %v5753_v12, %v5752_v2 }
 0x37d   : > { %v5761_v5 = vpop.permute.xlu1 %5760 }
 0x37e   : > { %v5763_v8 = vunpack.i.h.bf16 %v5761_v5  ;;  %v5762_v17 = vunpack.i.l.bf16 %v5761_v5  ;;  %v807_v10 = vpop.xlane.xlu0 %806  ;;  %5491 = vmatprep.subr.bf16.mxu0 %v5490_v4  ;;  %v651_v5 = vld [vmem:[%s6914_s4 + $0x8] sm:$0xff] }
 0x37f   : > { %5881 = vrcp.f32 %v807_v10 }
 0x380   : > { %v5518_v14 = vpack.c.bf16 %v5763_v8, %v5762_v17  ;;  %5883 = vrcp.f32 %v810_v3 }
 0x381   : > { %v5766_v11 = vpop.permute.xlu1 %5765  ;;  %5885 = vpow2.f32 %v1168_v28  ;;  %v5878_v34 = vpop.eup %5877 }
 0x382   : > { %v5768_v13 = vunpack.i.h.bf16 %v5766_v11  ;;  %v5767_v19 = vunpack.i.l.bf16 %v5766_v11  ;;  %5520 = vmatprep.subr.msk.bf16.mxu1 %vm6229_vm2, %v5518_v14  ;;  %v5756_v15 = vpop.permute.xlu0 %5755  ;;  %v5880_v59 = vpop.eup %5879  ;;  %5887 = vpow2.f32 %v1170_v30 }
 0x383   : > { %5523 = vmatpush3.bf16.xpose.msk.msra.mxu1 %vm6229_vm2, %v5518_v14  ;;  %v5758_v35 = vunpack.i.h.bf16 %v5756_v15  ;;  %v5757_v36 = vunpack.i.l.bf16 %v5756_v15  ;;  %5889 = vpow2.f32 %v1172_v32 }
 0x384   : > { %v5524_v18 = vpack.c.bf16 %v5768_v13, %v5767_v19  ;;  %5891 = vpow2.f32 %v1174_v38 }
 0x385   : > { %v1780_v22 = vpop.permute.xlu1 %1779  ;;  %v5494_v63 = vpack.c.bf16 %v5758_v35, %v5757_v36 }
 0x386   : > { %5526 = vmatprep.subr.msk.bf16.mxu1 %vm6229_vm2, %v5524_v18  ;;  %v1778_v21 = vpop.permute.xlu0 %1777 }
 0x387   : > { %5208 = vmatprep.mubr.msk.f32.mxu1 %vm673_vm1, %v1778_v21 }
 0x389   : > { %v1784_v25 = vpop.permute.xlu1 %1783  ;;  %v5882_v61 = vpop.eup %5881 }
 0x38a   : > { %v1782_v23 = vpop.permute.xlu0 %1781  ;;  %v5884_v43 = vpop.eup %5883 }
 0x38b   : > { %5529 = vmatpush3.bf16.xpose.msk.msra.mxu1 %vm6229_vm2, %v5524_v18  ;;  %v5886_v50 = vpop.eup %5885 }
 0x38c   : > { %v5888_v56 = vpop.eup %5887  ;;  %v1176_v12 = vsel %vm552_vm0, %v5886_v50, 0.0 }
 0x38d   : > { %v5890_v58 = vpop.eup %5889  ;;  %v1179_v2 = vsel %vm552_vm0, %v5888_v56, 0.0 }
 0x38e   : > { %v5892_v1 = vpop.eup %5891 }
 0x38f   : > { %v1185_v3 = vsel %vm552_vm0, %v5892_v1, 0.0 }
 0x392   : > { %5209 = vmatmul.mubr.msk.f32.vlgmr.msra.gmra.mrb[12].mxu1 %vm673_vm1, %v1780_v22 }
 0x393   : > { %5211 = vmatprep.mubr.msk.f32.mxu1 %vm673_vm1, %v1782_v23 }
 0x396   : > { %5212 = vmatmul.mubr.msk.f32.gmra.mrb[14].mxu1 %vm673_vm1, %v1784_v25 }
 0x3c1   : > { %v5116_v33 = vpop.f32.mrb[4].mxu0 }
 0x3c2   : > { %v901_v37 = vpop.f32.mrb[5].mxu0  ;;  %v923_v60 = vmul.f32 %v5880_v59, %v5116_v33 }
 0x3c3   : > { %v921_v39 = vmul.f32 %v5878_v34, %v901_v37 }
 0x3c5   : > { %v5119_v40 = vpop.f32.mrb[6].mxu0  ;;  %5122 = vmatprep.mubr.msk.f32.mxu0 %vm673_vm1, %v921_v39 }
 0x3c6   : > { %v911_v41 = vpop.f32.mrb[7].mxu0  ;;  %5123 = vmatmul.mubr.msk.f32.vlgmr.msra.gmra.mrb[8].mxu0 %vm673_vm1, %v923_v60  ;;  %v927_v46 = vmul.f32 %v5884_v43, %v5119_v40 }
 0x3c7   : > { %v925_v44 = vmul.f32 %v5882_v61, %v911_v41  ;;  %5493 = vmatpush3.bf16.msra.mxu0 %v5490_v4  ;;  %v5174_v45 = vpop.f32.mrb[8].mxu1  ;;  %v1182_v4 = vsel %vm552_vm0, %v5890_v58, 0.0 }
 0x3c8   : > { %5495 = vmatprep.subr.bf16.mxu0 %v5494_v63  ;;  %v1510_v47 = vadd.f32 %v5174_v45, %v6266_v42  ;;  %v1504_v48 = vpop.f32.mrb[9].mxu1 }
 0x3c9   : > { %5125 = vmatprep.mubr.msk.f32.mxu0 %vm673_vm1, %v925_v44  ;;  %v1505_v49 = vadd.f32 %v6266_v42, %v1504_v48 }
 0x3ca   : > { %5126 = vmatmul.mubr.msk.f32.gmra.mrb[10].mxu0 %vm673_vm1, %v927_v46  ;;  %v1526_v51 = vsel %vm552_vm0, %v1510_v47, -inf }
 0x3cb   : > { %5497 = vmatpush3.bf16.msra.mxu0 %v5494_v63  ;;  %5150 = vmatprep.mubr.msk.f32.mxu0 %vm552_vm0, %v5886_v50  ;;  %v5177_v52 = vpop.f32.mrb[10].mxu1  ;;  %v1523_v53 = vsel %vm552_vm0, %v1505_v49, -inf }
 0x3cc   : > { %1527 = vmax.xlane.f32.xlu0 %v1526_v51  ;;  %v1520_v54 = vadd.f32 %v5177_v52, %v6266_v42  ;;  %1524 = vmax.xlane.f32.xlu1 %v1523_v53  ;;  %v1514_v55 = vpop.f32.mrb[11].mxu1 }
 0x3cd   : > { %v1515_v57 = vadd.f32 %v6266_v42, %v1514_v55  ;;  %5156 = vmatprep.subr.mxu0 %v651_v5 }
 0x3ce   : > { %5151 = vmatmul.mubr.msk.f32.vlgmr.msra.gmra.mrb[12].mxu0 %vm552_vm0, %v5888_v56  ;;  %v1532_v62 = vsel %vm552_vm0, %v1520_v54, -inf }
 0x3cf   : > { %5153 = vmatprep.mubr.msk.f32.mxu0 %vm552_vm0, %v5890_v58  ;;  %v1529_v0 = vsel %vm552_vm0, %v1515_v57, -inf  ;;  %5157 = vmatpush3.msra.mxu0 %v651_v5 }
 0x3d0   : > { %1533 = vmax.xlane.f32.xlu0 %v1532_v62  ;;  %1530 = vmax.xlane.f32.xlu1 %v1529_v0 }
 0x3d2   : > { %5154 = vmatmul.mubr.msk.f32.gmra.mrb[14].mxu0 %vm552_vm0, %v5892_v1 }
 0x3d4   : > { %1177 = vadd.xlane.f32.xlu0 %v1176_v12  ;;  %1180 = vadd.xlane.f32.xlu1 %v1179_v2  ;;  %v652_v2 = vld [vmem:[%s6914_s4 + $0x10] sm:$0xff] }
 0x3d8   : > { %1186 = vadd.xlane.f32.xlu0 %v1185_v3 }
 0x3dc   : > { %1183 = vadd.xlane.f32.xlu0 %v1182_v4 }
 0x3e5   : > { %5770 = vrot.lane.b32.xlu1 %v6201_v16, %s6932_s24 }
 0x3f2   : > { %5775 = vrot.lane.b32.xlu0 %v6213_v20, %s6932_s24 }
 0x459   : > { %v1528_v8 = vpop.xlane.xlu0 %1527  ;;  %v1525_v17 = vpop.xlane.xlu1 %1524 }
 0x45a   : > { %v1536_v10 = vsub.f32 %v1510_v47, %v1528_v8  ;;  %v1535_v14 = vsub.f32 %v1505_v49, %v1525_v17 }
 0x45c   : > { %v1541_v19 = vmul.f32 1.442695, %v1536_v10  ;;  %v1539_v18 = vmul.f32 1.442695, %v1535_v14 }
 0x45d   : > { %v1534_v11 = vpop.xlane.xlu0 %1533  ;;  %v1531_v13 = vpop.xlane.xlu1 %1530 }
 0x45e   : > { %v1538_v15 = vsub.f32 %v1520_v54, %v1534_v11  ;;  %v1537_v21 = vsub.f32 %v1515_v57, %v1531_v13  ;;  %5893 = vpow2.f32 %v1541_v19 }
 0x45f   : > { %5895 = vpow2.f32 %v1539_v18 }
 0x460   : > { %v1545_v23 = vmul.f32 1.442695, %v1538_v15  ;;  %v1543_v25 = vmul.f32 1.442695, %v1537_v21 }
 0x461   : > { %v1181_v22 = vpop.xlane.xlu1 %1180  ;;  %v1178_v46 = vpop.xlane.xlu0 %1177 }
 0x462   : > { %5897 = vpow2.f32 %v1545_v23 }
 0x463   : > { %5899 = vpow2.f32 %v1543_v25 }
 0x464   : > { %5901 = vrcp.f32 %v1178_v46 }
 0x465   : > { %v5771_v26 = vpop.permute.xlu1 %5770  ;;  %v5210_v29 = vpop.f32.mrb[12].mxu1  ;;  %5903 = vrcp.f32 %v1181_v22 }
 0x466   : > { %v5773_v27 = vunpack.i.h.bf16 %v5771_v26  ;;  %v5772_v28 = vunpack.i.l.bf16 %v5771_v26  ;;  %v6395_v30 = vadd.f32 %v5210_v29, %v6266_v42  ;;  %v1875_v31 = vpop.f32.mrb[13].mxu1  ;;  %v1187_v47 = vpop.xlane.xlu0 %1186 }
 0x467   : > { %v6398_v32 = vadd.f32 %v6266_v42, %v1875_v31 }
 0x468   : > { %v5510_v33 = vpack.c.bf16 %v5773_v27, %v5772_v28  ;;  %v1897_v34 = vsel %vm552_vm0, %v6395_v30, -inf  ;;  %v5894_v40 = vpop.eup %5893 }
 0x469   : > { %v5213_v35 = vpop.f32.mrb[14].mxu1  ;;  %1898 = vmax.xlane.f32.xlu0 %v1897_v34  ;;  %v1894_v37 = vsel %vm552_vm0, %v6398_v32, -inf  ;;  %v5896_v61 = vpop.eup %5895  ;;  %v1550_v41 = vsel %vm552_vm0, %v5894_v40, 0.0 }
 0x46a   : > { %v6403_v36 = vadd.f32 %v5213_v35, %v6266_v42  ;;  %5511 = vmatprep.subr.bf16.mxu0 %v5510_v33  ;;  %v1885_v59 = vpop.f32.mrb[15].mxu1  ;;  %1895 = vmax.xlane.f32.xlu1 %v1894_v37  ;;  %v1547_v43 = vsel %vm552_vm0, %v5896_v61, 0.0  ;;  %v1184_v48 = vpop.xlane.xlu0 %1183 }
 0x46b   : > { %v6408_v38 = vadd.f32 %v6266_v42, %v1885_v59  ;;  %5905 = vrcp.f32 %v1184_v48 }
 0x46c   : > { %v1903_v39 = vsel %vm552_vm0, %v6403_v36, -inf  ;;  %v5898_v63 = vpop.eup %5897  ;;  %5907 = vrcp.f32 %v1187_v47 }
 0x46d   : > { %v1900_v60 = vsel %vm552_vm0, %v6408_v38, -inf  ;;  %1904 = vmax.xlane.f32.xlu0 %v1903_v39  ;;  %v5900_v44 = vpop.eup %5899  ;;  %v1556_v42 = vsel %vm552_vm0, %v5898_v63, 0.0 }
 0x46e   : > { %1901 = vmax.xlane.f32.xlu1 %v1900_v60  ;;  %v1553_v45 = vsel %vm552_vm0, %v5900_v44, 0.0  ;;  %v5776_v49 = vpop.permute.xlu0 %5775  ;;  %v5902_v51 = vpop.eup %5901 }
 0x46f   : > { %v5778_v52 = vunpack.i.h.bf16 %v5776_v49  ;;  %v5777_v53 = vunpack.i.l.bf16 %v5776_v49  ;;  %v5904_v55 = vpop.eup %5903 }
 0x471   : > { %1551 = vadd.xlane.f32.xlu0 %v1550_v41  ;;  %v5514_v62 = vpack.c.bf16 %v5778_v52, %v5777_v53 }
 0x472   : > { %1548 = vadd.xlane.f32.xlu1 %v1547_v43 }
 0x475   : > { %1557 = vadd.xlane.f32.xlu0 %v1556_v42 }
 0x476   : > { %1554 = vadd.xlane.f32.xlu1 %v1553_v45 }
 0x487   : > { %5780 = vrot.lane.b32.xlu1 %v6201_v16, %s6930_s0 }
 0x48b   : > { %5785 = vrot.lane.b32.xlu0 %v6213_v20, %s6930_s0  ;;  %v5906_v20 = vpop.eup %5905 }
 0x48c   : > { %v5908_v0 = vpop.eup %5907 }
 0x4a1   : > { %v5152_v50 = vpop.f32.mrb[12].mxu0 }
 0x4a2   : > { %v1278_v54 = vpop.f32.mrb[13].mxu0  ;;  %v1300_v57 = vmul.f32 %v5904_v55, %v5152_v50  ;;  %v653_v50 = vld [vmem:[%s6914_s4 + $0x18] sm:$0xff] }
 0x4a3   : > { %v1298_v56 = vmul.f32 %v5902_v51, %v1278_v54 }
 0x4a5   : > { %v5155_v16 = vpop.f32.mrb[14].mxu0  ;;  %5158 = vmatprep.mubr.msk.f32.mxu0 %vm673_vm1, %v1298_v56 }
 0x4a6   : > { %v1288_v58 = vpop.f32.mrb[15].mxu0  ;;  %5159 = vmatmul.mubr.msk.f32.vlgmr.msra.gmra.mrb[8].mxu0 %vm673_vm1, %v1300_v57  ;;  %v1304_v12 = vmul.f32 %v5908_v0, %v5155_v16 }
 0x4a7   : > { %v1302_v1 = vmul.f32 %v5906_v20, %v1288_v58  ;;  %5513 = vmatpush3.bf16.msra.mxu0 %v5510_v33 }
 0x4a8   : > { %5515 = vmatprep.subr.bf16.mxu0 %v5514_v62 }
 0x4a9   : > { %5161 = vmatprep.mubr.msk.f32.mxu0 %vm673_vm1, %v1302_v1 }
 0x4aa   : > { %5162 = vmatmul.mubr.msk.f32.gmra.mrb[10].mxu0 %vm673_vm1, %v1304_v12 }
 0x4ab   : > { %5517 = vmatpush3.bf16.msra.mxu0 %v5514_v62  ;;  %5186 = vmatprep.mubr.msk.f32.mxu0 %vm552_vm0, %v5896_v61 }
 0x4ac   : > { %5192 = vmatprep.subr.mxu0 %v652_v2 }
 0x4ae   : > { %5187 = vmatmul.mubr.msk.f32.vlgmr.msra.gmra.mrb[16].mxu0 %vm552_vm0, %v5894_v40 }
 0x4af   : > { %5189 = vmatprep.mubr.msk.f32.mxu0 %vm552_vm0, %v5900_v44  ;;  %5193 = vmatpush3.msra.mxu0 %v652_v2 }
 0x4b2   : > { %5190 = vmatmul.mubr.msk.f32.gmra.mrb[18].mxu0 %vm552_vm0, %v5898_v63 }
 0x4f6   : > { %v1899_v3 = vpop.xlane.xlu0 %1898 }
 0x4f7   : > { %v1907_v4 = vsub.f32 %v6395_v30, %v1899_v3  ;;  %v1896_v5 = vpop.xlane.xlu1 %1895 }
 0x4f8   : > { %v1906_v8 = vsub.f32 %v6398_v32, %v1896_v5 }
 0x4f9   : > { %v1912_v17 = vmul.f32 1.442695, %v1907_v4  ;;  %v4685_v4 = vld [vmem:[%s6915_s5] ss:$0 sm:$0xff] }
 0x4fa   : > { %v1910_v10 = vmul.f32 1.442695, %v1906_v8  ;;  %v1905_v14 = vpop.xlane.xlu0 %1904 }
 0x4fb   : > { %5909 = vpow2.f32 %v1912_v17  ;;  %v1909_v11 = vsub.f32 %v6403_v36, %v1905_v14  ;;  %v1902_v13 = vpop.xlane.xlu1 %1901 }
 0x4fc   : > { %5911 = vpow2.f32 %v1910_v10  ;;  %v1908_v19 = vsub.f32 %v6408_v38, %v1902_v13 }
 0x4fd   : > { %v1916_v15 = vmul.f32 1.442695, %v1909_v11 }
 0x4fe   : > { %v1914_v18 = vmul.f32 1.442695, %v1908_v19  ;;  %v1552_v36 = vpop.xlane.xlu0 %1551 }
 0x4ff   : > { %5913 = vpow2.f32 %v1916_v15  ;;  %v1549_v21 = vpop.xlane.xlu1 %1548 }
 0x500   : > { %5915 = vpow2.f32 %v1914_v18 }
 0x501   : > { %5917 = vrcp.f32 %v1549_v21 }
 0x502   : > { %5919 = vrcp.f32 %v1552_v36  ;;  %v1558_v37 = vpop.xlane.xlu0 %1557 }
 0x503   : > { %v1555_v22 = vpop.xlane.xlu1 %1554 }
 0x504   : > { %5921 = vrcp.f32 %v1555_v22 }
 0x505   : > { %v5910_v23 = vpop.eup %5909  ;;  %5923 = vrcp.f32 %v1558_v37 }
 0x506   : > { %v5912_v25 = vpop.eup %5911  ;;  %v1921_v26 = vsel %vm552_vm0, %v5910_v23, 0.0  ;;  %v5786_v59 = vpop.permute.xlu0 %5785 }
 0x507   : > { %v5781_v27 = vpop.permute.xlu1 %5780  ;;  %1922 = vadd.xlane.f32.xlu0 %v1921_v26  ;;  %v1918_v28 = vsel %vm552_vm0, %v5912_v25, 0.0  ;;  %v5788_v60 = vunpack.i.h.bf16 %v5786_v59  ;;  %v5787_v40 = vunpack.i.l.bf16 %v5786_v59 }
 0x508   : > { %v5783_v29 = vunpack.i.h.bf16 %v5781_v27  ;;  %v5782_v30 = vunpack.i.l.bf16 %v5781_v27  ;;  %1919 = vadd.xlane.f32.xlu1 %v1918_v28 }
 0x509   : > { %v5914_v31 = vpop.eup %5913  ;;  %v5534_v46 = vpack.c.bf16 %v5788_v60, %v5787_v40 }
 0x50a   : > { %v5916_v32 = vpop.eup %5915  ;;  %v1927_v33 = vsel %vm552_vm0, %v5914_v31, 0.0  ;;  %v5530_v34 = vpack.c.bf16 %v5783_v29, %v5782_v30 }
 0x50b   : > { %1928 = vadd.xlane.f32.xlu0 %v1927_v33  ;;  %v1924_v35 = vsel %vm552_vm0, %v5916_v32, 0.0  ;;  %v5918_v39 = vpop.eup %5917 }
 0x50c   : > { %1925 = vadd.xlane.f32.xlu1 %v1924_v35  ;;  %5531 = vmatprep.subr.bf16.mxu0 %v5530_v34  ;;  %v5920_v41 = vpop.eup %5919 }
 0x50e   : > { %v5922_v42 = vpop.eup %5921 }
 0x50f   : > { %v5924_v47 = vpop.eup %5923 }
 0x581   : > { %v5188_v38 = vpop.f32.mrb[16].mxu0 }
 0x582   : > { %v1649_v61 = vpop.f32.mrb[17].mxu0  ;;  %v1671_v43 = vmul.f32 %v5920_v41, %v5188_v38 }
 0x583   : > { %v1669_v63 = vmul.f32 %v5918_v39, %v1649_v61 }
 0x585   : > { %v5191_v44 = vpop.f32.mrb[18].mxu0  ;;  %5194 = vmatprep.mubr.msk.f32.mxu0 %vm673_vm1, %v1669_v63 }
 0x586   : > { %v1659_v45 = vpop.f32.mrb[19].mxu0  ;;  %5195 = vmatmul.mubr.msk.f32.vlgmr.msra.gmra.mrb[8].mxu0 %vm673_vm1, %v1671_v43  ;;  %v1675_v49 = vmul.f32 %v5924_v47, %v5191_v44  ;;  %v2227_v43 = vld [vmem:[%s6918_s8] sm:$0xff]  ;;  %v2228_v44 = vld [vmem:[%s6918_s8 + $0x8] sm:$0xff] }
 0x587   : > { %v1673_v48 = vmul.f32 %v5922_v42, %v1659_v45  ;;  %5533 = vmatpush3.bf16.msra.mxu0 %v5530_v34  ;;  %v5538_v42 = vpack.c.bf16 %v2228_v44, %v2227_v43  ;;  %v2229_v45 = vld [vmem:[%s6918_s8 + $0x10] sm:$0xff] }
 0x588   : > { %5535 = vmatprep.subr.bf16.mxu0 %v5534_v46 }
 0x589   : > { %5197 = vmatprep.mubr.msk.f32.mxu0 %vm673_vm1, %v1673_v48  ;;  %5539 = vmatprep.subr.bf16.mxu1 %v5538_v42  ;;  %v2339_v48 = vld [vmem:[%s6920_s10] sm:$0xff] }
 0x58a   : > { %5198 = vmatmul.mubr.msk.f32.gmra.mrb[10].mxu0 %vm673_vm1, %v1675_v49  ;;  %5541 = vmatpush3.bf16.msra.mxu1 %v5538_v42  ;;  %v2340_v49 = vld [vmem:[%s6920_s10 + $0x8] sm:$0xff] }
 0x58b   : > { %5537 = vmatpush3.bf16.msra.mxu0 %v5534_v46  ;;  %5222 = vmatprep.mubr.msk.f32.mxu0 %vm552_vm0, %v5912_v25  ;;  %v6037_v25 = vld [vmem:[%s6171_s20 + $0x10] sm:$0xff]  ;;  %v2230_v46 = vld [vmem:[%s6918_s8 + $0x18] sm:$0xff]  ;;  %s6951_s20 = smov 48  }
 0x58c   : > { %5228 = vmatprep.subr.mxu0 %v653_v50  ;;  %v5542_v47 = vpack.c.bf16 %v2230_v46, %v2229_v45 }
 0x58e   : > { %5223 = vmatmul.mubr.msk.f32.vlgmr.msra.gmra.mrb[20].mxu0 %vm552_vm0, %v5910_v23  ;;  %5543 = vmatprep.subr.bf16.mxu1 %v5542_v47 }
 0x58f   : > { %5225 = vmatprep.mubr.msk.f32.mxu0 %vm552_vm0, %v5916_v32  ;;  %5229 = vmatpush3.msra.mxu0 %v653_v50  ;;  %v5546_v50 = vpack.c.bf16 %v2340_v49, %v2339_v48 }
 0x590   : > { %5545 = vmatpush3.bf16.msra.mxu1 %v5542_v47 }
 0x591   : > { %5547 = vmatprep.subr.bf16.mxu0 %v5546_v50 }
 0x592   : > { %5226 = vmatmul.mubr.msk.f32.gmra.mrb[22].mxu0 %vm552_vm0, %v5914_v31 }
 0x594   : > { %v1923_v52 = vpop.xlane.xlu0 %1922 }
 0x595   : > { %v1920_v51 = vpop.xlane.xlu1 %1919 }
 0x596   : > { %5925 = vrcp.f32 %v1920_v51 }
 0x597   : > { %5927 = vrcp.f32 %v1923_v52 }
 0x598   : > { %v1929_v54 = vpop.xlane.xlu0 %1928 }
 0x599   : > { %v1926_v53 = vpop.xlane.xlu1 %1925 }
 0x59a   : > { %5929 = vrcp.f32 %v1926_v53 }
 0x59b   : > { %5931 = vrcp.f32 %v1929_v54 }
 0x5a0   : > { %v5926_v56 = vpop.eup %5925 }
 0x5a1   : > { %v5928_v16 = vpop.eup %5927 }
 0x5a4   : > { %v5930_v0 = vpop.eup %5929 }
 0x5a5   : > { %v5932_v12 = vpop.eup %5931 }
 0x661   : > { %v5224_v55 = vpop.f32.mrb[20].mxu0 }
 0x662   : > { %v2020_v57 = vpop.f32.mrb[21].mxu0  ;;  %v2042_v58 = vmul.f32 %v5928_v16, %v5224_v55 }
 0x663   : > { %v2040_v20 = vmul.f32 %v5926_v56, %v2020_v57 }
 0x665   : > { %v5227_v62 = vpop.f32.mrb[22].mxu0  ;;  %5230 = vmatprep.mubr.msk.f32.mxu0 %vm673_vm1, %v2040_v20 }
 0x666   : > { %v2030_v1 = vpop.f32.mrb[23].mxu0  ;;  %5231 = vmatmul.mubr.msk.f32.vlgmr.msra.gmra.mrb[8].mxu0 %vm673_vm1, %v2042_v58  ;;  %v2046_v3 = vmul.f32 %v5932_v12, %v5227_v62  ;;  %v4734_v12 = vld [vmem:[%s6916_s6] ss:$0 sm:$0xff] }
 0x667   : > { %v2044_v2 = vmul.f32 %v5930_v0, %v2030_v1  ;;  %5549 = vmatpush3.bf16.msra.mxu0 %v5546_v50 }
 0x669   : > { %5233 = vmatprep.mubr.msk.f32.mxu0 %vm673_vm1, %v2044_v2 }
 0x66a   : > { %5234 = vmatmul.mubr.msk.f32.gmra.mrb[10].mxu0 %vm673_vm1, %v2046_v3 }
 0x739   : > { %v5232_v5 = vpop.f32.mrb[8].mxu0 }
 0x73a   : > { %v5658_v8 = vadd.f32 %v5232_v5, %v4685_v4  ;;  %v2125_v17 = vpop.f32.mrb[9].mxu0  ;;  %v4735_v5 = vld [vmem:[%s6917_s7] ss:$0 sm:$0xff] }
 0x73b   : > { %v5659_v10 = vadd.f32 %v4685_v4, %v2125_v17 }
 0x73c   : > { %v2149_v14 = vadd.f32 %v5658_v8, %v6179_v7 }
 0x73d   : > { %v5235_v11 = vpop.f32.mrb[10].mxu0  ;;  %v2148_v13 = vadd.f32 %v5659_v10, %v6174_v6 }
 0x73e   : > { %v5660_v19 = vadd.f32 %v5235_v11, %v4685_v4  ;;  %v2135_v15 = vpop.f32.mrb[11].mxu0  ;;  %v2157_v18 = vsel %vm552_vm0, %v2149_v14, 0.0 }
 0x73f   : > { %v5661_v21 = vadd.f32 %v4685_v4, %v2135_v15  ;;  %2158 = vadd.xlane.f32.xlu0 %v2157_v18  ;;  %v2154_v22 = vsel %vm552_vm0, %v2148_v13, 0.0 }
 0x740   : > { %2155 = vadd.xlane.f32.xlu1 %v2154_v22  ;;  %v2151_v23 = vadd.f32 %v5660_v19, %v6186_v9 }
 0x741   : > { %v2150_v26 = vadd.f32 %v6037_v25, %v5661_v21  ;;  %v2341_v25 = vld [vmem:[%s6920_s10 + $0x10] sm:$0xff] }
 0x742   : > { %v2163_v27 = vsel %vm552_vm0, %v2151_v23, 0.0 }
 0x743   : > { %2164 = vadd.xlane.f32.xlu0 %v2163_v27  ;;  %v2160_v7 = vsel %vm552_vm0, %v2150_v26, 0.0 }
 0x744   : > { %2161 = vadd.xlane.f32.xlu1 %v2160_v7  ;;  %v4736_v7 = vld [vmem:[%s6919_s9] ss:$0 sm:$0xff] }
 0x7cc   : > { %v2159_v6 = vpop.xlane.xlu0 %2158 }
 0x7cd   : > { %v2168_v28 = vmul.f32 0.03125, %v2159_v6  ;;  %v2156_v29 = vpop.xlane.xlu1 %2155 }
 0x7ce   : > { %v2167_v30 = vmul.f32 0.03125, %v2156_v29 }
 0x7cf   : > { %v2172_v31 = vsub.f32 %v2149_v14, %v2168_v28 }
 0x7d0   : > { %v2171_v32 = vsub.f32 %v2148_v13, %v2167_v30  ;;  %v2165_v33 = vpop.xlane.xlu0 %2164 }
 0x7d1   : > { %v2170_v34 = vmul.f32 0.03125, %v2165_v33  ;;  %v2162_v35 = vpop.xlane.xlu1 %2161  ;;  %v2176_v36 = vmul.f32 %v2172_v31, %v2172_v31 }
 0x7d2   : > { %v2169_v37 = vmul.f32 0.03125, %v2162_v35  ;;  %v2175_v9 = vmul.f32 %v2171_v32, %v2171_v32 }
 0x7d3   : > { %v2174_v59 = vsub.f32 %v2151_v23, %v2170_v34  ;;  %v2182_v38 = vsel %vm552_vm0, %v2176_v36, 0.0 }
 0x7d4   : > { %v2173_v39 = vsub.f32 %v2150_v26, %v2169_v37  ;;  %2183 = vadd.xlane.f32.xlu0 %v2182_v38  ;;  %v2179_v60 = vsel %vm552_vm0, %v2175_v9, 0.0  ;;  %v2342_v26 = vld [vmem:[%s6920_s10 + $0x18] sm:$0xff] }
 0x7d5   : > { %2180 = vadd.xlane.f32.xlu1 %v2179_v60  ;;  %v2178_v40 = vmul.f32 %v2174_v59, %v2174_v59  ;;  %v5550_v27 = vpack.c.bf16 %v2342_v26, %v2341_v25 }
 0x7d6   : > { %v2177_v61 = vmul.f32 %v2173_v39, %v2173_v39 }
 0x7d7   : > { %v2188_v41 = vsel %vm552_vm0, %v2178_v40, 0.0  ;;  %5551 = vmatprep.subr.bf16.mxu0 %v5550_v27 }
 0x7d8   : > { %2189 = vadd.xlane.f32.xlu0 %v2188_v41  ;;  %v2185_v63 = vsel %vm552_vm0, %v2177_v61, 0.0  ;;  %5553 = vmatpush3.bf16.msra.mxu0 %v5550_v27 }
 0x7d9   : > { %2186 = vadd.xlane.f32.xlu1 %v2185_v63 }
 0x861   : > { %v2184_v51 = vpop.xlane.xlu0 %2183 }
 0x862   : > { %v2192_v52 = vmul.f32 0.03125, %v2184_v51  ;;  %v2181_v53 = vpop.xlane.xlu1 %2180 }
 0x863   : > { %v2191_v54 = vmul.f32 0.03125, %v2181_v53 }
 0x864   : > { %v2196_v55 = vadd.f32 1e-05, %v2192_v52 }
 0x865   : > { %v2195_v56 = vadd.f32 1e-05, %v2191_v54  ;;  %v2190_v57 = vpop.xlane.xlu0 %2189 }
 0x866   : > { %5933 = vrsqrt.f32 %v2196_v55  ;;  %v2194_v16 = vmul.f32 0.03125, %v2190_v57  ;;  %v2187_v20 = vpop.xlane.xlu1 %2186 }
 0x867   : > { %5935 = vrsqrt.f32 %v2195_v56  ;;  %v2193_v58 = vmul.f32 0.03125, %v2187_v20 }
 0x868   : > { %v2198_v62 = vadd.f32 1e-05, %v2194_v16 }
 0x869   : > { %v2197_v0 = vadd.f32 1e-05, %v2193_v58 }
 0x86a   : > { %5937 = vrsqrt.f32 %v2198_v62 }
 0x86b   : > { %5939 = vrsqrt.f32 %v2197_v0 }
 0x870   : > { %v5934_v1 = vpop.eup %5933 }
 0x871   : > { %v5936_v2 = vpop.eup %5935  ;;  %v2204_v3 = vmul.f32 %v5934_v1, %v2172_v31 }
 0x872   : > { %v2203_v4 = vmul.f32 %v5936_v2, %v2171_v32 }
 0x873   : > { %v2214_v8 = vmul.f32 %v4734_v12, %v2204_v3 }
 0x874   : > { %v5938_v17 = vpop.eup %5937  ;;  %v2213_v10 = vmul.f32 %v4734_v12, %v2203_v4 }
 0x875   : > { %v5940_v14 = vpop.eup %5939  ;;  %v2206_v11 = vmul.f32 %v5938_v17, %v2174_v59  ;;  %v2224_v15 = vadd.f32 %v4735_v5, %v2214_v8  ;;  %v4741_v59 = vld [vmem:[%s6921_s11] ss:$0 sm:$0xff] }
 0x876   : > { %v2223_v13 = vadd.f32 %v4735_v5, %v2213_v10  ;;  %v2205_v19 = vmul.f32 %v5940_v14, %v2173_v39  ;;  %v4748_v10 = vld [vmem:[%s6912_s2 + $0x20] sm:$0xff]  ;;  %v4749_v14 = vld [vmem:[%s6912_s2 + $0x28] sm:$0xff] }
 0x877   : > { %v2216_v18 = vmul.f32 %v4734_v12, %v2206_v11  ;;  %v5554_v11 = vpack.c.bf16 %v4749_v14, %v4748_v10 }
 0x878   : > { %5244 = vmatprep.mubr.msk.f32.mxu1 %vm552_vm0, %v2223_v13  ;;  %v2215_v21 = vmul.f32 %v4734_v12, %v2205_v19  ;;  %v4751_v19 = vld [vmem:[%s6912_s2 + $0x38] sm:$0xff] }
 0x879   : > { %5245 = vmatmul.mubr.msk.f32.vlgmr.msra.gmra.mrb[16].mxu1 %vm552_vm0, %v2224_v15  ;;  %v2226_v23 = vadd.f32 %v4735_v5, %v2216_v18  ;;  %5555 = vmatprep.subr.bf16.mxu1 %v5554_v11 }
 0x87a   : > { %v2225_v22 = vadd.f32 %v4735_v5, %v2215_v21  ;;  %5557 = vmatpush3.bf16.msra.mxu1 %v5554_v11 }
 0x87c   : > { %5247 = vmatprep.mubr.msk.f32.mxu1 %vm552_vm0, %v2225_v22 }
 0x87d   : > { %5248 = vmatmul.mubr.msk.f32.gmra.mrb[18].mxu1 %vm552_vm0, %v2226_v23 }
 0x94c   : > { %v5246_v6 = vpop.f32.mrb[16].mxu1 }
 0x94d   : > { %v2322_v28 = vadd.f32 %v5246_v6, %v4736_v7  ;;  %v2316_v29 = vpop.f32.mrb[17].mxu1 }
 0x94e   : > { %v2317_v30 = vadd.f32 %v4736_v7, %v2316_v29 }
 0x94f   : > { %v2336_v33 = vmax.f32 %v2322_v28, 0.0 }
 0x950   : > { %v2335_v31 = vmax.f32 %v2317_v30, 0.0  ;;  %v5249_v32 = vpop.f32.mrb[18].mxu1 }
 0x951   : > { %v2332_v34 = vadd.f32 %v5249_v32, %v4736_v7  ;;  %v2326_v35 = vpop.f32.mrb[19].mxu1  ;;  %v4746_v32 = vld [vmem:[%s6922_s12] ss:$0 sm:$0xff] }
 0x952   : > { %v2327_v36 = vadd.f32 %v4736_v7, %v2326_v35  ;;  %5258 = vmatprep.mubr.msk.f32.mxu0 %vm552_vm0, %v2335_v31 }
 0x953   : > { %5259 = vmatmul.mubr.msk.f32.vlgmr.msra.gmra.mrb[24].mxu0 %vm552_vm0, %v2336_v33  ;;  %v2338_v9 = vmax.f32 %v2332_v34, 0.0 }
 0x954   : > { %v2337_v37 = vmax.f32 %v2327_v36, 0.0  ;;  %v4747_v36 = vld [vmem:[%s6923_s13] ss:$0 sm:$0xff] }
 0x956   : > { %5261 = vmatprep.mubr.msk.f32.mxu0 %vm552_vm0, %v2337_v37 }
 0x957   : > { %5262 = vmatmul.mubr.msk.f32.gmra.mrb[26].mxu0 %vm552_vm0, %v2338_v9 }
 0xa26   : > { %v5260_v38 = vpop.f32.mrb[24].mxu0 }
 0xa27   : > { %v2434_v39 = vadd.f32 %v5260_v38, %v4741_v59  ;;  %v2428_v60 = vpop.f32.mrb[25].mxu0 }
 0xa28   : > { %v2429_v40 = vadd.f32 %v4741_v59, %v2428_v60 }
 0xa29   : > { %v2448_v61 = vadd.f32 %v2434_v39, %v2224_v15 }
 0xa2a   : > { %v5263_v41 = vpop.f32.mrb[26].mxu0  ;;  %v2447_v63 = vadd.f32 %v2429_v40, %v2223_v13  ;;  %v4750_v13 = vld [vmem:[%s6912_s2 + $0x30] sm:$0xff] }
 0xa2b   : > { %v2444_v43 = vadd.f32 %v5263_v41, %v4741_v59  ;;  %v2438_v44 = vpop.f32.mrb[27].mxu0  ;;  %v2456_v42 = vsel %vm552_vm0, %v2448_v61, 0.0  ;;  %v5558_v15 = vpack.c.bf16 %v4751_v19, %v4750_v13 }
 0xa2c   : > { %v2439_v45 = vadd.f32 %v4741_v59, %v2438_v44  ;;  %2457 = vadd.xlane.f32.xlu0 %v2456_v42  ;;  %v2453_v46 = vsel %vm552_vm0, %v2447_v63, 0.0  ;;  %v4753_v42 = vld [vmem:[%s6913_s3 + $0x1] ss:$0 sm:$0xff] }
 0xa2d   : > { %2454 = vadd.xlane.f32.xlu1 %v2453_v46  ;;  %v2450_v47 = vadd.f32 %v2444_v43, %v2226_v23  ;;  %5559 = vmatprep.subr.bf16.mxu1 %v5558_v15 }
 0xa2e   : > { %v2449_v48 = vadd.f32 %v2439_v45, %v2225_v22  ;;  %5561 = vmatpush3.bf16.msra.mxu1 %v5558_v15  ;;  %v6621_v15 = vld [vmem:[%s6263_s30] ss:$0 sm:$0xff] }
 0xa2f   : > { %v2462_v49 = vsel %vm552_vm0, %v2450_v47, 0.0 }
 0xa30   : > { %2463 = vadd.xlane.f32.xlu0 %v2462_v49  ;;  %v2459_v50 = vsel %vm552_vm0, %v2449_v48, 0.0 }
 0xa31   : > { %2460 = vadd.xlane.f32.xlu1 %v2459_v50 }
 0xab9   : > { %v2458_v51 = vpop.xlane.xlu0 %2457 }
 0xaba   : > { %v2466_v52 = vmul.f32 0.03125, %v2458_v51  ;;  %v2455_v53 = vpop.xlane.xlu1 %2454 }
 0xabb   : > { %v2465_v54 = vmul.f32 0.03125, %v2455_v53 }
 0xabc   : > { %v2470_v55 = vsub.f32 %v2448_v61, %v2466_v52 }
 0xabd   : > { %v2469_v56 = vsub.f32 %v2447_v63, %v2465_v54  ;;  %v2464_v57 = vpop.xlane.xlu0 %2463 }
 0xabe   : > { %v2468_v16 = vmul.f32 0.03125, %v2464_v57  ;;  %v2461_v20 = vpop.xlane.xlu1 %2460  ;;  %v2474_v58 = vmul.f32 %v2470_v55, %v2470_v55 }
 0xabf   : > { %v2467_v62 = vmul.f32 0.03125, %v2461_v20  ;;  %v2473_v0 = vmul.f32 %v2469_v56, %v2469_v56 }
 0xac0   : > { %v2472_v1 = vsub.f32 %v2450_v47, %v2468_v16  ;;  %v2480_v12 = vsel %vm552_vm0, %v2474_v58, 0.0 }
 0xac1   : > { %v2471_v2 = vsub.f32 %v2449_v48, %v2467_v62  ;;  %2481 = vadd.xlane.f32.xlu0 %v2480_v12  ;;  %v2477_v3 = vsel %vm552_vm0, %v2473_v0, 0.0 }
 0xac2   : > { %2478 = vadd.xlane.f32.xlu1 %v2477_v3  ;;  %v2476_v4 = vmul.f32 %v2472_v1, %v2472_v1 }
 0xac3   : > { %v2475_v5 = vmul.f32 %v2471_v2, %v2471_v2 }
 0xac4   : > { %v2486_v8 = vsel %vm552_vm0, %v2476_v4, 0.0 }
 0xac5   : > { %2487 = vadd.xlane.f32.xlu0 %v2486_v8  ;;  %v2483_v17 = vsel %vm552_vm0, %v2475_v5, 0.0 }
 0xac6   : > { %2484 = vadd.xlane.f32.xlu1 %v2483_v17 }
 0xb4e   : > { %v2482_v18 = vpop.xlane.xlu0 %2481 }
 0xb4f   : > { %v2490_v21 = vmul.f32 0.03125, %v2482_v18  ;;  %v2479_v22 = vpop.xlane.xlu1 %2478 }
 0xb50   : > { %v2489_v23 = vmul.f32 0.03125, %v2479_v22 }
 0xb51   : > { %v2494_v25 = vadd.f32 1e-05, %v2490_v21 }
 0xb52   : > { %v2493_v26 = vadd.f32 1e-05, %v2489_v23  ;;  %v2488_v27 = vpop.xlane.xlu0 %2487 }
 0xb53   : > { %5941 = vrsqrt.f32 %v2494_v25  ;;  %v2492_v7 = vmul.f32 0.03125, %v2488_v27  ;;  %v2485_v6 = vpop.xlane.xlu1 %2484 }
 0xb54   : > { %5943 = vrsqrt.f32 %v2493_v26  ;;  %v2491_v28 = vmul.f32 0.03125, %v2485_v6 }
 0xb55   : > { %v2496_v29 = vadd.f32 1e-05, %v2492_v7 }
 0xb56   : > { %v2495_v30 = vadd.f32 1e-05, %v2491_v28 }
 0xb57   : > { %5945 = vrsqrt.f32 %v2496_v29 }
 0xb58   : > { %5947 = vrsqrt.f32 %v2495_v30 }
 0xb5d   : > { %v5942_v31 = vpop.eup %5941 }
 0xb5e   : > { %v5944_v33 = vpop.eup %5943  ;;  %v2502_v34 = vmul.f32 %v5942_v31, %v2470_v55 }
 0xb5f   : > { %v2501_v35 = vmul.f32 %v5944_v33, %v2469_v56 }
 0xb60   : > { %v2512_v37 = vmul.f32 %v4746_v32, %v2502_v34 }
 0xb61   : > { %v5946_v9 = vpop.eup %5945  ;;  %v2511_v59 = vmul.f32 %v4746_v32, %v2501_v35 }
 0xb62   : > { %v5948_v38 = vpop.eup %5947  ;;  %v2504_v39 = vmul.f32 %v5946_v9, %v2472_v1  ;;  %v6543_v61 = vadd.f32 %v4747_v36, %v2512_v37 }
 0xb63   : > { %v6541_v60 = vadd.f32 %v4747_v36, %v2511_v59  ;;  %v2503_v40 = vmul.f32 %v5948_v38, %v2471_v2 }
 0xb64   : > { %v2514_v41 = vmul.f32 %v4746_v32, %v2504_v39 }
 0xb65   : > { %5272 = vmatprep.mubr.msk.f32.mxu1 %vm552_vm0, %v6541_v60  ;;  %v2513_v63 = vmul.f32 %v4746_v32, %v2503_v40 }
 0xb66   : > { %5273 = vmatmul.mubr.msk.f32.vlgmr.msra.gmra.mrb[20].mxu1 %vm552_vm0, %v6543_v61  ;;  %v6551_v44 = vadd.f32 %v4747_v36, %v2514_v41 }
 0xb67   : > { %v6549_v43 = vadd.f32 %v4747_v36, %v2513_v63 }
 0xb69   : > { %5275 = vmatprep.mubr.msk.f32.mxu1 %vm552_vm0, %v6549_v43 }
 0xb6a   : > { %5276 = vmatmul.mubr.msk.f32.gmra.mrb[22].mxu1 %vm552_vm0, %v6551_v44 }
 0xc39   : > { %v5274_v45 = vpop.f32.mrb[20].mxu1 }
 0xc3a   : > { %v6560_v46 = vadd.f32 %v5274_v45, %v4753_v42  ;;  %v2616_v47 = vpop.f32.mrb[21].mxu1 }
 0xc3b   : > { %v6562_v48 = vadd.f32 %v4753_v42, %v2616_v47 }
 0xc3d   : > { %v5277_v49 = vpop.f32.mrb[22].mxu1  ;;  %5286 = vmatprep.mubr.msk.f32.mxu0 %vm673_vm1, %v6562_v48  ;;  %v6568_v50 = vpack.i.bf16 %v6560_v46, %v6562_v48 }
 0xc3e   : > { %v6570_v51 = vadd.f32 %v5277_v49, %v4753_v42  ;;  %v2626_v52 = vpop.f32.mrb[23].mxu1 }
 0xc3f   : > { %v6572_v53 = vadd.f32 %v4753_v42, %v2626_v52  ;;  %5790 = vrot.lane.b32.xlu1 %v6568_v50, %s6048_s26 }
 0xc41   : > { %v6578_v54 = vpack.i.bf16 %v6570_v51, %v6572_v53 }
 0xc43   : > { %5800 = vrot.lane.b32.xlu1 %v6568_v50, %s6047_s25  ;;  %5795 = vrot.lane.b32.xlu0 %v6578_v54, %s6048_s26  ;;  %s6947_s26 = smov 112  }
 0xc47   : > { %5805 = vrot.lane.b32.xlu1 %v6578_v54, %s6047_s25  ;;  %3015 = vrot.lane.b32.xlu0 %v6562_v48, %s6049_s27  ;;  %s6946_s25 = smov 80  }
 0xc4b   : > { %3017 = vrot.lane.b32.xlu1 %v6560_v46, %s6049_s27  ;;  %3019 = vrot.lane.b32.xlu0 %v6572_v53, %s6049_s27 }
 0xc4f   : > { %3021 = vrot.lane.b32.xlu1 %v6570_v51, %s6049_s27  ;;  %s6948_s27 = smov 56  }
 0xcb1   : > { %v5791_v55 = vpop.permute.xlu1 %5790 }
 0xcb2   : > { %v5793_v56 = vunpack.i.h.bf16 %v5791_v55  ;;  %v5792_v57 = vunpack.i.l.bf16 %v5791_v55 }
 0xcb4   : > { %v5562_v16 = vpack.c.bf16 %v5793_v56, %v5792_v57 }
 0xcb5   : > { %v5796_v20 = vpop.permute.xlu0 %5795  ;;  %v5801_v0 = vpop.permute.xlu1 %5800 }
 0xcb6   : > { %v5798_v58 = vunpack.i.h.bf16 %v5796_v20  ;;  %v5797_v62 = vunpack.i.l.bf16 %v5796_v20  ;;  %5564 = vmatprep.subr.msk.bf16.mxu0 %vm6229_vm2, %v5562_v16  ;;  %v5803_v12 = vunpack.i.h.bf16 %v5801_v0  ;;  %v5802_v2 = vunpack.i.l.bf16 %v5801_v0 }
 0xcb7   : > { %5567 = vmatpush3.bf16.xpose.msk.msra.mxu0 %vm6229_vm2, %v5562_v16 }
 0xcb8   : > { %v5568_v1 = vpack.c.bf16 %v5798_v58, %v5797_v62  ;;  %v5582_v3 = vpack.c.bf16 %v5803_v12, %v5802_v2 }
 0xcb9   : > { %v5806_v4 = vpop.permute.xlu1 %5805  ;;  %v3016_v10 = vpop.permute.xlu0 %3015 }
 0xcba   : > { %5570 = vmatprep.subr.msk.bf16.mxu0 %vm6229_vm2, %v5568_v1  ;;  %v5808_v5 = vunpack.i.h.bf16 %v5806_v4  ;;  %v5807_v8 = vunpack.i.l.bf16 %v5806_v4 }
 0xcbc   : > { %v5588_v17 = vpack.c.bf16 %v5808_v5, %v5807_v8 }
 0xcbd   : > { %v3018_v14 = vpop.permute.xlu1 %3017  ;;  %v3020_v11 = vpop.permute.xlu0 %3019 }
 0xcbf   : > { %5573 = vmatpush3.bf16.xpose.msk.msra.mxu0 %vm6229_vm2, %v5568_v1 }
 0xcc0   : > { %5584 = vmatprep.subr.msk.bf16.mxu0 %vm6229_vm2, %v5582_v3 }
 0xcc1   : > { %v3022_v13 = vpop.permute.xlu1 %3021 }
 0xcc6   : > { %5287 = vmatmul.mubr.msk.f32.vlgmr.msra.gmra.mrb[28].mxu0 %vm673_vm1, %v6560_v46 }
 0xcc7   : > { %5289 = vmatprep.mubr.msk.f32.mxu0 %vm673_vm1, %v6572_v53  ;;  %5587 = vmatpush3.bf16.xpose.msk.msra.mxu0 %vm6229_vm2, %v5582_v3 }
 0xcc8   : > { %5590 = vmatprep.subr.msk.bf16.mxu0 %vm6229_vm2, %v5588_v17 }
 0xcca   : > { %5290 = vmatmul.mubr.msk.f32.gmra.mrb[30].mxu0 %vm673_vm1, %v6570_v51 }
 0xccb   : > { %5322 = vmatprep.mubr.msk.f32.mxu0 %vm673_vm1, %v3016_v10 }
 0xccf   : > { %5593 = vmatpush3.bf16.xpose.msk.msra.mxu0 %vm6229_vm2, %v5588_v17 }
 0xcd6   : > { %5323 = vmatmul.mubr.msk.f32.vlgmr.msra.gmra.mrb[32].mxu0 %vm673_vm1, %v3018_v14 }
 0xcd7   : > { %5325 = vmatprep.mubr.msk.f32.mxu0 %vm673_vm1, %v3020_v11 }
 0xcda   : > { %5326 = vmatmul.mubr.msk.f32.gmra.mrb[34].mxu0 %vm673_vm1, %v3022_v13 }
 0xd99   : > { %v5288_v19 = vpop.f32.mrb[28].mxu0 }
 0xd9a   : > { %v2742_v18 = vadd.f32 %v6621_v15, %v5288_v19  ;;  %v2736_v21 = vpop.f32.mrb[29].mxu0 }
 0xd9b   : > { %v2737_v22 = vadd.f32 %v6621_v15, %v2736_v21 }
 0xd9c   : > { %v2758_v23 = vsel %vm552_vm0, %v2742_v18, -inf }
 0xd9d   : > { %2759 = vmax.xlane.f32.xlu1 %v2758_v23  ;;  %v5291_v25 = vpop.f32.mrb[30].mxu0  ;;  %v2755_v26 = vsel %vm552_vm0, %v2737_v22, -inf }
 0xd9e   : > { %v2752_v27 = vadd.f32 %v6621_v15, %v5291_v25  ;;  %v2746_v7 = vpop.f32.mrb[31].mxu0  ;;  %2756 = vmax.xlane.f32.xlu0 %v2755_v26 }
 0xd9f   : > { %v2747_v28 = vadd.f32 %v6621_v15, %v2746_v7 }
 0xda0   : > { %v2764_v6 = vsel %vm552_vm0, %v2752_v27, -inf }
 0xda1   : > { %v2761_v29 = vsel %vm552_vm0, %v2747_v28, -inf }
 0xda2   : > { %2765 = vmax.xlane.f32.xlu0 %v2764_v6 }
 0xda6   : > { %2762 = vmax.xlane.f32.xlu0 %v2761_v29 }
 0xda9   : > { %v5324_v30 = vpop.f32.mrb[32].mxu0 }
 0xdaa   : > { %v3113_v31 = vpop.f32.mrb[33].mxu0  ;;  %v6651_v35 = vadd.f32 %v6621_v15, %v5324_v30  ;;  %v4758_v30 = vld [vmem:[%s6914_s4 + $0x20] sm:$0xff] }
 0xdab   : > { %v6648_v34 = vadd.f32 %v6621_v15, %v3113_v31 }
 0xdac   : > { %v3135_v59 = vsel %vm552_vm0, %v6651_v35, -inf }
 0xdad   : > { %v5327_v32 = vpop.f32.mrb[34].mxu0  ;;  %v3132_v37 = vsel %vm552_vm0, %v6648_v34, -inf }
 0xdae   : > { %5810 = vrot.lane.b32.xlu1 %v6568_v50, %s6050_s17  ;;  %v3123_v33 = vpop.f32.mrb[35].mxu0  ;;  %v6659_v9 = vadd.f32 %v6621_v15, %v5327_v32 }
 0xdaf   : > { %v6654_v36 = vadd.f32 %v6621_v15, %v3123_v33 }
 0xdb0   : > { %v3141_v39 = vsel %vm552_vm0, %v6659_v9, -inf }
 0xdb1   : > { %v3138_v38 = vsel %vm552_vm0, %v6654_v36, -inf }
 0xdb2   : > { %5820 = vrot.lane.b32.xlu1 %v6568_v50, %s6946_s25 }
 0xdb6   : > { %5825 = vrot.lane.b32.xlu1 %v6578_v54, %s6946_s25 }
 0xdba   : > { %3388 = vrot.lane.b32.xlu1 %v6560_v46, %s6947_s26 }
 0xdbc   : > { %5815 = vrot.lane.b32.xlu0 %v6578_v54, %s6050_s17 }
 0xdbe   : > { %3392 = vrot.lane.b32.xlu1 %v6570_v51, %s6947_s26 }
 0xdc0   : > { %3386 = vrot.lane.b32.xlu0 %v6562_v48, %s6947_s26 }
 0xdc4   : > { %3390 = vrot.lane.b32.xlu0 %v6572_v53, %s6947_s26 }
 0xde2   : > { %3133 = vmax.xlane.f32.xlu1 %v3132_v37 }
 0xde3   : > { %3136 = vmax.xlane.f32.xlu0 %v3135_v59 }
 0xde6   : > { %3139 = vmax.xlane.f32.xlu1 %v3138_v38 }
 0xde7   : > { %3142 = vmax.xlane.f32.xlu0 %v3141_v39 }
 0xe2a   : > { %v2760_v40 = vpop.xlane.xlu1 %2759 }
 0xe2b   : > { %v2768_v41 = vsub.f32 %v2742_v18, %v2760_v40  ;;  %v2757_v63 = vpop.xlane.xlu0 %2756 }
 0xe2c   : > { %v2767_v42 = vsub.f32 %v2737_v22, %v2757_v63 }
 0xe2d   : > { %v2773_v45 = vmul.f32 1.442695, %v2768_v41 }
 0xe2e   : > { %v2771_v47 = vmul.f32 1.442695, %v2767_v42  ;;  %v5811_v49 = vpop.permute.xlu1 %5810 }
 0xe2f   : > { %5949 = vpow2.f32 %v2773_v45  ;;  %v5813_v52 = vunpack.i.h.bf16 %v5811_v49  ;;  %v5812_v55 = vunpack.i.l.bf16 %v5811_v49  ;;  %v2766_v56 = vpop.xlane.xlu0 %2765 }
 0xe30   : > { %5951 = vpow2.f32 %v2771_v47  ;;  %v2770_v57 = vsub.f32 %v2752_v27, %v2766_v56 }
 0xe31   : > { %v5574_v16 = vpack.c.bf16 %v5813_v52, %v5812_v55 }
 0xe32   : > { %v2777_v20 = vmul.f32 1.442695, %v2770_v57  ;;  %v5821_v58 = vpop.permute.xlu1 %5820 }
 0xe33   : > { %v5823_v62 = vunpack.i.h.bf16 %v5821_v58  ;;  %v5822_v0 = vunpack.i.l.bf16 %v5821_v58  ;;  %5575 = vmatprep.subr.bf16.mxu1 %v5574_v16  ;;  %v2763_v1 = vpop.xlane.xlu0 %2762 }
 0xe34   : > { %5953 = vpow2.f32 %v2777_v20  ;;  %v2769_v12 = vsub.f32 %v2747_v28, %v2763_v1  ;;  %5577 = vmatpush3.bf16.msra.mxu1 %v5574_v16 }
 0xe35   : > { %v5602_v2 = vpack.c.bf16 %v5823_v62, %v5822_v0 }
 0xe36   : > { %v2775_v3 = vmul.f32 1.442695, %v2769_v12  ;;  %v5826_v4 = vpop.permute.xlu1 %5825 }
 0xe37   : > { %v5828_v5 = vunpack.i.h.bf16 %v5826_v4  ;;  %v5827_v8 = vunpack.i.l.bf16 %v5826_v4  ;;  %5604 = vmatprep.subr.msk.bf16.mxu0 %vm6229_vm2, %v5602_v2  ;;  %v5816_v17 = vpop.permute.xlu0 %5815 }
 0xe38   : > { %5955 = vpow2.f32 %v2775_v3  ;;  %v5818_v10 = vunpack.i.h.bf16 %v5816_v17  ;;  %v5817_v14 = vunpack.i.l.bf16 %v5816_v17  ;;  %5607 = vmatpush3.bf16.xpose.msk.msra.mxu0 %vm6229_vm2, %v5602_v2 }
 0xe39   : > { %v5950_v11 = vpop.eup %5949  ;;  %v5608_v13 = vpack.c.bf16 %v5828_v5, %v5827_v8 }
 0xe3a   : > { %v5952_v19 = vpop.eup %5951  ;;  %v5578_v18 = vpack.c.bf16 %v5818_v10, %v5817_v14  ;;  %v2782_v21 = vsel %vm552_vm0, %v5950_v11, 0.0  ;;  %v3389_v6 = vpop.permute.xlu1 %3388 }
 0xe3b   : > { %5610 = vmatprep.subr.msk.bf16.mxu0 %vm6229_vm2, %v5608_v13  ;;  %2783 = vadd.xlane.f32.xlu1 %v2782_v21  ;;  %v3387_v22 = vpop.permute.xlu0 %3386  ;;  %v2779_v23 = vsel %vm552_vm0, %v5952_v19, 0.0 }
 0xe3c   : > { %5300 = vmatprep.mubr.msk.f32.mxu1 %vm552_vm0, %v5952_v19  ;;  %2780 = vadd.xlane.f32.xlu0 %v2779_v23 }
 0xe3d   : > { %5579 = vmatprep.subr.bf16.mxu1 %v5578_v18  ;;  %5358 = vmatprep.mubr.msk.f32.mxu0 %vm673_vm1, %v3387_v22 }
 0xe3e   : > { %v5954_v25 = vpop.eup %5953  ;;  %5581 = vmatpush3.bf16.msra.mxu1 %v5578_v18  ;;  %v3393_v29 = vpop.permute.xlu1 %3392 }
 0xe3f   : > { %v2788_v26 = vsel %vm552_vm0, %v5954_v25, 0.0  ;;  %v3391_v28 = vpop.permute.xlu0 %3390  ;;  %5306 = vmatprep.subr.mxu1 %v4758_v30 }
 0xe40   : > { %5613 = vmatpush3.bf16.xpose.msk.msra.mxu0 %vm6229_vm2, %v5608_v13  ;;  %2789 = vadd.xlane.f32.xlu0 %v2788_v26 }
 0xe41   : > { %5301 = vmatmul.mubr.msk.f32.vlgmr.msra.gmra.mrb[24].mxu1 %vm552_vm0, %v5950_v11 }
 0xe42   : > { %v5956_v27 = vpop.eup %5955  ;;  %5307 = vmatpush3.msra.mxu1 %v4758_v30 }
 0xe43   : > { %5303 = vmatprep.mubr.msk.f32.mxu1 %vm552_vm0, %v5956_v27  ;;  %v2785_v7 = vsel %vm552_vm0, %v5956_v27, 0.0 }
 0xe44   : > { %2786 = vadd.xlane.f32.xlu0 %v2785_v7 }
 0xe45   : > { %5304 = vmatmul.mubr.msk.f32.gmra.mrb[26].mxu1 %vm552_vm0, %v5954_v25 }
 0xe47   : > { %5359 = vmatmul.mubr.msk.f32.vlgmr.msra.gmra.mrb[36].mxu0 %vm673_vm1, %v3389_v6 }
 0xe48   : > { %5361 = vmatprep.mubr.msk.f32.mxu0 %vm673_vm1, %v3391_v28 }
 0xe4b   : > { %5362 = vmatmul.mubr.msk.f32.gmra.mrb[38].mxu0 %vm673_vm1, %v3393_v29 }
 0xe4c   : > { %5830 = vrot.lane.b32.xlu1 %v6568_v50, %s6948_s27 }
 0xe50   : > { %5840 = vrot.lane.b32.xlu1 %v6568_v50, %s6949_s23 }
 0xe54   : > { %5845 = vrot.lane.b32.xlu1 %v6578_v54, %s6949_s23 }
 0xe58   : > { %3759 = vrot.lane.b32.xlu1 %v6560_v46, %s6950_s29 }
 0xe5a   : > { %5835 = vrot.lane.b32.xlu0 %v6578_v54, %s6948_s27 }
 0xe5c   : > { %3763 = vrot.lane.b32.xlu1 %v6570_v51, %s6950_s29 }
 0xe5e   : > { %3757 = vrot.lane.b32.xlu0 %v6562_v48, %s6950_s29 }
 0xe62   : > { %3761 = vrot.lane.b32.xlu0 %v6572_v53, %s6950_s29 }
 0xe6f   : > { %v3134_v31 = vpop.xlane.xlu1 %3133 }
 0xe70   : > { %v3137_v32 = vpop.xlane.xlu0 %3136  ;;  %v3144_v62 = vsub.f32 %v6648_v34, %v3134_v31 }
 0xe71   : > { %v3145_v0 = vsub.f32 %v6651_v35, %v3137_v32 }
 0xe72   : > { %v3148_v1 = vmul.f32 1.442695, %v3144_v62 }
 0xe73   : > { %v3140_v33 = vpop.xlane.xlu1 %3139  ;;  %v3150_v12 = vmul.f32 1.442695, %v3145_v0 }
 0xe74   : > { %v3143_v37 = vpop.xlane.xlu0 %3142  ;;  %v3146_v24 = vsub.f32 %v6654_v36, %v3140_v33 }
 0xe75   : > { %v3147_v2 = vsub.f32 %v6659_v9, %v3143_v37 }
 0xe76   : > { %v3152_v3 = vmul.f32 1.442695, %v3146_v24 }
 0xe77   : > { %v3154_v11 = vmul.f32 1.442695, %v3147_v2 }
 0xec8   : > { %v2784_v59 = vpop.xlane.xlu1 %2783 }
 0xec9   : > { %v2781_v38 = vpop.xlane.xlu0 %2780  ;;  %5957 = vrcp.f32 %v2784_v59 }
 0xeca   : > { %5959 = vrcp.f32 %v2781_v38 }
 0xecc   : > { %v5831_v39 = vpop.permute.xlu1 %5830 }
 0xecd   : > { %v5833_v46 = vunpack.i.h.bf16 %v5831_v39  ;;  %v5832_v40 = vunpack.i.l.bf16 %v5831_v39  ;;  %v2790_v41 = vpop.xlane.xlu0 %2789 }
 0xece   : > { %5961 = vrcp.f32 %v2790_v41 }
 0xecf   : > { %v5594_v63 = vpack.c.bf16 %v5833_v46, %v5832_v40 }
 0xed0   : > { %v5841_v42 = vpop.permute.xlu1 %5840 }
 0xed1   : > { %v5843_v45 = vunpack.i.h.bf16 %v5841_v42  ;;  %v5842_v51 = vunpack.i.l.bf16 %v5841_v42  ;;  %v2787_v47 = vpop.xlane.xlu0 %2786  ;;  %5595 = vmatprep.subr.bf16.mxu1 %v5594_v63  ;;  %v4759_v42 = vld [vmem:[%s6914_s4 + $0x28] sm:$0xff] }
 0xed2   : > { %5963 = vrcp.f32 %v2787_v47 }
 0xed3   : > { %v5622_v48 = vpack.c.bf16 %v5843_v45, %v5842_v51  ;;  %5965 = vpow2.f32 %v3148_v1  ;;  %v5958_v4 = vpop.eup %5957 }
 0xed4   : > { %v5846_v49 = vpop.permute.xlu1 %5845  ;;  %v5960_v8 = vpop.eup %5959  ;;  %5967 = vpow2.f32 %v3150_v12 }
 0xed5   : > { %v5848_v52 = vunpack.i.h.bf16 %v5846_v49  ;;  %v5847_v53 = vunpack.i.l.bf16 %v5846_v49  ;;  %5624 = vmatprep.subr.msk.bf16.mxu0 %vm6229_vm2, %v5622_v48  ;;  %v5836_v55 = vpop.permute.xlu0 %5835  ;;  %5969 = vpow2.f32 %v3152_v3 }
 0xed6   : > { %5627 = vmatpush3.bf16.xpose.msk.msra.mxu0 %vm6229_vm2, %v5622_v48  ;;  %v5838_v17 = vunpack.i.h.bf16 %v5836_v55  ;;  %v5837_v10 = vunpack.i.l.bf16 %v5836_v55  ;;  %5971 = vpow2.f32 %v3154_v11 }
 0xed7   : > { %v5628_v56 = vpack.c.bf16 %v5848_v52, %v5847_v53 }
 0xed8   : > { %v3760_v16 = vpop.permute.xlu1 %3759  ;;  %v5962_v13 = vpop.eup %5961  ;;  %v5598_v18 = vpack.c.bf16 %v5838_v17, %v5837_v10 }
 0xed9   : > { %5630 = vmatprep.subr.msk.bf16.mxu0 %vm6229_vm2, %v5628_v56  ;;  %v3758_v57 = vpop.permute.xlu0 %3757 }
 0xeda   : > { %5394 = vmatprep.mubr.msk.f32.mxu0 %vm673_vm1, %v3758_v57 }
 0xedc   : > { %v3764_v58 = vpop.permute.xlu1 %3763  ;;  %v5964_v36 = vpop.eup %5963 }
 0xedd   : > { %v3762_v20 = vpop.permute.xlu0 %3761  ;;  %v5966_v7 = vpop.eup %5965 }
 0xede   : > { %5633 = vmatpush3.bf16.xpose.msk.msra.mxu0 %vm6229_vm2, %v5628_v56  ;;  %v5968_v32 = vpop.eup %5967  ;;  %v3156_v46 = vsel %vm552_vm0, %v5966_v7, 0.0 }
 0xedf   : > { %v5970_v37 = vpop.eup %5969  ;;  %v3159_v40 = vsel %vm552_vm0, %v5968_v32, 0.0 }
 0xee0   : > { %v5972_v39 = vpop.eup %5971 }
 0xee1   : > { %v3165_v41 = vsel %vm552_vm0, %v5972_v39, 0.0 }
 0xee5   : > { %5395 = vmatmul.mubr.msk.f32.vlgmr.msra.gmra.mrb[40].mxu0 %vm673_vm1, %v3760_v16 }
 0xee6   : > { %5397 = vmatprep.mubr.msk.f32.mxu0 %vm673_vm1, %v3762_v20 }
 0xee9   : > { %5398 = vmatmul.mubr.msk.f32.gmra.mrb[42].mxu0 %vm673_vm1, %v3764_v58 }
 0xf14   : > { %v5302_v5 = vpop.f32.mrb[24].mxu1 }
 0xf15   : > { %v2903_v14 = vmul.f32 %v5958_v4, %v5302_v5  ;;  %v2881_v34 = vpop.f32.mrb[25].mxu1 }
 0xf16   : > { %v2901_v35 = vmul.f32 %v5960_v8, %v2881_v34 }
 0xf18   : > { %v5305_v19 = vpop.f32.mrb[26].mxu1  ;;  %5308 = vmatprep.mubr.msk.f32.mxu1 %vm673_vm1, %v2901_v35 }
 0xf19   : > { %v2907_v9 = vmul.f32 %v5962_v13, %v5305_v19  ;;  %v2891_v21 = vpop.f32.mrb[27].mxu1  ;;  %5309 = vmatmul.mubr.msk.f32.vlgmr.msra.gmra.mrb[28].mxu1 %vm673_vm1, %v2903_v14 }
 0xf1a   : > { %v2905_v22 = vmul.f32 %v5964_v36, %v2891_v21  ;;  %5597 = vmatpush3.bf16.msra.mxu1 %v5594_v63  ;;  %v5360_v23 = vpop.f32.mrb[36].mxu0  ;;  %v3162_v63 = vsel %vm552_vm0, %v5970_v37, 0.0 }
 0xf1b   : > { %5599 = vmatprep.subr.bf16.mxu1 %v5598_v18  ;;  %v3490_v25 = vadd.f32 %v6621_v15, %v5360_v23  ;;  %v3484_v26 = vpop.f32.mrb[37].mxu0 }
 0xf1c   : > { %5311 = vmatprep.mubr.msk.f32.mxu1 %vm673_vm1, %v2905_v22  ;;  %v3485_v27 = vadd.f32 %v6621_v15, %v3484_v26 }
 0xf1d   : > { %5312 = vmatmul.mubr.msk.f32.gmra.mrb[30].mxu1 %vm673_vm1, %v2907_v9  ;;  %v3506_v6 = vsel %vm552_vm0, %v3490_v25, -inf }
 0xf1e   : > { %5601 = vmatpush3.bf16.msra.mxu1 %v5598_v18  ;;  %5336 = vmatprep.mubr.msk.f32.mxu1 %vm552_vm0, %v5966_v7  ;;  %v5363_v28 = vpop.f32.mrb[38].mxu0  ;;  %v3503_v29 = vsel %vm552_vm0, %v3485_v27, -inf }
 0xf1f   : > { %3507 = vmax.xlane.f32.xlu0 %v3506_v6  ;;  %v3500_v30 = vadd.f32 %v6621_v15, %v5363_v28  ;;  %3504 = vmax.xlane.f32.xlu1 %v3503_v29  ;;  %v3494_v31 = vpop.f32.mrb[39].mxu0 }
 0xf20   : > { %v3495_v33 = vadd.f32 %v6621_v15, %v3494_v31  ;;  %5342 = vmatprep.subr.mxu1 %v4759_v42 }
 0xf21   : > { %5337 = vmatmul.mubr.msk.f32.vlgmr.msra.gmra.mrb[32].mxu1 %vm552_vm0, %v5968_v32  ;;  %v3512_v59 = vsel %vm552_vm0, %v3500_v30, -inf }
 0xf22   : > { %5339 = vmatprep.mubr.msk.f32.mxu1 %vm552_vm0, %v5970_v37  ;;  %v3509_v38 = vsel %vm552_vm0, %v3495_v33, -inf  ;;  %5343 = vmatpush3.msra.mxu1 %v4759_v42 }
 0xf23   : > { %3513 = vmax.xlane.f32.xlu0 %v3512_v59  ;;  %3510 = vmax.xlane.f32.xlu1 %v3509_v38 }
 0xf25   : > { %5340 = vmatmul.mubr.msk.f32.gmra.mrb[34].mxu1 %vm552_vm0, %v5972_v39 }
 0xf27   : > { %3157 = vadd.xlane.f32.xlu0 %v3156_v46  ;;  %3160 = vadd.xlane.f32.xlu1 %v3159_v40  ;;  %v4760_v40 = vld [vmem:[%s6914_s4 + $0x30] sm:$0xff] }
 0xf2b   : > { %3166 = vadd.xlane.f32.xlu0 %v3165_v41 }
 0xf2f   : > { %3163 = vadd.xlane.f32.xlu0 %v3162_v63 }
 0xf38   : > { %5850 = vrot.lane.b32.xlu1 %v6568_v50, %s6951_s20 }
 0xf45   : > { %5855 = vrot.lane.b32.xlu0 %v6578_v54, %s6951_s20 }
 0xfac   : > { %v3508_v45 = vpop.xlane.xlu0 %3507  ;;  %v3505_v51 = vpop.xlane.xlu1 %3504 }
 0xfad   : > { %v3516_v47 = vsub.f32 %v3490_v25, %v3508_v45  ;;  %v3515_v48 = vsub.f32 %v3485_v27, %v3505_v51 }
 0xfaf   : > { %v3521_v53 = vmul.f32 1.442695, %v3516_v47  ;;  %v3519_v56 = vmul.f32 1.442695, %v3515_v48 }
 0xfb0   : > { %v3514_v49 = vpop.xlane.xlu0 %3513  ;;  %v3511_v52 = vpop.xlane.xlu1 %3510 }
 0xfb1   : > { %v3518_v55 = vsub.f32 %v3500_v30, %v3514_v49  ;;  %v3517_v57 = vsub.f32 %v3495_v33, %v3511_v52  ;;  %5973 = vpow2.f32 %v3521_v53 }
 0xfb2   : > { %5975 = vpow2.f32 %v3519_v56 }
 0xfb3   : > { %v3525_v20 = vmul.f32 1.442695, %v3518_v55  ;;  %v3523_v58 = vmul.f32 1.442695, %v3517_v57 }
 0xfb4   : > { %v3161_v16 = vpop.xlane.xlu1 %3160  ;;  %v3158_v23 = vpop.xlane.xlu0 %3157 }
 0xfb5   : > { %5977 = vpow2.f32 %v3525_v20 }
 0xfb6   : > { %5979 = vpow2.f32 %v3523_v58 }
 0xfb7   : > { %5981 = vrcp.f32 %v3158_v23 }
 0xfb8   : > { %v5851_v62 = vpop.permute.xlu1 %5850  ;;  %v5396_v24 = vpop.f32.mrb[40].mxu0  ;;  %5983 = vrcp.f32 %v3161_v16 }
 0xfb9   : > { %v5853_v0 = vunpack.i.h.bf16 %v5851_v62  ;;  %v5852_v1 = vunpack.i.l.bf16 %v5851_v62  ;;  %v6750_v12 = vadd.f32 %v6621_v15, %v5396_v24  ;;  %v3855_v2 = vpop.f32.mrb[41].mxu0  ;;  %v3167_v25 = vpop.xlane.xlu0 %3166 }
 0xfba   : > { %v6753_v4 = vadd.f32 %v6621_v15, %v3855_v2 }
 0xfbb   : > { %v5614_v3 = vpack.c.bf16 %v5853_v0, %v5852_v1  ;;  %v3877_v5 = vsel %vm552_vm0, %v6750_v12, -inf  ;;  %v5974_v13 = vpop.eup %5973 }
 0xfbc   : > { %v5399_v8 = vpop.f32.mrb[42].mxu0  ;;  %3878 = vmax.xlane.f32.xlu0 %v3877_v5  ;;  %v3874_v10 = vsel %vm552_vm0, %v6753_v4, -inf  ;;  %v5976_v19 = vpop.eup %5975  ;;  %v3530_v36 = vsel %vm552_vm0, %v5974_v13, 0.0 }
 0xfbd   : > { %v6758_v17 = vadd.f32 %v6621_v15, %v5399_v8  ;;  %5615 = vmatprep.subr.bf16.mxu1 %v5614_v3  ;;  %v3865_v14 = vpop.f32.mrb[43].mxu0  ;;  %3875 = vmax.xlane.f32.xlu1 %v3874_v10  ;;  %v3527_v9 = vsel %vm552_vm0, %v5976_v19, 0.0  ;;  %v3164_v26 = vpop.xlane.xlu0 %3163 }
 0xfbe   : > { %v6763_v34 = vadd.f32 %v6621_v15, %v3865_v14  ;;  %5985 = vrcp.f32 %v3164_v26 }
 0xfbf   : > { %v3883_v11 = vsel %vm552_vm0, %v6758_v17, -inf  ;;  %v5978_v18 = vpop.eup %5977  ;;  %5987 = vrcp.f32 %v3167_v25 }
 0xfc0   : > { %v3880_v35 = vsel %vm552_vm0, %v6763_v34, -inf  ;;  %3884 = vmax.xlane.f32.xlu0 %v3883_v11  ;;  %v5980_v21 = vpop.eup %5979  ;;  %v3536_v15 = vsel %vm552_vm0, %v5978_v18, 0.0 }
 0xfc1   : > { %3881 = vmax.xlane.f32.xlu1 %v3880_v35  ;;  %v3533_v22 = vsel %vm552_vm0, %v5980_v21, 0.0  ;;  %v5856_v27 = vpop.permute.xlu0 %5855  ;;  %v5982_v6 = vpop.eup %5981 }
 0xfc2   : > { %v5858_v28 = vunpack.i.h.bf16 %v5856_v27  ;;  %v5857_v29 = vunpack.i.l.bf16 %v5856_v27  ;;  %v5984_v31 = vpop.eup %5983 }
 0xfc4   : > { %3531 = vadd.xlane.f32.xlu0 %v3530_v36  ;;  %v5618_v37 = vpack.c.bf16 %v5858_v28, %v5857_v29 }
 0xfc5   : > { %3528 = vadd.xlane.f32.xlu1 %v3527_v9 }
 0xfc8   : > { %3537 = vadd.xlane.f32.xlu0 %v3536_v15 }
 0xfc9   : > { %3534 = vadd.xlane.f32.xlu1 %v3533_v22 }
 0xfda   : > { %5860 = vrot.lane.b32.xlu1 %v6568_v50, %s6952_s28 }
 0xfde   : > { %5865 = vrot.lane.b32.xlu0 %v6578_v54, %s6952_s28  ;;  %v5986_v54 = vpop.eup %5985  ;;  %s6953_s28 = sshll.u32 %s6955_s22, 5 }
 0xfdf   : > { %v5988_v38 = vpop.eup %5987  ;;  %s535_s25 = scalar_lea.vmem %s6926_s16, %s6953_s28 }
 0xff4   : > { %v5338_v7 = vpop.f32.mrb[32].mxu1 }
 0xff5   : > { %v3258_v30 = vpop.f32.mrb[33].mxu1  ;;  %v3280_v33 = vmul.f32 %v5984_v31, %v5338_v7  ;;  %v4761_v7 = vld [vmem:[%s6914_s4 + $0x38] sm:$0xff] }
 0xff6   : > { %v3278_v32 = vmul.f32 %v5982_v6, %v3258_v30 }
 0xff8   : > { %v5341_v50 = vpop.f32.mrb[34].mxu1  ;;  %5344 = vmatprep.mubr.msk.f32.mxu1 %vm673_vm1, %v3278_v32 }
 0xff9   : > { %v3268_v59 = vpop.f32.mrb[35].mxu1  ;;  %5345 = vmatmul.mubr.msk.f32.vlgmr.msra.gmra.mrb[28].mxu1 %vm673_vm1, %v3280_v33  ;;  %v3284_v46 = vmul.f32 %v5988_v38, %v5341_v50 }
 0xffa   : > { %v3282_v39 = vmul.f32 %v5986_v54, %v3268_v59  ;;  %5617 = vmatpush3.bf16.msra.mxu1 %v5614_v3 }
 0xffb   : > { %5619 = vmatprep.subr.bf16.mxu1 %v5618_v37 }
 0xffc   : > { %5347 = vmatprep.mubr.msk.f32.mxu1 %vm673_vm1, %v3282_v39 }
 0xffd   : > { %5348 = vmatmul.mubr.msk.f32.gmra.mrb[30].mxu1 %vm673_vm1, %v3284_v46 }
 0xffe   : > { %5621 = vmatpush3.bf16.msra.mxu1 %v5618_v37  ;;  %5372 = vmatprep.mubr.msk.f32.mxu1 %vm552_vm0, %v5976_v19 }
 0xfff   : > { %5378 = vmatprep.subr.mxu1 %v4760_v40 }
0x1001   : > { %5373 = vmatmul.mubr.msk.f32.vlgmr.msra.gmra.mrb[36].mxu1 %vm552_vm0, %v5974_v13 }
0x1002   : > { %5375 = vmatprep.mubr.msk.f32.mxu1 %vm552_vm0, %v5980_v21  ;;  %5379 = vmatpush3.msra.mxu1 %v4760_v40 }
0x1005   : > { %5376 = vmatmul.mubr.msk.f32.gmra.mrb[38].mxu1 %vm552_vm0, %v5978_v18 }
0x1049   : > { %v3879_v41 = vpop.xlane.xlu0 %3878 }
0x104a   : > { %v3887_v63 = vsub.f32 %v6750_v12, %v3879_v41  ;;  %v3876_v42 = vpop.xlane.xlu1 %3875 }
0x104b   : > { %v3886_v45 = vsub.f32 %v6753_v4, %v3876_v42 }
0x104c   : > { %v3892_v51 = vmul.f32 1.442695, %v3887_v63  ;;  %v4779_v63 = vld [vmem:[%s6915_s5 + $0x1] ss:$0 sm:$0xff] }
0x104d   : > { %v3890_v47 = vmul.f32 1.442695, %v3886_v45  ;;  %v3885_v48 = vpop.xlane.xlu0 %3884 }
0x104e   : > { %5989 = vpow2.f32 %v3892_v51  ;;  %v3889_v49 = vsub.f32 %v6758_v17, %v3885_v48  ;;  %v3882_v52 = vpop.xlane.xlu1 %3881 }
0x104f   : > { %5991 = vpow2.f32 %v3890_v47  ;;  %v3888_v53 = vsub.f32 %v6763_v34, %v3882_v52 }
0x1050   : > { %v3896_v55 = vmul.f32 1.442695, %v3889_v49 }
0x1051   : > { %v3894_v56 = vmul.f32 1.442695, %v3888_v53  ;;  %v3532_v17 = vpop.xlane.xlu0 %3531 }
0x1052   : > { %5993 = vpow2.f32 %v3896_v55  ;;  %v3529_v57 = vpop.xlane.xlu1 %3528 }
0x1053   : > { %5995 = vpow2.f32 %v3894_v56 }
0x1054   : > { %5997 = vrcp.f32 %v3529_v57 }
0x1055   : > { %5999 = vrcp.f32 %v3532_v17  ;;  %v3538_v10 = vpop.xlane.xlu0 %3537 }
0x1056   : > { %v3535_v16 = vpop.xlane.xlu1 %3534 }
0x1057   : > { %6001 = vrcp.f32 %v3535_v16 }
0x1058   : > { %v5990_v20 = vpop.eup %5989  ;;  %6003 = vrcp.f32 %v3538_v10 }
0x1059   : > { %v5992_v58 = vpop.eup %5991  ;;  %v3901_v62 = vsel %vm552_vm0, %v5990_v20, 0.0  ;;  %v5866_v14 = vpop.permute.xlu0 %5865 }
0x105a   : > { %v5861_v0 = vpop.permute.xlu1 %5860  ;;  %3902 = vadd.xlane.f32.xlu0 %v3901_v62  ;;  %v3898_v1 = vsel %vm552_vm0, %v5992_v58, 0.0  ;;  %v5868_v35 = vunpack.i.h.bf16 %v5866_v14  ;;  %v5867_v13 = vunpack.i.l.bf16 %v5866_v14 }
0x105b   : > { %v5863_v24 = vunpack.i.h.bf16 %v5861_v0  ;;  %v5862_v12 = vunpack.i.l.bf16 %v5861_v0  ;;  %3899 = vadd.xlane.f32.xlu1 %v3898_v1 }
0x105c   : > { %v5994_v2 = vpop.eup %5993  ;;  %v5638_v22 = vpack.c.bf16 %v5868_v35, %v5867_v13 }
0x105d   : > { %v5996_v3 = vpop.eup %5995  ;;  %v5634_v4 = vpack.c.bf16 %v5863_v24, %v5862_v12  ;;  %v3907_v5 = vsel %vm552_vm0, %v5994_v2, 0.0 }
0x105e   : > { %3908 = vadd.xlane.f32.xlu0 %v3907_v5  ;;  %v3904_v8 = vsel %vm552_vm0, %v5996_v3, 0.0  ;;  %v5998_v11 = vpop.eup %5997 }
0x105f   : > { %3905 = vadd.xlane.f32.xlu1 %v3904_v8  ;;  %5635 = vmatprep.subr.bf16.mxu1 %v5634_v4  ;;  %v6000_v36 = vpop.eup %5999 }
0x1061   : > { %v6002_v15 = vpop.eup %6001 }
0x1062   : > { %v6004_v25 = vpop.eup %6003 }
0x10d4   : > { %v5374_v34 = vpop.f32.mrb[36].mxu1 }
0x10d5   : > { %v3629_v19 = vpop.f32.mrb[37].mxu1  ;;  %v3651_v9 = vmul.f32 %v6000_v36, %v5374_v34  ;;  %v4832_v36 = vld [vmem:[%s6918_s8 + $0x20] sm:$0xff] }
0x10d6   : > { %v3649_v18 = vmul.f32 %v5998_v11, %v3629_v19 }
0x10d8   : > { %v5377_v21 = vpop.f32.mrb[38].mxu1  ;;  %5380 = vmatprep.mubr.msk.f32.mxu1 %vm673_vm1, %v3649_v18  ;;  %v4833_v18 = vld [vmem:[%s6918_s8 + $0x28] sm:$0xff] }
0x10d9   : > { %v3639_v23 = vpop.f32.mrb[39].mxu1  ;;  %5381 = vmatmul.mubr.msk.f32.vlgmr.msra.gmra.mrb[28].mxu1 %vm673_vm1, %v3651_v9  ;;  %v3655_v27 = vmul.f32 %v6004_v25, %v5377_v21  ;;  %v5642_v9 = vpack.c.bf16 %v4833_v18, %v4832_v36  ;;  %v4834_v21 = vld [vmem:[%s6918_s8 + $0x30] sm:$0xff]  ;;  %v4843_v25 = vld [vmem:[%s6920_s10 + $0x28] sm:$0xff] }
0x10da   : > { %v3653_v26 = vmul.f32 %v6002_v15, %v3639_v23  ;;  %5637 = vmatpush3.bf16.msra.mxu1 %v5634_v4  ;;  %v4835_v15 = vld [vmem:[%s6918_s8 + $0x38] sm:$0xff]  ;;  %v4842_v23 = vld [vmem:[%s6920_s10 + $0x20] sm:$0xff] }
0x10db   : > { %5639 = vmatprep.subr.bf16.mxu1 %v5638_v22  ;;  %5643 = vmatprep.subr.bf16.mxu0 %v5642_v9 }
0x10dc   : > { %5383 = vmatprep.mubr.msk.f32.mxu1 %vm673_vm1, %v3653_v26  ;;  %5645 = vmatpush3.bf16.msra.mxu0 %v5642_v9  ;;  %v5650_v26 = vpack.c.bf16 %v4843_v25, %v4842_v23 }
0x10dd   : > { %5384 = vmatmul.mubr.msk.f32.gmra.mrb[30].mxu1 %vm673_vm1, %v3655_v27 }
0x10de   : > { %5641 = vmatpush3.bf16.msra.mxu1 %v5638_v22  ;;  %5408 = vmatprep.mubr.msk.f32.mxu1 %vm552_vm0, %v5992_v58  ;;  %v5646_v22 = vpack.c.bf16 %v4835_v15, %v4834_v21 }
0x10df   : > { %5414 = vmatprep.subr.mxu1 %v4761_v7 }
0x10e0   : > { %5647 = vmatprep.subr.bf16.mxu0 %v5646_v22 }
0x10e1   : > { %5409 = vmatmul.mubr.msk.f32.vlgmr.msra.gmra.mrb[40].mxu1 %vm552_vm0, %v5990_v20  ;;  %5649 = vmatpush3.bf16.msra.mxu0 %v5646_v22 }
0x10e2   : > { %5411 = vmatprep.mubr.msk.f32.mxu1 %vm552_vm0, %v5996_v3  ;;  %5415 = vmatpush3.msra.mxu1 %v4761_v7 }
0x10e3   : > { %5651 = vmatprep.subr.bf16.mxu1 %v5650_v26 }
0x10e5   : > { %5412 = vmatmul.mubr.msk.f32.gmra.mrb[42].mxu1 %vm552_vm0, %v5994_v2 }
0x10e7   : > { %v3903_v28 = vpop.xlane.xlu0 %3902 }
0x10e8   : > { %v3900_v6 = vpop.xlane.xlu1 %3899 }
0x10e9   : > { %6005 = vrcp.f32 %v3900_v6 }
0x10ea   : > { %6007 = vrcp.f32 %v3903_v28 }
0x10eb   : > { %v3909_v30 = vpop.xlane.xlu0 %3908 }
0x10ec   : > { %v3906_v29 = vpop.xlane.xlu1 %3905 }
0x10ed   : > { %6009 = vrcp.f32 %v3906_v29 }
0x10ee   : > { %6011 = vrcp.f32 %v3909_v30 }
0x10f3   : > { %v6006_v32 = vpop.eup %6005 }
0x10f4   : > { %v6008_v50 = vpop.eup %6007 }
0x10f7   : > { %v6010_v38 = vpop.eup %6009 }
0x10f8   : > { %v6012_v46 = vpop.eup %6011 }
0x11b4   : > { %v5410_v31 = vpop.f32.mrb[40].mxu1 }
0x11b5   : > { %v4000_v33 = vpop.f32.mrb[41].mxu1  ;;  %v4022_v37 = vmul.f32 %v6008_v50, %v5410_v31 }
0x11b6   : > { %v4020_v54 = vmul.f32 %v6006_v32, %v4000_v33 }
0x11b8   : > { %v5413_v59 = vpop.f32.mrb[42].mxu1  ;;  %5416 = vmatprep.mubr.msk.f32.mxu1 %vm673_vm1, %v4020_v54 }
0x11b9   : > { %v4010_v39 = vpop.f32.mrb[43].mxu1  ;;  %5417 = vmatmul.mubr.msk.f32.vlgmr.msra.gmra.mrb[28].mxu1 %vm673_vm1, %v4022_v37  ;;  %v4026_v41 = vmul.f32 %v6012_v46, %v5413_v59 }
0x11ba   : > { %v4024_v40 = vmul.f32 %v6010_v38, %v4010_v39  ;;  %5653 = vmatpush3.bf16.msra.mxu1 %v5650_v26  ;;  %v4830_v38 = vld [vmem:[%s6916_s6 + $0x1] ss:$0 sm:$0xff] }
0x11bc   : > { %5419 = vmatprep.mubr.msk.f32.mxu1 %vm673_vm1, %v4024_v40 }
0x11bd   : > { %5420 = vmatmul.mubr.msk.f32.gmra.mrb[30].mxu1 %vm673_vm1, %v4026_v41  ;;  %v4831_v41 = vld [vmem:[%s6917_s7 + $0x1] ss:$0 sm:$0xff] }
0x128c   : > { %v5418_v42 = vpop.f32.mrb[28].mxu1 }
0x128d   : > { %v5662_v45 = vadd.f32 %v5418_v42, %v4779_v63  ;;  %v4105_v51 = vpop.f32.mrb[29].mxu1 }
0x128e   : > { %v5663_v47 = vadd.f32 %v4779_v63, %v4105_v51 }
0x128f   : > { %v4129_v48 = vadd.f32 %v5662_v45, %v6543_v61 }
0x1290   : > { %v4128_v49 = vadd.f32 %v5663_v47, %v6541_v60  ;;  %v5421_v52 = vpop.f32.mrb[30].mxu1 }
0x1291   : > { %v5664_v53 = vadd.f32 %v5421_v52, %v4779_v63  ;;  %v4115_v55 = vpop.f32.mrb[31].mxu1  ;;  %v4139_v56 = vsel %vm552_vm0, %v4129_v48, 0.0 }
0x1292   : > { %v5665_v57 = vadd.f32 %v4779_v63, %v4115_v55  ;;  %4140 = vadd.xlane.f32.xlu0 %v4139_v56  ;;  %v4136_v16 = vsel %vm552_vm0, %v4128_v49, 0.0 }
0x1293   : > { %v4131_v20 = vadd.f32 %v5664_v53, %v6551_v44  ;;  %4137 = vadd.xlane.f32.xlu1 %v4136_v16  ;;  %v4844_v16 = vld [vmem:[%s6920_s10 + $0x30] sm:$0xff] }
0x1294   : > { %v4130_v58 = vadd.f32 %v5665_v57, %v6549_v43 }
0x1295   : > { %v4145_v62 = vsel %vm552_vm0, %v4131_v20, 0.0 }
0x1296   : > { %4146 = vadd.xlane.f32.xlu0 %v4145_v62  ;;  %v4142_v61 = vsel %vm552_vm0, %v4130_v58, 0.0  ;;  %v4837_v62 = vld [vmem:[%s6919_s9 + $0x1] ss:$0 sm:$0xff] }
0x1297   : > { %4143 = vadd.xlane.f32.xlu1 %v4142_v61 }
0x131f   : > { %v4141_v60 = vpop.xlane.xlu0 %4140 }
0x1320   : > { %v4149_v0 = vmul.f32 0.03125, %v4141_v60  ;;  %v4138_v1 = vpop.xlane.xlu1 %4137 }
0x1321   : > { %v4148_v24 = vmul.f32 0.03125, %v4138_v1 }
0x1322   : > { %v4153_v12 = vsub.f32 %v4129_v48, %v4149_v0 }
0x1323   : > { %v4152_v2 = vsub.f32 %v4128_v49, %v4148_v24  ;;  %v4147_v3 = vpop.xlane.xlu0 %4146 }
0x1324   : > { %v4151_v4 = vmul.f32 0.03125, %v4147_v3  ;;  %v4144_v5 = vpop.xlane.xlu1 %4143  ;;  %v4157_v8 = vmul.f32 %v4153_v12, %v4153_v12 }
0x1325   : > { %v4150_v44 = vmul.f32 0.03125, %v4144_v5  ;;  %v4156_v17 = vmul.f32 %v4152_v2, %v4152_v2 }
0x1326   : > { %v4155_v10 = vsub.f32 %v4131_v20, %v4151_v4  ;;  %v4163_v43 = vsel %vm552_vm0, %v4157_v8, 0.0  ;;  %v4845_v20 = vld [vmem:[%s6920_s10 + $0x38] sm:$0xff] }
0x1327   : > { %v4154_v14 = vsub.f32 %v4130_v58, %v4150_v44  ;;  %4164 = vadd.xlane.f32.xlu0 %v4163_v43  ;;  %v4160_v34 = vsel %vm552_vm0, %v4156_v17, 0.0  ;;  %v5654_v58 = vpack.c.bf16 %v4845_v20, %v4844_v16  ;;  %v4847_v17 = vld [vmem:[%s6921_s11 + $0x1] ss:$0 sm:$0xff] }
0x1328   : > { %4161 = vadd.xlane.f32.xlu1 %v4160_v34  ;;  %v4159_v11 = vmul.f32 %v4155_v10, %v4155_v10 }
0x1329   : > { %v4158_v35 = vmul.f32 %v4154_v14, %v4154_v14  ;;  %5655 = vmatprep.subr.bf16.mxu1 %v5654_v58 }
0x132a   : > { %v4169_v13 = vsel %vm552_vm0, %v4159_v11, 0.0  ;;  %5657 = vmatpush3.bf16.msra.mxu1 %v5654_v58  ;;  %v4854_v58 = vld [vmem:[%s6922_s12 + $0x1] ss:$0 sm:$0xff] }
0x132b   : > { %4170 = vadd.xlane.f32.xlu0 %v4169_v13  ;;  %v4166_v19 = vsel %vm552_vm0, %v4158_v35, 0.0 }
0x132c   : > { %4167 = vadd.xlane.f32.xlu1 %v4166_v19 }
0x13b4   : > { %v4165_v27 = vpop.xlane.xlu0 %4164 }
0x13b5   : > { %v4173_v7 = vmul.f32 0.03125, %v4165_v27  ;;  %v4162_v6 = vpop.xlane.xlu1 %4161 }
0x13b6   : > { %v4172_v28 = vmul.f32 0.03125, %v4162_v6 }
0x13b7   : > { %v4177_v29 = vadd.f32 1e-05, %v4173_v7 }
0x13b8   : > { %v4176_v30 = vadd.f32 1e-05, %v4172_v28  ;;  %v4171_v31 = vpop.xlane.xlu0 %4170 }
0x13b9   : > { %6013 = vrsqrt.f32 %v4177_v29  ;;  %v4175_v32 = vmul.f32 0.03125, %v4171_v31  ;;  %v4168_v33 = vpop.xlane.xlu1 %4167 }
0x13ba   : > { %6015 = vrsqrt.f32 %v4176_v30  ;;  %v4174_v50 = vmul.f32 0.03125, %v4168_v33 }
0x13bb   : > { %v4179_v54 = vadd.f32 1e-05, %v4175_v32 }
0x13bc   : > { %v4178_v37 = vadd.f32 1e-05, %v4174_v50 }
0x13bd   : > { %6017 = vrsqrt.f32 %v4179_v54 }
0x13be   : > { %6019 = vrsqrt.f32 %v4178_v37 }
0x13c3   : > { %v6014_v59 = vpop.eup %6013 }
0x13c4   : > { %v6016_v39 = vpop.eup %6015  ;;  %v4185_v46 = vmul.f32 %v6014_v59, %v4153_v12 }
0x13c5   : > { %v4184_v40 = vmul.f32 %v6016_v39, %v4152_v2 }
0x13c6   : > { %v4195_v63 = vmul.f32 %v4830_v38, %v4185_v46 }
0x13c7   : > { %v6018_v42 = vpop.eup %6017  ;;  %v4194_v45 = vmul.f32 %v4830_v38, %v4184_v40 }
0x13c8   : > { %v6020_v51 = vpop.eup %6019  ;;  %v4187_v47 = vmul.f32 %v6018_v42, %v4155_v10  ;;  %v4205_v52 = vadd.f32 %v4831_v41, %v4195_v63 }
0x13c9   : > { %v4204_v48 = vadd.f32 %v4831_v41, %v4194_v45  ;;  %v4186_v49 = vmul.f32 %v6020_v51, %v4154_v14 }
0x13ca   : > { %v4197_v53 = vmul.f32 %v4830_v38, %v4187_v47 }
0x13cb   : > { %5430 = vmatprep.mubr.msk.f32.mxu0 %vm552_vm0, %v4204_v48  ;;  %v4196_v55 = vmul.f32 %v4830_v38, %v4186_v49 }
0x13cc   : > { %5431 = vmatmul.mubr.msk.f32.vlgmr.msra.gmra.mrb[44].mxu0 %vm552_vm0, %v4205_v52  ;;  %v4207_v57 = vadd.f32 %v4831_v41, %v4197_v53 }
0x13cd   : > { %v4206_v56 = vadd.f32 %v4831_v41, %v4196_v55 }
0x13cf   : > { %5433 = vmatprep.mubr.msk.f32.mxu0 %vm552_vm0, %v4206_v56 }
0x13d0   : > { %5434 = vmatmul.mubr.msk.f32.gmra.mrb[46].mxu0 %vm552_vm0, %v4207_v57 }
0x149f   : > { %v5432_v61 = vpop.f32.mrb[44].mxu0 }
0x14a0   : > { %v4305_v60 = vadd.f32 %v5432_v61, %v4837_v62  ;;  %v4299_v0 = vpop.f32.mrb[45].mxu0 }
0x14a1   : > { %v4300_v1 = vadd.f32 %v4837_v62, %v4299_v0 }
0x14a2   : > { %v4319_v2 = vmax.f32 %v4305_v60, 0.0  ;;  %v4855_v60 = vld [vmem:[%s6923_s13 + $0x1] ss:$0 sm:$0xff] }
0x14a3   : > { %v4318_v24 = vmax.f32 %v4300_v1, 0.0  ;;  %v5435_v12 = vpop.f32.mrb[46].mxu0 }
0x14a4   : > { %v4315_v3 = vadd.f32 %v5435_v12, %v4837_v62  ;;  %v4309_v4 = vpop.f32.mrb[47].mxu0 }
0x14a5   : > { %v4310_v5 = vadd.f32 %v4837_v62, %v4309_v4  ;;  %5444 = vmatprep.mubr.msk.f32.mxu1 %vm552_vm0, %v4318_v24 }
0x14a6   : > { %5445 = vmatmul.mubr.msk.f32.vlgmr.msra.gmra.mrb[44].mxu1 %vm552_vm0, %v4319_v2  ;;  %v4321_v44 = vmax.f32 %v4315_v3, 0.0 }
0x14a7   : > { %v4320_v8 = vmax.f32 %v4310_v5, 0.0 }
0x14a9   : > { %5447 = vmatprep.mubr.msk.f32.mxu1 %vm552_vm0, %v4320_v8 }
0x14aa   : > { %5448 = vmatmul.mubr.msk.f32.gmra.mrb[46].mxu1 %vm552_vm0, %v4321_v44 }
0x1579   : > { %v5446_v10 = vpop.f32.mrb[44].mxu1 }
0x157a   : > { %v4419_v43 = vadd.f32 %v5446_v10, %v4847_v17  ;;  %v4413_v14 = vpop.f32.mrb[45].mxu1 }
0x157b   : > { %v4414_v34 = vadd.f32 %v4847_v17, %v4413_v14 }
0x157c   : > { %v4433_v11 = vadd.f32 %v4419_v43, %v4205_v52 }
0x157d   : > { %v4432_v35 = vadd.f32 %v4414_v34, %v4204_v48  ;;  %v5449_v13 = vpop.f32.mrb[46].mxu1 }
0x157e   : > { %v4429_v19 = vadd.f32 %v5449_v13, %v4847_v17  ;;  %v4423_v36 = vpop.f32.mrb[47].mxu1  ;;  %v4443_v18 = vsel %vm552_vm0, %v4433_v11, 0.0 }
0x157f   : > { %v4424_v9 = vadd.f32 %v4847_v17, %v4423_v36  ;;  %4444 = vadd.xlane.f32.xlu0 %v4443_v18  ;;  %v4440_v21 = vsel %vm552_vm0, %v4432_v35, 0.0 }
0x1580   : > { %v4435_v15 = vadd.f32 %v4429_v19, %v4207_v57  ;;  %4441 = vadd.xlane.f32.xlu1 %v4440_v21 }
0x1581   : > { %v4434_v22 = vadd.f32 %v4424_v9, %v4206_v56 }
0x1582   : > { %v4449_v23 = vsel %vm552_vm0, %v4435_v15, 0.0 }
0x1583   : > { %4450 = vadd.xlane.f32.xlu0 %v4449_v23  ;;  %v4446_v25 = vsel %vm552_vm0, %v4434_v22, 0.0 }
0x1584   : > { %4447 = vadd.xlane.f32.xlu1 %v4446_v25 }
0x160c   : > { %v4445_v26 = vpop.xlane.xlu0 %4444 }
0x160d   : > { %v4453_v27 = vmul.f32 0.03125, %v4445_v26  ;;  %v4442_v7 = vpop.xlane.xlu1 %4441 }
0x160e   : > { %v4452_v6 = vmul.f32 0.03125, %v4442_v7 }
0x160f   : > { %v4457_v28 = vsub.f32 %v4433_v11, %v4453_v27 }
0x1610   : > { %v4456_v29 = vsub.f32 %v4432_v35, %v4452_v6  ;;  %v4451_v30 = vpop.xlane.xlu0 %4450 }
0x1611   : > { %v4455_v31 = vmul.f32 0.03125, %v4451_v30  ;;  %v4448_v32 = vpop.xlane.xlu1 %4447  ;;  %v4461_v33 = vmul.f32 %v4457_v28, %v4457_v28 }
0x1612   : > { %v4454_v50 = vmul.f32 0.03125, %v4448_v32  ;;  %v4460_v54 = vmul.f32 %v4456_v29, %v4456_v29 }
0x1613   : > { %v4459_v37 = vsub.f32 %v4435_v15, %v4455_v31  ;;  %v4467_v59 = vsel %vm552_vm0, %v4461_v33, 0.0 }
0x1614   : > { %v4458_v38 = vsub.f32 %v4434_v22, %v4454_v50  ;;  %4468 = vadd.xlane.f32.xlu0 %v4467_v59  ;;  %v4464_v39 = vsel %vm552_vm0, %v4460_v54, 0.0 }
0x1615   : > { %4465 = vadd.xlane.f32.xlu1 %v4464_v39  ;;  %v4463_v46 = vmul.f32 %v4459_v37, %v4459_v37 }
0x1616   : > { %v4462_v40 = vmul.f32 %v4458_v38, %v4458_v38 }
0x1617   : > { %v4473_v41 = vsel %vm552_vm0, %v4463_v46, 0.0 }
0x1618   : > { %4474 = vadd.xlane.f32.xlu0 %v4473_v41  ;;  %v4470_v63 = vsel %vm552_vm0, %v4462_v40, 0.0 }
0x1619   : > { %4471 = vadd.xlane.f32.xlu1 %v4470_v63 }
0x16a1   : > { %v4469_v42 = vpop.xlane.xlu0 %4468 }
0x16a2   : > { %v4477_v45 = vmul.f32 0.03125, %v4469_v42  ;;  %v4466_v51 = vpop.xlane.xlu1 %4465 }
0x16a3   : > { %v4476_v47 = vmul.f32 0.03125, %v4466_v51 }
0x16a4   : > { %v4481_v48 = vadd.f32 1e-05, %v4477_v45 }
0x16a5   : > { %v4480_v49 = vadd.f32 1e-05, %v4476_v47  ;;  %v4475_v52 = vpop.xlane.xlu0 %4474  ;;  %v4856_v47 = vld [vmem:[%s6924_s14] ss:$0 sm:$0xff] }
0x16a6   : > { %6021 = vrsqrt.f32 %v4481_v48  ;;  %v4479_v53 = vmul.f32 0.03125, %v4475_v52  ;;  %v4472_v55 = vpop.xlane.xlu1 %4471  ;;  %v4857_v52 = vld [vmem:[%s6925_s15] ss:$0 sm:$0xff] }
0x16a7   : > { %6023 = vrsqrt.f32 %v4480_v49  ;;  %v4478_v56 = vmul.f32 0.03125, %v4472_v55 }
0x16a8   : > { %v4483_v57 = vadd.f32 1e-05, %v4479_v53 }
0x16a9   : > { %v4482_v16 = vadd.f32 1e-05, %v4478_v56 }
0x16aa   : > { %6025 = vrsqrt.f32 %v4483_v57 }
0x16ab   : > { %6027 = vrsqrt.f32 %v4482_v16 }
0x16b0   : > { %v6022_v20 = vpop.eup %6021 }
0x16b1   : > { %v6024_v62 = vpop.eup %6023  ;;  %v4489_v61 = vmul.f32 %v6022_v20, %v4457_v28 }
0x16b2   : > { %v4488_v0 = vmul.f32 %v6024_v62, %v4456_v29 }
0x16b3   : > { %v4499_v1 = vmul.f32 %v4854_v58, %v4489_v61 }
0x16b4   : > { %v6026_v24 = vpop.eup %6025  ;;  %v4498_v12 = vmul.f32 %v4854_v58, %v4488_v0 }
0x16b5   : > { %v6028_v2 = vpop.eup %6027  ;;  %v4509_v3 = vadd.f32 %v4855_v60, %v4499_v1  ;;  %v4491_v4 = vmul.f32 %v6026_v24, %v4459_v37 }
0x16b6   : > { %v4508_v5 = vadd.f32 %v4855_v60, %v4498_v12  ;;  %v4490_v8 = vmul.f32 %v6028_v2, %v4458_v38 }
0x16b7   : > { %v4517_v44 = vsel %vm552_vm0, %v4509_v3, 0.0  ;;  %v4501_v17 = vmul.f32 %v4854_v58, %v4491_v4 }
0x16b8   : > { %4518 = vadd.xlane.f32.xlu0 %v4517_v44  ;;  %v4514_v10 = vsel %vm552_vm0, %v4508_v5, 0.0  ;;  %v4500_v43 = vmul.f32 %v4854_v58, %v4490_v8 }
0x16b9   : > { %4515 = vadd.xlane.f32.xlu1 %v4514_v10  ;;  %v4511_v14 = vadd.f32 %v4855_v60, %v4501_v17 }
0x16ba   : > { %v4510_v34 = vadd.f32 %v4855_v60, %v4500_v43 }
0x16bb   : > { %v4523_v11 = vsel %vm552_vm0, %v4511_v14, 0.0 }
0x16bc   : > { %4524 = vadd.xlane.f32.xlu0 %v4523_v11  ;;  %v4520_v35 = vsel %vm552_vm0, %v4510_v34, 0.0 }
0x16bd   : > { %4521 = vadd.xlane.f32.xlu1 %v4520_v35 }
0x1745   : > { %v4519_v13 = vpop.xlane.xlu0 %4518 }
0x1746   : > { %v4527_v19 = vmul.f32 0.03125, %v4519_v13  ;;  %v4516_v36 = vpop.xlane.xlu1 %4515 }
0x1747   : > { %v4526_v18 = vmul.f32 0.03125, %v4516_v36 }
0x1748   : > { %v4531_v9 = vsub.f32 %v4509_v3, %v4527_v19 }
0x1749   : > { %v4530_v21 = vsub.f32 %v4508_v5, %v4526_v18  ;;  %v4525_v15 = vpop.xlane.xlu0 %4524 }
0x174a   : > { %v4529_v22 = vmul.f32 0.03125, %v4525_v15  ;;  %v4522_v23 = vpop.xlane.xlu1 %4521  ;;  %v4535_v25 = vmul.f32 %v4531_v9, %v4531_v9 }
0x174b   : > { %v4528_v26 = vmul.f32 0.03125, %v4522_v23  ;;  %v4534_v27 = vmul.f32 %v4530_v21, %v4530_v21 }
0x174c   : > { %v4533_v7 = vsub.f32 %v4511_v14, %v4529_v22  ;;  %v4541_v6 = vsel %vm552_vm0, %v4535_v25, 0.0 }
0x174d   : > { %v4532_v28 = vsub.f32 %v4510_v34, %v4528_v26  ;;  %4542 = vadd.xlane.f32.xlu0 %v4541_v6  ;;  %v4538_v29 = vsel %vm552_vm0, %v4534_v27, 0.0 }
0x174e   : > { %4539 = vadd.xlane.f32.xlu1 %v4538_v29  ;;  %v4537_v30 = vmul.f32 %v4533_v7, %v4533_v7 }
0x174f   : > { %v4536_v31 = vmul.f32 %v4532_v28, %v4532_v28 }
0x1750   : > { %v4547_v32 = vsel %vm552_vm0, %v4537_v30, 0.0 }
0x1751   : > { %4548 = vadd.xlane.f32.xlu0 %v4547_v32  ;;  %v4544_v33 = vsel %vm552_vm0, %v4536_v31, 0.0 }
0x1752   : > { %4545 = vadd.xlane.f32.xlu1 %v4544_v33 }
0x17da   : > { %v4543_v50 = vpop.xlane.xlu0 %4542 }
0x17db   : > { %v4551_v54 = vmul.f32 0.03125, %v4543_v50  ;;  %v4540_v37 = vpop.xlane.xlu1 %4539 }
0x17dc   : > { %v4550_v59 = vmul.f32 0.03125, %v4540_v37 }
0x17dd   : > { %v4555_v38 = vadd.f32 1e-05, %v4551_v54 }
0x17de   : > { %v4554_v39 = vadd.f32 1e-05, %v4550_v59  ;;  %v4549_v46 = vpop.xlane.xlu0 %4548 }
0x17df   : > { %6029 = vrsqrt.f32 %v4555_v38  ;;  %v4553_v40 = vmul.f32 0.03125, %v4549_v46  ;;  %v4546_v41 = vpop.xlane.xlu1 %4545 }
0x17e0   : > { %6031 = vrsqrt.f32 %v4554_v39  ;;  %v4552_v63 = vmul.f32 0.03125, %v4546_v41 }
0x17e1   : > { %v4557_v42 = vadd.f32 1e-05, %v4553_v40 }
0x17e2   : > { %v4556_v45 = vadd.f32 1e-05, %v4552_v63 }
0x17e3   : > { %6033 = vrsqrt.f32 %v4557_v42 }
0x17e4   : > { %6035 = vrsqrt.f32 %v4556_v45 }
0x17e9   : > { %v6030_v51 = vpop.eup %6029 }
0x17ea   : > { %v6032_v48 = vpop.eup %6031  ;;  %v4563_v49 = vmul.f32 %v6030_v51, %v4531_v9 }
0x17eb   : > { %v4562_v53 = vmul.f32 %v6032_v48, %v4530_v21 }
0x17ec   : > { %v4573_v55 = vmul.f32 %v4856_v47, %v4563_v49 }
0x17ed   : > { %v6034_v56 = vpop.eup %6033  ;;  %v4572_v57 = vmul.f32 %v4856_v47, %v4562_v53 }
0x17ee   : > { %v6036_v16 = vpop.eup %6035  ;;  %v4583_v20 = vadd.f32 %v4857_v52, %v4573_v55  ;;  %v4565_v58 = vmul.f32 %v6034_v56, %v4533_v7 }
0x17ef   : > { %v4582_v62 = vadd.f32 %v4857_v52, %v4572_v57  ;;  %v4564_v61 = vmul.f32 %v6036_v16, %v4532_v28 }
0x17f0   : > { %4587 = vst.msk [vmem:[%s535_s25 + $0x8] sm:$0xff] %vm552_vm0, %v4583_v20  ;;  %v4575_v60 = vmul.f32 %v4856_v47, %v4565_v58 }
0x17f1   : > { %4586 = vst.msk [vmem:[%s535_s25] sm:$0xff] %vm552_vm0, %v4582_v62  ;;  %v4574_v0 = vmul.f32 %v4856_v47, %v4564_v61 }
0x17f2   : > { %v4585_v1 = vadd.f32 %v4857_v52, %v4575_v60 }
0x17f3   : > { %v4584_v24 = vadd.f32 %v4857_v52, %v4574_v0 }
0x17f4   : > { %4589 = vst.msk [vmem:[%s535_s25 + $0x18] sm:$0xff] %vm552_vm0, %v4585_v1 }
0x17f5   : > { %4588 = vst.msk [vmem:[%s535_s25 + $0x10] sm:$0xff] %vm552_vm0, %v4584_v24 }
0x17f6 PF: > { %s26_s21 = sadd.s32 1, %s6045_s21  }
0x17f7   : > { %p23_p4 = scmp.ge.s32.totalorder %s26_s21, 10  }
0x17f9   :  { %25 = sbr.rel (!%p23_p4) target bundleno = 2 (0x2), region = 129 }

// kernel: forward.3
= control target key start
LH: loop header
LB: loop body
LE: loop exit
PB: predicated region body
PF: predicated region fallthrough
CT: control target
= control target key end

     0   :  { %s12852_s0 = inlined_call_operand.vmem [shape: f32[2,16,32], index: 0, kind: input, shape index: {}]   ;;  %s12853_s1 = inlined_call_operand.vmem [shape: f32[2,128,32], index: 1, kind: input, shape index: {}]   ;;  %s12854_s2 = inlined_call_operand.vmem [shape: f32[2,16,16], index: 2, kind: input, shape index: {}]   ;;  %s12855_s3 = inlined_call_operand.vmem [shape: f32[2,1,128], index: 3, kind: input, shape index: {}]   ;;  %s12856_s4 = inlined_call_operand.vmem [shape: f32[2,32,96], index: 4, kind: input, shape index: {}]   ;;  %s12857_s5 = inlined_call_operand.vmem [shape: f32[2,1,96], index: 5, kind: input, shape index: {}]   ;;  %s12858_s6 = inlined_call_operand.vmem [shape: f32[2,32,32], index: 6, kind: input, shape index: {}]   ;;  %s12859_s7 = inlined_call_operand.vmem [shape: f32[2,1,32], index: 7, kind: input, shape index: {}]   ;;  %s12860_s8 = inlined_call_operand.vmem [shape: f32[2,1,32], index: 8, kind: input, shape index: {}]   ;;  %s12861_s9 = inlined_call_operand.vmem [shape: f32[2,1,32], index: 9, kind: input, shape index: {}]   ;;  %s12862_s10 = inlined_call_operand.vmem [shape: f32[2,32,32], index: 10, kind: input, shape index: {}]   ;;  %s12863_s11 = inlined_call_operand.vmem [shape: f32[2,1,32], index: 11, kind: input, shape index: {}]   ;;  %s12864_s12 = inlined_call_operand.vmem [shape: f32[2,32,64], index: 12, kind: input, shape index: {}]   ;;  %s12865_s13 = inlined_call_operand.vmem [shape: f32[2,1,64], index: 13, kind: input, shape index: {}]   ;;  %s12866_s14 = inlined_call_operand.vmem [shape: f32[2,32,32], index: 14, kind: input, shape index: {}]   ;;  %s12867_s15 = inlined_call_operand.vmem [shape: f32[2,1,32], index: 15, kind: input, shape index: {}]   ;;  %s12868_s16 = inlined_call_operand.vmem [shape: f32[2,1,32], index: 16, kind: input, shape index: {}]   ;;  %s12869_s17 = inlined_call_operand.vmem [shape: f32[2,1,32], index: 17, kind: input, shape index: {}]   ;;  %s12870_s18 = inlined_call_operand.vmem [shape: f32[2,32,32], index: 18, kind: input, shape index: {}]   ;;  %s12871_s19 = inlined_call_operand.vmem [shape: f32[2,1,32], index: 19, kind: input, shape index: {}]   ;;  %s12872_s20 = inlined_call_operand.vmem [shape: f32[2,32,32], index: 20, kind: input, shape index: {}]   ;;  %s12873_s21 = inlined_call_operand.vmem [shape: f32[2,1,32], index: 21, kind: input, shape index: {}]   ;;  %s12874_s22 = inlined_call_operand.vmem [shape: f32[2,1,32], index: 22, kind: input, shape index: {}]   ;;  %s12875_s23 = inlined_call_operand.vmem [shape: f32[2,1,32], index: 23, kind: input, shape index: {}]   ;;  %s12876_s24 = inlined_call_operand.vmem [shape: f32[1,32], index: 24, kind: input, shape index: {}]   ;;  %s12877_s25 = inlined_call_operand.vmem [shape: f32[1,32], index: 25, kind: input, shape index: {}]   ;;  %s12878_s26 = inlined_call_operand.vmem [shape: f32[32,128], index: 26, kind: input, shape index: {}]   ;;  %s12879_s27 = inlined_call_operand.vmem [shape: f32[1,128], index: 27, kind: input, shape index: {}]   ;;  %s12880_s28 = inlined_call_operand.vmem [shape: f32[2,16,128], index: 28, kind: output, shape index: {}]  }
   0x1   :  { %12913 = sst [smem:[#allocation5_spill]] %s12852_s0 }
   0x2   :  { %12914 = sst [smem:[#allocation6_spill]] %s12853_s1 }
   0x3   :  { %12915 = sst [smem:[#allocation7_spill]] %s12854_s2 }
   0x4   :  { %12916 = sst [smem:[#allocation8_spill]] %s12855_s3 }
   0x5   :  { %12917 = sst [smem:[#allocation9_spill]] %s12856_s4 }
   0x6   :  { %12918 = sst [smem:[#allocation10_spill]] %s12857_s5 }
   0x7   :  { %12919 = sst [smem:[#allocation11_spill]] %s12858_s6 }
   0x8   :  { %12920 = sst [smem:[#allocation12_spill]] %s12859_s7 }
   0x9   :  { %12921 = sst [smem:[#allocation13_spill]] %s12860_s8  ;;  %s11401_s8 = smov 0  }
   0xa   :  { %12922 = sst [smem:[#allocation14_spill]] %s12861_s9 }
   0xb   :  { %12923 = sst [smem:[#allocation15_spill]] %s12862_s10 }
   0xc   :  { %12924 = sst [smem:[#allocation16_spill]] %s12863_s11 }
   0xd   :  { %12925 = sst [smem:[#allocation17_spill]] %s12864_s12 }
   0xe   :  { %12926 = sst [smem:[#allocation18_spill]] %s12865_s13 }
   0xf   :  { %12927 = sst [smem:[#allocation19_spill]] %s12866_s14 }
  0x10   :  { %12928 = sst [smem:[#allocation20_spill]] %s12867_s15 }
  0x11   :  { %12929 = sst [smem:[#allocation21_spill]] %s12876_s24 }
  0x12   :  { %12930 = sst [smem:[#allocation22_spill]] %s12877_s25 }
  0x13   :  { %12931 = sst [smem:[#allocation23_spill]] %s12878_s26 }
  0x14   :  { %12932 = sst [smem:[#allocation24_spill]] %s12879_s27 }
  0x15   :  { %12933 = sst [smem:[#allocation25_spill]] %s12880_s28 }
  0x16 LB: > { %12934 = sst [smem:[#allocation2_spill]] %s11243_s8  ;;  %s7789_s5 = sadd.s32 4294967295, %s11243_s8   ;;  %s11243_s8 = sphi %s11401_s8, %s38_s8  }
  0x17   : > { %p7793_p0 = scmp.ge.s32.totalorder %s11243_s8, 1  ;;  %p790_p1 = scmp.lt.s32.totalorder %s11243_s8, 3 }
  0x19   : > { %p791_p2 = pnand %p7793_p0, %p790_p1 }
  0x1b   : > { %794 = sbr.rel (%p791_p2) target bundleno = 12677 (0x3185), region = 132 }
  0x22   : > { %s12935_s3 = sld [smem:[#allocation9_spill]]  ;;  %p877_p3 = scmp.lt.s32.totalorder %s7789_s5, 1  ;;  %vm932_vm0 = vcmask 261120   ;;  %vm1025_vm1 = vcmask 64512   ;;  %vm1109_vm3 = vcmask 130048  }
  0x23   : > { %s12937_s4 = sld [smem:[#allocation5_spill]]  ;;  %s12938_s10 = sld [smem:[#allocation10_spill]]  ;;  %vm11462_vm2 = vmpackc.low %vm1025_vm1, %vm1025_vm1 }
  0x24   : > { %s12982_s5 = smov (!%p877_p3, %s7789_s5), 1  ;;  %s12904_s0 = smov 120  }
  0x25   : > { %s11424_s7 = sshll.u32 %s12982_s5, 4  ;;  %s12906_s11 = smov 96  }
  0x26   : > { %12936 = sst [smem:[#allocation3_spill]] %s11424_s7  ;;  %s12902_s29 = smov 88  }
  0x27   : > { %s12941_s1 = sld [smem:[#allocation7_spill]]  ;;  %s12893_s30 = smov 112  }
  0x28   : > { %v921_v0 = vld [vmem:[%s12935_s3] sm:$0xff]  ;;  %v922_v1 = vld [vmem:[%s12935_s3 + $0x8] sm:$0xff]  ;;  %v923_v2 = vld [vmem:[%s12935_s3 + $0x10] sm:$0xff]  ;;  %s12890_s6 = smov 64   ;;  %s12897_s2 = smov 56  }
  0x29   : > { %v9562_v3 = vpack.c.bf16 %v922_v1, %v921_v0  ;;  %v924_v4 = vld [vmem:[%s12935_s3 + $0x18] sm:$0xff]  ;;  %s881_s9 = scalar_lea.vmem %s12937_s4, %s11424_s7  ;;  %v7802_v8 = vld [vmem:[%s12938_s10] ss:$0 sm:$0xff]  ;;  %s12896_s12 = smov 48  }
  0x2a   : > { %v9566_v5 = vpack.c.bf16 %v924_v4, %v923_v2  ;;  %v11430_v6 = vld [vmem:[%s881_s9] sm:$0xff]  ;;  %v11434_v7 = vld [vmem:[%s881_s9 + $0x8] sm:$0xff]  ;;  %s12891_s9 = smov 80   ;;  %s12945_s8 = sld [smem:[#allocation17_spill]] }
  0x2b   : > { %9563 = vmatprep.subr.bf16.mxu0 %v9562_v3  ;;  %8655 = vmatprep.mubr.msk.f32.mxu0 %vm932_vm0, %v11430_v6  ;;  %s12947_s27 = sld [smem:[#allocation15_spill]]  ;;  %s12948_s13 = sld [smem:[#allocation18_spill]] }
  0x2c   : > { %9565 = vmatpush3.bf16.msra.mxu0 %v9562_v3  ;;  %s12949_s24 = smov 96   ;;  %s12955_s14 = sld [smem:[#allocation19_spill]] }
  0x2d   : > { %9567 = vmatprep.subr.bf16.mxu0 %v9566_v5  ;;  %s11481_s4 = scalar_lea.vmem %s12941_s1, %s11424_s7  ;;  %s12895_s1 = smov 40  }
  0x2e   : > { %v11484_v25 = vld [vmem:[%s11481_s4 + $0x8] sm:$0xff]  ;;  %v11487_v26 = vld [vmem:[%s11481_s4] sm:$0xff]  ;;  %s12950_s7 = sld [smem:[#allocation13_spill]]  ;;  %s12957_s25 = smov 88  }
  0x2f   : > { %s12962_s15 = sld [smem:[#allocation20_spill]]  ;;  %s12972_s26 = sld [smem:[#allocation19_spill]] }
  0x30   : > { %9569 = vmatpush3.bf16.msra.mxu0 %v9566_v5  ;;  %s12946_s28 = smov %s12945_s8 }
  0x33   : > { %8656 = vmatmul.mubr.msk.f32.vlgmr.msra.gmra.mrb[0].mxu0 %vm932_vm0, %v11434_v7 }
 0x106   : > { %v8657_v9 = vpop.f32.mrb[0].mxu0 }
 0x107   : > { %v11441_v10 = vadd.f32 %v8657_v9, %v7802_v8  ;;  %v1005_v11 = vpop.f32.mrb[1].mxu0 }
 0x108   : > { %v11443_v12 = vadd.f32 %v7802_v8, %v1005_v11 }
 0x10a   : > { %1308 = vrot.lane.b32.xlu1 %v11443_v12, %s12904_s0  ;;  %8662 = vmatprep.mubr.msk.f32.mxu1 %vm1025_vm1, %v11443_v12  ;;  %v11451_v13 = vpack.i.bf16 %v11441_v10, %v11443_v12 }
 0x10c   : > { %10422 = vrot.lane.b32.xlu0 %v11451_v13, %s12906_s11  ;;  %s12953_s11 = sld [smem:[#allocation8_spill]] }
 0x10e   : > { %1310 = vrot.lane.b32.xlu1 %v11441_v10, %s12904_s0  ;;  %s12944_s0 = sld [smem:[#allocation6_spill]] }
 0x110   : > { %10427 = vrot.lane.b32.xlu0 %v11451_v13, %s12902_s29  ;;  %s12952_s29 = sld [smem:[#allocation16_spill]] }
 0x17c   : > { %v1309_v14 = vpop.permute.xlu1 %1308 }
 0x17d   : > { %8681 = vmatprep.mubr.msk.f32.mxu0 %vm1025_vm1, %v1309_v14 }
 0x17e   : > { %v10423_v15 = vpop.permute.xlu0 %10422 }
 0x17f   : > { %v10425_v16 = vunpack.i.h.bf16 %v10423_v15  ;;  %v10424_v17 = vunpack.i.l.bf16 %v10423_v15 }
 0x180   : > { %v1311_v24 = vpop.permute.xlu1 %1310 }
 0x181   : > { %v9570_v19 = vpack.c.bf16 %v10425_v16, %v10424_v17 }
 0x182   : > { %v10428_v20 = vpop.permute.xlu0 %10427 }
 0x183   : > { %v10430_v21 = vunpack.i.h.bf16 %v10428_v20  ;;  %v10429_v22 = vunpack.i.l.bf16 %v10428_v20  ;;  %9572 = vmatprep.subr.msk.bf16.mxu1 %vm11462_vm2, %v9570_v19 }
 0x184   : > { %9575 = vmatpush3.bf16.xpose.msk.msra.mxu1 %vm11462_vm2, %v9570_v19 }
 0x185   : > { %v9580_v23 = vpack.c.bf16 %v10430_v21, %v10429_v22 }
 0x187   : > { %9582 = vmatprep.subr.msk.bf16.mxu0 %vm11462_vm2, %v9580_v23 }
 0x188   : > { %9585 = vmatpush3.bf16.xpose.msk.msra.mxu0 %vm11462_vm2, %v9580_v23 }
 0x18b   : > { %8663 = vmatmul.mubr.msk.f32.vlgmr.msra.gmra.mrb[0].mxu1 %vm1025_vm1, %v11441_v10 }
 0x18f   : > { %8682 = vmatmul.mubr.msk.f32.vlgmr.msra.gmra.mrb[2].mxu0 %vm1025_vm1, %v1311_v24 }
 0x25e   : > { %v8664_v27 = vpop.f32.mrb[0].mxu1 }
 0x25f   : > { %v1106_v28 = vadd.f32 %v8664_v27, %v11484_v25  ;;  %v1100_v29 = vpop.f32.mrb[1].mxu1 }
 0x260   : > { %v1101_v30 = vadd.f32 %v1100_v29, %v11487_v26 }
 0x261   : > { %v1113_v31 = vsel %vm1109_vm3, %v1106_v28, -inf }
 0x262   : > { %v8683_v32 = vpop.f32.mrb[2].mxu0  ;;  %1114 = vmax.xlane.f32.xlu1 %v1113_v31  ;;  %v1110_v33 = vsel %vm1109_vm3, %v1101_v30, -inf }
 0x263   : > { %v1390_v34 = vpop.f32.mrb[3].mxu0  ;;  %1111 = vmax.xlane.f32.xlu0 %v1110_v33  ;;  %v1396_v55 = vadd.f32 %v8683_v32, %v11484_v25 }
 0x264   : > { %v11502_v35 = vadd.f32 %v1390_v34, %v11487_v26 }
 0x265   : > { %v1402_v58 = vsel %vm1109_vm3, %v1396_v55, -inf }
 0x266   : > { %v1399_v36 = vsel %vm1109_vm3, %v11502_v35, -inf }
 0x273   : > { %10437 = vrot.lane.b32.xlu1 %v11451_v13, %s12891_s9  ;;  %s12900_s9 = smov 104  }
 0x277   : > { %1593 = vrot.lane.b32.xlu1 %v11441_v10, %s12893_s30 }
 0x279   : > { %10432 = vrot.lane.b32.xlu0 %v11451_v13, %s12890_s6  ;;  %s12942_s6 = sld [smem:[#allocation11_spill]] }
 0x27d   : > { %1591 = vrot.lane.b32.xlu0 %v11443_v12, %s12893_s30  ;;  %s12898_s30 = smov 72  }
 0x27f   : > { %v1014_v59 = vld [vmem:[%s12942_s6] sm:$0xff] }
 0x29c   : > { %1400 = vmax.xlane.f32.xlu0 %v1399_v36 }
 0x2ef   : > { %v1115_v37 = vpop.xlane.xlu1 %1114 }
 0x2f0   : > { %v1117_v38 = vsub.f32 %v1106_v28, %v1115_v37  ;;  %v1112_v39 = vpop.xlane.xlu0 %1111 }
 0x2f1   : > { %v1116_v40 = vsub.f32 %v1101_v30, %v1112_v39 }
 0x2f2   : > { %v1120_v41 = vmul.f32 1.442695, %v1117_v38 }
 0x2f3   : > { %v1118_v42 = vmul.f32 1.442695, %v1116_v40  ;;  %v10438_v43 = vpop.permute.xlu1 %10437 }
 0x2f4   : > { %11061 = vpow2.f32 %v1120_v41  ;;  %v10440_v44 = vunpack.i.h.bf16 %v10438_v43  ;;  %v10439_v45 = vunpack.i.l.bf16 %v10438_v43  ;;  %v10433_v46 = vpop.permute.xlu0 %10432 }
 0x2f5   : > { %11063 = vpow2.f32 %v1118_v42  ;;  %v10435_v47 = vunpack.i.h.bf16 %v10433_v46  ;;  %v10434_v48 = vunpack.i.l.bf16 %v10433_v46 }
 0x2f6   : > { %v9590_v49 = vpack.c.bf16 %v10440_v44, %v10439_v45 }
 0x2f7   : > { %v9576_v50 = vpack.c.bf16 %v10435_v47, %v10434_v48  ;;  %v1594_v56 = vpop.permute.xlu1 %1593 }
 0x2f8   : > { %9592 = vmatprep.subr.msk.bf16.mxu0 %vm11462_vm2, %v9590_v49  ;;  %v1592_v51 = vpop.permute.xlu0 %1591 }
 0x2f9   : > { %9577 = vmatprep.subr.bf16.mxu1 %v9576_v50  ;;  %9595 = vmatpush3.bf16.xpose.msk.msra.mxu0 %vm11462_vm2, %v9590_v49 }
 0x2fa   : > { %8700 = vmatprep.mubr.msk.f32.mxu0 %vm1025_vm1, %v1592_v51  ;;  %9579 = vmatpush3.bf16.msra.mxu1 %v9576_v50 }
 0x2fb   : > { %8672 = vmatprep.subr.mxu1 %v1014_v59 }
 0x2fe   : > { %v11062_v52 = vpop.eup %11061 }
 0x2ff   : > { %v11064_v53 = vpop.eup %11063  ;;  %v1125_v54 = vsel %vm1109_vm3, %v11062_v52, 0.0 }
 0x300   : > { %1126 = vadd.xlane.f32.xlu1 %v1125_v54  ;;  %8669 = vmatprep.mubr.msk.f32.mxu1 %vm1109_vm3, %v11064_v53  ;;  %v1122_v57 = vsel %vm1109_vm3, %v11064_v53, 0.0 }
 0x301   : > { %8701 = vmatmul.mubr.msk.f32.vlgmr.msra.gmra.mrb[4].mxu0 %vm1025_vm1, %v1594_v56  ;;  %1123 = vadd.xlane.f32.xlu0 %v1122_v57 }
 0x302   : > { %8670 = vmatmul.mubr.msk.f32.vlgmr.msra.gmra.mrb[2].mxu1 %vm1109_vm3, %v11062_v52 }
 0x303   : > { %8673 = vmatpush3.msra.mxu1 %v1014_v59 }
 0x305   : > { %1403 = vmax.xlane.f32.xlu0 %v1402_v58 }
 0x311   : > { %10442 = vrot.lane.b32.xlu1 %v11451_v13, %s12897_s2 }
 0x315   : > { %1874 = vrot.lane.b32.xlu1 %v11443_v12, %s12900_s9 }
 0x319   : > { %1876 = vrot.lane.b32.xlu1 %v11441_v10, %s12900_s9  ;;  %s11771_s9 = scalar_lea.vmem %s12953_s11, %s12982_s5  ;;  %s12959_s11 = smov 80  }
 0x31a   : > { %12954 = sst [smem:[#allocation4_spill]] %s11771_s9 }
 0x31b   : > { %10447 = vrot.lane.b32.xlu0 %v11451_v13, %s12898_s30  ;;  %s8150_s30 = sshll.u32 %s12982_s5, 7  ;;  %s12960_s5 = smov 104  }
 0x31c   : > { %s11588_s2 = scalar_lea.vmem %s12944_s0, %s8150_s30  ;;  %s12951_s30 = sld [smem:[#allocation14_spill]] }
 0x31d   : > { %s12956_s0 = smov 120  }
 0x329   : > { %v1401_v60 = vpop.xlane.xlu0 %1400 }
 0x32a   : > { %v1405_v17 = vsub.f32 %v11502_v35, %v1401_v60 }
 0x32c   : > { %v1407_v19 = vmul.f32 1.442695, %v1405_v17 }
 0x38d   : > { %v1127_v61 = vpop.xlane.xlu1 %1126 }
 0x38e   : > { %v1124_v62 = vpop.xlane.xlu0 %1123 }
 0x391   : > { %v10443_v63 = vpop.permute.xlu1 %10442 }
 0x392   : > { %v10445_v0 = vunpack.i.h.bf16 %v10443_v63  ;;  %v10444_v1 = vunpack.i.l.bf16 %v10443_v63  ;;  %v1404_v2 = vpop.xlane.xlu0 %1403 }
 0x393   : > { %v1406_v3 = vsub.f32 %v1396_v55, %v1404_v2 }
 0x394   : > { %v9586_v4 = vpack.c.bf16 %v10445_v0, %v10444_v1 }
 0x395   : > { %v1409_v5 = vmul.f32 1.442695, %v1406_v3  ;;  %v1875_v8 = vpop.permute.xlu1 %1874 }
 0x396   : > { %8719 = vmatprep.mubr.msk.f32.mxu0 %vm1025_vm1, %v1875_v8  ;;  %v10448_v9 = vpop.permute.xlu0 %10447  ;;  %9587 = vmatprep.subr.bf16.mxu1 %v9586_v4 }
 0x397   : > { %11065 = vpow2.f32 %v1409_v5  ;;  %v10450_v10 = vunpack.i.h.bf16 %v10448_v9  ;;  %v10449_v11 = vunpack.i.l.bf16 %v10448_v9 }
 0x398   : > { %11067 = vrcp.f32 %v1124_v62 }
 0x399   : > { %v9600_v12 = vpack.c.bf16 %v10450_v10, %v10449_v11  ;;  %v1877_v15 = vpop.permute.xlu1 %1876  ;;  %11069 = vrcp.f32 %v1127_v61 }
 0x39a   : > { %11071 = vpow2.f32 %v1407_v19 }
 0x39b   : > { %9602 = vmatprep.subr.msk.bf16.mxu0 %vm11462_vm2, %v9600_v12 }
 0x39c   : > { %9605 = vmatpush3.bf16.xpose.msk.msra.mxu0 %vm11462_vm2, %v9600_v12 }
 0x3a1   : > { %v11066_v14 = vpop.eup %11065 }
 0x3a2   : > { %v1414_v16 = vsel %vm1109_vm3, %v11066_v14, 0.0  ;;  %v11068_v23 = vpop.eup %11067 }
 0x3a3   : > { %1415 = vadd.xlane.f32.xlu1 %v1414_v16  ;;  %8720 = vmatmul.mubr.msk.f32.vlgmr.msra.gmra.mrb[6].mxu0 %vm1025_vm1, %v1877_v15  ;;  %v11070_v28 = vpop.eup %11069 }
 0x3a4   : > { %v11072_v32 = vpop.eup %11071 }
 0x3a5   : > { %v1411_v34 = vsel %vm1109_vm3, %v11072_v32, 0.0 }
 0x3b4   : > { %10452 = vrot.lane.b32.xlu1 %v11451_v13, %s12896_s12  ;;  %s12965_s12 = smov 48  }
 0x3b8   : > { %10457 = vrot.lane.b32.xlu1 %v11451_v13, %s12895_s1  ;;  %v1015_v13 = vld [vmem:[%s12942_s6 + $0x8] sm:$0xff]  ;;  %s12943_s1 = sld [smem:[#allocation12_spill]] }
 0x3d4   : > { %v8702_v20 = vpop.f32.mrb[4].mxu0 }
 0x3d5   : > { %v8671_v21 = vpop.f32.mrb[2].mxu1  ;;  %v1673_v22 = vpop.f32.mrb[5].mxu0  ;;  %v1679_v33 = vadd.f32 %v8702_v20, %v11484_v25 }
 0x3d6   : > { %v1674_v24 = vadd.f32 %v1673_v22, %v11487_v26  ;;  %v1206_v27 = vpop.f32.mrb[3].mxu1  ;;  %v1218_v30 = vmul.f32 %v11070_v28, %v8671_v21 }
 0x3d7   : > { %v1216_v29 = vmul.f32 %v11068_v23, %v1206_v27  ;;  %v1685_v35 = vsel %vm1109_vm3, %v1679_v33, -inf  ;;  %v1017_v27 = vld [vmem:[%s12942_s6 + $0x18] sm:$0xff] }
 0x3d8   : > { %v1682_v31 = vsel %vm1109_vm3, %v1674_v24, -inf }
 0x3d9   : > { %1683 = vmax.xlane.f32.xlu0 %v1682_v31  ;;  %8674 = vmatprep.mubr.msk.f32.mxu1 %vm1025_vm1, %v1216_v29 }
 0x3da   : > { %8675 = vmatmul.mubr.msk.f32.vlgmr.msra.gmra.mrb[4].mxu1 %vm1025_vm1, %v1218_v30 }
 0x3db   : > { %9589 = vmatpush3.bf16.msra.mxu1 %v9586_v4  ;;  %8688 = vmatprep.mubr.msk.f32.mxu1 %vm1109_vm3, %v11072_v32 }
 0x3dc   : > { %8691 = vmatprep.subr.mxu1 %v1015_v13 }
 0x3dd   : > { %1412 = vadd.xlane.f32.xlu0 %v1411_v34 }
 0x3de   : > { %8689 = vmatmul.mubr.msk.f32.vlgmr.msra.gmra.mrb[6].mxu1 %vm1109_vm3, %v11066_v14 }
 0x3df   : > { %8692 = vmatpush3.msra.mxu1 %v1015_v13 }
 0x3e1   : > { %1686 = vmax.xlane.f32.xlu0 %v1685_v35  ;;  %v7813_v35 = vld [vmem:[%s12943_s1] ss:$0 sm:$0xff] }
 0x430   : > { %v1416_v36 = vpop.xlane.xlu1 %1415 }
 0x434   : > { %v10453_v37 = vpop.permute.xlu1 %10452 }
 0x435   : > { %v10455_v38 = vunpack.i.h.bf16 %v10453_v37  ;;  %v10454_v39 = vunpack.i.l.bf16 %v10453_v37 }
 0x437   : > { %v9596_v40 = vpack.c.bf16 %v10455_v38, %v10454_v39 }
 0x438   : > { %v10458_v61 = vpop.permute.xlu1 %10457 }
 0x439   : > { %9597 = vmatprep.subr.bf16.mxu1 %v9596_v40  ;;  %v10460_v0 = vunpack.i.h.bf16 %v10458_v61  ;;  %v10459_v1 = vunpack.i.l.bf16 %v10458_v61 }
 0x43b   : > { %v9606_v2 = vpack.c.bf16 %v10460_v0, %v10459_v1 }
 0x466   : > { %v1684_v41 = vpop.xlane.xlu0 %1683 }
 0x467   : > { %v1688_v43 = vsub.f32 %v1674_v24, %v1684_v41 }
 0x469   : > { %v1690_v46 = vmul.f32 1.442695, %v1688_v43 }
 0x46a   : > { %v1413_v42 = vpop.xlane.xlu0 %1412 }
 0x46e   : > { %v1687_v44 = vpop.xlane.xlu0 %1686 }
 0x46f   : > { %v1689_v45 = vsub.f32 %v1679_v33, %v1687_v44  ;;  %v2298_v44 = vld [vmem:[%s12946_s28 + $0x10] sm:$0xff] }
 0x471   : > { %v1692_v47 = vmul.f32 1.442695, %v1689_v45 }
 0x473   : > { %11073 = vpow2.f32 %v1692_v47  ;;  %v902_v47 = vld [vmem:[%s11588_s2] sm:$0xff] }
 0x474   : > { %11075 = vpow2.f32 %v1690_v46  ;;  %v2299_v46 = vld [vmem:[%s12946_s28 + $0x18] sm:$0xff] }
 0x475   : > { %11077 = vrcp.f32 %v1413_v42 }
 0x476   : > { %v8721_v48 = vpop.f32.mrb[6].mxu0  ;;  %11079 = vrcp.f32 %v1416_v36 }
 0x477   : > { %v1956_v49 = vpop.f32.mrb[7].mxu0  ;;  %v1962_v55 = vadd.f32 %v8721_v48, %v11484_v25  ;;  %v1016_v25 = vld [vmem:[%s12942_s6 + $0x10] sm:$0xff]  ;;  %v9622_v48 = vpack.c.bf16 %v2299_v46, %v2298_v44 }
 0x478   : > { %v1957_v50 = vadd.f32 %v1956_v49, %v11487_v26  ;;  %v903_v49 = vld [vmem:[%s11588_s2 + $0x8] sm:$0xff] }
 0x479   : > { %v1968_v57 = vsel %vm1109_vm3, %v1962_v55, -inf }
 0x47a   : > { %v1965_v51 = vsel %vm1109_vm3, %v1957_v50, -inf }
 0x47b   : > { %1966 = vmax.xlane.f32.xlu0 %v1965_v51  ;;  %v905_v51 = vld [vmem:[%s11588_s2 + $0x18] sm:$0xff] }
 0x47d   : > { %v11074_v52 = vpop.eup %11073 }
 0x47e   : > { %v1697_v53 = vsel %vm1109_vm3, %v11074_v52, 0.0  ;;  %v11076_v54 = vpop.eup %11075 }
 0x47f   : > { %1698 = vadd.xlane.f32.xlu0 %v1697_v53  ;;  %v1694_v56 = vsel %vm1109_vm3, %v11076_v54, 0.0  ;;  %v11078_v26 = vpop.eup %11077  ;;  %v907_v53 = vld [vmem:[%s11588_s2 + $0x28] sm:$0xff] }
 0x480   : > { %v11080_v60 = vpop.eup %11079 }
 0x483   : > { %1695 = vadd.xlane.f32.xlu0 %v1694_v56  ;;  %v910_v56 = vld [vmem:[%s11588_s2 + $0x40] sm:$0xff] }
 0x487   : > { %1969 = vmax.xlane.f32.xlu0 %v1968_v57  ;;  %v911_v57 = vld [vmem:[%s11588_s2 + $0x48] sm:$0xff] }
 0x4b1   : > { %v8690_v58 = vpop.f32.mrb[6].mxu1 }
 0x4b2   : > { %v1495_v59 = vpop.f32.mrb[7].mxu1  ;;  %v1507_v63 = vmul.f32 %v11080_v60, %v8690_v58  ;;  %v912_v58 = vld [vmem:[%s11588_s2 + $0x50] sm:$0xff] }
 0x4b3   : > { %v1505_v62 = vmul.f32 %v11078_v26, %v1495_v59  ;;  %v913_v26 = vld [vmem:[%s11588_s2 + $0x58] sm:$0xff] }
 0x4b5   : > { %8693 = vmatprep.mubr.msk.f32.mxu1 %vm1025_vm1, %v1505_v62 }
 0x4b6   : > { %8694 = vmatmul.mubr.msk.f32.vlgmr.msra.gmra.mrb[4].mxu1 %vm1025_vm1, %v1507_v63 }
 0x4b7   : > { %9599 = vmatpush3.bf16.msra.mxu1 %v9596_v40  ;;  %8707 = vmatprep.mubr.msk.f32.mxu1 %vm1109_vm3, %v11076_v54  ;;  %v908_v54 = vld [vmem:[%s11588_s2 + $0x30] sm:$0xff] }
 0x4b8   : > { %8710 = vmatprep.subr.mxu1 %v1016_v25 }
 0x4ba   : > { %8708 = vmatmul.mubr.msk.f32.vlgmr.msra.gmra.mrb[8].mxu1 %vm1109_vm3, %v11074_v52  ;;  %v906_v52 = vld [vmem:[%s11588_s2 + $0x20] sm:$0xff] }
 0x4bb   : > { %8711 = vmatpush3.msra.mxu1 %v1016_v25 }
 0x4bc   : > { %9607 = vmatprep.subr.bf16.mxu1 %v9606_v2 }
 0x508   : > { %v1967_v3 = vpop.xlane.xlu0 %1966 }
 0x509   : > { %v1971_v4 = vsub.f32 %v1957_v50, %v1967_v3  ;;  %v904_v50 = vld [vmem:[%s11588_s2 + $0x10] sm:$0xff] }
 0x50b   : > { %v1973_v5 = vmul.f32 1.442695, %v1971_v4  ;;  %v914_v4 = vld [vmem:[%s11588_s2 + $0x60] sm:$0xff] }
 0x50c   : > { %v1699_v8 = vpop.xlane.xlu0 %1698 }
 0x50d   : > { %11081 = vpow2.f32 %v1973_v5  ;;  %v915_v5 = vld [vmem:[%s11588_s2 + $0x68] sm:$0xff] }
 0x510   : > { %v1696_v9 = vpop.xlane.xlu0 %1695 }
 0x514   : > { %v1970_v10 = vpop.xlane.xlu0 %1969 }
 0x515   : > { %v1972_v11 = vsub.f32 %v1962_v55, %v1970_v10  ;;  %v909_v55 = vld [vmem:[%s11588_s2 + $0x38] sm:$0xff]  ;;  %v2204_v10 = vld [vmem:[%s12947_s27] sm:$0xff] }
 0x517   : > { %v11082_v12 = vpop.eup %11081  ;;  %v1975_v14 = vmul.f32 1.442695, %v1972_v11  ;;  %v2205_v11 = vld [vmem:[%s12947_s27 + $0x8] sm:$0xff] }
 0x518   : > { %v1977_v15 = vsel %vm1109_vm3, %v11082_v12, 0.0 }
 0x519   : > { %11083 = vpow2.f32 %v1975_v14  ;;  %1978 = vadd.xlane.f32.xlu0 %v1977_v15  ;;  %v2207_v14 = vld [vmem:[%s12947_s27 + $0x18] sm:$0xff]  ;;  %v9610_v15 = vpack.c.bf16 %v2205_v11, %v2204_v10 }
 0x51a   : > { %11085 = vrcp.f32 %v1696_v9  ;;  %v917_v9 = vld [vmem:[%s11588_s2 + $0x78] sm:$0xff] }
 0x51b   : > { %11087 = vrcp.f32 %v1699_v8  ;;  %v916_v8 = vld [vmem:[%s11588_s2 + $0x70] sm:$0xff]  ;;  %9611 = vmatprep.subr.bf16.mxu0 %v9610_v15 }
 0x51c   : > { %9613 = vmatpush3.bf16.msra.mxu0 %v9610_v15 }
 0x523   : > { %v11084_v16 = vpop.eup %11083 }
 0x524   : > { %v1980_v17 = vsel %vm1109_vm3, %v11084_v16, 0.0  ;;  %v11086_v20 = vpop.eup %11085 }
 0x525   : > { %1981 = vadd.xlane.f32.xlu1 %v1980_v17  ;;  %v11088_v22 = vpop.eup %11087  ;;  %v11659_v17 = vld [vmem:[%s12948_s13] ss:$0 sm:$0xff]  ;;  %s12966_s13 = smov 40  }
 0x58d   : > { %v8709_v19 = vpop.f32.mrb[8].mxu1 }
 0x58e   : > { %v1778_v21 = vpop.f32.mrb[9].mxu1  ;;  %v1790_v24 = vmul.f32 %v11088_v22, %v8709_v19 }
 0x58f   : > { %v1788_v23 = vmul.f32 %v11086_v20, %v1778_v21 }
 0x591   : > { %8712 = vmatprep.mubr.msk.f32.mxu1 %vm1025_vm1, %v1788_v23 }
 0x592   : > { %8713 = vmatmul.mubr.msk.f32.vlgmr.msra.gmra.mrb[4].mxu1 %vm1025_vm1, %v1790_v24 }
 0x593   : > { %9609 = vmatpush3.bf16.msra.mxu1 %v9606_v2  ;;  %8726 = vmatprep.mubr.msk.f32.mxu1 %vm1109_vm3, %v11082_v12  ;;  %v2206_v12 = vld [vmem:[%s12947_s27 + $0x10] sm:$0xff] }
 0x594   : > { %8729 = vmatprep.subr.mxu1 %v1017_v27 }
 0x596   : > { %8727 = vmatmul.mubr.msk.f32.vlgmr.msra.gmra.mrb[10].mxu1 %vm1109_vm3, %v11084_v16  ;;  %v9614_v16 = vpack.c.bf16 %v2207_v14, %v2206_v12 }
 0x597   : > { %8730 = vmatpush3.msra.mxu1 %v1017_v27 }
 0x598   : > { %9615 = vmatprep.subr.bf16.mxu0 %v9614_v16 }
 0x599   : > { %9617 = vmatpush3.bf16.msra.mxu0 %v9614_v16 }
 0x5a6   : > { %v1979_v28 = vpop.xlane.xlu0 %1978 }
 0x5a7   : > { %11089 = vrcp.f32 %v1979_v28 }
 0x5b1   : > { %v11090_v31 = vpop.eup %11089 }
 0x5b2   : > { %v1982_v29 = vpop.xlane.xlu1 %1981 }
 0x5b3   : > { %11091 = vrcp.f32 %v1982_v29 }
 0x5bd   : > { %v11092_v13 = vpop.eup %11091 }
 0x669   : > { %v8728_v30 = vpop.f32.mrb[10].mxu1 }
 0x66a   : > { %v2061_v32 = vpop.f32.mrb[11].mxu1  ;;  %v2073_v34 = vmul.f32 %v11092_v13, %v8728_v30 }
 0x66b   : > { %v2071_v33 = vmul.f32 %v11090_v31, %v2061_v32 }
 0x66d   : > { %8731 = vmatprep.mubr.msk.f32.mxu1 %vm1025_vm1, %v2071_v33 }
 0x66e   : > { %8732 = vmatmul.mubr.msk.f32.vlgmr.msra.gmra.mrb[4].mxu1 %vm1025_vm1, %v2073_v34 }
 0x66f   : > { %8753 = vmatprep.mubr.msk.f32.mxu1 %vm932_vm0, %v902_v47 }
 0x741   : > { %v8733_v36 = vpop.f32.mrb[4].mxu1 }
 0x742   : > { %v2146_v37 = vpop.f32.mrb[5].mxu1  ;;  %v10370_v38 = vadd.f32 %v8733_v36, %v7813_v35 }
 0x743   : > { %v10371_v39 = vadd.f32 %v7813_v35, %v2146_v37 }
 0x744   : > { %v2158_v42 = vadd.f32 %v10370_v38, %v11434_v7  ;;  %v2297_v7 = vld [vmem:[%s12946_s28 + $0x8] sm:$0xff] }
 0x745   : > { %v2157_v40 = vadd.f32 %v10371_v39, %v11430_v6  ;;  %v2296_v6 = vld [vmem:[%s12945_s8] sm:$0xff]  ;;  %s12958_s8 = smov 112  }
 0x746   : > { %v2164_v43 = vsel %vm932_vm0, %v2158_v42, 0.0  ;;  %v9618_v45 = vpack.c.bf16 %v2297_v7, %v2296_v6 }
 0x747   : > { %v2161_v41 = vsel %vm932_vm0, %v2157_v40, 0.0 }
 0x748   : > { %2162 = vadd.xlane.f32.xlu0 %v2161_v41  ;;  %9619 = vmatprep.subr.bf16.mxu1 %v9618_v45 }
 0x749   : > { %9621 = vmatpush3.bf16.msra.mxu1 %v9618_v45 }
 0x74a   : > { %9623 = vmatprep.subr.bf16.mxu1 %v9622_v48 }
 0x74c   : > { %2165 = vadd.xlane.f32.xlu0 %v2164_v43 }
 0x74d   : > { %9625 = vmatpush3.bf16.msra.mxu1 %v9622_v48 }
 0x750   : > { %8754 = vmatmul.mubr.msk.f32.vlgmr.msra.gmra.mrb[12].mxu1 %vm932_vm0, %v903_v49 }
 0x751   : > { %8756 = vmatprep.mubr.msk.f32.mxu1 %vm932_vm0, %v904_v50 }
 0x754   : > { %8757 = vmatmul.mubr.msk.f32.gmra.mrb[14].mxu1 %vm932_vm0, %v905_v51 }
 0x755   : > { %8759 = vmatprep.mubr.msk.f32.mxu1 %vm932_vm0, %v906_v52 }
 0x758   : > { %8760 = vmatmul.mubr.msk.f32.gmra.mrb[16].mxu1 %vm932_vm0, %v907_v53  ;;  %v7838_v53 = vld [vmem:[%s12950_s7] ss:$0 sm:$0xff] }
 0x759   : > { %8762 = vmatprep.mubr.msk.f32.mxu1 %vm932_vm0, %v908_v54 }
 0x75c   : > { %8763 = vmatmul.mubr.msk.f32.gmra.mrb[18].mxu1 %vm932_vm0, %v909_v55  ;;  %v7839_v55 = vld [vmem:[%s12951_s30] ss:$0 sm:$0xff]  ;;  %s12964_s30 = smov 56  }
 0x75d   : > { %8765 = vmatprep.mubr.msk.f32.mxu1 %vm932_vm0, %v910_v56 }
 0x760   : > { %8766 = vmatmul.mubr.msk.f32.gmra.mrb[20].mxu1 %vm932_vm0, %v911_v57 }
 0x761   : > { %8768 = vmatprep.mubr.msk.f32.mxu1 %vm932_vm0, %v912_v58 }
 0x764   : > { %8769 = vmatmul.mubr.msk.f32.gmra.mrb[22].mxu1 %vm932_vm0, %v913_v26 }
 0x765   : > { %8771 = vmatprep.mubr.msk.f32.mxu1 %vm932_vm0, %v914_v4 }
 0x768   : > { %8772 = vmatmul.mubr.msk.f32.gmra.mrb[24].mxu1 %vm932_vm0, %v915_v5 }
 0x769   : > { %8774 = vmatprep.mubr.msk.f32.mxu1 %vm932_vm0, %v916_v8 }
 0x76c   : > { %8775 = vmatmul.mubr.msk.f32.gmra.mrb[26].mxu1 %vm932_vm0, %v917_v9 }
 0x7d5   : > { %v2163_v59 = vpop.xlane.xlu0 %2162 }
 0x7d6   : > { %v2168_v60 = vmul.f32 0.03125, %v2163_v59 }
 0x7d8   : > { %v11626_v61 = vsub.f32 %v2157_v40, %v2168_v60 }
 0x7d9   : > { %v2166_v62 = vpop.xlane.xlu0 %2165 }
 0x7da   : > { %v2169_v63 = vmul.f32 0.03125, %v2166_v62  ;;  %v2172_v25 = vmul.f32 %v11626_v61, %v11626_v61 }
 0x7dc   : > { %v11630_v0 = vsub.f32 %v2158_v42, %v2169_v63  ;;  %v2174_v1 = vsel %vm932_vm0, %v2172_v25, 0.0 }
 0x7dd   : > { %2175 = vadd.xlane.f32.xlu0 %v2174_v1 }
 0x7de   : > { %v2173_v2 = vmul.f32 %v11630_v0, %v11630_v0 }
 0x7e0   : > { %v2177_v3 = vsel %vm932_vm0, %v2173_v2, 0.0 }
 0x7e1   : > { %2178 = vadd.xlane.f32.xlu0 %v2177_v3 }
 0x823   : > { %v8755_v19 = vpop.f32.mrb[12].mxu1 }
 0x824   : > { %v2427_v20 = vadd.f32 %v8755_v19, %v11659_v17  ;;  %v2421_v21 = vpop.f32.mrb[13].mxu1 }
 0x825   : > { %v2422_v22 = vadd.f32 %v11659_v17, %v2421_v21 }
 0x827   : > { %v9626_v23 = vpack.c.bf16 %v2427_v20, %v2422_v22  ;;  %v11663_v24 = vpack.i.bf16 %v2427_v20, %v2422_v22  ;;  %v8758_v27 = vpop.f32.mrb[14].mxu1 }
 0x828   : > { %v2437_v28 = vadd.f32 %v8758_v27, %v11659_v17  ;;  %v2431_v29 = vpop.f32.mrb[15].mxu1 }
 0x829   : > { %9628 = vmatprep.subr.msk.bf16.mxu0 %vm11462_vm2, %v9626_v23  ;;  %10462 = vrot.lane.b32.xlu0 %v11663_v24, %s12949_s24  ;;  %v2432_v30 = vadd.f32 %v11659_v17, %v2431_v29 }
 0x82b   : > { %v11671_v31 = vpack.i.bf16 %v2437_v28, %v2432_v30  ;;  %v8761_v32 = vpop.f32.mrb[16].mxu1  ;;  %v9632_v62 = vpack.c.bf16 %v2437_v28, %v2432_v30 }
 0x82c   : > { %v2447_v13 = vadd.f32 %v8761_v32, %v11659_v17  ;;  %v2441_v33 = vpop.f32.mrb[17].mxu1 }
 0x82d   : > { %10467 = vrot.lane.b32.xlu0 %v11671_v31, %s12949_s24  ;;  %v2442_v34 = vadd.f32 %v11659_v17, %v2441_v33 }
 0x82f   : > { %v11677_v35 = vpack.i.bf16 %v2447_v13, %v2442_v34  ;;  %v8764_v36 = vpop.f32.mrb[18].mxu1 }
 0x830   : > { %v2451_v37 = vpop.f32.mrb[19].mxu1  ;;  %v11718_v63 = vadd.f32 %v8764_v36, %v11659_v17 }
 0x831   : > { %10472 = vrot.lane.b32.xlu0 %v11677_v35, %s12949_s24  ;;  %v2452_v25 = vadd.f32 %v11659_v17, %v2451_v37 }
 0x833   : > { %v8767_v38 = vpop.f32.mrb[20].mxu1 }
 0x834   : > { %v2467_v39 = vadd.f32 %v8767_v38, %v11659_v17  ;;  %v2461_v40 = vpop.f32.mrb[21].mxu1 }
 0x835   : > { %v2462_v41 = vadd.f32 %v11659_v17, %v2461_v40  ;;  %v11774_v40 = vld [vmem:[%s11771_s9] ss:$0 sm:$0xff] }
 0x837   : > { %v11683_v42 = vpack.i.bf16 %v2467_v39, %v2462_v41  ;;  %v8770_v43 = vpop.f32.mrb[22].mxu1  ;;  %v9650_v1 = vpack.c.bf16 %v2467_v39, %v2462_v41 }
 0x838   : > { %v2477_v6 = vadd.f32 %v8770_v43, %v11659_v17  ;;  %v2471_v7 = vpop.f32.mrb[23].mxu1 }
 0x839   : > { %10482 = vrot.lane.b32.xlu0 %v11683_v42, %s12949_s24  ;;  %v2472_v44 = vadd.f32 %v11659_v17, %v2471_v7 }
 0x83b   : > { %v11689_v45 = vpack.i.bf16 %v2477_v6, %v2472_v44  ;;  %v9656_v2 = vpack.c.bf16 %v2477_v6, %v2472_v44  ;;  %v8773_v3 = vpop.f32.mrb[24].mxu1  ;;  %v11779_v44 = vpack.i.bf16 %v11718_v63, %v2452_v25 }
 0x83c   : > { %v2487_v4 = vadd.f32 %v8773_v3, %v11659_v17  ;;  %v2481_v5 = vpop.f32.mrb[25].mxu1 }
 0x83d   : > { %10487 = vrot.lane.b32.xlu0 %v11689_v45, %s12949_s24  ;;  %v2482_v8 = vadd.f32 %v11659_v17, %v2481_v5 }
 0x83f   : > { %v9662_v9 = vpack.c.bf16 %v2487_v4, %v2482_v8  ;;  %v11738_v10 = vpack.i.bf16 %v2487_v4, %v2482_v8  ;;  %v8776_v11 = vpop.f32.mrb[26].mxu1 }
 0x840   : > { %v2497_v12 = vadd.f32 %v8776_v11, %v11659_v17  ;;  %v2491_v14 = vpop.f32.mrb[27].mxu1 }
 0x841   : > { %10492 = vrot.lane.b32.xlu0 %v11738_v10, %s12949_s24  ;;  %v2492_v15 = vadd.f32 %v11659_v17, %v2491_v14  ;;  %v2500_v14 = vld [vmem:[%s12955_s14] sm:$0xff] }
 0x843   : > { %v9668_v16 = vpack.c.bf16 %v2497_v12, %v2492_v15  ;;  %v11748_v19 = vpack.i.bf16 %v2497_v12, %v2492_v15 }
 0x845   : > { %10497 = vrot.lane.b32.xlu0 %v11748_v19, %s12949_s24 }
 0x86a   : > { %v2176_v46 = vpop.xlane.xlu0 %2175 }
 0x86b   : > { %v2180_v47 = vmul.f32 0.03125, %v2176_v46 }
 0x86d   : > { %v2182_v48 = vadd.f32 1e-05, %v2180_v47 }
 0x86e   : > { %v2179_v49 = vpop.xlane.xlu0 %2178 }
 0x86f   : > { %11093 = vrsqrt.f32 %v2182_v48  ;;  %v2181_v50 = vmul.f32 0.03125, %v2179_v49 }
 0x871   : > { %v2183_v51 = vadd.f32 1e-05, %v2181_v50 }
 0x873   : > { %11095 = vrsqrt.f32 %v2183_v51 }
 0x879   : > { %v11094_v52 = vpop.eup %11093 }
 0x87a   : > { %v2186_v54 = vmul.f32 %v11094_v52, %v11626_v61  ;;  %v9638_v61 = vpack.c.bf16 %v2447_v13, %v2442_v34  ;;  %v7840_v34 = vld [vmem:[%s12952_s29] ss:$0 sm:$0xff]  ;;  %s12961_s29 = smov 72  }
 0x87c   : > { %v2194_v56 = vmul.f32 %v7838_v53, %v2186_v54 }
 0x87d   : > { %v11096_v57 = vpop.eup %11095 }
 0x87e   : > { %v2187_v58 = vmul.f32 %v11096_v57, %v11630_v0  ;;  %v11701_v26 = vadd.f32 %v7839_v55, %v2194_v56  ;;  %v9644_v0 = vpack.c.bf16 %v11718_v63, %v2452_v25 }
 0x880   : > { %v2195_v59 = vmul.f32 %v7838_v53, %v2187_v58  ;;  %8742 = vmatprep.mubr.msk.f32.mxu0 %vm932_vm0, %v11701_v26 }
 0x882   : > { %v11705_v60 = vadd.f32 %v7839_v55, %v2195_v59 }
 0x884   : > { %8743 = vmatmul.mubr.msk.f32.vlgmr.msra.gmra.mrb[8].mxu0 %vm932_vm0, %v11705_v60 }
 0x885   : > { %9631 = vmatpush3.bf16.xpose.msk.msra.mxu0 %vm11462_vm2, %v9626_v23 }
 0x886   : > { %9634 = vmatprep.subr.msk.bf16.mxu0 %vm11462_vm2, %v9632_v62 }
 0x88d   : > { %9637 = vmatpush3.bf16.xpose.msk.msra.mxu0 %vm11462_vm2, %v9632_v62 }
 0x88e   : > { %9640 = vmatprep.subr.msk.bf16.mxu0 %vm11462_vm2, %v9638_v61 }
 0x895   : > { %9643 = vmatpush3.bf16.xpose.msk.msra.mxu0 %vm11462_vm2, %v9638_v61 }
 0x896   : > { %9646 = vmatprep.subr.msk.bf16.mxu0 %vm11462_vm2, %v9644_v0 }
 0x89b   : > { %v10463_v20 = vpop.permute.xlu0 %10462 }
 0x89c   : > { %v10465_v21 = vunpack.i.h.bf16 %v10463_v20  ;;  %v10464_v22 = vunpack.i.l.bf16 %v10463_v20 }
 0x89d   : > { %9649 = vmatpush3.bf16.xpose.msk.msra.mxu0 %vm11462_vm2, %v9644_v0 }
 0x89e   : > { %9652 = vmatprep.subr.msk.bf16.mxu0 %vm11462_vm2, %v9650_v1  ;;  %v9674_v23 = vpack.c.bf16 %v10465_v21, %v10464_v22 }
 0x89f   : > { %v10468_v17 = vpop.permute.xlu0 %10467 }
 0x8a0   : > { %9675 = vmatprep.subr.bf16.mxu1 %v9674_v23  ;;  %v10470_v27 = vunpack.i.h.bf16 %v10468_v17  ;;  %v10469_v28 = vunpack.i.l.bf16 %v10468_v17 }
 0x8a1   : > { %9677 = vmatpush3.bf16.msra.mxu1 %v9674_v23 }
 0x8a2   : > { %v9678_v29 = vpack.c.bf16 %v10470_v27, %v10469_v28 }
 0x8a3   : > { %v10473_v30 = vpop.permute.xlu0 %10472 }
 0x8a4   : > { %9679 = vmatprep.subr.bf16.mxu1 %v9678_v29  ;;  %v10475_v32 = vunpack.i.h.bf16 %v10473_v30  ;;  %v10474_v13 = vunpack.i.l.bf16 %v10473_v30 }
 0x8a5   : > { %9655 = vmatpush3.bf16.xpose.msk.msra.mxu0 %vm11462_vm2, %v9650_v1  ;;  %9681 = vmatpush3.bf16.msra.mxu1 %v9678_v29 }
 0x8a6   : > { %9658 = vmatprep.subr.msk.bf16.mxu0 %vm11462_vm2, %v9656_v2  ;;  %v9682_v33 = vpack.c.bf16 %v10475_v32, %v10474_v13 }
 0x8a8   : > { %9683 = vmatprep.subr.bf16.mxu1 %v9682_v33 }
 0x8a9   : > { %9685 = vmatpush3.bf16.msra.mxu1 %v9682_v33 }
 0x8ab   : > { %v10483_v50 = vpop.permute.xlu0 %10482 }
 0x8ac   : > { %v10485_v53 = vunpack.i.h.bf16 %v10483_v50  ;;  %v10484_v55 = vunpack.i.l.bf16 %v10483_v50 }
 0x8ad   : > { %9661 = vmatpush3.bf16.xpose.msk.msra.mxu0 %vm11462_vm2, %v9656_v2 }
 0x8ae   : > { %9664 = vmatprep.subr.msk.bf16.mxu0 %vm11462_vm2, %v9662_v9  ;;  %v9690_v63 = vpack.c.bf16 %v10485_v53, %v10484_v55 }
 0x8af   : > { %v10488_v58 = vpop.permute.xlu0 %10487 }
 0x8b0   : > { %v10490_v62 = vunpack.i.h.bf16 %v10488_v58  ;;  %v10489_v61 = vunpack.i.l.bf16 %v10488_v58 }
 0x8b2   : > { %v9694_v3 = vpack.c.bf16 %v10490_v62, %v10489_v61 }
 0x8b3   : > { %v10493_v25 = vpop.permute.xlu0 %10492 }
 0x8b4   : > { %v10495_v1 = vunpack.i.h.bf16 %v10493_v25  ;;  %v10494_v2 = vunpack.i.l.bf16 %v10493_v25 }
 0x8b5   : > { %9667 = vmatpush3.bf16.xpose.msk.msra.mxu0 %vm11462_vm2, %v9662_v9 }
 0x8b6   : > { %9670 = vmatprep.subr.msk.bf16.mxu0 %vm11462_vm2, %v9668_v16  ;;  %v9698_v11 = vpack.c.bf16 %v10495_v1, %v10494_v2 }
 0x8b7   : > { %v10498_v4 = vpop.permute.xlu0 %10497 }
 0x8b8   : > { %v10500_v8 = vunpack.i.h.bf16 %v10498_v4  ;;  %v10499_v9 = vunpack.i.l.bf16 %v10498_v4 }
 0x8ba   : > { %v9702_v12 = vpack.c.bf16 %v10500_v8, %v10499_v9 }
 0x8bd   : > { %9673 = vmatpush3.bf16.xpose.msk.msra.mxu0 %vm11462_vm2, %v9668_v16 }
 0x957   : > { %v8744_v36 = vpop.f32.mrb[8].mxu0 }
 0x958   : > { %v2287_v37 = vpop.f32.mrb[9].mxu0  ;;  %v11761_v39 = vadd.f32 %v8744_v36, %v7840_v34 }
 0x959   : > { %v11759_v38 = vadd.f32 %v7840_v34, %v2287_v37 }
 0x95b   : > { %8809 = vmatprep.mubr.msk.f32.mxu0 %vm1025_vm1, %v11759_v38 }
 0x95c   : > { %8810 = vmatmul.mubr.msk.f32.vlgmr.msra.gmra.mrb[10].mxu0 %vm1025_vm1, %v11761_v39 }
 0xa2f   : > { %v8811_v41 = vpop.f32.mrb[10].mxu0 }
 0xa30   : > { %v2637_v43 = vadd.f32 %v8811_v41, %v11774_v40  ;;  %v2631_v6 = vpop.f32.mrb[11].mxu0 }
 0xa31   : > { %v2632_v7 = vadd.f32 %v11774_v40, %v2631_v6 }
 0xa32   : > { %2642 = vmax.xlane.f32.xlu1 %v2637_v43 }
 0xa36   : > { %2640 = vmax.xlane.f32.xlu1 %v2632_v7 }
 0xa47   : > { %10477 = vrot.lane.b32.xlu1 %v11779_v44, %s12949_s24 }
 0xabf   : > { %v2643_v46 = vpop.xlane.xlu1 %2642 }
 0xac0   : > { %v2645_v47 = vsub.f32 %v2637_v43, %v2643_v46 }
 0xac2   : > { %v2648_v48 = vmul.f32 1.442695, %v2645_v47 }
 0xac3   : > { %v2641_v49 = vpop.xlane.xlu1 %2640 }
 0xac4   : > { %11097 = vpow2.f32 %v2648_v48  ;;  %v2644_v51 = vsub.f32 %v2632_v7, %v2641_v49 }
 0xac6   : > { %v2646_v52 = vmul.f32 1.442695, %v2644_v51 }
 0xac7   : > { %v10478_v54 = vpop.permute.xlu1 %10477 }
 0xac8   : > { %11099 = vpow2.f32 %v2646_v52  ;;  %v10480_v56 = vunpack.i.h.bf16 %v10478_v54  ;;  %v10479_v57 = vunpack.i.l.bf16 %v10478_v54 }
 0xaca   : > { %v9686_v59 = vpack.c.bf16 %v10480_v56, %v10479_v57 }
 0xacc   : > { %9687 = vmatprep.subr.bf16.mxu1 %v9686_v59 }
 0xacd   : > { %9689 = vmatpush3.bf16.msra.mxu1 %v9686_v59 }
 0xace   : > { %v11098_v0 = vpop.eup %11097  ;;  %9691 = vmatprep.subr.bf16.mxu1 %v9690_v63 }
 0xacf   : > { %2652 = vadd.xlane.f32.xlu0 %v11098_v0 }
 0xad1   : > { %9693 = vmatpush3.bf16.msra.mxu1 %v9690_v63 }
 0xad2   : > { %v11100_v5 = vpop.eup %11099  ;;  %9695 = vmatprep.subr.bf16.mxu1 %v9694_v3 }
 0xad3   : > { %2650 = vadd.xlane.f32.xlu1 %v11100_v5  ;;  %8844 = vmatprep.mubr.f32.mxu1 %v11100_v5 }
 0xad5   : > { %9697 = vmatpush3.bf16.msra.mxu1 %v9694_v3 }
 0xad6   : > { %9699 = vmatprep.subr.bf16.mxu1 %v9698_v11 }
 0xad9   : > { %9701 = vmatpush3.bf16.msra.mxu1 %v9698_v11 }
 0xada   : > { %9703 = vmatprep.subr.bf16.mxu1 %v9702_v12 }
 0xadd   : > { %9705 = vmatpush3.bf16.msra.mxu1 %v9702_v12 }
 0xade   : > { %8847 = vmatprep.subr.mxu1 %v2500_v14 }
 0xae0   : > { %8845 = vmatmul.mubr.f32.vlgmr.msra.gmra.mrb[28].mxu1 %v11098_v0 }
 0xae1   : > { %8848 = vmatpush3.msra.mxu1 %v2500_v14 }
 0xae4   : > { %10507 = vrot.lane.b32.xlu1 %v11671_v31, %s12956_s0 }
 0xae5   : > { %10502 = vrot.lane.b32.xlu0 %v11663_v24, %s12956_s0 }
 0xae8   : > { %10512 = vrot.lane.b32.xlu1 %v11677_v35, %s12956_s0 }
 0xae9   : > { %10517 = vrot.lane.b32.xlu0 %v11779_v44, %s12956_s0 }
 0xaec   : > { %10522 = vrot.lane.b32.xlu1 %v11683_v42, %s12956_s0 }
 0xaed   : > { %10527 = vrot.lane.b32.xlu0 %v11689_v45, %s12956_s0 }
 0xaf0   : > { %10532 = vrot.lane.b32.xlu1 %v11738_v10, %s12956_s0 }
 0xaf1   : > { %10537 = vrot.lane.b32.xlu0 %v11748_v19, %s12956_s0 }
 0xaf4   : > { %2870 = vrot.lane.b32.xlu1 %v11759_v38, %s12956_s0 }
 0xaf5   : > { %2872 = vrot.lane.b32.xlu0 %v11761_v39, %s12956_s0 }
 0xaf8   : > { %10542 = vrot.lane.b32.xlu1 %v11663_v24, %s12957_s25 }
 0xaf9   : > { %10547 = vrot.lane.b32.xlu0 %v11671_v31, %s12957_s25 }
 0xafc   : > { %10552 = vrot.lane.b32.xlu1 %v11677_v35, %s12957_s25 }
 0xafd   : > { %10557 = vrot.lane.b32.xlu0 %v11779_v44, %s12957_s25 }
 0xb00   : > { %10562 = vrot.lane.b32.xlu1 %v11683_v42, %s12957_s25 }
 0xb01   : > { %10567 = vrot.lane.b32.xlu0 %v11689_v45, %s12957_s25 }
 0xb04   : > { %10572 = vrot.lane.b32.xlu1 %v11738_v10, %s12957_s25 }
 0xb5c   : > { %v2653_v15 = vpop.xlane.xlu0 %2652 }
 0xb60   : > { %v2651_v16 = vpop.xlane.xlu1 %2650  ;;  %v10503_v20 = vpop.permute.xlu0 %10502 }
 0xb61   : > { %v10505_v21 = vunpack.i.h.bf16 %v10503_v20  ;;  %v10504_v22 = vunpack.i.l.bf16 %v10503_v20  ;;  %11101 = vrcp.f32 %v2651_v16 }
 0xb62   : > { %11103 = vrcp.f32 %v2653_v15 }
 0xb63   : > { %v11820_v23 = vpack.c.bf16 %v10505_v21, %v10504_v22 }
 0xb64   : > { %v11822_v17 = vpop.permute.xlu1 %10507  ;;  %v11824_v27 = vpop.permute.xlu0 %10517 }
 0xb65   : > { %9708 = vmatprep.subr.msk.bf16.mxu1 %vm11462_vm2, %v11820_v23  ;;  %v10510_v8 = vunpack.i.h.bf16 %v11822_v17  ;;  %v10509_v9 = vunpack.i.l.bf16 %v11822_v17  ;;  %v10520_v17 = vunpack.i.h.bf16 %v11824_v27 }
 0xb67   : > { %v9712_v21 = vpack.c.bf16 %v10510_v8, %v10509_v9 }
 0xb68   : > { %v11829_v28 = vpop.permute.xlu1 %10512  ;;  %v11831_v29 = vpop.permute.xlu0 %10527 }
 0xb69   : > { %v10515_v15 = vunpack.i.h.bf16 %v11829_v28  ;;  %v10514_v16 = vunpack.i.l.bf16 %v11829_v28 }
 0xb6b   : > { %v11102_v5 = vpop.eup %11101  ;;  %v9718_v22 = vpack.c.bf16 %v10515_v15, %v10514_v16 }
 0xb6c   : > { %v11833_v30 = vpop.permute.xlu1 %10522  ;;  %v11835_v32 = vpop.permute.xlu0 %10537 }
 0xb6d   : > { %v11104_v12 = vpop.eup %11103  ;;  %v10525_v28 = vunpack.i.h.bf16 %v11833_v30 }
 0xb70   : > { %v11837_v13 = vpop.permute.xlu1 %10532  ;;  %v11839_v33 = vpop.permute.xlu0 %2872 }
 0xb74   : > { %v2871_v34 = vpop.permute.xlu1 %2870  ;;  %v10548_v36 = vpop.permute.xlu0 %10547 }
 0xb75   : > { %v10550_v41 = vunpack.i.h.bf16 %v10548_v36  ;;  %v10549_v43 = vunpack.i.l.bf16 %v10548_v36 }
 0xb77   : > { %v9758_v50 = vpack.c.bf16 %v10550_v41, %v10549_v43  ;;  %v10529_v41 = vunpack.i.l.bf16 %v11831_v29 }
 0xb78   : > { %v10543_v37 = vpop.permute.xlu1 %10542  ;;  %v10558_v51 = vpop.permute.xlu0 %10557 }
 0xb79   : > { %v10545_v6 = vunpack.i.h.bf16 %v10543_v37  ;;  %v10544_v7 = vunpack.i.l.bf16 %v10543_v37  ;;  %v10560_v52 = vunpack.i.h.bf16 %v10558_v51  ;;  %v10559_v53 = vunpack.i.l.bf16 %v10558_v51 }
 0xb7b   : > { %v9754_v46 = vpack.c.bf16 %v10545_v6, %v10544_v7  ;;  %v9766_v58 = vpack.c.bf16 %v10560_v52, %v10559_v53  ;;  %v10534_v6 = vunpack.i.l.bf16 %v11837_v13 }
 0xb7c   : > { %v10553_v47 = vpop.permute.xlu1 %10552  ;;  %v10568_v59 = vpop.permute.xlu0 %10567 }
 0xb7d   : > { %v10555_v48 = vunpack.i.h.bf16 %v10553_v47  ;;  %v10554_v49 = vunpack.i.l.bf16 %v10553_v47  ;;  %9755 = vmatprep.subr.bf16.mxu0 %v9754_v46  ;;  %v10570_v62 = vunpack.i.h.bf16 %v10568_v59  ;;  %v10569_v61 = vunpack.i.l.bf16 %v10568_v59 }
 0xb7e   : > { %9757 = vmatpush3.bf16.msra.mxu0 %v9754_v46  ;;  %v10539_v46 = vunpack.i.l.bf16 %v11835_v32 }
 0xb7f   : > { %9759 = vmatprep.subr.bf16.mxu0 %v9758_v50  ;;  %v9762_v54 = vpack.c.bf16 %v10555_v48, %v10554_v49  ;;  %v9774_v2 = vpack.c.bf16 %v10570_v62, %v10569_v61 }
 0xb80   : > { %v10563_v55 = vpop.permute.xlu1 %10562 }
 0xb81   : > { %v10565_v56 = vunpack.i.h.bf16 %v10563_v55  ;;  %v10564_v57 = vunpack.i.l.bf16 %v10563_v55 }
 0xb82   : > { %9761 = vmatpush3.bf16.msra.mxu0 %v9758_v50 }
 0xb83   : > { %9763 = vmatprep.subr.bf16.mxu0 %v9762_v54  ;;  %v9770_v63 = vpack.c.bf16 %v10565_v56, %v10564_v57 }
 0xb84   : > { %v10573_v25 = vpop.permute.xlu1 %10572 }
 0xb85   : > { %v10575_v0 = vunpack.i.h.bf16 %v10573_v25  ;;  %v10574_v1 = vunpack.i.l.bf16 %v10573_v25 }
 0xb86   : > { %9765 = vmatpush3.bf16.msra.mxu0 %v9762_v54 }
 0xb87   : > { %9767 = vmatprep.subr.bf16.mxu0 %v9766_v58  ;;  %v9778_v3 = vpack.c.bf16 %v10575_v0, %v10574_v1 }
 0xb8a   : > { %9769 = vmatpush3.bf16.msra.mxu0 %v9766_v58 }
 0xb8b   : > { %9771 = vmatprep.subr.bf16.mxu0 %v9770_v63 }
 0xb8e   : > { %9773 = vmatpush3.bf16.msra.mxu0 %v9770_v63 }
 0xb8f   : > { %9775 = vmatprep.subr.bf16.mxu0 %v9774_v2 }
 0xb92   : > { %9777 = vmatpush3.bf16.msra.mxu0 %v9774_v2 }
 0xb93   : > { %9779 = vmatprep.subr.bf16.mxu0 %v9778_v3 }
 0xb96   : > { %9781 = vmatpush3.bf16.msra.mxu0 %v9778_v3 }
 0xbb3   : > { %v8846_v4 = vpop.f32.mrb[28].mxu1 }
 0xbb4   : > { %v2768_v11 = vpop.f32.mrb[29].mxu1  ;;  %v2780_v20 = vmul.f32 %v11104_v12, %v8846_v4 }
 0xbb5   : > { %v2778_v14 = vmul.f32 %v11102_v5, %v2768_v11 }
 0xbb7   : > { %8849 = vmatprep.mubr.msk.f32.mxu1 %vm1025_vm1, %v2778_v14 }
 0xbb8   : > { %8850 = vmatmul.mubr.msk.f32.vlgmr.msra.gmra.mrb[30].mxu1 %vm1025_vm1, %v2780_v20 }
 0xbb9   : > { %9711 = vmatpush3.bf16.xpose.msk.msra.mxu1 %vm11462_vm2, %v11820_v23  ;;  %8884 = vmatprep.mubr.msk.f32.mxu1 %vm1025_vm1, %v2871_v34  ;;  %v10519_v23 = vunpack.i.l.bf16 %v11824_v27  ;;  %v10524_v34 = vunpack.i.l.bf16 %v11833_v30  ;;  %v10530_v27 = vunpack.i.h.bf16 %v11831_v29  ;;  %v10535_v30 = vunpack.i.h.bf16 %v11837_v13 }
 0xbba   : > { %9714 = vmatprep.subr.msk.bf16.mxu1 %vm11462_vm2, %v9712_v21  ;;  %v10540_v29 = vunpack.i.h.bf16 %v11835_v32 }
 0xbbb   : > { %v9724_v36 = vpack.c.bf16 %v10520_v17, %v10519_v23  ;;  %v9730_v37 = vpack.c.bf16 %v10525_v28, %v10524_v34  ;;  %v9736_v43 = vpack.c.bf16 %v10530_v27, %v10529_v41  ;;  %v9742_v7 = vpack.c.bf16 %v10535_v30, %v10534_v6  ;;  %v2501_v17 = vld [vmem:[%s12955_s14 + $0x8] sm:$0xff] }
 0xbbc   : > { %v9748_v47 = vpack.c.bf16 %v10540_v29, %v10539_v46 }
 0xbc1   : > { %9717 = vmatpush3.bf16.xpose.msk.msra.mxu1 %vm11462_vm2, %v9712_v21 }
 0xbc2   : > { %9720 = vmatprep.subr.msk.bf16.mxu1 %vm11462_vm2, %v9718_v22 }
 0xbc9   : > { %9723 = vmatpush3.bf16.xpose.msk.msra.mxu1 %vm11462_vm2, %v9718_v22 }
 0xbca   : > { %9726 = vmatprep.subr.msk.bf16.mxu1 %vm11462_vm2, %v9724_v36 }
 0xbd1   : > { %9729 = vmatpush3.bf16.xpose.msk.msra.mxu1 %vm11462_vm2, %v9724_v36 }
 0xbd2   : > { %9732 = vmatprep.subr.msk.bf16.mxu1 %vm11462_vm2, %v9730_v37 }
 0xbd9   : > { %9735 = vmatpush3.bf16.xpose.msk.msra.mxu1 %vm11462_vm2, %v9730_v37 }
 0xbda   : > { %9738 = vmatprep.subr.msk.bf16.mxu1 %vm11462_vm2, %v9736_v43 }
 0xbe1   : > { %9741 = vmatpush3.bf16.xpose.msk.msra.mxu1 %vm11462_vm2, %v9736_v43 }
 0xbe2   : > { %9744 = vmatprep.subr.msk.bf16.mxu1 %vm11462_vm2, %v9742_v7 }
 0xbe9   : > { %9747 = vmatpush3.bf16.xpose.msk.msra.mxu1 %vm11462_vm2, %v9742_v7 }
 0xbea   : > { %9750 = vmatprep.subr.msk.bf16.mxu1 %vm11462_vm2, %v9748_v47 }
 0xbf1   : > { %9753 = vmatpush3.bf16.xpose.msk.msra.mxu1 %vm11462_vm2, %v9748_v47 }
 0xbf2   : > { %8922 = vmatprep.subr.mxu1 %v2501_v17 }
 0xbf8   : > { %8885 = vmatmul.mubr.msk.f32.vlgmr.msra.gmra.mrb[32].mxu1 %vm1025_vm1, %v11839_v33 }
 0xbf9   : > { %8923 = vmatpush3.msra.mxu1 %v2501_v17 }
 0xccb   : > { %v8886_v13 = vpop.f32.mrb[32].mxu1 }
 0xccc   : > { %v3014_v48 = vadd.f32 %v8886_v13, %v11774_v40  ;;  %v3008_v49 = vpop.f32.mrb[33].mxu1 }
 0xccd   : > { %v3009_v50 = vadd.f32 %v11774_v40, %v3008_v49 }
 0xcce   : > { %3019 = vmax.xlane.f32.xlu1 %v3014_v48 }
 0xccf   : > { %3017 = vmax.xlane.f32.xlu0 %v3009_v50 }
 0xcdf   : > { %10582 = vrot.lane.b32.xlu1 %v11663_v24, %s12958_s8 }
 0xce3   : > { %10592 = vrot.lane.b32.xlu1 %v11677_v35, %s12958_s8 }
 0xce5   : > { %10577 = vrot.lane.b32.xlu0 %v11748_v19, %s12957_s25 }
 0xce7   : > { %10602 = vrot.lane.b32.xlu1 %v11683_v42, %s12958_s8 }
 0xce9   : > { %10587 = vrot.lane.b32.xlu0 %v11671_v31, %s12958_s8 }
 0xceb   : > { %10612 = vrot.lane.b32.xlu1 %v11738_v10, %s12958_s8 }
 0xced   : > { %10597 = vrot.lane.b32.xlu0 %v11779_v44, %s12958_s8 }
 0xcef   : > { %3241 = vrot.lane.b32.xlu1 %v11759_v38, %s12958_s8 }
 0xcf1   : > { %10607 = vrot.lane.b32.xlu0 %v11689_v45, %s12958_s8 }
 0xcf3   : > { %10627 = vrot.lane.b32.xlu1 %v11671_v31, %s12959_s11 }
 0xcf5   : > { %10617 = vrot.lane.b32.xlu0 %v11748_v19, %s12958_s8 }
 0xcf9   : > { %3243 = vrot.lane.b32.xlu0 %v11761_v39, %s12958_s8 }
 0xd5b   : > { %v3020_v32 = vpop.xlane.xlu1 %3019 }
 0xd5c   : > { %v3022_v33 = vsub.f32 %v3014_v48, %v3020_v32  ;;  %v3018_v51 = vpop.xlane.xlu0 %3017 }
 0xd5d   : > { %v3021_v52 = vsub.f32 %v3009_v50, %v3018_v51 }
 0xd5e   : > { %v3025_v53 = vmul.f32 1.442695, %v3022_v33 }
 0xd5f   : > { %v3023_v54 = vmul.f32 1.442695, %v3021_v52  ;;  %v10583_v55 = vpop.permute.xlu1 %10582 }
 0xd60   : > { %11105 = vpow2.f32 %v3025_v53  ;;  %v10585_v56 = vunpack.i.h.bf16 %v10583_v55  ;;  %v10578_v57 = vpop.permute.xlu0 %10577  ;;  %v10584_v58 = vunpack.i.l.bf16 %v10583_v55 }
 0xd61   : > { %11107 = vpow2.f32 %v3023_v54  ;;  %v10580_v59 = vunpack.i.h.bf16 %v10578_v57  ;;  %v10579_v62 = vunpack.i.l.bf16 %v10578_v57 }
 0xd62   : > { %v9786_v25 = vpack.c.bf16 %v10585_v56, %v10584_v58 }
 0xd63   : > { %v10593_v61 = vpop.permute.xlu1 %10592  ;;  %v9782_v63 = vpack.c.bf16 %v10580_v59, %v10579_v62 }
 0xd64   : > { %v10588_v0 = vpop.permute.xlu0 %10587  ;;  %v10595_v12 = vunpack.i.h.bf16 %v10593_v61  ;;  %v10594_v14 = vunpack.i.l.bf16 %v10593_v61 }
 0xd65   : > { %9783 = vmatprep.subr.bf16.mxu0 %v9782_v63  ;;  %v10590_v3 = vunpack.i.h.bf16 %v10588_v0  ;;  %v10589_v4 = vunpack.i.l.bf16 %v10588_v0 }
 0xd66   : > { %9785 = vmatpush3.bf16.msra.mxu0 %v9782_v63  ;;  %v9798_v20 = vpack.c.bf16 %v10595_v12, %v10594_v14 }
 0xd67   : > { %v10603_v1 = vpop.permute.xlu1 %10602  ;;  %9788 = vmatprep.subr.msk.bf16.mxu0 %vm11462_vm2, %v9786_v25  ;;  %v9792_v9 = vpack.c.bf16 %v10590_v3, %v10589_v4 }
 0xd68   : > { %v10598_v21 = vpop.permute.xlu0 %10597  ;;  %v10605_v23 = vunpack.i.h.bf16 %v10603_v1  ;;  %v10604_v36 = vunpack.i.l.bf16 %v10603_v1 }
 0xd69   : > { %v10600_v15 = vunpack.i.h.bf16 %v10598_v21  ;;  %v10599_v16 = vunpack.i.l.bf16 %v10598_v21 }
 0xd6a   : > { %v11106_v2 = vpop.eup %11105  ;;  %v9810_v28 = vpack.c.bf16 %v10605_v23, %v10604_v36 }
 0xd6b   : > { %v11108_v5 = vpop.eup %11107  ;;  %v10613_v8 = vpop.permute.xlu1 %10612  ;;  %3029 = vadd.xlane.f32.xlu0 %v11106_v2  ;;  %v9804_v22 = vpack.c.bf16 %v10600_v15, %v10599_v16 }
 0xd6c   : > { %3027 = vadd.xlane.f32.xlu1 %v11108_v5  ;;  %8919 = vmatprep.mubr.f32.mxu0 %v11108_v5  ;;  %v10608_v34 = vpop.permute.xlu0 %10607  ;;  %v10615_v43 = vunpack.i.h.bf16 %v10613_v8  ;;  %v10614_v30 = vunpack.i.l.bf16 %v10613_v8 }
 0xd6d   : > { %8920 = vmatmul.mubr.f32.vlgmr.msra.gmra.mrb[12].mxu0 %v11106_v2  ;;  %v10610_v37 = vunpack.i.h.bf16 %v10608_v34  ;;  %v10609_v27 = vunpack.i.l.bf16 %v10608_v34 }
 0xd6e   : > { %v9822_v6 = vpack.c.bf16 %v10615_v43, %v10614_v30 }
 0xd6f   : > { %v3242_v11 = vpop.permute.xlu1 %3241  ;;  %9791 = vmatpush3.bf16.xpose.msk.msra.mxu0 %vm11462_vm2, %v9786_v25  ;;  %v9816_v41 = vpack.c.bf16 %v10610_v37, %v10609_v27 }
 0xd70   : > { %9794 = vmatprep.subr.msk.bf16.mxu0 %vm11462_vm2, %v9792_v9  ;;  %8959 = vmatprep.mubr.msk.f32.mxu0 %vm1025_vm1, %v3242_v11  ;;  %v10618_v7 = vpop.permute.xlu0 %10617 }
 0xd71   : > { %v10620_v29 = vunpack.i.h.bf16 %v10618_v7  ;;  %v10619_v46 = vunpack.i.l.bf16 %v10618_v7 }
 0xd73   : > { %v9828_v47 = vpack.c.bf16 %v10620_v29, %v10619_v46  ;;  %v10628_v51 = vpop.permute.xlu1 %10627 }
 0xd74   : > { %v3244_v13 = vpop.permute.xlu0 %3243  ;;  %v10630_v57 = vunpack.i.h.bf16 %v10628_v51  ;;  %v10629_v58 = vunpack.i.l.bf16 %v10628_v51 }
 0xd76   : > { %v9838_v1 = vpack.c.bf16 %v10630_v57, %v10629_v58 }
 0xd77   : > { %9797 = vmatpush3.bf16.xpose.msk.msra.mxu0 %vm11462_vm2, %v9792_v9 }
 0xd78   : > { %9800 = vmatprep.subr.msk.bf16.mxu0 %vm11462_vm2, %v9798_v20 }
 0xd7d   : > { %10632 = vrot.lane.b32.xlu1 %v11677_v35, %s12959_s11 }
 0xd7f   : > { %9803 = vmatpush3.bf16.xpose.msk.msra.mxu0 %vm11462_vm2, %v9798_v20 }
 0xd80   : > { %9806 = vmatprep.subr.msk.bf16.mxu0 %vm11462_vm2, %v9804_v22 }
 0xd81   : > { %10622 = vrot.lane.b32.xlu0 %v11663_v24, %s12959_s11  ;;  %10637 = vrot.lane.b32.xlu1 %v11779_v44, %s12959_s11 }
 0xd85   : > { %10642 = vrot.lane.b32.xlu1 %v11683_v42, %s12959_s11 }
 0xd87   : > { %9809 = vmatpush3.bf16.xpose.msk.msra.mxu0 %vm11462_vm2, %v9804_v22 }
 0xd88   : > { %9812 = vmatprep.subr.msk.bf16.mxu0 %vm11462_vm2, %v9810_v28 }
 0xd89   : > { %10647 = vrot.lane.b32.xlu1 %v11689_v45, %s12959_s11 }
 0xd8d   : > { %10652 = vrot.lane.b32.xlu1 %v11738_v10, %s12959_s11 }
 0xd8f   : > { %9815 = vmatpush3.bf16.xpose.msk.msra.mxu0 %vm11462_vm2, %v9810_v28 }
 0xd90   : > { %9818 = vmatprep.subr.msk.bf16.mxu0 %vm11462_vm2, %v9816_v41 }
 0xd97   : > { %9821 = vmatpush3.bf16.xpose.msk.msra.mxu0 %vm11462_vm2, %v9816_v41 }
 0xd98   : > { %9824 = vmatprep.subr.msk.bf16.mxu0 %vm11462_vm2, %v9822_v6 }
 0xd9f   : > { %9827 = vmatpush3.bf16.xpose.msk.msra.mxu0 %vm11462_vm2, %v9822_v6 }
 0xda0   : > { %9830 = vmatprep.subr.msk.bf16.mxu0 %vm11462_vm2, %v9828_v47 }
 0xda7   : > { %9833 = vmatpush3.bf16.xpose.msk.msra.mxu0 %vm11462_vm2, %v9828_v47 }
 0xdae   : > { %8960 = vmatmul.mubr.msk.f32.vlgmr.msra.gmra.mrb[14].mxu0 %vm1025_vm1, %v3244_v13 }
 0xdf8   : > { %v3030_v48 = vpop.xlane.xlu0 %3029 }
 0xdf9   : > { %v3028_v52 = vpop.xlane.xlu1 %3027 }
 0xdfa   : > { %11109 = vrcp.f32 %v3028_v52 }
 0xdfb   : > { %11111 = vrcp.f32 %v3030_v48 }
 0xdfc   : > { %v10623_v49 = vpop.permute.xlu0 %10622 }
 0xdfd   : > { %v10625_v50 = vunpack.i.h.bf16 %v10623_v49  ;;  %v10624_v32 = vunpack.i.l.bf16 %v10623_v49  ;;  %v10633_v53 = vpop.permute.xlu1 %10632  ;;  %v2502_v49 = vld [vmem:[%s12955_s14 + $0x10] sm:$0xff] }
 0xdfe   : > { %v10635_v25 = vunpack.i.h.bf16 %v10633_v53  ;;  %v10634_v0 = vunpack.i.l.bf16 %v10633_v53 }
 0xdff   : > { %v9834_v33 = vpack.c.bf16 %v10625_v50, %v10624_v32 }
 0xe00   : > { %v9842_v5 = vpack.c.bf16 %v10635_v25, %v10634_v0 }
 0xe01   : > { %9835 = vmatprep.subr.bf16.mxu1 %v9834_v33  ;;  %v10638_v54 = vpop.permute.xlu1 %10637 }
 0xe02   : > { %v10640_v3 = vunpack.i.h.bf16 %v10638_v54  ;;  %v10639_v4 = vunpack.i.l.bf16 %v10638_v54 }
 0xe04   : > { %v11110_v56 = vpop.eup %11109  ;;  %v9846_v12 = vpack.c.bf16 %v10640_v3, %v10639_v4 }
 0xe05   : > { %v11112_v62 = vpop.eup %11111  ;;  %v10643_v2 = vpop.permute.xlu1 %10642 }
 0xe06   : > { %v10645_v9 = vunpack.i.h.bf16 %v10643_v2  ;;  %v10644_v11 = vunpack.i.l.bf16 %v10643_v2 }
 0xe08   : > { %v9850_v21 = vpack.c.bf16 %v10645_v9, %v10644_v11 }
 0xe09   : > { %v10648_v8 = vpop.permute.xlu1 %10647 }
 0xe0a   : > { %v10650_v14 = vunpack.i.h.bf16 %v10648_v8  ;;  %v10649_v20 = vunpack.i.l.bf16 %v10648_v8 }
 0xe0c   : > { %v9854_v17 = vpack.c.bf16 %v10650_v14, %v10649_v20 }
 0xe0d   : > { %v10653_v15 = vpop.permute.xlu1 %10652 }
 0xe0e   : > { %v10655_v16 = vunpack.i.h.bf16 %v10653_v15  ;;  %v10654_v22 = vunpack.i.l.bf16 %v10653_v15 }
 0xe10   : > { %v9858_v23 = vpack.c.bf16 %v10655_v16, %v10654_v22 }
 0xe40   : > { %v8921_v55 = vpop.f32.mrb[12].mxu0 }
 0xe41   : > { %v3145_v59 = vpop.f32.mrb[13].mxu0  ;;  %v3157_v63 = vmul.f32 %v11112_v62, %v8921_v55 }
 0xe42   : > { %v3155_v61 = vmul.f32 %v11110_v56, %v3145_v59 }
 0xe44   : > { %8924 = vmatprep.mubr.msk.f32.mxu1 %vm1025_vm1, %v3155_v61 }
 0xe45   : > { %8925 = vmatmul.mubr.msk.f32.vlgmr.msra.gmra.mrb[30].mxu1 %vm1025_vm1, %v3157_v63 }
 0xe46   : > { %9837 = vmatpush3.bf16.msra.mxu1 %v9834_v33 }
 0xe47   : > { %9839 = vmatprep.subr.bf16.mxu1 %v9838_v1 }
 0xe4a   : > { %9841 = vmatpush3.bf16.msra.mxu1 %v9838_v1 }
 0xe4b   : > { %9843 = vmatprep.subr.bf16.mxu1 %v9842_v5 }
 0xe4e   : > { %9845 = vmatpush3.bf16.msra.mxu1 %v9842_v5 }
 0xe4f   : > { %9847 = vmatprep.subr.bf16.mxu1 %v9846_v12 }
 0xe52   : > { %9849 = vmatpush3.bf16.msra.mxu1 %v9846_v12 }
 0xe53   : > { %9851 = vmatprep.subr.bf16.mxu1 %v9850_v21 }
 0xe56   : > { %9853 = vmatpush3.bf16.msra.mxu1 %v9850_v21 }
 0xe57   : > { %9855 = vmatprep.subr.bf16.mxu1 %v9854_v17 }
 0xe5a   : > { %9857 = vmatpush3.bf16.msra.mxu1 %v9854_v17 }
 0xe5b   : > { %9859 = vmatprep.subr.bf16.mxu1 %v9858_v23 }
 0xe5e   : > { %9861 = vmatpush3.bf16.msra.mxu1 %v9858_v23 }
 0xe81   : > { %v8961_v36 = vpop.f32.mrb[14].mxu0 }
 0xe82   : > { %v3385_v28 = vadd.f32 %v8961_v36, %v11774_v40  ;;  %v3379_v34 = vpop.f32.mrb[15].mxu0 }
 0xe83   : > { %v3380_v37 = vadd.f32 %v11774_v40, %v3379_v34 }
 0xe84   : > { %3390 = vmax.xlane.f32.xlu0 %v3385_v28 }
 0xe85   : > { %3388 = vmax.xlane.f32.xlu1 %v3380_v37 }
 0xe96   : > { %10657 = vrot.lane.b32.xlu1 %v11748_v19, %s12959_s11 }
 0xf11   : > { %v3391_v27 = vpop.xlane.xlu0 %3390 }
 0xf12   : > { %v3393_v41 = vsub.f32 %v3385_v28, %v3391_v27  ;;  %v3389_v43 = vpop.xlane.xlu1 %3388 }
 0xf13   : > { %v3392_v30 = vsub.f32 %v3380_v37, %v3389_v43 }
 0xf14   : > { %v3396_v6 = vmul.f32 1.442695, %v3393_v41 }
 0xf15   : > { %v3394_v7 = vmul.f32 1.442695, %v3392_v30 }
 0xf16   : > { %11113 = vpow2.f32 %v3396_v6  ;;  %v10658_v29 = vpop.permute.xlu1 %10657 }
 0xf17   : > { %11115 = vpow2.f32 %v3394_v7  ;;  %v10660_v46 = vunpack.i.h.bf16 %v10658_v29  ;;  %v10659_v47 = vunpack.i.l.bf16 %v10658_v29 }
 0xf19   : > { %v9862_v13 = vpack.c.bf16 %v10660_v46, %v10659_v47 }
 0xf1b   : > { %9863 = vmatprep.subr.bf16.mxu1 %v9862_v13 }
 0xf1c   : > { %9865 = vmatpush3.bf16.msra.mxu1 %v9862_v13 }
 0xf1d   : > { %8997 = vmatprep.subr.mxu1 %v2502_v49 }
 0xf20   : > { %v11114_v40 = vpop.eup %11113 }
 0xf21   : > { %v11116_v48 = vpop.eup %11115  ;;  %3400 = vadd.xlane.f32.xlu0 %v11114_v40 }
 0xf22   : > { %3398 = vadd.xlane.f32.xlu1 %v11116_v48  ;;  %8994 = vmatprep.mubr.f32.mxu1 %v11116_v48 }
 0xf23   : > { %8995 = vmatmul.mubr.f32.vlgmr.msra.gmra.mrb[34].mxu1 %v11114_v40 }
 0xf24   : > { %8998 = vmatpush3.msra.mxu1 %v2502_v49 }
 0xf33   : > { %10677 = vrot.lane.b32.xlu1 %v11779_v44, %s12960_s5 }
 0xf37   : > { %10662 = vrot.lane.b32.xlu0 %v11663_v24, %s12960_s5  ;;  %3612 = vrot.lane.b32.xlu1 %v11759_v38, %s12960_s5 }
 0xf3b   : > { %10667 = vrot.lane.b32.xlu0 %v11671_v31, %s12960_s5  ;;  %10702 = vrot.lane.b32.xlu1 %v11663_v24, %s12961_s29 }
 0xf3f   : > { %10672 = vrot.lane.b32.xlu0 %v11677_v35, %s12960_s5  ;;  %10707 = vrot.lane.b32.xlu1 %v11671_v31, %s12961_s29 }
 0xf43   : > { %10682 = vrot.lane.b32.xlu0 %v11683_v42, %s12960_s5  ;;  %10717 = vrot.lane.b32.xlu1 %v11779_v44, %s12961_s29 }
 0xf47   : > { %10687 = vrot.lane.b32.xlu0 %v11689_v45, %s12960_s5 }
 0xf4b   : > { %10692 = vrot.lane.b32.xlu0 %v11738_v10, %s12960_s5 }
 0xf4f   : > { %10697 = vrot.lane.b32.xlu0 %v11748_v19, %s12960_s5 }
 0xf53   : > { %3614 = vrot.lane.b32.xlu0 %v11761_v39, %s12960_s5 }
 0xf57   : > { %10712 = vrot.lane.b32.xlu0 %v11677_v35, %s12961_s29 }
 0xf5b   : > { %10722 = vrot.lane.b32.xlu0 %v11683_v42, %s12961_s29 }
 0xf5f   : > { %10727 = vrot.lane.b32.xlu0 %v11689_v45, %s12961_s29 }
 0xfae   : > { %v3401_v24 = vpop.xlane.xlu0 %3400 }
 0xfaf   : > { %v3399_v31 = vpop.xlane.xlu1 %3398 }
 0xfb0   : > { %11117 = vrcp.f32 %v3399_v31 }
 0xfb1   : > { %11119 = vrcp.f32 %v3401_v24 }
 0xfb2   : > { %v10663_v38 = vpop.permute.xlu0 %10662 }
 0xfb3   : > { %v10665_v44 = vunpack.i.h.bf16 %v10663_v38  ;;  %v10664_v50 = vunpack.i.l.bf16 %v10663_v38  ;;  %v12007_v32 = vpop.permute.xlu1 %10677 }
 0xfb4   : > { %v10680_v7 = vunpack.i.h.bf16 %v12007_v32  ;;  %v10679_v29 = vunpack.i.l.bf16 %v12007_v32 }
 0xfb5   : > { %v9866_v33 = vpack.c.bf16 %v10665_v44, %v10664_v50 }
 0xfb6   : > { %v10668_v51 = vpop.permute.xlu0 %10667  ;;  %v9884_v46 = vpack.c.bf16 %v10680_v7, %v10679_v29 }
 0xfb7   : > { %v3613_v52 = vpop.permute.xlu1 %3612  ;;  %9868 = vmatprep.subr.msk.bf16.mxu1 %vm11462_vm2, %v9866_v33  ;;  %v10670_v23 = vunpack.i.h.bf16 %v10668_v51  ;;  %v10669_v36 = vunpack.i.l.bf16 %v10668_v51 }
 0xfb9   : > { %v9872_v41 = vpack.c.bf16 %v10670_v23, %v10669_v36 }
 0xfba   : > { %v10673_v35 = vpop.permute.xlu0 %10672  ;;  %v11118_v17 = vpop.eup %11117 }
 0xfbb   : > { %v10703_v39 = vpop.permute.xlu1 %10702  ;;  %v11120_v34 = vpop.eup %11119  ;;  %v10675_v43 = vunpack.i.h.bf16 %v10673_v35  ;;  %v10674_v30 = vunpack.i.l.bf16 %v10673_v35 }
 0xfbc   : > { %v10705_v53 = vunpack.i.h.bf16 %v10703_v39  ;;  %v10704_v42 = vunpack.i.l.bf16 %v10703_v39 }
 0xfbd   : > { %v9878_v6 = vpack.c.bf16 %v10675_v43, %v10674_v30 }
 0xfbe   : > { %v12011_v54 = vpop.permute.xlu0 %10682  ;;  %v9914_v45 = vpack.c.bf16 %v10705_v53, %v10704_v42 }
 0xfbf   : > { %v10708_v55 = vpop.permute.xlu1 %10707  ;;  %v10685_v47 = vunpack.i.h.bf16 %v12011_v54  ;;  %v10684_v13 = vunpack.i.l.bf16 %v12011_v54 }
 0xfc0   : > { %v10710_v56 = vunpack.i.h.bf16 %v10708_v55  ;;  %v10709_v57 = vunpack.i.l.bf16 %v10708_v55  ;;  %9915 = vmatprep.subr.bf16.mxu0 %v9914_v45 }
 0xfc1   : > { %9917 = vmatpush3.bf16.msra.mxu0 %v9914_v45  ;;  %v9890_v40 = vpack.c.bf16 %v10685_v47, %v10684_v13  ;;  %v4031_v47 = vld [vmem:[%s12870_s18 + $0x10] sm:$0xff] }
 0xfc2   : > { %v12013_v58 = vpop.permute.xlu0 %10687  ;;  %v9918_v59 = vpack.c.bf16 %v10710_v56, %v10709_v57 }
 0xfc3   : > { %v10718_v25 = vpop.permute.xlu1 %10717  ;;  %v10690_v48 = vunpack.i.h.bf16 %v12013_v58  ;;  %v10689_v49 = vunpack.i.l.bf16 %v12013_v58 }
 0xfc4   : > { %9919 = vmatprep.subr.bf16.mxu0 %v9918_v59  ;;  %v10720_v1 = vunpack.i.h.bf16 %v10718_v25  ;;  %v10719_v2 = vunpack.i.l.bf16 %v10718_v25 }
 0xfc5   : > { %9921 = vmatpush3.bf16.msra.mxu0 %v9918_v59  ;;  %v9896_v24 = vpack.c.bf16 %v10690_v48, %v10689_v49  ;;  %v4123_v49 = vld [vmem:[%s12872_s20] sm:$0xff] }
 0xfc6   : > { %v12015_v62 = vpop.permute.xlu0 %10692  ;;  %v9926_v12 = vpack.c.bf16 %v10720_v1, %v10719_v2  ;;  %v2503_v2 = vld [vmem:[%s12955_s14 + $0x18] sm:$0xff]  ;;  %s12973_s14 = sld [smem:[#allocation20_spill]] }
 0xfc7   : > { %v10695_v31 = vunpack.i.h.bf16 %v12015_v62  ;;  %v10694_v38 = vunpack.i.l.bf16 %v12015_v62 }
 0xfc9   : > { %v9902_v44 = vpack.c.bf16 %v10695_v31, %v10694_v38 }
 0xfca   : > { %v12017_v61 = vpop.permute.xlu0 %10697 }
 0xfcb   : > { %v10700_v50 = vunpack.i.h.bf16 %v12017_v61  ;;  %v10699_v32 = vunpack.i.l.bf16 %v12017_v61 }
 0xfce   : > { %v12019_v63 = vpop.permute.xlu0 %3614 }
 0xfd2   : > { %v10713_v0 = vpop.permute.xlu0 %10712 }
 0xfd3   : > { %v10715_v3 = vunpack.i.h.bf16 %v10713_v0  ;;  %v10714_v4 = vunpack.i.l.bf16 %v10713_v0 }
 0xfd5   : > { %v9922_v5 = vpack.c.bf16 %v10715_v3, %v10714_v4 }
 0xfd6   : > { %v10723_v8 = vpop.permute.xlu0 %10722 }
 0xfd7   : > { %v10725_v9 = vunpack.i.h.bf16 %v10723_v8  ;;  %v10724_v11 = vunpack.i.l.bf16 %v10723_v8  ;;  %9923 = vmatprep.subr.bf16.mxu0 %v9922_v5 }
 0xfd8   : > { %9925 = vmatpush3.bf16.msra.mxu0 %v9922_v5 }
 0xfd9   : > { %9927 = vmatprep.subr.bf16.mxu0 %v9926_v12  ;;  %v9930_v15 = vpack.c.bf16 %v10725_v9, %v10724_v11 }
 0xfda   : > { %v10728_v14 = vpop.permute.xlu0 %10727 }
 0xfdb   : > { %v10730_v20 = vunpack.i.h.bf16 %v10728_v14  ;;  %v10729_v21 = vunpack.i.l.bf16 %v10728_v14 }
 0xfdc   : > { %9929 = vmatpush3.bf16.msra.mxu0 %v9926_v12 }
 0xfdd   : > { %9931 = vmatprep.subr.bf16.mxu0 %v9930_v15  ;;  %v9934_v16 = vpack.c.bf16 %v10730_v20, %v10729_v21  ;;  %v7881_v20 = vld [vmem:[%s12962_s15] ss:$0 sm:$0xff]  ;;  %s12963_s15 = smov 64  }
 0xfe0   : > { %9933 = vmatpush3.bf16.msra.mxu0 %v9930_v15 }
 0xfe1   : > { %9935 = vmatprep.subr.bf16.mxu0 %v9934_v16 }
 0xfe4   : > { %9937 = vmatpush3.bf16.msra.mxu0 %v9934_v16 }
 0xff6   : > { %v8996_v22 = vpop.f32.mrb[34].mxu1 }
 0xff7   : > { %v3516_v28 = vpop.f32.mrb[35].mxu1  ;;  %v3528_v27 = vmul.f32 %v11120_v34, %v8996_v22 }
 0xff8   : > { %v3526_v37 = vmul.f32 %v11118_v17, %v3516_v28 }
 0xffa   : > { %8999 = vmatprep.mubr.msk.f32.mxu1 %vm1025_vm1, %v3526_v37 }
 0xffb   : > { %9000 = vmatmul.mubr.msk.f32.vlgmr.msra.gmra.mrb[30].mxu1 %vm1025_vm1, %v3528_v27 }
 0xffc   : > { %9871 = vmatpush3.bf16.xpose.msk.msra.mxu1 %vm11462_vm2, %v9866_v33  ;;  %9034 = vmatprep.mubr.msk.f32.mxu1 %vm1025_vm1, %v3613_v52  ;;  %v9908_v33 = vpack.c.bf16 %v10700_v50, %v10699_v32  ;;  %v11217_v52 = vld [vmem:[%s11771_s9] ss:$0 sm:$0xff]  ;;  %s12976_s9 = sld [smem:[#allocation21_spill]] }
 0xffd   : > { %9874 = vmatprep.subr.msk.bf16.mxu1 %vm11462_vm2, %v9872_v41 }
0x1004   : > { %9877 = vmatpush3.bf16.xpose.msk.msra.mxu1 %vm11462_vm2, %v9872_v41 }
0x1005   : > { %9880 = vmatprep.subr.msk.bf16.mxu1 %vm11462_vm2, %v9878_v6 }
0x100c   : > { %9883 = vmatpush3.bf16.xpose.msk.msra.mxu1 %vm11462_vm2, %v9878_v6 }
0x100d   : > { %9886 = vmatprep.subr.msk.bf16.mxu1 %vm11462_vm2, %v9884_v46 }
0x1014   : > { %9889 = vmatpush3.bf16.xpose.msk.msra.mxu1 %vm11462_vm2, %v9884_v46  ;;  %v4030_v46 = vld [vmem:[%s12870_s18 + $0x8] sm:$0xff] }
0x1015   : > { %9892 = vmatprep.subr.msk.bf16.mxu1 %vm11462_vm2, %v9890_v40 }
0x101c   : > { %9895 = vmatpush3.bf16.xpose.msk.msra.mxu1 %vm11462_vm2, %v9890_v40  ;;  %v4032_v40 = vld [vmem:[%s12870_s18 + $0x18] sm:$0xff] }
0x101d   : > { %9898 = vmatprep.subr.msk.bf16.mxu1 %vm11462_vm2, %v9896_v24  ;;  %v9950_v48 = vpack.c.bf16 %v4032_v40, %v4031_v47  ;;  %v7950_v40 = vld [vmem:[%s12874_s22] ss:$0 sm:$0xff] }
0x1024   : > { %9901 = vmatpush3.bf16.xpose.msk.msra.mxu1 %vm11462_vm2, %v9896_v24  ;;  %v4124_v24 = vld [vmem:[%s12872_s20 + $0x8] sm:$0xff] }
0x1025   : > { %9904 = vmatprep.subr.msk.bf16.mxu1 %vm11462_vm2, %v9902_v44  ;;  %v9954_v31 = vpack.c.bf16 %v4124_v24, %v4123_v49 }
0x102c   : > { %9907 = vmatpush3.bf16.xpose.msk.msra.mxu1 %vm11462_vm2, %v9902_v44 }
0x102d   : > { %9910 = vmatprep.subr.msk.bf16.mxu1 %vm11462_vm2, %v9908_v33 }
0x1034   : > { %9913 = vmatpush3.bf16.xpose.msk.msra.mxu1 %vm11462_vm2, %v9908_v33 }
0x1035   : > { %9072 = vmatprep.subr.mxu1 %v2503_v2 }
0x103b   : > { %9035 = vmatmul.mubr.msk.f32.vlgmr.msra.gmra.mrb[36].mxu1 %vm1025_vm1, %v12019_v63 }
0x103c   : > { %9073 = vmatpush3.msra.mxu1 %v2503_v2  ;;  %v7947_v2 = vld [vmem:[%s12873_s21] ss:$0 sm:$0xff] }
0x110e   : > { %v9036_v51 = vpop.f32.mrb[36].mxu1 }
0x110f   : > { %v3756_v35 = vadd.f32 %v11217_v52, %v9036_v51  ;;  %v3750_v39 = vpop.f32.mrb[37].mxu1 }
0x1110   : > { %v3751_v53 = vadd.f32 %v11217_v52, %v3750_v39 }
0x1111   : > { %3761 = vmax.xlane.f32.xlu1 %v3756_v35 }
0x1112   : > { %3759 = vmax.xlane.f32.xlu0 %v3751_v53 }
0x1122   : > { %10732 = vrot.lane.b32.xlu1 %v11738_v10, %s12961_s29 }
0x1128   : > { %10737 = vrot.lane.b32.xlu0 %v11748_v19, %s12961_s29 }
0x119e   : > { %v3762_v42 = vpop.xlane.xlu1 %3761 }
0x119f   : > { %v3764_v54 = vsub.f32 %v3756_v35, %v3762_v42  ;;  %v3760_v45 = vpop.xlane.xlu0 %3759  ;;  %v7942_v35 = vld [vmem:[%s12868_s16] ss:$0 sm:$0xff] }
0x11a0   : > { %v3763_v55 = vsub.f32 %v3751_v53, %v3760_v45 }
0x11a1   : > { %v3767_v56 = vmul.f32 1.442695, %v3764_v54  ;;  %v7943_v54 = vld [vmem:[%s12869_s17] ss:$0 sm:$0xff] }
0x11a2   : > { %v3765_v57 = vmul.f32 1.442695, %v3763_v55  ;;  %v10733_v58 = vpop.permute.xlu1 %10732 }
0x11a3   : > { %11121 = vpow2.f32 %v3767_v56  ;;  %v10735_v59 = vunpack.i.h.bf16 %v10733_v58  ;;  %v10734_v62 = vunpack.i.l.bf16 %v10733_v58  ;;  %v10738_v61 = vpop.permute.xlu0 %10737  ;;  %v4125_v58 = vld [vmem:[%s12872_s20 + $0x10] sm:$0xff] }
0x11a4   : > { %11123 = vpow2.f32 %v3765_v57  ;;  %v10740_v63 = vunpack.i.h.bf16 %v10738_v61  ;;  %v10739_v25 = vunpack.i.l.bf16 %v10738_v61  ;;  %v7944_v61 = vld [vmem:[%s12871_s19] ss:$0 sm:$0xff] }
0x11a5   : > { %v9938_v0 = vpack.c.bf16 %v10735_v59, %v10734_v62  ;;  %v4126_v59 = vld [vmem:[%s12872_s20 + $0x18] sm:$0xff] }
0x11a6   : > { %v9942_v1 = vpack.c.bf16 %v10740_v63, %v10739_v25  ;;  %v9958_v62 = vpack.c.bf16 %v4126_v59, %v4125_v58 }
0x11a7   : > { %9939 = vmatprep.subr.bf16.mxu0 %v9938_v0 }
0x11a8   : > { %9941 = vmatpush3.bf16.msra.mxu0 %v9938_v0 }
0x11a9   : > { %9943 = vmatprep.subr.bf16.mxu0 %v9942_v1 }
0x11ac   : > { %9945 = vmatpush3.bf16.msra.mxu0 %v9942_v1 }
0x11ad   : > { %v11122_v10 = vpop.eup %11121 }
0x11ae   : > { %v11124_v19 = vpop.eup %11123  ;;  %3771 = vadd.xlane.f32.xlu0 %v11122_v10 }
0x11af   : > { %3769 = vadd.xlane.f32.xlu1 %v11124_v19  ;;  %9069 = vmatprep.mubr.f32.mxu0 %v11124_v19 }
0x11b0   : > { %9070 = vmatmul.mubr.f32.vlgmr.msra.gmra.mrb[16].mxu0 %v11122_v10 }
0x123b   : > { %v3772_v4 = vpop.xlane.xlu0 %3771 }
0x123c   : > { %v3770_v3 = vpop.xlane.xlu1 %3769 }
0x123d   : > { %11125 = vrcp.f32 %v3770_v3 }
0x123e   : > { %11127 = vrcp.f32 %v3772_v4 }
0x1247   : > { %v11126_v8 = vpop.eup %11125 }
0x1248   : > { %v11128_v11 = vpop.eup %11127 }
0x1283   : > { %v9071_v5 = vpop.f32.mrb[16].mxu0 }
0x1284   : > { %v3887_v9 = vpop.f32.mrb[17].mxu0  ;;  %v3899_v14 = vmul.f32 %v11128_v11, %v9071_v5 }
0x1285   : > { %v3897_v12 = vmul.f32 %v11126_v8, %v3887_v9 }
0x1287   : > { %9074 = vmatprep.mubr.msk.f32.mxu1 %vm1025_vm1, %v3897_v12 }
0x1288   : > { %9075 = vmatmul.mubr.msk.f32.vlgmr.msra.gmra.mrb[30].mxu1 %vm1025_vm1, %v3899_v14 }
0x135b   : > { %v9076_v21 = vpop.f32.mrb[30].mxu1 }
0x135c   : > { %v10372_v15 = vadd.f32 %v9076_v21, %v7881_v20  ;;  %v3972_v16 = vpop.f32.mrb[31].mxu1 }
0x135d   : > { %v10373_v22 = vadd.f32 %v7881_v20, %v3972_v16 }
0x135e   : > { %v3984_v17 = vadd.f32 %v10372_v15, %v11705_v60 }
0x135f   : > { %v3983_v23 = vadd.f32 %v10373_v22, %v11701_v26  ;;  %v4029_v26 = vld [vmem:[%s12870_s18] sm:$0xff] }
0x1360   : > { %v3990_v36 = vsel %vm932_vm0, %v3984_v17, 0.0  ;;  %v9946_v13 = vpack.c.bf16 %v4030_v46, %v4029_v26 }
0x1361   : > { %3991 = vadd.xlane.f32.xlu1 %v3990_v36  ;;  %v3987_v28 = vsel %vm932_vm0, %v3983_v23, 0.0 }
0x1362   : > { %3988 = vadd.xlane.f32.xlu0 %v3987_v28  ;;  %9947 = vmatprep.subr.bf16.mxu0 %v9946_v13 }
0x1363   : > { %9949 = vmatpush3.bf16.msra.mxu0 %v9946_v13 }
0x1364   : > { %9951 = vmatprep.subr.bf16.mxu0 %v9950_v48 }
0x1367   : > { %9953 = vmatpush3.bf16.msra.mxu0 %v9950_v48 }
0x1368   : > { %9955 = vmatprep.subr.bf16.mxu0 %v9954_v31 }
0x13ee   : > { %v3992_v34 = vpop.xlane.xlu1 %3991 }
0x13ef   : > { %v3994_v37 = vmul.f32 0.03125, %v3992_v34  ;;  %v3989_v27 = vpop.xlane.xlu0 %3988 }
0x13f0   : > { %v3993_v41 = vmul.f32 0.03125, %v3989_v27  ;;  %v7953_v27 = vld [vmem:[%s12935_s3 + $0x28] sm:$0xff] }
0x13f1   : > { %v3996_v43 = vsub.f32 %v3984_v17, %v3994_v37  ;;  %v7952_v37 = vld [vmem:[%s12935_s3 + $0x20] sm:$0xff] }
0x13f2   : > { %v3995_v30 = vsub.f32 %v3983_v23, %v3993_v41  ;;  %v7954_v41 = vld [vmem:[%s12935_s3 + $0x30] sm:$0xff] }
0x13f3   : > { %v3998_v6 = vmul.f32 %v3996_v43, %v3996_v43 }
0x13f4   : > { %v3997_v7 = vmul.f32 %v3995_v30, %v3995_v30 }
0x13f5   : > { %v4002_v29 = vsel %vm932_vm0, %v3998_v6, 0.0 }
0x13f6   : > { %4003 = vadd.xlane.f32.xlu1 %v4002_v29  ;;  %v3999_v60 = vsel %vm932_vm0, %v3997_v7, 0.0 }
0x13f7   : > { %4000 = vadd.xlane.f32.xlu0 %v3999_v60 }
0x1483   : > { %v4004_v38 = vpop.xlane.xlu1 %4003 }
0x1484   : > { %v4006_v44 = vmul.f32 0.03125, %v4004_v38  ;;  %v4001_v50 = vpop.xlane.xlu0 %4000 }
0x1485   : > { %v4005_v32 = vmul.f32 0.03125, %v4001_v50 }
0x1486   : > { %v4008_v33 = vadd.f32 1e-05, %v4006_v44 }
0x1487   : > { %v4007_v51 = vadd.f32 1e-05, %v4005_v32 }
0x1488   : > { %11129 = vrsqrt.f32 %v4008_v33  ;;  %v7957_v33 = vld [vmem:[%s12938_s10 + $0x1] ss:$0 sm:$0xff] }
0x1489   : > { %11131 = vrsqrt.f32 %v4007_v51 }
0x1492   : > { %v11130_v52 = vpop.eup %11129 }
0x1493   : > { %v11132_v39 = vpop.eup %11131  ;;  %v4012_v53 = vmul.f32 %v11130_v52, %v3996_v43  ;;  %v9962_v43 = vpack.c.bf16 %v7953_v27, %v7952_v37 }
0x1494   : > { %v4011_v42 = vmul.f32 %v11132_v39, %v3995_v30  ;;  %v7955_v30 = vld [vmem:[%s12935_s3 + $0x38] sm:$0xff] }
0x1495   : > { %v4020_v45 = vmul.f32 %v7942_v35, %v4012_v53  ;;  %v9966_v6 = vpack.c.bf16 %v7955_v30, %v7954_v41 }
0x1496   : > { %v4019_v55 = vmul.f32 %v7942_v35, %v4011_v42 }
0x1497   : > { %v4028_v57 = vadd.f32 %v7943_v54, %v4020_v45 }
0x1498   : > { %v4027_v56 = vadd.f32 %v7943_v54, %v4019_v55 }
0x149a   : > { %9085 = vmatprep.mubr.msk.f32.mxu0 %vm932_vm0, %v4027_v56 }
0x149b   : > { %9086 = vmatmul.mubr.msk.f32.vlgmr.msra.gmra.mrb[18].mxu0 %vm932_vm0, %v4028_v57 }
0x149c   : > { %9957 = vmatpush3.bf16.msra.mxu0 %v9954_v31  ;;  %v7951_v31 = vld [vmem:[%s12875_s23] ss:$0 sm:$0xff] }
0x149d   : > { %9959 = vmatprep.subr.bf16.mxu0 %v9958_v62 }
0x14a0   : > { %9961 = vmatpush3.bf16.msra.mxu0 %v9958_v62  ;;  %v12189_v62 = vld [vmem:[%s11481_s4] sm:$0xff] }
0x14a1   : > { %9963 = vmatprep.subr.bf16.mxu0 %v9962_v43 }
0x156e   : > { %v9087_v63 = vpop.f32.mrb[18].mxu0 }
0x156f   : > { %v4118_v25 = vadd.f32 %v9087_v63, %v7944_v61  ;;  %v4112_v0 = vpop.f32.mrb[19].mxu0 }
0x1570   : > { %v4113_v1 = vadd.f32 %v7944_v61, %v4112_v0 }
0x1571   : > { %v4122_v19 = vmax.f32 %v4118_v25, 0.0 }
0x1572   : > { %v4121_v10 = vmax.f32 %v4113_v1, 0.0 }
0x1574   : > { %9096 = vmatprep.mubr.msk.f32.mxu0 %vm932_vm0, %v4121_v10 }
0x1575   : > { %9097 = vmatmul.mubr.msk.f32.vlgmr.msra.gmra.mrb[20].mxu0 %vm932_vm0, %v4122_v19 }
0x1576   : > { %9965 = vmatpush3.bf16.msra.mxu0 %v9962_v43  ;;  %v7960_v43 = vld [vmem:[%s12942_s6 + $0x20] sm:$0xff] }
0x1577   : > { %9967 = vmatprep.subr.bf16.mxu0 %v9966_v6 }
0x157a   : > { %9969 = vmatpush3.bf16.msra.mxu0 %v9966_v6 }
0x1648   : > { %v9098_v3 = vpop.f32.mrb[20].mxu0 }
0x1649   : > { %v4212_v4 = vadd.f32 %v9098_v3, %v7947_v2  ;;  %v4206_v5 = vpop.f32.mrb[21].mxu0 }
0x164a   : > { %v4207_v8 = vadd.f32 %v7947_v2, %v4206_v5 }
0x164b   : > { %v4216_v9 = vadd.f32 %v4212_v4, %v4028_v57  ;;  %v12185_v57 = vld [vmem:[%s11481_s4 + $0x8] sm:$0xff]  ;;  %s12970_s4 = sld [smem:[#allocation4_spill]] }
0x164c   : > { %v4215_v11 = vadd.f32 %v4207_v8, %v4027_v56 }
0x164d   : > { %v4222_v12 = vsel %vm932_vm0, %v4216_v9, 0.0 }
0x164e   : > { %4223 = vadd.xlane.f32.xlu1 %v4222_v12  ;;  %v4219_v14 = vsel %vm932_vm0, %v4215_v11, 0.0 }
0x164f   : > { %4220 = vadd.xlane.f32.xlu0 %v4219_v14 }
0x16db   : > { %v4224_v20 = vpop.xlane.xlu1 %4223 }
0x16dc   : > { %v4226_v21 = vmul.f32 0.03125, %v4224_v20  ;;  %v4221_v15 = vpop.xlane.xlu0 %4220 }
0x16dd   : > { %v4225_v16 = vmul.f32 0.03125, %v4221_v15 }
0x16de   : > { %v4228_v22 = vsub.f32 %v4216_v9, %v4226_v21 }
0x16df   : > { %v4227_v17 = vsub.f32 %v4215_v11, %v4225_v16 }
0x16e0   : > { %v4230_v23 = vmul.f32 %v4228_v22, %v4228_v22 }
0x16e1   : > { %v4229_v36 = vmul.f32 %v4227_v17, %v4227_v17 }
0x16e2   : > { %v4234_v28 = vsel %vm932_vm0, %v4230_v23, 0.0 }
0x16e3   : > { %4235 = vadd.xlane.f32.xlu1 %v4234_v28  ;;  %v4231_v34 = vsel %vm932_vm0, %v4229_v36, 0.0 }
0x16e4   : > { %4232 = vadd.xlane.f32.xlu0 %v4231_v34 }
0x1770   : > { %v4236_v7 = vpop.xlane.xlu1 %4235 }
0x1771   : > { %v4238_v29 = vmul.f32 0.03125, %v4236_v7  ;;  %v4233_v60 = vpop.xlane.xlu0 %4232 }
0x1772   : > { %v4237_v26 = vmul.f32 0.03125, %v4233_v60 }
0x1773   : > { %v4240_v46 = vadd.f32 1e-05, %v4238_v29 }
0x1774   : > { %v4239_v47 = vadd.f32 1e-05, %v4237_v26 }
0x1775   : > { %11133 = vrsqrt.f32 %v4240_v46 }
0x1776   : > { %11135 = vrsqrt.f32 %v4239_v47 }
0x177f   : > { %v11134_v13 = vpop.eup %11133 }
0x1780   : > { %v11136_v48 = vpop.eup %11135  ;;  %v4244_v49 = vmul.f32 %v11134_v13, %v4228_v22 }
0x1781   : > { %v4243_v24 = vmul.f32 %v11136_v48, %v4227_v17 }
0x1782   : > { %v4252_v38 = vmul.f32 %v7950_v40, %v4244_v49 }
0x1783   : > { %v4251_v44 = vmul.f32 %v7950_v40, %v4243_v24 }
0x1784   : > { %v12149_v32 = vadd.f32 %v7951_v31, %v4252_v38 }
0x1785   : > { %v12147_v50 = vadd.f32 %v7951_v31, %v4251_v44 }
0x1787   : > { %9107 = vmatprep.mubr.msk.f32.mxu0 %vm932_vm0, %v12147_v50 }
0x1788   : > { %9108 = vmatmul.mubr.msk.f32.vlgmr.msra.gmra.mrb[22].mxu0 %vm932_vm0, %v12149_v32 }
0x185b   : > { %v9109_v51 = vpop.f32.mrb[22].mxu0 }
0x185c   : > { %v12158_v52 = vadd.f32 %v9109_v51, %v7957_v33  ;;  %v4346_v35 = vpop.f32.mrb[23].mxu0 }
0x185d   : > { %v12160_v39 = vadd.f32 %v7957_v33, %v4346_v35 }
0x185f   : > { %9114 = vmatprep.mubr.msk.f32.mxu1 %vm1025_vm1, %v12160_v39  ;;  %v12166_v53 = vpack.i.bf16 %v12158_v52, %v12160_v39 }
0x1861   : > { %10742 = vrot.lane.b32.xlu0 %v12166_v53, %s12949_s24 }
0x1865   : > { %10752 = vrot.lane.b32.xlu0 %v12166_v53, %s12957_s25 }
0x1869   : > { %4649 = vrot.lane.b32.xlu0 %v12160_v39, %s12956_s0 }
0x186d   : > { %10757 = vrot.lane.b32.xlu0 %v12166_v53, %s12959_s11 }
0x1871   : > { %4934 = vrot.lane.b32.xlu0 %v12158_v52, %s12958_s8 }
0x18d3   : > { %v10743_v42 = vpop.permute.xlu0 %10742 }
0x18d4   : > { %v10745_v54 = vunpack.i.h.bf16 %v10743_v42  ;;  %v10744_v45 = vunpack.i.l.bf16 %v10743_v42 }
0x18d6   : > { %v9970_v55 = vpack.c.bf16 %v10745_v54, %v10744_v45 }
0x18d7   : > { %v10753_v10 = vpop.permute.xlu0 %10752 }
0x18d8   : > { %9972 = vmatprep.subr.msk.bf16.mxu1 %vm11462_vm2, %v9970_v55  ;;  %v10755_v5 = vunpack.i.h.bf16 %v10753_v10  ;;  %v10754_v9 = vunpack.i.l.bf16 %v10753_v10 }
0x18d9   : > { %9975 = vmatpush3.bf16.xpose.msk.msra.mxu1 %vm11462_vm2, %v9970_v55 }
0x18da   : > { %v9980_v21 = vpack.c.bf16 %v10755_v5, %v10754_v9  ;;  %9124 = vmatprep.subr.mxu1 %v7960_v43  ;;  %v7961_v9 = vld [vmem:[%s12942_s6 + $0x28] sm:$0xff] }
0x18db   : > { %v4650_v11 = vpop.permute.xlu0 %4649 }
0x18df   : > { %v10758_v16 = vpop.permute.xlu0 %10757 }
0x18e0   : > { %9115 = vmatmul.mubr.msk.f32.vlgmr.msra.gmra.mrb[38].mxu1 %vm1025_vm1, %v12158_v52  ;;  %v10760_v17 = vunpack.i.h.bf16 %v10758_v16  ;;  %v10759_v23 = vunpack.i.l.bf16 %v10758_v16 }
0x18e1   : > { %9125 = vmatpush3.msra.mxu1 %v7960_v43 }
0x18e2   : > { %v9990_v34 = vpack.c.bf16 %v10760_v17, %v10759_v23 }
0x18e3   : > { %v4935_v41 = vpop.permute.xlu0 %4934 }
0x19b3   : > { %v9116_v56 = vpop.f32.mrb[38].mxu1 }
0x19b4   : > { %v4448_v58 = vadd.f32 %v12185_v57, %v9116_v56  ;;  %v4442_v59 = vpop.f32.mrb[39].mxu1 }
0x19b5   : > { %v4443_v61 = vadd.f32 %v12189_v62, %v4442_v59 }
0x19b6   : > { %v4454_v63 = vsel %vm1109_vm3, %v4448_v58, -inf }
0x19b7   : > { %4455 = vmax.xlane.f32.xlu1 %v4454_v63  ;;  %v4451_v25 = vsel %vm1109_vm3, %v4443_v61, -inf }
0x19bb   : > { %4452 = vmax.xlane.f32.xlu1 %v4451_v25 }
0x19cc   : > { %10747 = vrot.lane.b32.xlu1 %v12166_v53, %s12963_s15  ;;  %s12969_s15 = sld [smem:[#allocation14_spill]] }
0x19d0   : > { %4651 = vrot.lane.b32.xlu1 %v12158_v52, %s12956_s0 }
0x19d4   : > { %4932 = vrot.lane.b32.xlu1 %v12160_v39, %s12958_s8 }
0x1a44   : > { %v4456_v0 = vpop.xlane.xlu1 %4455 }
0x1a45   : > { %v4458_v1 = vsub.f32 %v4448_v58, %v4456_v0 }
0x1a47   : > { %v4461_v19 = vmul.f32 1.442695, %v4458_v1 }
0x1a48   : > { %v4453_v2 = vpop.xlane.xlu1 %4452 }
0x1a49   : > { %11137 = vpow2.f32 %v4461_v19  ;;  %v4457_v3 = vsub.f32 %v4443_v61, %v4453_v2 }
0x1a4b   : > { %v4459_v4 = vmul.f32 1.442695, %v4457_v3 }
0x1a4c   : > { %v10748_v8 = vpop.permute.xlu1 %10747 }
0x1a4d   : > { %11139 = vpow2.f32 %v4459_v4  ;;  %v10750_v12 = vunpack.i.h.bf16 %v10748_v8  ;;  %v10749_v14 = vunpack.i.l.bf16 %v10748_v8 }
0x1a4f   : > { %v9976_v20 = vpack.c.bf16 %v10750_v12, %v10749_v14 }
0x1a50   : > { %v4652_v37 = vpop.permute.xlu1 %4651 }
0x1a51   : > { %9977 = vmatprep.subr.bf16.mxu0 %v9976_v20 }
0x1a52   : > { %9979 = vmatpush3.bf16.msra.mxu0 %v9976_v20 }
0x1a53   : > { %v11138_v15 = vpop.eup %11137  ;;  %9982 = vmatprep.subr.msk.bf16.mxu0 %vm11462_vm2, %v9980_v21 }
0x1a54   : > { %v4466_v22 = vsel %vm1109_vm3, %v11138_v15, 0.0  ;;  %v4933_v27 = vpop.permute.xlu1 %4932 }
0x1a55   : > { %4467 = vadd.xlane.f32.xlu0 %v4466_v22 }
0x1a57   : > { %v11140_v36 = vpop.eup %11139 }
0x1a58   : > { %9121 = vmatprep.mubr.msk.f32.mxu0 %vm1109_vm3, %v11140_v36  ;;  %v4463_v28 = vsel %vm1109_vm3, %v11140_v36, 0.0 }
0x1a59   : > { %4464 = vadd.xlane.f32.xlu1 %v4463_v28  ;;  %9122 = vmatmul.mubr.msk.f32.vlgmr.msra.gmra.mrb[24].mxu0 %vm1109_vm3, %v11138_v15 }
0x1a5a   : > { %9133 = vmatprep.mubr.msk.f32.mxu0 %vm1025_vm1, %v4650_v11 }
0x1a5b   : > { %9985 = vmatpush3.bf16.xpose.msk.msra.mxu0 %vm11462_vm2, %v9980_v21 }
0x1a5c   : > { %9992 = vmatprep.subr.msk.bf16.mxu0 %vm11462_vm2, %v9990_v34 }
0x1a62   : > { %9134 = vmatmul.mubr.msk.f32.vlgmr.msra.gmra.mrb[26].mxu0 %vm1025_vm1, %v4652_v37 }
0x1a63   : > { %9995 = vmatpush3.bf16.xpose.msk.msra.mxu0 %vm11462_vm2, %v9990_v34  ;;  %9152 = vmatprep.mubr.msk.f32.mxu0 %vm1025_vm1, %v4933_v27 }
0x1a6a   : > { %9153 = vmatmul.mubr.msk.f32.vlgmr.msra.gmra.mrb[28].mxu0 %vm1025_vm1, %v4935_v41 }
0x1ae2   : > { %v4468_v6 = vpop.xlane.xlu0 %4467 }
0x1ae6   : > { %v4465_v30 = vpop.xlane.xlu1 %4464 }
0x1ae7   : > { %11141 = vrcp.f32 %v4465_v30 }
0x1ae8   : > { %11143 = vrcp.f32 %v4468_v6 }
0x1af1   : > { %v11142_v29 = vpop.eup %11141 }
0x1af2   : > { %v11144_v26 = vpop.eup %11143 }
0x1b2c   : > { %v9123_v7 = vpop.f32.mrb[24].mxu0 }
0x1b2d   : > { %v4547_v60 = vpop.f32.mrb[25].mxu0  ;;  %v4559_v47 = vmul.f32 %v11144_v26, %v9123_v7 }
0x1b2e   : > { %v4557_v46 = vmul.f32 %v11142_v29, %v4547_v60 }
0x1b30   : > { %9126 = vmatprep.mubr.msk.f32.mxu1 %vm1025_vm1, %v4557_v46 }
0x1b31   : > { %9127 = vmatmul.mubr.msk.f32.vlgmr.msra.gmra.mrb[40].mxu1 %vm1025_vm1, %v4559_v47 }
0x1b35   : > { %v9135_v13 = vpop.f32.mrb[26].mxu0 }
0x1b36   : > { %v4737_v40 = vadd.f32 %v12185_v57, %v9135_v13  ;;  %v4731_v48 = vpop.f32.mrb[27].mxu0 }
0x1b37   : > { %v4732_v49 = vadd.f32 %v12189_v62, %v4731_v48 }
0x1b38   : > { %v4743_v24 = vsel %vm1109_vm3, %v4737_v40, -inf }
0x1b39   : > { %4744 = vmax.xlane.f32.xlu1 %v4743_v24  ;;  %v4740_v31 = vsel %vm1109_vm3, %v4732_v49, -inf }
0x1b3a   : > { %4741 = vmax.xlane.f32.xlu0 %v4740_v31 }
0x1b3d   : > { %v9154_v38 = vpop.f32.mrb[28].mxu0 }
0x1b3e   : > { %v5014_v44 = vpop.f32.mrb[29].mxu0  ;;  %v5020_v3 = vadd.f32 %v12185_v57, %v9154_v38 }
0x1b3f   : > { %v5015_v33 = vadd.f32 %v12189_v62, %v5014_v44 }
0x1b40   : > { %v5026_v8 = vsel %vm1109_vm3, %v5020_v3, -inf }
0x1b41   : > { %v5023_v51 = vsel %vm1109_vm3, %v5015_v33, -inf }
0x1b4a   : > { %10767 = vrot.lane.b32.xlu1 %v12166_v53, %s12961_s29 }
0x1b4e   : > { %5215 = vrot.lane.b32.xlu1 %v12160_v39, %s12960_s5 }
0x1b50   : > { %10762 = vrot.lane.b32.xlu0 %v12166_v53, %s12964_s30  ;;  %s12975_s30 = sld [smem:[#allocation3_spill]] }
0x1b54   : > { %5217 = vrot.lane.b32.xlu0 %v12158_v52, %s12960_s5 }
0x1b73   : > { %5024 = vmax.xlane.f32.xlu0 %v5023_v51 }
0x1bc6   : > { %v4745_v35 = vpop.xlane.xlu1 %4744 }
0x1bc7   : > { %v4747_v42 = vsub.f32 %v4737_v40, %v4745_v35  ;;  %v4742_v54 = vpop.xlane.xlu0 %4741  ;;  %v7962_v40 = vld [vmem:[%s12942_s6 + $0x30] sm:$0xff] }
0x1bc8   : > { %v4746_v45 = vsub.f32 %v4732_v49, %v4742_v54 }
0x1bc9   : > { %v4750_v55 = vmul.f32 1.442695, %v4747_v42 }
0x1bca   : > { %v4748_v56 = vmul.f32 1.442695, %v4746_v45  ;;  %v10768_v58 = vpop.permute.xlu1 %10767 }
0x1bcb   : > { %11145 = vpow2.f32 %v4750_v55  ;;  %v10770_v39 = vunpack.i.h.bf16 %v10768_v58  ;;  %v10769_v59 = vunpack.i.l.bf16 %v10768_v58  ;;  %v10763_v61 = vpop.permute.xlu0 %10762 }
0x1bcc   : > { %11147 = vpow2.f32 %v4748_v56  ;;  %v10765_v63 = vunpack.i.h.bf16 %v10763_v61  ;;  %v10764_v25 = vunpack.i.l.bf16 %v10763_v61 }
0x1bcd   : > { %v10000_v52 = vpack.c.bf16 %v10770_v39, %v10769_v59 }
0x1bce   : > { %v5216_v0 = vpop.permute.xlu1 %5215  ;;  %v9986_v1 = vpack.c.bf16 %v10765_v63, %v10764_v25 }
0x1bcf   : > { %10002 = vmatprep.subr.msk.bf16.mxu0 %vm11462_vm2, %v10000_v52  ;;  %9171 = vmatprep.mubr.msk.f32.mxu0 %vm1025_vm1, %v5216_v0  ;;  %v5218_v4 = vpop.permute.xlu0 %5217  ;;  %v7963_v0 = vld [vmem:[%s12942_s6 + $0x38] sm:$0xff] }
0x1bd0   : > { %9987 = vmatprep.subr.bf16.mxu1 %v9986_v1  ;;  %10005 = vmatpush3.bf16.xpose.msk.msra.mxu0 %vm11462_vm2, %v10000_v52 }
0x1bd1   : > { %9989 = vmatpush3.bf16.msra.mxu1 %v9986_v1 }
0x1bd2   : > { %9143 = vmatprep.subr.mxu1 %v7961_v9 }
0x1bd5   : > { %v11146_v10 = vpop.eup %11145 }
0x1bd6   : > { %v11148_v19 = vpop.eup %11147  ;;  %v4755_v2 = vsel %vm1109_vm3, %v11146_v10, 0.0 }
0x1bd7   : > { %4756 = vadd.xlane.f32.xlu0 %v4755_v2  ;;  %9140 = vmatprep.mubr.msk.f32.mxu1 %vm1109_vm3, %v11148_v19  ;;  %v4752_v5 = vsel %vm1109_vm3, %v11148_v19, 0.0 }
0x1bd8   : > { %9172 = vmatmul.mubr.msk.f32.vlgmr.msra.gmra.mrb[30].mxu0 %vm1025_vm1, %v5218_v4  ;;  %4753 = vadd.xlane.f32.xlu1 %v4752_v5 }
0x1bd9   : > { %9141 = vmatmul.mubr.msk.f32.vlgmr.msra.gmra.mrb[42].mxu1 %vm1109_vm3, %v11146_v10 }
0x1bda   : > { %9144 = vmatpush3.msra.mxu1 %v7961_v9  ;;  %v11220_v9 = vld [vmem:[%s11588_s2] sm:$0xff] }
0x1bdc   : > { %5027 = vmax.xlane.f32.xlu1 %v5026_v8 }
0x1bed   : > { %10772 = vrot.lane.b32.xlu0 %v12166_v53, %s12965_s12  ;;  %s12968_s12 = sld [smem:[#allocation13_spill]] }
0x1c00   : > { %v5025_v11 = vpop.xlane.xlu0 %5024 }
0x1c01   : > { %v5029_v22 = vsub.f32 %v5015_v33, %v5025_v11  ;;  %v7973_v11 = vld [vmem:[%s12943_s1 + $0x1] ss:$0 sm:$0xff] }
0x1c03   : > { %v5031_v36 = vmul.f32 1.442695, %v5029_v22 }
0x1c64   : > { %v4757_v12 = vpop.xlane.xlu0 %4756 }
0x1c65   : > { %v4754_v16 = vpop.xlane.xlu1 %4753 }
0x1c66   : > { %11149 = vrcp.f32 %v4754_v16 }
0x1c67   : > { %11151 = vrcp.f32 %v4757_v12 }
0x1c68   : > { %v10773_v14 = vpop.permute.xlu0 %10772  ;;  %11153 = vpow2.f32 %v5031_v36 }
0x1c69   : > { %v10775_v20 = vunpack.i.h.bf16 %v10773_v14  ;;  %v10774_v21 = vunpack.i.l.bf16 %v10773_v14  ;;  %v5028_v17 = vpop.xlane.xlu1 %5027 }
0x1c6a   : > { %v5030_v23 = vsub.f32 %v5020_v3, %v5028_v17 }
0x1c6b   : > { %v9996_v15 = vpack.c.bf16 %v10775_v20, %v10774_v21 }
0x1c6c   : > { %v5033_v28 = vmul.f32 1.442695, %v5030_v23  ;;  %v8010_v23 = vld [vmem:[%s12946_s28 + $0x20] sm:$0xff] }
0x1c6d   : > { %9997 = vmatprep.subr.bf16.mxu1 %v9996_v15 }
0x1c6e   : > { %11155 = vpow2.f32 %v5033_v28  ;;  %v8013_v28 = vld [vmem:[%s12946_s28 + $0x38] sm:$0xff] }
0x1c70   : > { %v11150_v41 = vpop.eup %11149 }
0x1c71   : > { %v11152_v6 = vpop.eup %11151 }
0x1c72   : > { %v11154_v46 = vpop.eup %11153 }
0x1c73   : > { %v5035_v13 = vsel %vm1109_vm3, %v11154_v46, 0.0 }
0x1cab   : > { %v9173_v34 = vpop.f32.mrb[30].mxu0 }
0x1cac   : > { %v9142_v37 = vpop.f32.mrb[42].mxu1  ;;  %v5297_v27 = vpop.f32.mrb[31].mxu0  ;;  %v5303_v29 = vadd.f32 %v12185_v57, %v9173_v34 }
0x1cad   : > { %v5298_v43 = vadd.f32 %v12189_v62, %v5297_v27  ;;  %v4836_v30 = vpop.f32.mrb[43].mxu1  ;;  %v4848_v60 = vmul.f32 %v11152_v6, %v9142_v37  ;;  %v11156_v62 = vpop.eup %11155  ;;  %v11221_v37 = vld [vmem:[%s11588_s2 + $0x8] sm:$0xff]  ;;  %v11222_v27 = vld [vmem:[%s11588_s2 + $0x10] sm:$0xff] }
0x1cae   : > { %v4846_v7 = vmul.f32 %v11150_v41, %v4836_v30  ;;  %v5309_v47 = vsel %vm1109_vm3, %v5303_v29, -inf  ;;  %v5038_v57 = vsel %vm1109_vm3, %v11156_v62, 0.0  ;;  %v11223_v41 = vld [vmem:[%s11588_s2 + $0x18] sm:$0xff]  ;;  %v11225_v30 = vld [vmem:[%s11588_s2 + $0x28] sm:$0xff]  ;;  %v11226_v6 = vld [vmem:[%s11588_s2 + $0x30] sm:$0xff] }
0x1caf   : > { %v5306_v26 = vsel %vm1109_vm3, %v5298_v43, -inf }
0x1cb0   : > { %5307 = vmax.xlane.f32.xlu1 %v5306_v26  ;;  %9145 = vmatprep.mubr.msk.f32.mxu1 %vm1025_vm1, %v4846_v7  ;;  %v11227_v7 = vld [vmem:[%s11588_s2 + $0x38] sm:$0xff]  ;;  %v11230_v26 = vld [vmem:[%s11588_s2 + $0x50] sm:$0xff] }
0x1cb1   : > { %9146 = vmatmul.mubr.msk.f32.vlgmr.msra.gmra.mrb[40].mxu1 %vm1025_vm1, %v4848_v60  ;;  %v11229_v60 = vld [vmem:[%s11588_s2 + $0x48] sm:$0xff] }
0x1cb2   : > { %9999 = vmatpush3.bf16.msra.mxu1 %v9996_v15  ;;  %9159 = vmatprep.mubr.msk.f32.mxu1 %vm1109_vm3, %v11154_v46  ;;  %v11231_v46 = vld [vmem:[%s11588_s2 + $0x58] sm:$0xff] }
0x1cb3   : > { %9162 = vmatprep.subr.mxu1 %v7962_v40 }
0x1cb4   : > { %5310 = vmax.xlane.f32.xlu1 %v5309_v47  ;;  %v11232_v47 = vld [vmem:[%s11588_s2 + $0x60] sm:$0xff] }
0x1cb5   : > { %9160 = vmatmul.mubr.msk.f32.vlgmr.msra.gmra.mrb[44].mxu1 %vm1109_vm3, %v11156_v62  ;;  %v11233_v62 = vld [vmem:[%s11588_s2 + $0x68] sm:$0xff] }
0x1cb6   : > { %9163 = vmatpush3.msra.mxu1 %v7962_v40 }
0x1cb8   : > { %5039 = vadd.xlane.f32.xlu1 %v5038_v57  ;;  %v11234_v57 = vld [vmem:[%s11588_s2 + $0x70] sm:$0xff] }
0x1cbc   : > { %5036 = vadd.xlane.f32.xlu1 %v5035_v13  ;;  %v11235_v13 = vld [vmem:[%s11588_s2 + $0x78] sm:$0xff] }
0x1ccd   : > { %10777 = vrot.lane.b32.xlu1 %v12166_v53, %s12966_s13 }
0x1d3d   : > { %v5308_v48 = vpop.xlane.xlu1 %5307 }
0x1d3e   : > { %v5312_v49 = vsub.f32 %v5298_v43, %v5308_v48  ;;  %v11224_v43 = vld [vmem:[%s11588_s2 + $0x20] sm:$0xff] }
0x1d40   : > { %v5314_v24 = vmul.f32 1.442695, %v5312_v49 }
0x1d41   : > { %v5311_v31 = vpop.xlane.xlu1 %5310 }
0x1d42   : > { %11157 = vpow2.f32 %v5314_v24  ;;  %v5313_v38 = vsub.f32 %v5303_v29, %v5311_v31  ;;  %v11228_v29 = vld [vmem:[%s11588_s2 + $0x40] sm:$0xff]  ;;  %s12967_s2 = sld [smem:[#allocation18_spill]] }
0x1d44   : > { %v5316_v44 = vmul.f32 1.442695, %v5313_v38 }
0x1d45   : > { %v5040_v33 = vpop.xlane.xlu1 %5039 }
0x1d46   : > { %11159 = vpow2.f32 %v5316_v44 }
0x1d49   : > { %v5037_v51 = vpop.xlane.xlu1 %5036 }
0x1d4a   : > { %11161 = vrcp.f32 %v5037_v51 }
0x1d4b   : > { %11163 = vrcp.f32 %v5040_v33 }
0x1d4c   : > { %v11158_v35 = vpop.eup %11157 }
0x1d4d   : > { %v10778_v42 = vpop.permute.xlu1 %10777  ;;  %v5318_v53 = vsel %vm1109_vm3, %v11158_v35, 0.0 }
0x1d4e   : > { %v10780_v54 = vunpack.i.h.bf16 %v10778_v42  ;;  %v10779_v45 = vunpack.i.l.bf16 %v10778_v42  ;;  %5319 = vadd.xlane.f32.xlu0 %v5318_v53  ;;  %v8002_v42 = vld [vmem:[%s12947_s27 + $0x20] sm:$0xff]  ;;  %v8003_v53 = vld [vmem:[%s12947_s27 + $0x28] sm:$0xff] }
0x1d50   : > { %v11160_v55 = vpop.eup %11159  ;;  %v10006_v56 = vpack.c.bf16 %v10780_v54, %v10779_v45  ;;  %v10010_v54 = vpack.c.bf16 %v8003_v53, %v8002_v42  ;;  %v8004_v45 = vld [vmem:[%s12947_s27 + $0x30] sm:$0xff] }
0x1d51   : > { %v5321_v58 = vsel %vm1109_vm3, %v11160_v55, 0.0 }
0x1d52   : > { %5322 = vadd.xlane.f32.xlu1 %v5321_v58  ;;  %10007 = vmatprep.subr.bf16.mxu1 %v10006_v56  ;;  %v8015_v58 = vld [vmem:[%s12967_s2 + $0x1] ss:$0 sm:$0xff]  ;;  %s12971_s2 = sld [smem:[#allocation16_spill]] }
0x1d53   : > { %10011 = vmatprep.subr.bf16.mxu0 %v10010_v54 }
0x1d54   : > { %v11162_v59 = vpop.eup %11161  ;;  %10013 = vmatpush3.bf16.msra.mxu0 %v10010_v54 }
0x1d55   : > { %v11164_v63 = vpop.eup %11163 }
0x1d88   : > { %v9161_v39 = vpop.f32.mrb[44].mxu1 }
0x1d89   : > { %v5119_v61 = vpop.f32.mrb[45].mxu1  ;;  %v5131_v52 = vmul.f32 %v11164_v63, %v9161_v39 }
0x1d8a   : > { %v5129_v25 = vmul.f32 %v11162_v59, %v5119_v61 }
0x1d8c   : > { %9164 = vmatprep.mubr.msk.f32.mxu1 %vm1025_vm1, %v5129_v25 }
0x1d8d   : > { %9165 = vmatmul.mubr.msk.f32.vlgmr.msra.gmra.mrb[40].mxu1 %vm1025_vm1, %v5131_v52 }
0x1d8e   : > { %10009 = vmatpush3.bf16.msra.mxu1 %v10006_v56  ;;  %9178 = vmatprep.mubr.msk.f32.mxu1 %vm1109_vm3, %v11158_v35 }
0x1d8f   : > { %9181 = vmatprep.subr.mxu1 %v7963_v0 }
0x1d91   : > { %9179 = vmatmul.mubr.msk.f32.vlgmr.msra.gmra.mrb[46].mxu1 %vm1109_vm3, %v11160_v55  ;;  %v8005_v55 = vld [vmem:[%s12947_s27 + $0x38] sm:$0xff] }
0x1d92   : > { %9182 = vmatpush3.msra.mxu1 %v7963_v0  ;;  %v10014_v56 = vpack.c.bf16 %v8005_v55, %v8004_v45 }
0x1d94   : > { %10015 = vmatprep.subr.bf16.mxu0 %v10014_v56 }
0x1d95   : > { %10017 = vmatpush3.bf16.msra.mxu0 %v10014_v56 }
0x1ddb   : > { %v5320_v1 = vpop.xlane.xlu0 %5319 }
0x1ddc   : > { %11165 = vrcp.f32 %v5320_v1 }
0x1ddf   : > { %v5323_v10 = vpop.xlane.xlu1 %5322 }
0x1de0   : > { %11167 = vrcp.f32 %v5323_v10 }
0x1de6   : > { %v11166_v2 = vpop.eup %11165 }
0x1dea   : > { %v11168_v4 = vpop.eup %11167 }
0x1e64   : > { %v9180_v19 = vpop.f32.mrb[46].mxu1 }
0x1e65   : > { %v5402_v3 = vpop.f32.mrb[47].mxu1  ;;  %v5414_v8 = vmul.f32 %v11168_v4, %v9180_v19 }
0x1e66   : > { %v5412_v5 = vmul.f32 %v11166_v2, %v5402_v3 }
0x1e68   : > { %9183 = vmatprep.mubr.msk.f32.mxu1 %vm1025_vm1, %v5412_v5 }
0x1e69   : > { %9184 = vmatmul.mubr.msk.f32.vlgmr.msra.gmra.mrb[40].mxu1 %vm1025_vm1, %v5414_v8 }
0x1e6a   : > { %9205 = vmatprep.mubr.msk.f32.mxu1 %vm932_vm0, %v11220_v9 }
0x1f3c   : > { %v9185_v12 = vpop.f32.mrb[40].mxu1 }
0x1f3d   : > { %v5487_v14 = vpop.f32.mrb[41].mxu1  ;;  %v10374_v20 = vadd.f32 %v9185_v12, %v7973_v11 }
0x1f3e   : > { %v10375_v21 = vadd.f32 %v7973_v11, %v5487_v14 }
0x1f3f   : > { %v5499_v16 = vadd.f32 %v10374_v20, %v12149_v32  ;;  %v8012_v32 = vld [vmem:[%s12946_s28 + $0x30] sm:$0xff] }
0x1f40   : > { %v5498_v15 = vadd.f32 %v10375_v21, %v12147_v50  ;;  %v8011_v50 = vld [vmem:[%s12946_s28 + $0x28] sm:$0xff]  ;;  %v10022_v34 = vpack.c.bf16 %v8013_v28, %v8012_v32 }
0x1f41   : > { %v5507_v17 = vsel %vm932_vm0, %v5499_v16, 0.0  ;;  %v10018_v36 = vpack.c.bf16 %v8011_v50, %v8010_v23 }
0x1f42   : > { %v5504_v22 = vsel %vm932_vm0, %v5498_v15, 0.0 }
0x1f43   : > { %5505 = vadd.xlane.f32.xlu0 %v5504_v22  ;;  %10019 = vmatprep.subr.bf16.mxu1 %v10018_v36 }
0x1f44   : > { %10021 = vmatpush3.bf16.msra.mxu1 %v10018_v36 }
0x1f45   : > { %10023 = vmatprep.subr.bf16.mxu1 %v10022_v34 }
0x1f47   : > { %5508 = vadd.xlane.f32.xlu0 %v5507_v17 }
0x1f48   : > { %10025 = vmatpush3.bf16.msra.mxu1 %v10022_v34 }
0x1f4b   : > { %9206 = vmatmul.mubr.msk.f32.vlgmr.msra.gmra.mrb[48].mxu1 %vm932_vm0, %v11221_v37 }
0x1f4c   : > { %9208 = vmatprep.mubr.msk.f32.mxu1 %vm932_vm0, %v11222_v27 }
0x1f4f   : > { %9209 = vmatmul.mubr.msk.f32.gmra.mrb[50].mxu1 %vm932_vm0, %v11223_v41 }
0x1f50   : > { %9211 = vmatprep.mubr.msk.f32.mxu1 %vm932_vm0, %v11224_v43 }
0x1f53   : > { %9212 = vmatmul.mubr.msk.f32.gmra.mrb[52].mxu1 %vm932_vm0, %v11225_v30 }
0x1f54   : > { %9214 = vmatprep.mubr.msk.f32.mxu1 %vm932_vm0, %v11226_v6 }
0x1f57   : > { %9215 = vmatmul.mubr.msk.f32.gmra.mrb[54].mxu1 %vm932_vm0, %v11227_v7 }
0x1f58   : > { %9217 = vmatprep.mubr.msk.f32.mxu1 %vm932_vm0, %v11228_v29 }
0x1f5b   : > { %9218 = vmatmul.mubr.msk.f32.gmra.mrb[56].mxu1 %vm932_vm0, %v11229_v60 }
0x1f5c   : > { %9220 = vmatprep.mubr.msk.f32.mxu1 %vm932_vm0, %v11230_v26 }
0x1f5f   : > { %9221 = vmatmul.mubr.msk.f32.gmra.mrb[58].mxu1 %vm932_vm0, %v11231_v46 }
0x1f60   : > { %9223 = vmatprep.mubr.msk.f32.mxu1 %vm932_vm0, %v11232_v47 }
0x1f63   : > { %9224 = vmatmul.mubr.msk.f32.gmra.mrb[60].mxu1 %vm932_vm0, %v11233_v62 }
0x1f64   : > { %9226 = vmatprep.mubr.msk.f32.mxu1 %vm932_vm0, %v11234_v57 }
0x1f67   : > { %9227 = vmatmul.mubr.msk.f32.gmra.mrb[62].mxu1 %vm932_vm0, %v11235_v13 }
0x1fd0   : > { %v5506_v40 = vpop.xlane.xlu0 %5505 }
0x1fd1   : > { %v5510_v48 = vmul.f32 0.03125, %v5506_v40 }
0x1fd3   : > { %v12329_v49 = vsub.f32 %v5498_v15, %v5510_v48  ;;  %v8000_v48 = vld [vmem:[%s12968_s12 + $0x1] ss:$0 sm:$0xff] }
0x1fd4   : > { %v5509_v24 = vpop.xlane.xlu0 %5508 }
0x1fd5   : > { %v5511_v31 = vmul.f32 0.03125, %v5509_v24  ;;  %v5514_v38 = vmul.f32 %v12329_v49, %v12329_v49 }
0x1fd7   : > { %v12333_v44 = vsub.f32 %v5499_v16, %v5511_v31  ;;  %v5516_v33 = vsel %vm932_vm0, %v5514_v38, 0.0  ;;  %v8001_v31 = vld [vmem:[%s12969_s15 + $0x1] ss:$0 sm:$0xff] }
0x1fd8   : > { %5517 = vadd.xlane.f32.xlu0 %v5516_v33 }
0x1fd9   : > { %v5515_v51 = vmul.f32 %v12333_v44, %v12333_v44 }
0x1fdb   : > { %v5519_v35 = vsel %vm932_vm0, %v5515_v51, 0.0 }
0x1fdc   : > { %5520 = vadd.xlane.f32.xlu0 %v5519_v35 }
0x201e   : > { %v9207_v39 = vpop.f32.mrb[48].mxu1 }
0x201f   : > { %v5725_v59 = vadd.f32 %v9207_v39, %v8015_v58  ;;  %v5719_v61 = vpop.f32.mrb[49].mxu1 }
0x2020   : > { %v5720_v63 = vadd.f32 %v8015_v58, %v5719_v61 }
0x2022   : > { %v12354_v25 = vpack.c.bf16 %v5725_v59, %v5720_v63  ;;  %v12356_v52 = vpack.i.bf16 %v5725_v59, %v5720_v63  ;;  %v9210_v0 = vpop.f32.mrb[50].mxu1 }
0x2023   : > { %v5735_v1 = vadd.f32 %v9210_v0, %v8015_v58  ;;  %v5729_v10 = vpop.f32.mrb[51].mxu1 }
0x2024   : > { %10028 = vmatprep.subr.msk.bf16.mxu0 %vm11462_vm2, %v12354_v25  ;;  %10782 = vrot.lane.b32.xlu0 %v12356_v52, %s12949_s24  ;;  %v5730_v19 = vadd.f32 %v8015_v58, %v5729_v10 }
0x2026   : > { %v12363_v2 = vpack.i.bf16 %v5735_v1, %v5730_v19  ;;  %v9213_v3 = vpop.f32.mrb[52].mxu1  ;;  %v10032_v54 = vpack.c.bf16 %v5735_v1, %v5730_v19 }
0x2027   : > { %v5745_v4 = vadd.f32 %v9213_v3, %v8015_v58  ;;  %v5739_v5 = vpop.f32.mrb[53].mxu1 }
0x2028   : > { %10787 = vrot.lane.b32.xlu1 %v12363_v2, %s12949_s24  ;;  %v5740_v8 = vadd.f32 %v8015_v58, %v5739_v5 }
0x202a   : > { %v12367_v9 = vpack.i.bf16 %v5745_v4, %v5740_v8  ;;  %v9216_v11 = vpop.f32.mrb[54].mxu1 }
0x202b   : > { %v5755_v12 = vadd.f32 %v9216_v11, %v8015_v58  ;;  %v5749_v14 = vpop.f32.mrb[55].mxu1 }
0x202c   : > { %10792 = vrot.lane.b32.xlu1 %v12367_v9, %s12949_s24  ;;  %v5750_v20 = vadd.f32 %v8015_v58, %v5749_v14 }
0x202e   : > { %v12371_v21 = vpack.i.bf16 %v5755_v12, %v5750_v20  ;;  %v9219_v15 = vpop.f32.mrb[56].mxu1 }
0x202f   : > { %v5765_v16 = vadd.f32 %v9219_v15, %v8015_v58  ;;  %v5759_v22 = vpop.f32.mrb[57].mxu1 }
0x2030   : > { %10797 = vrot.lane.b32.xlu1 %v12371_v21, %s12949_s24  ;;  %v5760_v17 = vadd.f32 %v8015_v58, %v5759_v22 }
0x2032   : > { %v12375_v23 = vpack.i.bf16 %v5765_v16, %v5760_v17  ;;  %v9222_v50 = vpop.f32.mrb[58].mxu1  ;;  %v10050_v45 = vpack.c.bf16 %v5765_v16, %v5760_v17 }
0x2033   : > { %v5775_v32 = vadd.f32 %v9222_v50, %v8015_v58  ;;  %v5769_v36 = vpop.f32.mrb[59].mxu1 }
0x2034   : > { %10802 = vrot.lane.b32.xlu1 %v12375_v23, %s12949_s24  ;;  %v5770_v28 = vadd.f32 %v8015_v58, %v5769_v36 }
0x2036   : > { %v12379_v34 = vpack.i.bf16 %v5775_v32, %v5770_v28  ;;  %v9225_v37 = vpop.f32.mrb[60].mxu1  ;;  %v10056_v55 = vpack.c.bf16 %v5775_v32, %v5770_v28 }
0x2037   : > { %v5785_v27 = vadd.f32 %v9225_v37, %v8015_v58  ;;  %v5779_v41 = vpop.f32.mrb[61].mxu1 }
0x2038   : > { %10807 = vrot.lane.b32.xlu1 %v12379_v34, %s12949_s24  ;;  %v5780_v43 = vadd.f32 %v8015_v58, %v5779_v41 }
0x203a   : > { %v12383_v30 = vpack.i.bf16 %v5785_v27, %v5780_v43  ;;  %v9228_v6 = vpop.f32.mrb[62].mxu1  ;;  %v10062_v56 = vpack.c.bf16 %v5785_v27, %v5780_v43  ;;  %v8007_v43 = vld [vmem:[%s12971_s2 + $0x1] ss:$0 sm:$0xff] }
0x203b   : > { %v12385_v7 = vadd.f32 %v9228_v6, %v8015_v58  ;;  %v5789_v29 = vpop.f32.mrb[63].mxu1 }
0x203c   : > { %10812 = vrot.lane.b32.xlu1 %v12383_v30, %s12949_s24  ;;  %v12389_v60 = vadd.f32 %v8015_v58, %v5789_v29 }
0x203e   : > { %v10068_v58 = vpack.c.bf16 %v12385_v7, %v12389_v60 }
0x2065   : > { %v5518_v26 = vpop.xlane.xlu0 %5517 }
0x2066   : > { %v5522_v46 = vmul.f32 0.03125, %v5518_v26 }
0x2068   : > { %v5524_v47 = vadd.f32 1e-05, %v5522_v46 }
0x2069   : > { %v5521_v62 = vpop.xlane.xlu0 %5520 }
0x206a   : > { %11169 = vrsqrt.f32 %v5524_v47  ;;  %v5523_v57 = vmul.f32 0.03125, %v5521_v62  ;;  %v12452_v62 = vld [vmem:[%s12970_s4] ss:$0 sm:$0xff] }
0x206c   : > { %v5525_v13 = vadd.f32 1e-05, %v5523_v57 }
0x206e   : > { %11171 = vrsqrt.f32 %v5525_v13 }
0x2074   : > { %v11170_v40 = vpop.eup %11169 }
0x2075   : > { %v5528_v24 = vmul.f32 %v11170_v40, %v12329_v49  ;;  %v10038_v49 = vpack.c.bf16 %v5745_v4, %v5740_v8 }
0x2077   : > { %v5536_v38 = vmul.f32 %v8000_v48, %v5528_v24 }
0x2078   : > { %v11172_v33 = vpop.eup %11171 }
0x2079   : > { %v5529_v51 = vmul.f32 %v11172_v33, %v12333_v44  ;;  %v12399_v35 = vadd.f32 %v8001_v31, %v5536_v38  ;;  %v10044_v44 = vpack.c.bf16 %v5755_v12, %v5750_v20 }
0x207b   : > { %v5537_v42 = vmul.f32 %v8000_v48, %v5529_v51  ;;  %9194 = vmatprep.mubr.msk.f32.mxu0 %vm932_vm0, %v12399_v35  ;;  %v12458_v48 = vpack.i.bf16 %v12385_v7, %v12389_v60  ;;  %v8032_v60 = vld [vmem:[%s12972_s26 + $0x20] sm:$0xff] }
0x207d   : > { %v12403_v53 = vadd.f32 %v8001_v31, %v5537_v42 }
0x207f   : > { %9195 = vmatmul.mubr.msk.f32.vlgmr.msra.gmra.mrb[32].mxu0 %vm932_vm0, %v12403_v53 }
0x2080   : > { %10031 = vmatpush3.bf16.xpose.msk.msra.mxu0 %vm11462_vm2, %v12354_v25 }
0x2081   : > { %10034 = vmatprep.subr.msk.bf16.mxu0 %vm11462_vm2, %v10032_v54 }
0x2088   : > { %10037 = vmatpush3.bf16.xpose.msk.msra.mxu0 %vm11462_vm2, %v10032_v54 }
0x2089   : > { %10040 = vmatprep.subr.msk.bf16.mxu0 %vm11462_vm2, %v10038_v49 }
0x2090   : > { %10043 = vmatpush3.bf16.xpose.msk.msra.mxu0 %vm11462_vm2, %v10038_v49 }
0x2091   : > { %10046 = vmatprep.subr.msk.bf16.mxu0 %vm11462_vm2, %v10044_v44 }
0x2096   : > { %v10783_v39 = vpop.permute.xlu0 %10782 }
0x2097   : > { %v10785_v61 = vunpack.i.h.bf16 %v10783_v39  ;;  %v10784_v63 = vunpack.i.l.bf16 %v10783_v39 }
0x2098   : > { %10049 = vmatpush3.bf16.xpose.msk.msra.mxu0 %vm11462_vm2, %v10044_v44 }
0x2099   : > { %10052 = vmatprep.subr.msk.bf16.mxu0 %vm11462_vm2, %v10050_v45  ;;  %v10074_v1 = vpack.c.bf16 %v10785_v61, %v10784_v63 }
0x209a   : > { %v10788_v59 = vpop.permute.xlu1 %10787 }
0x209b   : > { %v10790_v25 = vunpack.i.h.bf16 %v10788_v59  ;;  %v10789_v0 = vunpack.i.l.bf16 %v10788_v59  ;;  %10075 = vmatprep.subr.bf16.mxu1 %v10074_v1 }
0x209c   : > { %10077 = vmatpush3.bf16.msra.mxu1 %v10074_v1 }
0x209d   : > { %v10078_v10 = vpack.c.bf16 %v10790_v25, %v10789_v0 }
0x209e   : > { %v10793_v19 = vpop.permute.xlu1 %10792 }
0x209f   : > { %v10795_v3 = vunpack.i.h.bf16 %v10793_v19  ;;  %v10794_v4 = vunpack.i.l.bf16 %v10793_v19  ;;  %10079 = vmatprep.subr.bf16.mxu1 %v10078_v10 }
0x20a0   : > { %10055 = vmatpush3.bf16.xpose.msk.msra.mxu0 %vm11462_vm2, %v10050_v45  ;;  %10081 = vmatpush3.bf16.msra.mxu1 %v10078_v10 }
0x20a1   : > { %10058 = vmatprep.subr.msk.bf16.mxu0 %vm11462_vm2, %v10056_v55  ;;  %v10082_v5 = vpack.c.bf16 %v10795_v3, %v10794_v4 }
0x20a2   : > { %v10798_v8 = vpop.permute.xlu1 %10797 }
0x20a3   : > { %v10800_v11 = vunpack.i.h.bf16 %v10798_v8  ;;  %v10799_v12 = vunpack.i.l.bf16 %v10798_v8  ;;  %10083 = vmatprep.subr.bf16.mxu1 %v10082_v5 }
0x20a4   : > { %10085 = vmatpush3.bf16.msra.mxu1 %v10082_v5 }
0x20a5   : > { %v10086_v14 = vpack.c.bf16 %v10800_v11, %v10799_v12 }
0x20a6   : > { %v10803_v20 = vpop.permute.xlu1 %10802 }
0x20a7   : > { %v10805_v15 = vunpack.i.h.bf16 %v10803_v20  ;;  %v10804_v16 = vunpack.i.l.bf16 %v10803_v20  ;;  %10087 = vmatprep.subr.bf16.mxu1 %v10086_v14 }
0x20a8   : > { %10061 = vmatpush3.bf16.xpose.msk.msra.mxu0 %vm11462_vm2, %v10056_v55  ;;  %10089 = vmatpush3.bf16.msra.mxu1 %v10086_v14 }
0x20a9   : > { %10064 = vmatprep.subr.msk.bf16.mxu0 %vm11462_vm2, %v10062_v56  ;;  %v10090_v22 = vpack.c.bf16 %v10805_v15, %v10804_v16 }
0x20aa   : > { %v10808_v17 = vpop.permute.xlu1 %10807 }
0x20ab   : > { %v10810_v50 = vunpack.i.h.bf16 %v10808_v17  ;;  %v10809_v32 = vunpack.i.l.bf16 %v10808_v17  ;;  %10091 = vmatprep.subr.bf16.mxu1 %v10090_v22 }
0x20ac   : > { %10093 = vmatpush3.bf16.msra.mxu1 %v10090_v22 }
0x20ad   : > { %v10094_v36 = vpack.c.bf16 %v10810_v50, %v10809_v32 }
0x20ae   : > { %v10813_v28 = vpop.permute.xlu1 %10812 }
0x20af   : > { %v10815_v37 = vunpack.i.h.bf16 %v10813_v28  ;;  %v10814_v27 = vunpack.i.l.bf16 %v10813_v28  ;;  %10095 = vmatprep.subr.bf16.mxu1 %v10094_v36 }
0x20b0   : > { %10067 = vmatpush3.bf16.xpose.msk.msra.mxu0 %vm11462_vm2, %v10062_v56  ;;  %10097 = vmatpush3.bf16.msra.mxu1 %v10094_v36 }
0x20b1   : > { %10070 = vmatprep.subr.msk.bf16.mxu0 %vm11462_vm2, %v10068_v58  ;;  %v10098_v41 = vpack.c.bf16 %v10815_v37, %v10814_v27 }
0x20b3   : > { %10099 = vmatprep.subr.bf16.mxu1 %v10098_v41 }
0x20b4   : > { %10101 = vmatpush3.bf16.msra.mxu1 %v10098_v41 }
0x20b8   : > { %10073 = vmatpush3.bf16.xpose.msk.msra.mxu0 %vm11462_vm2, %v10068_v58 }
0x2152   : > { %v9196_v6 = vpop.f32.mrb[32].mxu0 }
0x2153   : > { %v5631_v29 = vpop.f32.mrb[33].mxu0  ;;  %v12445_v46 = vadd.f32 %v9196_v6, %v8007_v43 }
0x2154   : > { %v12443_v26 = vadd.f32 %v8007_v43, %v5631_v29 }
0x2156   : > { %9261 = vmatprep.mubr.msk.f32.mxu0 %vm1025_vm1, %v12443_v26 }
0x2157   : > { %9262 = vmatmul.mubr.msk.f32.vlgmr.msra.gmra.mrb[34].mxu0 %vm1025_vm1, %v12445_v46 }
0x222a   : > { %v9263_v47 = vpop.f32.mrb[34].mxu0 }
0x222b   : > { %v5931_v57 = vadd.f32 %v12452_v62, %v9263_v47  ;;  %v5925_v13 = vpop.f32.mrb[35].mxu0 }
0x222c   : > { %v5926_v40 = vadd.f32 %v12452_v62, %v5925_v13 }
0x222d   : > { %5936 = vmax.xlane.f32.xlu0 %v5931_v57 }
0x222e   : > { %5934 = vmax.xlane.f32.xlu1 %v5926_v40 }
0x223f   : > { %10817 = vrot.lane.b32.xlu1 %v12458_v48, %s12949_s24 }
0x22ba   : > { %v5937_v24 = vpop.xlane.xlu0 %5936 }
0x22bb   : > { %v5939_v31 = vsub.f32 %v5931_v57, %v5937_v24  ;;  %v5935_v38 = vpop.xlane.xlu1 %5934 }
0x22bc   : > { %v5938_v33 = vsub.f32 %v5926_v40, %v5935_v38 }
0x22bd   : > { %v5942_v51 = vmul.f32 1.442695, %v5939_v31 }
0x22be   : > { %v5940_v42 = vmul.f32 1.442695, %v5938_v33 }
0x22bf   : > { %11173 = vpow2.f32 %v5942_v51  ;;  %v10818_v54 = vpop.permute.xlu1 %10817 }
0x22c0   : > { %11175 = vpow2.f32 %v5940_v42  ;;  %v10820_v49 = vunpack.i.h.bf16 %v10818_v54  ;;  %v10819_v44 = vunpack.i.l.bf16 %v10818_v54 }
0x22c2   : > { %v10102_v45 = vpack.c.bf16 %v10820_v49, %v10819_v44 }
0x22c4   : > { %10103 = vmatprep.subr.bf16.mxu1 %v10102_v45 }
0x22c5   : > { %10105 = vmatpush3.bf16.msra.mxu1 %v10102_v45 }
0x22c6   : > { %9299 = vmatprep.subr.mxu1 %v8032_v60 }
0x22c9   : > { %v11174_v55 = vpop.eup %11173 }
0x22ca   : > { %v11176_v7 = vpop.eup %11175  ;;  %5946 = vadd.xlane.f32.xlu0 %v11174_v55 }
0x22cb   : > { %5944 = vadd.xlane.f32.xlu1 %v11176_v7  ;;  %9296 = vmatprep.mubr.f32.mxu1 %v11176_v7 }
0x22cc   : > { %9297 = vmatmul.mubr.f32.vlgmr.msra.gmra.mrb[64].mxu1 %v11174_v55 }
0x22cd   : > { %9300 = vmatpush3.msra.mxu1 %v8032_v60 }
0x22dc   : > { %10837 = vrot.lane.b32.xlu1 %v12371_v21, %s12956_s0 }
0x22e0   : > { %6164 = vrot.lane.b32.xlu1 %v12443_v26, %s12956_s0  ;;  %10822 = vrot.lane.b32.xlu0 %v12356_v52, %s12956_s0 }
0x22e4   : > { %10862 = vrot.lane.b32.xlu1 %v12356_v52, %s12957_s25  ;;  %10827 = vrot.lane.b32.xlu0 %v12363_v2, %s12956_s0 }
0x22e8   : > { %10872 = vrot.lane.b32.xlu1 %v12367_v9, %s12957_s25  ;;  %10832 = vrot.lane.b32.xlu0 %v12367_v9, %s12956_s0 }
0x22ec   : > { %10882 = vrot.lane.b32.xlu1 %v12375_v23, %s12957_s25  ;;  %10842 = vrot.lane.b32.xlu0 %v12375_v23, %s12956_s0 }
0x22f0   : > { %10892 = vrot.lane.b32.xlu1 %v12383_v30, %s12957_s25  ;;  %10847 = vrot.lane.b32.xlu0 %v12379_v34, %s12956_s0 }
0x22f4   : > { %10852 = vrot.lane.b32.xlu0 %v12383_v30, %s12956_s0 }
0x22f8   : > { %10857 = vrot.lane.b32.xlu0 %v12458_v48, %s12956_s0 }
0x22fc   : > { %6166 = vrot.lane.b32.xlu0 %v12445_v46, %s12956_s0 }
0x2300   : > { %10867 = vrot.lane.b32.xlu0 %v12363_v2, %s12957_s25 }
0x2304   : > { %10877 = vrot.lane.b32.xlu0 %v12371_v21, %s12957_s25 }
0x2308   : > { %10887 = vrot.lane.b32.xlu0 %v12379_v34, %s12957_s25 }
0x2357   : > { %v5947_v56 = vpop.xlane.xlu0 %5946 }
0x2358   : > { %v5945_v58 = vpop.xlane.xlu1 %5944 }
0x2359   : > { %11177 = vrcp.f32 %v5945_v58 }
0x235a   : > { %11179 = vrcp.f32 %v5947_v56 }
0x235b   : > { %v10823_v39 = vpop.permute.xlu0 %10822 }
0x235c   : > { %v10825_v59 = vunpack.i.h.bf16 %v10823_v39  ;;  %v10824_v61 = vunpack.i.l.bf16 %v10823_v39  ;;  %v12499_v63 = vpop.permute.xlu1 %10837 }
0x235e   : > { %v12501_v25 = vpack.c.bf16 %v10825_v59, %v10824_v61 }
0x235f   : > { %v12503_v0 = vpop.permute.xlu0 %10827 }
0x2360   : > { %v12505_v1 = vpop.permute.xlu1 %6164  ;;  %10108 = vmatprep.subr.msk.bf16.mxu1 %vm11462_vm2, %v12501_v25  ;;  %v10830_v44 = vunpack.i.h.bf16 %v12503_v0  ;;  %v10829_v45 = vunpack.i.l.bf16 %v12503_v0  ;;  %v10840_v0 = vunpack.i.h.bf16 %v12499_v63 }
0x2362   : > { %v10112_v59 = vpack.c.bf16 %v10830_v44, %v10829_v45 }
0x2363   : > { %v12510_v10 = vpop.permute.xlu0 %10832  ;;  %v11178_v49 = vpop.eup %11177 }
0x2364   : > { %v10863_v19 = vpop.permute.xlu1 %10862  ;;  %v11180_v7 = vpop.eup %11179  ;;  %v10835_v56 = vunpack.i.h.bf16 %v12510_v10  ;;  %v10834_v58 = vunpack.i.l.bf16 %v12510_v10 }
0x2365   : > { %v10865_v3 = vunpack.i.h.bf16 %v10863_v19  ;;  %v10864_v4 = vunpack.i.l.bf16 %v10863_v19 }
0x2366   : > { %v10118_v61 = vpack.c.bf16 %v10835_v56, %v10834_v58 }
0x2367   : > { %v10154_v5 = vpack.c.bf16 %v10865_v3, %v10864_v4  ;;  %v12512_v8 = vpop.permute.xlu0 %10842 }
0x2368   : > { %v10873_v15 = vpop.permute.xlu1 %10872  ;;  %v10844_v10 = vunpack.i.l.bf16 %v12512_v8 }
0x2369   : > { %10155 = vmatprep.subr.bf16.mxu0 %v10154_v5  ;;  %v10875_v22 = vunpack.i.h.bf16 %v10873_v15  ;;  %v10874_v17 = vunpack.i.l.bf16 %v10873_v15 }
0x236a   : > { %10157 = vmatpush3.bf16.msra.mxu0 %v10154_v5 }
0x236b   : > { %v12514_v11 = vpop.permute.xlu0 %10847  ;;  %v10162_v37 = vpack.c.bf16 %v10875_v22, %v10874_v17 }
0x236c   : > { %v10883_v43 = vpop.permute.xlu1 %10882  ;;  %v10849_v4 = vunpack.i.l.bf16 %v12514_v11 }
0x236d   : > { %v10885_v6 = vunpack.i.h.bf16 %v10883_v43  ;;  %v10884_v29 = vunpack.i.l.bf16 %v10883_v43 }
0x236f   : > { %v12516_v12 = vpop.permute.xlu0 %10852  ;;  %v10170_v13 = vpack.c.bf16 %v10885_v6, %v10884_v29 }
0x2370   : > { %v10893_v31 = vpop.permute.xlu1 %10892  ;;  %v10854_v15 = vunpack.i.l.bf16 %v12516_v12 }
0x2371   : > { %v10895_v38 = vunpack.i.h.bf16 %v10893_v31  ;;  %v10894_v33 = vunpack.i.l.bf16 %v10893_v31 }
0x2373   : > { %v12518_v14 = vpop.permute.xlu0 %10857  ;;  %v10178_v42 = vpack.c.bf16 %v10895_v38, %v10894_v33 }
0x2374   : > { %v10859_v22 = vunpack.i.l.bf16 %v12518_v14 }
0x2377   : > { %v12520_v20 = vpop.permute.xlu0 %6166 }
0x237b   : > { %v10868_v16 = vpop.permute.xlu0 %10867 }
0x237c   : > { %v10870_v50 = vunpack.i.h.bf16 %v10868_v16  ;;  %v10869_v32 = vunpack.i.l.bf16 %v10868_v16 }
0x237e   : > { %v10158_v36 = vpack.c.bf16 %v10870_v50, %v10869_v32 }
0x237f   : > { %v10878_v28 = vpop.permute.xlu0 %10877 }
0x2380   : > { %v10880_v27 = vunpack.i.h.bf16 %v10878_v28  ;;  %v10879_v41 = vunpack.i.l.bf16 %v10878_v28  ;;  %10159 = vmatprep.subr.bf16.mxu0 %v10158_v36 }
0x2381   : > { %10161 = vmatpush3.bf16.msra.mxu0 %v10158_v36 }
0x2382   : > { %10163 = vmatprep.subr.bf16.mxu0 %v10162_v37  ;;  %v10166_v47 = vpack.c.bf16 %v10880_v27, %v10879_v41 }
0x2383   : > { %v10888_v57 = vpop.permute.xlu0 %10887 }
0x2384   : > { %v10890_v40 = vunpack.i.h.bf16 %v10888_v57  ;;  %v10889_v24 = vunpack.i.l.bf16 %v10888_v57 }
0x2385   : > { %10165 = vmatpush3.bf16.msra.mxu0 %v10162_v37 }
0x2386   : > { %10167 = vmatprep.subr.bf16.mxu0 %v10166_v47  ;;  %v10174_v51 = vpack.c.bf16 %v10890_v40, %v10889_v24 }
0x2389   : > { %10169 = vmatpush3.bf16.msra.mxu0 %v10166_v47 }
0x238a   : > { %10171 = vmatprep.subr.bf16.mxu0 %v10170_v13 }
0x238d   : > { %10173 = vmatpush3.bf16.msra.mxu0 %v10170_v13 }
0x238e   : > { %10175 = vmatprep.subr.bf16.mxu0 %v10174_v51 }
0x2391   : > { %10177 = vmatpush3.bf16.msra.mxu0 %v10174_v51 }
0x2392   : > { %10179 = vmatprep.subr.bf16.mxu0 %v10178_v42 }
0x2395   : > { %10181 = vmatpush3.bf16.msra.mxu0 %v10178_v42 }
0x239f   : > { %v9298_v54 = vpop.f32.mrb[64].mxu1 }
0x23a0   : > { %v6062_v55 = vpop.f32.mrb[65].mxu1  ;;  %v6074_v39 = vmul.f32 %v11180_v7, %v9298_v54 }
0x23a1   : > { %v6072_v60 = vmul.f32 %v11178_v49, %v6062_v55 }
0x23a3   : > { %9301 = vmatprep.mubr.msk.f32.mxu1 %vm1025_vm1, %v6072_v60 }
0x23a4   : > { %9302 = vmatmul.mubr.msk.f32.vlgmr.msra.gmra.mrb[66].mxu1 %vm1025_vm1, %v6074_v39 }
0x23a5   : > { %10111 = vmatpush3.bf16.xpose.msk.msra.mxu1 %vm11462_vm2, %v12501_v25  ;;  %9336 = vmatprep.mubr.msk.f32.mxu1 %vm1025_vm1, %v12505_v1  ;;  %v10839_v25 = vunpack.i.l.bf16 %v12499_v63  ;;  %v10845_v1 = vunpack.i.h.bf16 %v12512_v8  ;;  %v10850_v63 = vunpack.i.h.bf16 %v12514_v11  ;;  %v10855_v8 = vunpack.i.h.bf16 %v12516_v12 }
0x23a6   : > { %10114 = vmatprep.subr.msk.bf16.mxu1 %vm11462_vm2, %v10112_v59  ;;  %v10860_v11 = vunpack.i.h.bf16 %v12518_v14 }
0x23a7   : > { %v10124_v19 = vpack.c.bf16 %v10840_v0, %v10839_v25  ;;  %v10130_v3 = vpack.c.bf16 %v10845_v1, %v10844_v10  ;;  %v10136_v5 = vpack.c.bf16 %v10850_v63, %v10849_v4  ;;  %v10142_v16 = vpack.c.bf16 %v10855_v8, %v10854_v15  ;;  %v8033_v0 = vld [vmem:[%s12972_s26 + $0x28] sm:$0xff] }
0x23a8   : > { %v10148_v17 = vpack.c.bf16 %v10860_v11, %v10859_v22 }
0x23ad   : > { %10117 = vmatpush3.bf16.xpose.msk.msra.mxu1 %vm11462_vm2, %v10112_v59 }
0x23ae   : > { %10120 = vmatprep.subr.msk.bf16.mxu1 %vm11462_vm2, %v10118_v61 }
0x23b5   : > { %10123 = vmatpush3.bf16.xpose.msk.msra.mxu1 %vm11462_vm2, %v10118_v61 }
0x23b6   : > { %10126 = vmatprep.subr.msk.bf16.mxu1 %vm11462_vm2, %v10124_v19 }
0x23bd   : > { %10129 = vmatpush3.bf16.xpose.msk.msra.mxu1 %vm11462_vm2, %v10124_v19 }
0x23be   : > { %10132 = vmatprep.subr.msk.bf16.mxu1 %vm11462_vm2, %v10130_v3 }
0x23c5   : > { %10135 = vmatpush3.bf16.xpose.msk.msra.mxu1 %vm11462_vm2, %v10130_v3 }
0x23c6   : > { %10138 = vmatprep.subr.msk.bf16.mxu1 %vm11462_vm2, %v10136_v5 }
0x23cd   : > { %10141 = vmatpush3.bf16.xpose.msk.msra.mxu1 %vm11462_vm2, %v10136_v5 }
0x23ce   : > { %10144 = vmatprep.subr.msk.bf16.mxu1 %vm11462_vm2, %v10142_v16 }
0x23d5   : > { %10147 = vmatpush3.bf16.xpose.msk.msra.mxu1 %vm11462_vm2, %v10142_v16 }
0x23d6   : > { %10150 = vmatprep.subr.msk.bf16.mxu1 %vm11462_vm2, %v10148_v17 }
0x23dd   : > { %10153 = vmatpush3.bf16.xpose.msk.msra.mxu1 %vm11462_vm2, %v10148_v17 }
0x23de   : > { %9374 = vmatprep.subr.mxu1 %v8033_v0 }
0x23e4   : > { %9337 = vmatmul.mubr.msk.f32.vlgmr.msra.gmra.mrb[68].mxu1 %vm1025_vm1, %v12520_v20 }
0x23e5   : > { %9375 = vmatpush3.msra.mxu1 %v8033_v0 }
0x24b7   : > { %v9338_v12 = vpop.f32.mrb[68].mxu1 }
0x24b8   : > { %v6308_v50 = vadd.f32 %v12452_v62, %v9338_v12  ;;  %v6302_v32 = vpop.f32.mrb[69].mxu1 }
0x24b9   : > { %v6303_v36 = vadd.f32 %v12452_v62, %v6302_v32 }
0x24ba   : > { %6313 = vmax.xlane.f32.xlu1 %v6308_v50 }
0x24bb   : > { %6311 = vmax.xlane.f32.xlu0 %v6303_v36 }
0x24cb   : > { %10902 = vrot.lane.b32.xlu1 %v12356_v52, %s12958_s8 }
0x24cf   : > { %10912 = vrot.lane.b32.xlu1 %v12367_v9, %s12958_s8 }
0x24d1   : > { %10897 = vrot.lane.b32.xlu0 %v12458_v48, %s12957_s25  ;;  %s12977_s25 = sld [smem:[#allocation22_spill]] }
0x24d3   : > { %10922 = vrot.lane.b32.xlu1 %v12375_v23, %s12958_s8 }
0x24d5   : > { %10907 = vrot.lane.b32.xlu0 %v12363_v2, %s12958_s8 }
0x24d7   : > { %10932 = vrot.lane.b32.xlu1 %v12383_v30, %s12958_s8 }
0x24d9   : > { %10917 = vrot.lane.b32.xlu0 %v12371_v21, %s12958_s8 }
0x24db   : > { %6535 = vrot.lane.b32.xlu1 %v12443_v26, %s12958_s8 }
0x24dd   : > { %10927 = vrot.lane.b32.xlu0 %v12379_v34, %s12958_s8 }
0x24df   : > { %10947 = vrot.lane.b32.xlu1 %v12363_v2, %s12959_s11 }
0x24e1   : > { %10937 = vrot.lane.b32.xlu0 %v12458_v48, %s12958_s8 }
0x24e5   : > { %6537 = vrot.lane.b32.xlu0 %v12445_v46, %s12958_s8 }
0x2547   : > { %v6314_v14 = vpop.xlane.xlu1 %6313 }
0x2548   : > { %v6316_v20 = vsub.f32 %v6308_v50, %v6314_v14  ;;  %v6312_v28 = vpop.xlane.xlu0 %6311 }
0x2549   : > { %v6315_v37 = vsub.f32 %v6303_v36, %v6312_v28 }
0x254a   : > { %v6319_v27 = vmul.f32 1.442695, %v6316_v20 }
0x254b   : > { %v6317_v41 = vmul.f32 1.442695, %v6315_v37  ;;  %v10903_v43 = vpop.permute.xlu1 %10902 }
0x254c   : > { %11181 = vpow2.f32 %v6319_v27  ;;  %v10905_v6 = vunpack.i.h.bf16 %v10903_v43  ;;  %v10898_v29 = vpop.permute.xlu0 %10897  ;;  %v10904_v47 = vunpack.i.l.bf16 %v10903_v43 }
0x254d   : > { %11183 = vpow2.f32 %v6317_v41  ;;  %v10900_v57 = vunpack.i.h.bf16 %v10898_v29  ;;  %v10899_v13 = vunpack.i.l.bf16 %v10898_v29 }
0x254e   : > { %v10186_v31 = vpack.c.bf16 %v10905_v6, %v10904_v47 }
0x254f   : > { %v10182_v40 = vpack.c.bf16 %v10900_v57, %v10899_v13  ;;  %v10913_v24 = vpop.permute.xlu1 %10912 }
0x2550   : > { %v10908_v38 = vpop.permute.xlu0 %10907  ;;  %v10915_v7 = vunpack.i.h.bf16 %v10913_v24  ;;  %v10914_v60 = vunpack.i.l.bf16 %v10913_v24 }
0x2551   : > { %10183 = vmatprep.subr.bf16.mxu0 %v10182_v40  ;;  %v10910_v42 = vunpack.i.h.bf16 %v10908_v38  ;;  %v10909_v54 = vunpack.i.l.bf16 %v10908_v38 }
0x2552   : > { %10185 = vmatpush3.bf16.msra.mxu0 %v10182_v40  ;;  %v10198_v39 = vpack.c.bf16 %v10915_v7, %v10914_v60 }
0x2553   : > { %v10923_v33 = vpop.permute.xlu1 %10922  ;;  %10188 = vmatprep.subr.msk.bf16.mxu0 %vm11462_vm2, %v10186_v31  ;;  %v10192_v45 = vpack.c.bf16 %v10910_v42, %v10909_v54 }
0x2554   : > { %v10918_v59 = vpop.permute.xlu0 %10917  ;;  %v10925_v25 = vunpack.i.h.bf16 %v10923_v33  ;;  %v10924_v19 = vunpack.i.l.bf16 %v10923_v33 }
0x2555   : > { %v10920_v56 = vunpack.i.h.bf16 %v10918_v59  ;;  %v10919_v58 = vunpack.i.l.bf16 %v10918_v59 }
0x2556   : > { %v11182_v51 = vpop.eup %11181  ;;  %v10210_v1 = vpack.c.bf16 %v10925_v25, %v10924_v19 }
0x2557   : > { %v11184_v49 = vpop.eup %11183  ;;  %v10933_v44 = vpop.permute.xlu1 %10932  ;;  %6323 = vadd.xlane.f32.xlu0 %v11182_v51  ;;  %v10204_v61 = vpack.c.bf16 %v10920_v56, %v10919_v58 }
0x2558   : > { %6321 = vadd.xlane.f32.xlu1 %v11184_v49  ;;  %9371 = vmatprep.mubr.f32.mxu0 %v11184_v49  ;;  %v10928_v10 = vpop.permute.xlu0 %10927  ;;  %v10935_v5 = vunpack.i.h.bf16 %v10933_v44  ;;  %v10934_v8 = vunpack.i.l.bf16 %v10933_v44 }
0x2559   : > { %9372 = vmatmul.mubr.f32.vlgmr.msra.gmra.mrb[36].mxu0 %v11182_v51  ;;  %v10930_v3 = vunpack.i.h.bf16 %v10928_v10  ;;  %v10929_v63 = vunpack.i.l.bf16 %v10928_v10 }
0x255a   : > { %v10222_v15 = vpack.c.bf16 %v10935_v5, %v10934_v8 }
0x255b   : > { %v6536_v55 = vpop.permute.xlu1 %6535  ;;  %10191 = vmatpush3.bf16.xpose.msk.msra.mxu0 %vm11462_vm2, %v10186_v31  ;;  %v10216_v4 = vpack.c.bf16 %v10930_v3, %v10929_v63 }
0x255c   : > { %10194 = vmatprep.subr.msk.bf16.mxu0 %vm11462_vm2, %v10192_v45  ;;  %9411 = vmatprep.mubr.msk.f32.mxu0 %vm1025_vm1, %v6536_v55  ;;  %v10938_v16 = vpop.permute.xlu0 %10937 }
0x255d   : > { %v10940_v11 = vunpack.i.h.bf16 %v10938_v16  ;;  %v10939_v22 = vunpack.i.l.bf16 %v10938_v16 }
0x255f   : > { %v10228_v17 = vpack.c.bf16 %v10940_v11, %v10939_v22  ;;  %v10948_v28 = vpop.permute.xlu1 %10947 }
0x2560   : > { %v6538_v12 = vpop.permute.xlu0 %6537  ;;  %v10950_v29 = vunpack.i.h.bf16 %v10948_v28  ;;  %v10949_v47 = vunpack.i.l.bf16 %v10948_v28 }
0x2562   : > { %v10238_v31 = vpack.c.bf16 %v10950_v29, %v10949_v47 }
0x2563   : > { %10197 = vmatpush3.bf16.xpose.msk.msra.mxu0 %vm11462_vm2, %v10192_v45 }
0x2564   : > { %10200 = vmatprep.subr.msk.bf16.mxu0 %vm11462_vm2, %v10198_v39 }
0x2569   : > { %10952 = vrot.lane.b32.xlu1 %v12367_v9, %s12959_s11 }
0x256b   : > { %10203 = vmatpush3.bf16.xpose.msk.msra.mxu0 %vm11462_vm2, %v10198_v39 }
0x256c   : > { %10206 = vmatprep.subr.msk.bf16.mxu0 %vm11462_vm2, %v10204_v61 }
0x256d   : > { %10942 = vrot.lane.b32.xlu0 %v12356_v52, %s12959_s11  ;;  %10957 = vrot.lane.b32.xlu1 %v12371_v21, %s12959_s11 }
0x2571   : > { %10962 = vrot.lane.b32.xlu1 %v12375_v23, %s12959_s11 }
0x2573   : > { %10209 = vmatpush3.bf16.xpose.msk.msra.mxu0 %vm11462_vm2, %v10204_v61 }
0x2574   : > { %10212 = vmatprep.subr.msk.bf16.mxu0 %vm11462_vm2, %v10210_v1 }
0x2575   : > { %10967 = vrot.lane.b32.xlu1 %v12379_v34, %s12959_s11 }
0x2579   : > { %10972 = vrot.lane.b32.xlu1 %v12383_v30, %s12959_s11 }
0x257b   : > { %10215 = vmatpush3.bf16.xpose.msk.msra.mxu0 %vm11462_vm2, %v10210_v1 }
0x257c   : > { %10218 = vmatprep.subr.msk.bf16.mxu0 %vm11462_vm2, %v10216_v4 }
0x2583   : > { %10221 = vmatpush3.bf16.xpose.msk.msra.mxu0 %vm11462_vm2, %v10216_v4 }
0x2584   : > { %10224 = vmatprep.subr.msk.bf16.mxu0 %vm11462_vm2, %v10222_v15 }
0x258b   : > { %10227 = vmatpush3.bf16.xpose.msk.msra.mxu0 %vm11462_vm2, %v10222_v15 }
0x258c   : > { %10230 = vmatprep.subr.msk.bf16.mxu0 %vm11462_vm2, %v10228_v17 }
0x2593   : > { %10233 = vmatpush3.bf16.xpose.msk.msra.mxu0 %vm11462_vm2, %v10228_v17 }
0x259a   : > { %9412 = vmatmul.mubr.msk.f32.vlgmr.msra.gmra.mrb[38].mxu0 %vm1025_vm1, %v6538_v12 }
0x25e4   : > { %v6324_v50 = vpop.xlane.xlu0 %6323 }
0x25e5   : > { %v6322_v37 = vpop.xlane.xlu1 %6321 }
0x25e6   : > { %11185 = vrcp.f32 %v6322_v37 }
0x25e7   : > { %11187 = vrcp.f32 %v6324_v50 }
0x25e8   : > { %v10943_v32 = vpop.permute.xlu0 %10942 }
0x25e9   : > { %v10945_v36 = vunpack.i.h.bf16 %v10943_v32  ;;  %v10944_v14 = vunpack.i.l.bf16 %v10943_v32  ;;  %v10953_v27 = vpop.permute.xlu1 %10952 }
0x25ea   : > { %v10955_v38 = vunpack.i.h.bf16 %v10953_v27  ;;  %v10954_v33 = vunpack.i.l.bf16 %v10953_v27 }
0x25eb   : > { %v10234_v20 = vpack.c.bf16 %v10945_v36, %v10944_v14  ;;  %v8034_v36 = vld [vmem:[%s12972_s26 + $0x30] sm:$0xff] }
0x25ec   : > { %v10242_v42 = vpack.c.bf16 %v10955_v38, %v10954_v33 }
0x25ed   : > { %10235 = vmatprep.subr.bf16.mxu1 %v10234_v20  ;;  %v10958_v41 = vpop.permute.xlu1 %10957 }
0x25ee   : > { %v10960_v54 = vunpack.i.h.bf16 %v10958_v41  ;;  %v10959_v49 = vunpack.i.l.bf16 %v10958_v41 }
0x25f0   : > { %v11186_v6 = vpop.eup %11185  ;;  %v10246_v45 = vpack.c.bf16 %v10960_v54, %v10959_v49 }
0x25f1   : > { %v11188_v13 = vpop.eup %11187  ;;  %v10963_v51 = vpop.permute.xlu1 %10962 }
0x25f2   : > { %v10965_v55 = vunpack.i.h.bf16 %v10963_v51  ;;  %v10964_v7 = vunpack.i.l.bf16 %v10963_v51 }
0x25f4   : > { %v10250_v60 = vpack.c.bf16 %v10965_v55, %v10964_v7 }
0x25f5   : > { %v10968_v44 = vpop.permute.xlu1 %10967 }
0x25f6   : > { %v10970_v39 = vunpack.i.h.bf16 %v10968_v44  ;;  %v10969_v59 = vunpack.i.l.bf16 %v10968_v44 }
0x25f8   : > { %v10254_v58 = vpack.c.bf16 %v10970_v39, %v10969_v59 }
0x25f9   : > { %v10973_v56 = vpop.permute.xlu1 %10972 }
0x25fa   : > { %v10975_v61 = vunpack.i.h.bf16 %v10973_v56  ;;  %v10974_v0 = vunpack.i.l.bf16 %v10973_v56 }
0x25fc   : > { %v10258_v25 = vpack.c.bf16 %v10975_v61, %v10974_v0 }
0x262c   : > { %v9373_v43 = vpop.f32.mrb[36].mxu0 }
0x262d   : > { %v6439_v57 = vpop.f32.mrb[37].mxu0  ;;  %v6451_v24 = vmul.f32 %v11188_v13, %v9373_v43 }
0x262e   : > { %v6449_v40 = vmul.f32 %v11186_v6, %v6439_v57 }
0x2630   : > { %9376 = vmatprep.mubr.msk.f32.mxu1 %vm1025_vm1, %v6449_v40 }
0x2631   : > { %9377 = vmatmul.mubr.msk.f32.vlgmr.msra.gmra.mrb[66].mxu1 %vm1025_vm1, %v6451_v24 }
0x2632   : > { %10237 = vmatpush3.bf16.msra.mxu1 %v10234_v20 }
0x2633   : > { %10239 = vmatprep.subr.bf16.mxu1 %v10238_v31 }
0x2636   : > { %10241 = vmatpush3.bf16.msra.mxu1 %v10238_v31 }
0x2637   : > { %10243 = vmatprep.subr.bf16.mxu1 %v10242_v42 }
0x263a   : > { %10245 = vmatpush3.bf16.msra.mxu1 %v10242_v42 }
0x263b   : > { %10247 = vmatprep.subr.bf16.mxu1 %v10246_v45 }
0x263e   : > { %10249 = vmatpush3.bf16.msra.mxu1 %v10246_v45 }
0x263f   : > { %10251 = vmatprep.subr.bf16.mxu1 %v10250_v60 }
0x2642   : > { %10253 = vmatpush3.bf16.msra.mxu1 %v10250_v60 }
0x2643   : > { %10255 = vmatprep.subr.bf16.mxu1 %v10254_v58 }
0x2646   : > { %10257 = vmatpush3.bf16.msra.mxu1 %v10254_v58 }
0x2647   : > { %10259 = vmatprep.subr.bf16.mxu1 %v10258_v25 }
0x264a   : > { %10261 = vmatpush3.bf16.msra.mxu1 %v10258_v25 }
0x266d   : > { %v9413_v19 = vpop.f32.mrb[38].mxu0 }
0x266e   : > { %v6679_v1 = vadd.f32 %v12452_v62, %v9413_v19  ;;  %v6673_v10 = vpop.f32.mrb[39].mxu0 }
0x266f   : > { %v6674_v3 = vadd.f32 %v12452_v62, %v6673_v10 }
0x2670   : > { %6684 = vmax.xlane.f32.xlu0 %v6679_v1 }
0x2671   : > { %6682 = vmax.xlane.f32.xlu1 %v6674_v3 }
0x2682   : > { %10977 = vrot.lane.b32.xlu1 %v12458_v48, %s12959_s11 }
0x26fd   : > { %v6685_v63 = vpop.xlane.xlu0 %6684 }
0x26fe   : > { %v6687_v4 = vsub.f32 %v6679_v1, %v6685_v63  ;;  %v6683_v5 = vpop.xlane.xlu1 %6682 }
0x26ff   : > { %v6686_v8 = vsub.f32 %v6674_v3, %v6683_v5 }
0x2700   : > { %v6690_v15 = vmul.f32 1.442695, %v6687_v4 }
0x2701   : > { %v6688_v16 = vmul.f32 1.442695, %v6686_v8 }
0x2702   : > { %11189 = vpow2.f32 %v6690_v15  ;;  %v10978_v11 = vpop.permute.xlu1 %10977 }
0x2703   : > { %11191 = vpow2.f32 %v6688_v16  ;;  %v10980_v22 = vunpack.i.h.bf16 %v10978_v11  ;;  %v10979_v17 = vunpack.i.l.bf16 %v10978_v11 }
0x2705   : > { %v10262_v12 = vpack.c.bf16 %v10980_v22, %v10979_v17 }
0x2707   : > { %10263 = vmatprep.subr.bf16.mxu1 %v10262_v12 }
0x2708   : > { %10265 = vmatpush3.bf16.msra.mxu1 %v10262_v12 }
0x2709   : > { %9449 = vmatprep.subr.mxu1 %v8034_v36 }
0x270c   : > { %v11190_v50 = vpop.eup %11189 }
0x270d   : > { %v11192_v32 = vpop.eup %11191  ;;  %6694 = vadd.xlane.f32.xlu0 %v11190_v50 }
0x270e   : > { %6692 = vadd.xlane.f32.xlu1 %v11192_v32  ;;  %9446 = vmatprep.mubr.f32.mxu1 %v11192_v32 }
0x270f   : > { %9447 = vmatmul.mubr.f32.vlgmr.msra.gmra.mrb[70].mxu1 %v11190_v50 }
0x2710   : > { %9450 = vmatpush3.msra.mxu1 %v8034_v36 }
0x271f   : > { %10997 = vrot.lane.b32.xlu1 %v12371_v21, %s12960_s5 }
0x2723   : > { %10982 = vrot.lane.b32.xlu0 %v12356_v52, %s12960_s5  ;;  %6906 = vrot.lane.b32.xlu1 %v12443_v26, %s12960_s5 }
0x2727   : > { %10987 = vrot.lane.b32.xlu0 %v12363_v2, %s12960_s5  ;;  %11022 = vrot.lane.b32.xlu1 %v12356_v52, %s12961_s29 }
0x272b   : > { %10992 = vrot.lane.b32.xlu0 %v12367_v9, %s12960_s5  ;;  %11027 = vrot.lane.b32.xlu1 %v12363_v2, %s12961_s29 }
0x272f   : > { %11002 = vrot.lane.b32.xlu0 %v12375_v23, %s12960_s5  ;;  %11037 = vrot.lane.b32.xlu1 %v12371_v21, %s12961_s29 }
0x2733   : > { %11007 = vrot.lane.b32.xlu0 %v12379_v34, %s12960_s5 }
0x2737   : > { %11012 = vrot.lane.b32.xlu0 %v12383_v30, %s12960_s5 }
0x273b   : > { %11017 = vrot.lane.b32.xlu0 %v12458_v48, %s12960_s5 }
0x273f   : > { %6908 = vrot.lane.b32.xlu0 %v12445_v46, %s12960_s5  ;;  %s12974_s5 = sld [smem:[#allocation23_spill]] }
0x2743   : > { %11032 = vrot.lane.b32.xlu0 %v12367_v9, %s12961_s29 }
0x2747   : > { %11042 = vrot.lane.b32.xlu0 %v12375_v23, %s12961_s29 }
0x274b   : > { %11047 = vrot.lane.b32.xlu0 %v12379_v34, %s12961_s29 }
0x279a   : > { %v6695_v52 = vpop.xlane.xlu0 %6694 }
0x279b   : > { %v6693_v2 = vpop.xlane.xlu1 %6692 }
0x279c   : > { %11193 = vrcp.f32 %v6693_v2 }
0x279d   : > { %11195 = vrcp.f32 %v6695_v52 }
0x279e   : > { %v10983_v21 = vpop.permute.xlu0 %10982 }
0x279f   : > { %v10985_v26 = vunpack.i.h.bf16 %v10983_v21  ;;  %v10984_v14 = vunpack.i.l.bf16 %v10983_v21  ;;  %v12689_v20 = vpop.permute.xlu1 %10997 }
0x27a0   : > { %v11000_v11 = vunpack.i.h.bf16 %v12689_v20  ;;  %v10999_v22 = vunpack.i.l.bf16 %v12689_v20 }
0x27a1   : > { %v10266_v28 = vpack.c.bf16 %v10985_v26, %v10984_v14 }
0x27a2   : > { %v10988_v37 = vpop.permute.xlu0 %10987  ;;  %v10284_v17 = vpack.c.bf16 %v11000_v11, %v10999_v22  ;;  %v8123_v11 = vld [vmem:[%s12870_s18 + $0x28] sm:$0xff] }
0x27a3   : > { %v6907_v27 = vpop.permute.xlu1 %6906  ;;  %10268 = vmatprep.subr.msk.bf16.mxu1 %vm11462_vm2, %v10266_v28  ;;  %v10990_v19 = vunpack.i.h.bf16 %v10988_v37  ;;  %v10989_v1 = vunpack.i.l.bf16 %v10988_v37 }
0x27a5   : > { %v10272_v5 = vpack.c.bf16 %v10990_v19, %v10989_v1 }
0x27a6   : > { %v10993_v9 = vpop.permute.xlu0 %10992  ;;  %v11194_v25 = vpop.eup %11193 }
0x27a7   : > { %v11023_v46 = vpop.permute.xlu1 %11022  ;;  %v11196_v3 = vpop.eup %11195  ;;  %v10995_v8 = vunpack.i.h.bf16 %v10993_v9  ;;  %v10994_v15 = vunpack.i.l.bf16 %v10993_v9 }
0x27a8   : > { %v11025_v41 = vunpack.i.h.bf16 %v11023_v46  ;;  %v11024_v23 = vunpack.i.l.bf16 %v11023_v46 }
0x27a9   : > { %v10278_v16 = vpack.c.bf16 %v10995_v8, %v10994_v15 }
0x27aa   : > { %v10314_v43 = vpack.c.bf16 %v11025_v41, %v11024_v23  ;;  %v12693_v6 = vpop.permute.xlu0 %11002 }
0x27ab   : > { %v11028_v34 = vpop.permute.xlu1 %11027  ;;  %v11005_v12 = vunpack.i.h.bf16 %v12693_v6  ;;  %v11004_v50 = vunpack.i.l.bf16 %v12693_v6 }
0x27ac   : > { %v11030_v29 = vunpack.i.h.bf16 %v11028_v34  ;;  %v11029_v47 = vunpack.i.l.bf16 %v11028_v34  ;;  %10315 = vmatprep.subr.bf16.mxu0 %v10314_v43 }
0x27ad   : > { %10317 = vmatpush3.bf16.msra.mxu0 %v10314_v43  ;;  %v10290_v32 = vpack.c.bf16 %v11005_v12, %v11004_v50  ;;  %v8125_v12 = vld [vmem:[%s12870_s18 + $0x38] sm:$0xff] }
0x27ae   : > { %v10318_v57 = vpack.c.bf16 %v11030_v29, %v11029_v47  ;;  %v12695_v13 = vpop.permute.xlu0 %11007 }
0x27af   : > { %v11038_v38 = vpop.permute.xlu1 %11037  ;;  %v11010_v36 = vunpack.i.h.bf16 %v12695_v13  ;;  %v11009_v52 = vunpack.i.l.bf16 %v12695_v13 }
0x27b0   : > { %10319 = vmatprep.subr.bf16.mxu0 %v10318_v57  ;;  %v11040_v51 = vunpack.i.h.bf16 %v11038_v38  ;;  %v11039_v42 = vunpack.i.l.bf16 %v11038_v38 }
0x27b1   : > { %10321 = vmatpush3.bf16.msra.mxu0 %v10318_v57  ;;  %v10296_v2 = vpack.c.bf16 %v11010_v36, %v11009_v52  ;;  %v8131_v36 = vld [vmem:[%s12872_s20 + $0x28] sm:$0xff] }
0x27b2   : > { %v12697_v40 = vpop.permute.xlu0 %11012  ;;  %v10326_v55 = vpack.c.bf16 %v11040_v51, %v11039_v42 }
0x27b3   : > { %v11015_v21 = vunpack.i.h.bf16 %v12697_v40  ;;  %v11014_v26 = vunpack.i.l.bf16 %v12697_v40 }
0x27b5   : > { %v10302_v14 = vpack.c.bf16 %v11015_v21, %v11014_v26 }
0x27b6   : > { %v12699_v24 = vpop.permute.xlu0 %11017 }
0x27b7   : > { %v11020_v20 = vunpack.i.h.bf16 %v12699_v24 }
0x27ba   : > { %v12701_v31 = vpop.permute.xlu0 %6908 }
0x27be   : > { %v11033_v33 = vpop.permute.xlu0 %11032 }
0x27bf   : > { %v11035_v54 = vunpack.i.h.bf16 %v11033_v33  ;;  %v11034_v49 = vunpack.i.l.bf16 %v11033_v33  ;;  %v8035_v33 = vld [vmem:[%s12972_s26 + $0x38] sm:$0xff] }
0x27c1   : > { %v10322_v44 = vpack.c.bf16 %v11035_v54, %v11034_v49 }
0x27c2   : > { %v11043_v45 = vpop.permute.xlu0 %11042 }
0x27c3   : > { %v11045_v7 = vunpack.i.h.bf16 %v11043_v45  ;;  %v11044_v60 = vunpack.i.l.bf16 %v11043_v45  ;;  %10323 = vmatprep.subr.bf16.mxu0 %v10322_v44 }
0x27c4   : > { %10325 = vmatpush3.bf16.msra.mxu0 %v10322_v44 }
0x27c5   : > { %10327 = vmatprep.subr.bf16.mxu0 %v10326_v55  ;;  %v10330_v59 = vpack.c.bf16 %v11045_v7, %v11044_v60  ;;  %v8057_v60 = vld [vmem:[%s12973_s14 + $0x1] ss:$0 sm:$0xff]  ;;  %s12979_s14 = sld [smem:[#allocation25_spill]] }
0x27c6   : > { %v11048_v39 = vpop.permute.xlu0 %11047 }
0x27c7   : > { %v11050_v56 = vunpack.i.h.bf16 %v11048_v39  ;;  %v11049_v58 = vunpack.i.l.bf16 %v11048_v39 }
0x27c8   : > { %10329 = vmatpush3.bf16.msra.mxu0 %v10326_v55 }
0x27c9   : > { %10331 = vmatprep.subr.bf16.mxu0 %v10330_v59  ;;  %v10334_v61 = vpack.c.bf16 %v11050_v56, %v11049_v58 }
0x27cb   : > { %s899_s15 = scalar_lea.vmem %s12979_s14, %s12975_s30 }
0x27cc   : > { %10333 = vmatpush3.bf16.msra.mxu0 %v10330_v59 }
0x27cd   : > { %10335 = vmatprep.subr.bf16.mxu0 %v10334_v61 }
0x27d0   : > { %10337 = vmatpush3.bf16.msra.mxu0 %v10334_v61 }
0x27e2   : > { %v9448_v0 = vpop.f32.mrb[70].mxu1 }
0x27e3   : > { %v6810_v10 = vpop.f32.mrb[71].mxu1  ;;  %v6822_v4 = vmul.f32 %v11196_v3, %v9448_v0 }
0x27e4   : > { %v6820_v63 = vmul.f32 %v11194_v25, %v6810_v10 }
0x27e6   : > { %9451 = vmatprep.mubr.msk.f32.mxu1 %vm1025_vm1, %v6820_v63 }
0x27e7   : > { %9452 = vmatmul.mubr.msk.f32.vlgmr.msra.gmra.mrb[66].mxu1 %vm1025_vm1, %v6822_v4 }
0x27e8   : > { %10271 = vmatpush3.bf16.xpose.msk.msra.mxu1 %vm11462_vm2, %v10266_v28  ;;  %9486 = vmatprep.mubr.msk.f32.mxu1 %vm1025_vm1, %v6907_v27  ;;  %v11019_v28 = vunpack.i.l.bf16 %v12699_v24 }
0x27e9   : > { %10274 = vmatprep.subr.msk.bf16.mxu1 %vm11462_vm2, %v10272_v5 }
0x27ea   : > { %v10308_v37 = vpack.c.bf16 %v11020_v20, %v11019_v28 }
0x27f0   : > { %10277 = vmatpush3.bf16.xpose.msk.msra.mxu1 %vm11462_vm2, %v10272_v5 }
0x27f1   : > { %10280 = vmatprep.subr.msk.bf16.mxu1 %vm11462_vm2, %v10278_v16 }
0x27f8   : > { %10283 = vmatpush3.bf16.xpose.msk.msra.mxu1 %vm11462_vm2, %v10278_v16 }
0x27f9   : > { %10286 = vmatprep.subr.msk.bf16.mxu1 %vm11462_vm2, %v10284_v17 }
0x2800   : > { %10289 = vmatpush3.bf16.xpose.msk.msra.mxu1 %vm11462_vm2, %v10284_v17  ;;  %v8124_v17 = vld [vmem:[%s12870_s18 + $0x30] sm:$0xff] }
0x2801   : > { %10292 = vmatprep.subr.msk.bf16.mxu1 %vm11462_vm2, %v10290_v32  ;;  %v10350_v50 = vpack.c.bf16 %v8125_v12, %v8124_v17 }
0x2808   : > { %10295 = vmatpush3.bf16.xpose.msk.msra.mxu1 %vm11462_vm2, %v10290_v32  ;;  %v8130_v32 = vld [vmem:[%s12872_s20 + $0x20] sm:$0xff] }
0x2809   : > { %10298 = vmatprep.subr.msk.bf16.mxu1 %vm11462_vm2, %v10296_v2  ;;  %v10354_v52 = vpack.c.bf16 %v8131_v36, %v8130_v32 }
0x2810   : > { %10301 = vmatpush3.bf16.xpose.msk.msra.mxu1 %vm11462_vm2, %v10296_v2 }
0x2811   : > { %10304 = vmatprep.subr.msk.bf16.mxu1 %vm11462_vm2, %v10302_v14 }
0x2818   : > { %10307 = vmatpush3.bf16.xpose.msk.msra.mxu1 %vm11462_vm2, %v10302_v14 }
0x2819   : > { %10310 = vmatprep.subr.msk.bf16.mxu1 %vm11462_vm2, %v10308_v37 }
0x2820   : > { %10313 = vmatpush3.bf16.xpose.msk.msra.mxu1 %vm11462_vm2, %v10308_v37 }
0x2821   : > { %9524 = vmatprep.subr.mxu1 %v8035_v33 }
0x2827   : > { %9487 = vmatmul.mubr.msk.f32.vlgmr.msra.gmra.mrb[72].mxu1 %vm1025_vm1, %v12701_v31 }
0x2828   : > { %9525 = vmatpush3.msra.mxu1 %v8035_v33 }
0x28fa   : > { %v9488_v27 = vpop.f32.mrb[72].mxu1 }
0x28fb   : > { %v7050_v9 = vadd.f32 %v12452_v62, %v9488_v27  ;;  %v7044_v46 = vpop.f32.mrb[73].mxu1  ;;  %v8120_v27 = vld [vmem:[%s12868_s16 + $0x1] ss:$0 sm:$0xff] }
0x28fc   : > { %v7045_v41 = vadd.f32 %v12452_v62, %v7044_v46 }
0x28fd   : > { %7055 = vmax.xlane.f32.xlu1 %v7050_v9 }
0x28fe   : > { %7053 = vmax.xlane.f32.xlu0 %v7045_v41 }
0x290e   : > { %11052 = vrot.lane.b32.xlu1 %v12383_v30, %s12961_s29 }
0x2914   : > { %11057 = vrot.lane.b32.xlu0 %v12458_v48, %s12961_s29  ;;  %s12978_s29 = sld [smem:[#allocation24_spill]] }
0x298a   : > { %v7056_v23 = vpop.xlane.xlu1 %7055 }
0x298b   : > { %v7058_v18 = vsub.f32 %v7050_v9, %v7056_v23  ;;  %v7054_v43 = vpop.xlane.xlu0 %7053  ;;  %v8121_v23 = vld [vmem:[%s12869_s17 + $0x1] ss:$0 sm:$0xff] }
0x298c   : > { %v7057_v6 = vsub.f32 %v7045_v41, %v7054_v43 }
0x298d   : > { %v7061_v34 = vmul.f32 1.442695, %v7058_v18 }
0x298e   : > { %v7059_v29 = vmul.f32 1.442695, %v7057_v6  ;;  %v11053_v47 = vpop.permute.xlu1 %11052 }
0x298f   : > { %11197 = vpow2.f32 %v7061_v34  ;;  %v11055_v57 = vunpack.i.h.bf16 %v11053_v47  ;;  %v11054_v13 = vunpack.i.l.bf16 %v11053_v47  ;;  %v11058_v40 = vpop.permute.xlu0 %11057  ;;  %v8133_v47 = vld [vmem:[%s12872_s20 + $0x38] sm:$0xff] }
0x2990   : > { %11199 = vpow2.f32 %v7059_v29  ;;  %v11060_v62 = vunpack.i.h.bf16 %v11058_v40  ;;  %v11059_v24 = vunpack.i.l.bf16 %v11058_v40  ;;  %v8132_v29 = vld [vmem:[%s12872_s20 + $0x30] sm:$0xff] }
0x2991   : > { %v10338_v31 = vpack.c.bf16 %v11055_v57, %v11054_v13  ;;  %v10358_v57 = vpack.c.bf16 %v8133_v47, %v8132_v29  ;;  %v8127_v13 = vld [vmem:[%s12871_s19 + $0x1] ss:$0 sm:$0xff] }
0x2992   : > { %v10342_v38 = vpack.c.bf16 %v11060_v62, %v11059_v24 }
0x2993   : > { %10339 = vmatprep.subr.bf16.mxu0 %v10338_v31 }
0x2994   : > { %10341 = vmatpush3.bf16.msra.mxu0 %v10338_v31 }
0x2995   : > { %10343 = vmatprep.subr.bf16.mxu0 %v10342_v38 }
0x2998   : > { %10345 = vmatpush3.bf16.msra.mxu0 %v10342_v38 }
0x2999   : > { %v11198_v30 = vpop.eup %11197 }
0x299a   : > { %v11200_v48 = vpop.eup %11199  ;;  %7065 = vadd.xlane.f32.xlu0 %v11198_v30 }
0x299b   : > { %7063 = vadd.xlane.f32.xlu1 %v11200_v48  ;;  %9521 = vmatprep.mubr.f32.mxu0 %v11200_v48  ;;  %v8135_v48 = vld [vmem:[%s12873_s21 + $0x1] ss:$0 sm:$0xff] }
0x299c   : > { %9522 = vmatmul.mubr.f32.vlgmr.msra.gmra.mrb[40].mxu0 %v11198_v30 }
0x2a27   : > { %v7066_v42 = vpop.xlane.xlu0 %7065 }
0x2a28   : > { %v7064_v51 = vpop.xlane.xlu1 %7063 }
0x2a29   : > { %11201 = vrcp.f32 %v7064_v51 }
0x2a2a   : > { %11203 = vrcp.f32 %v7066_v42 }
0x2a33   : > { %v11202_v49 = vpop.eup %11201 }
0x2a34   : > { %v11204_v45 = vpop.eup %11203 }
0x2a6f   : > { %v9523_v54 = vpop.f32.mrb[40].mxu0 }
0x2a70   : > { %v7181_v44 = vpop.f32.mrb[41].mxu0  ;;  %v7193_v7 = vmul.f32 %v11204_v45, %v9523_v54 }
0x2a71   : > { %v7191_v55 = vmul.f32 %v11202_v49, %v7181_v44 }
0x2a73   : > { %9526 = vmatprep.mubr.msk.f32.mxu1 %vm1025_vm1, %v7191_v55 }
0x2a74   : > { %9527 = vmatmul.mubr.msk.f32.vlgmr.msra.gmra.mrb[66].mxu1 %vm1025_vm1, %v7193_v7 }
0x2b47   : > { %v9528_v39 = vpop.f32.mrb[66].mxu1 }
0x2b48   : > { %v10376_v59 = vadd.f32 %v9528_v39, %v8057_v60  ;;  %v7266_v56 = vpop.f32.mrb[67].mxu1 }
0x2b49   : > { %v10377_v58 = vadd.f32 %v8057_v60, %v7266_v56 }
0x2b4a   : > { %v7278_v61 = vadd.f32 %v10376_v59, %v12403_v53 }
0x2b4b   : > { %v7277_v0 = vadd.f32 %v10377_v58, %v12399_v35  ;;  %v8122_v35 = vld [vmem:[%s12870_s18 + $0x20] sm:$0xff] }
0x2b4c   : > { %v7286_v25 = vsel %vm932_vm0, %v7278_v61, 0.0  ;;  %v10346_v22 = vpack.c.bf16 %v8123_v11, %v8122_v35  ;;  %v8141_v35 = vld [vmem:[%s12875_s23 + $0x1] ss:$0 sm:$0xff] }
0x2b4d   : > { %7287 = vadd.xlane.f32.xlu1 %v7286_v25  ;;  %v7283_v19 = vsel %vm932_vm0, %v7277_v0, 0.0 }
0x2b4e   : > { %7284 = vadd.xlane.f32.xlu0 %v7283_v19  ;;  %10347 = vmatprep.subr.bf16.mxu0 %v10346_v22 }
0x2b4f   : > { %10349 = vmatpush3.bf16.msra.mxu0 %v10346_v22 }
0x2b50   : > { %10351 = vmatprep.subr.bf16.mxu0 %v10350_v50 }
0x2b53   : > { %10353 = vmatpush3.bf16.msra.mxu0 %v10350_v50 }
0x2b54   : > { %10355 = vmatprep.subr.bf16.mxu0 %v10354_v52 }
0x2bda   : > { %v7288_v1 = vpop.xlane.xlu1 %7287 }
0x2bdb   : > { %v7290_v10 = vmul.f32 0.03125, %v7288_v1  ;;  %v7285_v3 = vpop.xlane.xlu0 %7284 }
0x2bdc   : > { %v7289_v63 = vmul.f32 0.03125, %v7285_v3 }
0x2bdd   : > { %v7292_v4 = vsub.f32 %v7278_v61, %v7290_v10 }
0x2bde   : > { %v7291_v5 = vsub.f32 %v7277_v0, %v7289_v63 }
0x2bdf   : > { %v7294_v8 = vmul.f32 %v7292_v4, %v7292_v4 }
0x2be0   : > { %v7293_v15 = vmul.f32 %v7291_v5, %v7291_v5 }
0x2be1   : > { %v7298_v16 = vsel %vm932_vm0, %v7294_v8, 0.0 }
0x2be2   : > { %7299 = vadd.xlane.f32.xlu1 %v7298_v16  ;;  %v7295_v53 = vsel %vm932_vm0, %v7293_v15, 0.0  ;;  %v8140_v15 = vld [vmem:[%s12874_s22 + $0x1] ss:$0 sm:$0xff] }
0x2be3   : > { %7296 = vadd.xlane.f32.xlu0 %v7295_v53 }
0x2c6f   : > { %v7300_v2 = vpop.xlane.xlu1 %7299 }
0x2c70   : > { %v7302_v21 = vmul.f32 0.03125, %v7300_v2  ;;  %v7297_v26 = vpop.xlane.xlu0 %7296 }
0x2c71   : > { %v7301_v14 = vmul.f32 0.03125, %v7297_v26 }
0x2c72   : > { %v7304_v20 = vadd.f32 1e-05, %v7302_v21 }
0x2c73   : > { %v7303_v28 = vadd.f32 1e-05, %v7301_v14 }
0x2c74   : > { %11205 = vrsqrt.f32 %v7304_v20 }
0x2c75   : > { %11207 = vrsqrt.f32 %v7303_v28 }
0x2c7e   : > { %v11206_v37 = vpop.eup %11205 }
0x2c7f   : > { %v11208_v9 = vpop.eup %11207  ;;  %v7308_v46 = vmul.f32 %v11206_v37, %v7292_v4 }
0x2c80   : > { %v7307_v41 = vmul.f32 %v11208_v9, %v7291_v5 }
0x2c81   : > { %v7316_v18 = vmul.f32 %v8120_v27, %v7308_v46  ;;  %v7607_v46 = vld [vmem:[%s12974_s5] sm:$0xff] }
0x2c82   : > { %v7315_v43 = vmul.f32 %v8120_v27, %v7307_v41  ;;  %v7608_v41 = vld [vmem:[%s12974_s5 + $0x8] sm:$0xff] }
0x2c83   : > { %v7324_v34 = vadd.f32 %v8121_v23, %v7316_v18  ;;  %v7609_v18 = vld [vmem:[%s12974_s5 + $0x10] sm:$0xff] }
0x2c84   : > { %v7323_v6 = vadd.f32 %v8121_v23, %v7315_v43  ;;  %v10362_v23 = vpack.c.bf16 %v7608_v41, %v7607_v46  ;;  %v7610_v43 = vld [vmem:[%s12974_s5 + $0x18] sm:$0xff] }
0x2c86   : > { %9537 = vmatprep.mubr.msk.f32.mxu0 %vm932_vm0, %v7323_v6 }
0x2c87   : > { %9538 = vmatmul.mubr.msk.f32.vlgmr.msra.gmra.mrb[42].mxu0 %vm932_vm0, %v7324_v34 }
0x2c88   : > { %10357 = vmatpush3.bf16.msra.mxu0 %v10354_v52 }
0x2c89   : > { %10359 = vmatprep.subr.bf16.mxu0 %v10358_v57 }
0x2c8c   : > { %10361 = vmatpush3.bf16.msra.mxu0 %v10358_v57 }
0x2c8d   : > { %10363 = vmatprep.subr.bf16.mxu0 %v10362_v23 }
0x2d5a   : > { %v9539_v40 = vpop.f32.mrb[42].mxu0 }
0x2d5b   : > { %v7416_v62 = vadd.f32 %v9539_v40, %v8127_v13  ;;  %v7410_v24 = vpop.f32.mrb[43].mxu0 }
0x2d5c   : > { %v7411_v31 = vadd.f32 %v8127_v13, %v7410_v24  ;;  %v8142_v24 = vld [vmem:[%s12976_s9] ss:$0 sm:$0xff] }
0x2d5d   : > { %v7420_v30 = vmax.f32 %v7416_v62, 0.0 }
0x2d5e   : > { %v7419_v38 = vmax.f32 %v7411_v31, 0.0 }
0x2d60   : > { %9548 = vmatprep.mubr.msk.f32.mxu0 %vm932_vm0, %v7419_v38 }
0x2d61   : > { %9549 = vmatmul.mubr.msk.f32.vlgmr.msra.gmra.mrb[44].mxu0 %vm932_vm0, %v7420_v30 }
0x2d62   : > { %10365 = vmatpush3.bf16.msra.mxu0 %v10362_v23 }
0x2e34   : > { %v9550_v33 = vpop.f32.mrb[44].mxu0 }
0x2e35   : > { %v7512_v51 = vadd.f32 %v9550_v33, %v8135_v48  ;;  %v7506_v42 = vpop.f32.mrb[45].mxu0 }
0x2e36   : > { %v7507_v54 = vadd.f32 %v8135_v48, %v7506_v42  ;;  %v8143_v48 = vld [vmem:[%s12977_s25] ss:$0 sm:$0xff] }
0x2e37   : > { %v7516_v49 = vadd.f32 %v7512_v51, %v7324_v34 }
0x2e38   : > { %v7515_v44 = vadd.f32 %v7507_v54, %v7323_v6  ;;  %v10366_v6 = vpack.c.bf16 %v7610_v43, %v7609_v18 }
0x2e39   : > { %v7524_v45 = vsel %vm932_vm0, %v7516_v49, 0.0 }
0x2e3a   : > { %7525 = vadd.xlane.f32.xlu1 %v7524_v45  ;;  %v7521_v55 = vsel %vm932_vm0, %v7515_v44, 0.0  ;;  %10367 = vmatprep.subr.bf16.mxu0 %v10366_v6 }
0x2e3b   : > { %7522 = vadd.xlane.f32.xlu0 %v7521_v55  ;;  %10369 = vmatpush3.bf16.msra.mxu0 %v10366_v6 }
0x2ec7   : > { %v7526_v7 = vpop.xlane.xlu1 %7525 }
0x2ec8   : > { %v7528_v60 = vmul.f32 0.03125, %v7526_v7  ;;  %v7523_v39 = vpop.xlane.xlu0 %7522 }
0x2ec9   : > { %v7527_v59 = vmul.f32 0.03125, %v7523_v39 }
0x2eca   : > { %v7530_v56 = vsub.f32 %v7516_v49, %v7528_v60  ;;  %v8144_v49 = vld [vmem:[%s12978_s29] ss:$0 sm:$0xff] }
0x2ecb   : > { %v7529_v58 = vsub.f32 %v7515_v44, %v7527_v59 }
0x2ecc   : > { %v7532_v61 = vmul.f32 %v7530_v56, %v7530_v56 }
0x2ecd   : > { %v7531_v0 = vmul.f32 %v7529_v58, %v7529_v58 }
0x2ece   : > { %v7536_v25 = vsel %vm932_vm0, %v7532_v61, 0.0 }
0x2ecf   : > { %7537 = vadd.xlane.f32.xlu1 %v7536_v25  ;;  %v7533_v19 = vsel %vm932_vm0, %v7531_v0, 0.0 }
0x2ed0   : > { %7534 = vadd.xlane.f32.xlu0 %v7533_v19 }
0x2f5c   : > { %v7538_v1 = vpop.xlane.xlu1 %7537 }
0x2f5d   : > { %v7540_v10 = vmul.f32 0.03125, %v7538_v1  ;;  %v7535_v3 = vpop.xlane.xlu0 %7534 }
0x2f5e   : > { %v7539_v63 = vmul.f32 0.03125, %v7535_v3 }
0x2f5f   : > { %v7542_v4 = vadd.f32 1e-05, %v7540_v10 }
0x2f60   : > { %v7541_v5 = vadd.f32 1e-05, %v7539_v63 }
0x2f61   : > { %11209 = vrsqrt.f32 %v7542_v4 }
0x2f62   : > { %11211 = vrsqrt.f32 %v7541_v5 }
0x2f6b   : > { %v11210_v8 = vpop.eup %11209 }
0x2f6c   : > { %v11212_v16 = vpop.eup %11211  ;;  %v7546_v53 = vmul.f32 %v11210_v8, %v7530_v56 }
0x2f6d   : > { %v7545_v11 = vmul.f32 %v11212_v16, %v7529_v58 }
0x2f6e   : > { %v7554_v22 = vmul.f32 %v8140_v15, %v7546_v53 }
0x2f6f   : > { %v7553_v17 = vmul.f32 %v8140_v15, %v7545_v11 }
0x2f70   : > { %v7562_v12 = vadd.f32 %v8141_v35, %v7554_v22 }
0x2f71   : > { %v7561_v50 = vadd.f32 %v8141_v35, %v7553_v17 }
0x2f72   : > { %v7568_v32 = vsel %vm932_vm0, %v7562_v12, 0.0 }
0x2f73   : > { %7569 = vadd.xlane.f32.xlu1 %v7568_v32  ;;  %v7565_v36 = vsel %vm932_vm0, %v7561_v50, 0.0 }
0x2f74   : > { %7566 = vadd.xlane.f32.xlu0 %v7565_v36 }
0x3000   : > { %v7570_v52 = vpop.xlane.xlu1 %7569 }
0x3001   : > { %v7572_v2 = vmul.f32 0.03125, %v7570_v52  ;;  %v7567_v21 = vpop.xlane.xlu0 %7566 }
0x3002   : > { %v7571_v26 = vmul.f32 0.03125, %v7567_v21 }
0x3003   : > { %v7574_v14 = vsub.f32 %v7562_v12, %v7572_v2 }
0x3004   : > { %v7573_v20 = vsub.f32 %v7561_v50, %v7571_v26 }
0x3005   : > { %v7576_v28 = vmul.f32 %v7574_v14, %v7574_v14 }
0x3006   : > { %v7575_v37 = vmul.f32 %v7573_v20, %v7573_v20 }
0x3007   : > { %v7580_v27 = vsel %vm932_vm0, %v7576_v28, 0.0 }
0x3008   : > { %7581 = vadd.xlane.f32.xlu1 %v7580_v27  ;;  %v7577_v9 = vsel %vm932_vm0, %v7575_v37, 0.0 }
0x3009   : > { %7578 = vadd.xlane.f32.xlu0 %v7577_v9 }
0x3095   : > { %v7582_v34 = vpop.xlane.xlu1 %7581 }
0x3096   : > { %v7584_v29 = vmul.f32 0.03125, %v7582_v34  ;;  %v7579_v47 = vpop.xlane.xlu0 %7578 }
0x3097   : > { %v7583_v57 = vmul.f32 0.03125, %v7579_v47 }
0x3098   : > { %v7586_v13 = vadd.f32 1e-05, %v7584_v29 }
0x3099   : > { %v7585_v40 = vadd.f32 1e-05, %v7583_v57 }
0x309a   : > { %11213 = vrsqrt.f32 %v7586_v13 }
0x309b   : > { %11215 = vrsqrt.f32 %v7585_v40 }
0x30a4   : > { %v11214_v62 = vpop.eup %11213 }
0x30a5   : > { %v11216_v31 = vpop.eup %11215  ;;  %v7590_v38 = vmul.f32 %v11214_v62, %v7574_v14 }
0x30a6   : > { %v7589_v30 = vmul.f32 %v11216_v31, %v7573_v20 }
0x30a7   : > { %v7598_v33 = vmul.f32 %v8142_v24, %v7590_v38 }
0x30a8   : > { %v7597_v51 = vmul.f32 %v8142_v24, %v7589_v30 }
0x30a9   : > { %v7606_v54 = vadd.f32 %v8143_v48, %v7598_v33 }
0x30aa   : > { %v7605_v42 = vadd.f32 %v8143_v48, %v7597_v51 }
0x30ac   : > { %9559 = vmatprep.mubr.msk.f32.mxu0 %vm932_vm0, %v7605_v42 }
0x30ad   : > { %9560 = vmatmul.mubr.msk.f32.vlgmr.msra.gmra.mrb[46].mxu0 %vm932_vm0, %v7606_v54 }
0x3180   : > { %v9561_v44 = vpop.f32.mrb[46].mxu0 }
0x3181   : > { %v7696_v45 = vadd.f32 %v9561_v44, %v8144_v49  ;;  %v7690_v55 = vpop.f32.mrb[47].mxu0 }
0x3182   : > { %v7691_v7 = vadd.f32 %v8144_v49, %v7690_v55 }
0x3183   : > { %7700 = vst [vmem:[%s899_s15 + $0x8] sm:$0xff] %v7696_v45 }
0x3184   : > { %7699 = vst [vmem:[%s899_s15] sm:$0xff] %v7691_v7 }
0x3185 PF: > { %s12980_s4 = sld [smem:[#allocation2_spill]] }
0x318b   : > { %s38_s8 = sadd.s32 1, %s12980_s4  }
0x318c   : > { %p35_p4 = scmp.ge.s32.totalorder %s38_s8, 4  }
0x318e   :  { %37 = sbr.rel (!%p35_p4) target bundleno = 22 (0x16), region = 191 }

</bundles_post_ra>
